<compile_context>
chip_gen: v5e
topology: v5e:2x2
jax: 0.10.0
libtpu: 0.0.40
codegen_flags: <defaults>
</compile_context>

<pallas_src>
import jax
import jax.numpy as jnp
import numpy as np
from jax.experimental import pallas as pl
from jax.experimental.pallas import tpu as pltpu


# -----------------------------------------------------------------------------
# Kernel
# -----------------------------------------------------------------------------
def _make_kernel(n_layer, hidden_size, d_size, t_chunk):
    L, H, D = n_layer, hidden_size, d_size
    NZ = L * 4 * H
    unroll = t_chunk <= 16

    def kernel(xw_ref, h0_ref, c0_ref, d0_ref,
               w_prev_ref, w_up_ref, w_dc_ref,
               o_ref, h_scr, c_scr, dt_scr):
        # initialize recurrent state slabs on the first time chunk
        @pl.when(pl.program_id(0) == 0)
        def _():
            h_scr[...] = h0_ref[...]
            c_scr[...] = c0_ref[...]
            dt_scr[...] = d0_ref[...]

        # loop-invariant weights: load once per grid step
        w_prev = w_prev_ref[...]
        w_up = w_up_ref[...] if L > 1 else None
        w_dc = w_dc_ref[...]

        def step(t, carry):
            h_prev = h_scr[...]                               # (B, L*H)

            # pre-activations for all layers:
            #   xw_ref[t] already holds vocab_t @ W_voc + bias (hoisted to XLA)
            pre = xw_ref[t] + jnp.dot(h_prev, w_prev,
                                      preferred_element_type=jnp.float32)

            for i in range(L):
                z = pre[:, i * 4 * H:(i + 1) * 4 * H]         # (B, 4H)

                # single sigmoid over the full 4H block; c_hat columns were
                # pre-scaled by 2 host-side, so tanh(x) == 2*sigmoid(2x) - 1.
                s = jax.nn.sigmoid(z)
                gate_i = s[:, 0 * H:1 * H]
                gate_f = s[:, 1 * H:2 * H]
                gate_o = s[:, 2 * H:3 * H]
                cell_hat = 2.0 * s[:, 3 * H:4 * H] - 1.0

                gate_r = jax.nn.sigmoid(pre[:, NZ + i * D:NZ + (i + 1) * D])
                dt_i = gate_r * dt_scr[:, i * D:(i + 1) * D]

                dc = jnp.tanh(jnp.dot(dt_i, w_dc[i * D:(i + 1) * D, :],
                                      preferred_element_type=jnp.float32))
                cell_i = (gate_f * c_scr[:, i * H:(i + 1) * H]
                          + gate_i * cell_hat + dc)
                hidden_i = gate_o * jnp.tanh(cell_i)

                h_scr[:, i * H:(i + 1) * H] = hidden_i
                c_scr[:, i * H:(i + 1) * H] = cell_i
                dt_scr[:, i * D:(i + 1) * D] = dt_i

                if i < L - 1:
                    # fold this fresh hidden into all higher layers' pre-acts
                    pre = pre + jnp.dot(
                        hidden_i, w_up[i * H:(i + 1) * H, :],
                        preferred_element_type=jnp.float32)

            o_ref[t] = h_scr[...]                             # (B, L*H)
            return carry

        jax.lax.fori_loop(0, t_chunk, step, 0, unroll=unroll)

    return kernel


# -----------------------------------------------------------------------------
# Host-side weight packing
# -----------------------------------------------------------------------------
def pack_params(params, *, input_size, hidden_size, d_size, n_layer):
    E, H, D, L = input_size, hidden_size, d_size, n_layer
    NZ, NR = L * 4 * H, L * D
    NC = NZ + NR
    alpha = 1.0 / L

    w_voc = np.zeros((E, NC), np.float32)
    w_prev = np.zeros((L * H, NC), np.float32)
    w_up = np.zeros((max(L - 1, 1) * H, NC), np.float32)
    bias = np.zeros((1, NC), np.float32)
    w_dc = np.zeros((L * D, H), np.float32)

    h2hr_b_sum = alpha * sum(
        np.asarray(params["layers"][j]["h2h_r_b"]) for j in range(L))

    for i in range(L):
        lp = {k: np.asarray(v) for k, v in params["layers"][i].items()}
        zc = slice(i * 4 * H, (i + 1) * 4 * H)
        rc = slice(NZ + i * D, NZ + (i + 1) * D)

        # vocab input rows of w2h / w2h_r
        w_voc[:, zc] = lp["w2h_w"][:E, :]
        w_voc[:, rc] = lp["w2h_r_w"][:E, :]

        # previous-hidden rows: h2h for this layer, alpha*h2h_r of ALL layers
        w_prev[i * H:(i + 1) * H, zc] = lp["h2h_w"]
        for j in range(L):
            w_prev[j * H:(j + 1) * H, rc] = (
                alpha * np.asarray(params["layers"][j]["h2h_r_w"]))

        # current lower-layer hidden rows of w2h / w2h_r
        for j in range(i):
            src = slice(E + j * H, E + (j + 1) * H)
            w_up[j * H:(j + 1) * H, zc] = lp["w2h_w"][src, :]
            w_up[j * H:(j + 1) * H, rc] = lp["w2h_r_w"][src, :]

        # biases pre-summed
        bias[:, zc] = lp["w2h_b"] + lp["h2h_b"]
        bias[:, rc] = lp["w2h_r_b"] + h2hr_b_sum

        # dc (no bias)
        w_dc[i * D:(i + 1) * D, :] = lp["dc_w"]

    # pre-scale every layer's c_hat columns by 2 so the kernel can use a single
    # sigmoid over the whole 4H gate block: tanh(x) == 2*sigmoid(2x) - 1.
    col_scale = np.ones((NC,), np.float32)
    for i in range(L):
        col_scale[i * 4 * H + 3 * H:(i + 1) * 4 * H] = 2.0
    w_voc *= col_scale
    w_prev *= col_scale
    w_up *= col_scale
    bias *= col_scale

    return (jnp.asarray(w_voc), jnp.asarray(w_prev), jnp.asarray(w_up),
            jnp.asarray(bias), jnp.asarray(w_dc))


# -----------------------------------------------------------------------------
# Wrapper (teacher-forcing forward pass: gen=False, sampling=False, dropout off)
# -----------------------------------------------------------------------------
def decoder_deep_forward(input_var, sos_onehot, init_hidden, init_feat, params,
                         *, n_layer, hidden_size, d_size, output_size,
                         t_chunk=None):
    """input_var : (B, T, E) float32 -> output_prob (B, T, O) float32."""
    B, T, E = input_var.shape
    H, D, L = hidden_size, d_size, n_layer
    LH, LD = L * H, L * D
    NC = L * 4 * H + L * D

    if t_chunk is None:
        t_chunk = T
    n_chunks = (T + t_chunk - 1) // t_chunk
    Tp = n_chunks * t_chunk

    # exact sequence of vocab_t the PyTorch loop consumes (time-major)
    x_tm = jnp.transpose(input_var, (1, 0, 2))                # (T, B, E)
    x_seq = jnp.concatenate([sos_onehot[None], x_tm[:T - 1]], axis=0)
    if Tp > T:
        x_seq = jnp.concatenate(
            [x_seq, jnp.zeros((Tp - T, B, E), x_seq.dtype)], axis=0)

    w_voc, w_prev, w_up, bias, w_dc = pack_params(
        params, input_size=E, hidden_size=H, d_size=D, n_layer=L)

    # hoisted, non-recurrent vocab projection: one lane-dense XLA matmul over
    # the whole sequence (removes one matmul per step from the serial path)
    xw = (x_seq.reshape(Tp * B, E) @ w_voc + bias).reshape(Tp, B, NC)

    h0 = jnp.tile(init_hidden, (1, L))                        # (B, L*H)
    c0 = jnp.tile(init_hidden, (1, L))                        # (B, L*H)
    d0 = jnp.tile(init_feat, (1, L))                          # (B, L*D)

    kernel = _make_kernel(L, H, D, t_chunk)

    def full_spec(arr):
        zeros = (0,) * arr.ndim
        return pl.BlockSpec(arr.shape, lambda g, _z=zeros: _z)

    in_specs = [
        pl.BlockSpec((t_chunk, B, NC), lambda g: (g, 0, 0)),  # xw chunk
        full_spec(h0), full_spec(c0), full_spec(d0),
        full_spec(w_prev), full_spec(w_up), full_spec(w_dc),
    ]
    out_specs = pl.BlockSpec((t_chunk, B, LH), lambda g: (g, 0, 0))

    # advisory cost estimate for the XLA scheduler (kernel work only)
    mm_flops_step = (2 * B * LH * NC
                     + (L - 1) * 2 * B * H * NC + L * 2 * B * D * H)
    trans_step = L * B * (4 * H + D + 2 * H)
    inputs = [xw, h0, c0, d0, w_prev, w_up, w_dc]
    bytes_accessed = int(sum(int(a.size) * a.dtype.itemsize for a in inputs)
                         + Tp * B * LH * 4)
    cost = pl.CostEstimate(flops=int(Tp * mm_flops_step),
                           transcendentals=int(Tp * trans_step),
                           bytes_accessed=bytes_accessed)

    h_all = pl.pallas_call(
        kernel,
        out_shape=jax.ShapeDtypeStruct((Tp, B, LH), jnp.float32),
        grid_spec=pltpu.PrefetchScalarGridSpec(
            num_scalar_prefetch=0,
            grid=(n_chunks,),
            in_specs=in_specs,
            out_specs=out_specs,
            scratch_shapes=[
                pltpu.VMEM((B, LH), jnp.float32),   # hidden state slab
                pltpu.VMEM((B, LH), jnp.float32),   # cell state slab
                pltpu.VMEM((B, LD), jnp.float32),   # dt state slab
            ],
        ),
        compiler_params=pltpu.CompilerParams(
            dimension_semantics=("arbitrary",)),
        cost_estimate=cost,
    )(xw, h0, c0, d0, w_prev, w_up, w_dc)

    # hoisted output projection: one batched, lane-dense matmul outside the loop
    h_flat = h_all[:T].reshape(T * B, LH)
    logits = h_flat @ params["out_w"] + params["out_b"]       # (T*B, O)
    out_tm = logits.reshape(T, B, output_size)
    return jnp.transpose(out_tm, (1, 0, 2))                   # (B, T, O)


# -----------------------------------------------------------------------------
# Pure-JAX reference mirroring DecoderDeep.forward (dropout off)
# -----------------------------------------------------------------------------
def reference_forward(input_var, sos_onehot, init_hidden, init_feat, params,
                      *, n_layer, hidden_size):
    B, T, E = input_var.shape
    H = hidden_size
    h = [init_hidden for _ in range(n_layer)]
    c = [init_hidden for _ in range(n_layer)]
    dt = [init_feat for _ in range(n_layer)]
    vocab_t = sos_onehot
    alpha = 1.0 / n_layer
    outs = []
    for t in range(T):
        gate_r_shared = 0.0
        for j in range(n_layer):
            lp = params["layers"][j]
            gate_r_shared = gate_r_shared + alpha * (h[j] @ lp["h2h_r_w"]
                                                     + lp["h2h_r_b"])
        new_h, new_c, new_dt = [], [], []
        for i in range(n_layer):
            lp = params["layers"][i]
            input_t = vocab_t if i == 0 else jnp.concatenate(
                [vocab_t] + new_h[:i], axis=1)
            z = (input_t @ lp["w2h_w"] + lp["w2h_b"]
                 + h[i] @ lp["h2h_w"] + lp["h2h_b"])
            gi = jax.nn.sigmoid(z[:, :H])
            gf = jax.nn.sigmoid(z[:, H:2 * H])
            go = jax.nn.sigmoid(z[:, 2 * H:3 * H])
            ch = jnp.tanh(z[:, 3 * H:])
            gr = jax.nn.sigmoid(input_t @ lp["w2h_r_w"] + lp["w2h_r_b"]
                                + gate_r_shared)
            d = gr * dt[i]
            cc = gf * c[i] + gi * ch + jnp.tanh(d @ lp["dc_w"])
            hh = go * jnp.tanh(cc)
            new_h.append(hh); new_c.append(cc); new_dt.append(d)
        h, c, dt = new_h, new_c, new_dt
        outs.append(jnp.concatenate(h, axis=1) @ params["out_w"]
                    + params["out_b"])
        vocab_t = input_var[:, t, :]
    return jnp.stack(outs, axis=1)


# -----------------------------------------------------------------------------
# Parameter init (nn.Linear stored as (in, out))
# -----------------------------------------------------------------------------
N_WEIGHTS_PER_LAYER = 9


def init_params(key, *, input_size, hidden_size, d_size, output_size, n_layer):
    keys = iter(jax.random.split(key, 8 * n_layer * N_WEIGHTS_PER_LAYER + 8))

    def lin(fan_in, fan_out):
        scale = 1.0 / np.sqrt(fan_in)
        w = jax.random.uniform(next(keys), (fan_in, fan_out), jnp.float32,
                               -scale, scale)
        b = jax.random.uniform(next(keys), (1, fan_out), jnp.float32,
                               -scale, scale)
        return w, b

    layers = []
    for i in range(n_layer):
        in_dim = input_size + i * hidden_size
        w2h_w, w2h_b = lin(in_dim, 4 * hidden_size)
        h2h_w, h2h_b = lin(hidden_size, 4 * hidden_size)
        w2h_r_w, w2h_r_b = lin(in_dim, d_size)
        h2h_r_w, h2h_r_b = lin(hidden_size, d_size)
        dc_w, _ = lin(d_size, hidden_size)            # nn.Linear(..., bias=False)
        layers.append(dict(w2h_w=w2h_w, w2h_b=w2h_b,
                           h2h_w=h2h_w, h2h_b=h2h_b,
                           w2h_r_w=w2h_r_w, w2h_r_b=w2h_r_b,
                           h2h_r_w=h2h_r_w, h2h_r_b=h2h_r_b,
                           dc_w=dc_w))
    out_w, out_b = lin(n_layer * hidden_size, output_size)
    return dict(layers=layers, out_w=out_w, out_b=out_b)


if __name__ == "__main__":
    # small shapes; L*H = 128 so the kernel's output stores are lane-dense
    B, T = 8, 8
    INPUT_SIZE = 32       # emb_size == vocab one-hot size
    OUTPUT_SIZE = 32      # vocab size
    HIDDEN = 64
    D_SIZE = 16
    N_LAYER = 2
    SOS_INDEX = 0

    root = jax.random.PRNGKey(0)
    k_par, k_in, k_h, k_f = jax.random.split(root, 4)

    params = init_params(k_par, input_size=INPUT_SIZE, hidden_size=HIDDEN,
                         d_size=D_SIZE, output_size=OUTPUT_SIZE,
                         n_layer=N_LAYER)

    input_var = jax.random.normal(k_in, (B, T, INPUT_SIZE), jnp.float32)
    init_hidden = jax.random.normal(k_h, (B, HIDDEN), jnp.float32)
    init_feat = jax.random.normal(k_f, (B, D_SIZE), jnp.float32)
    sos_onehot = jnp.zeros((B, INPUT_SIZE), jnp.float32).at[:, SOS_INDEX].set(1.0)

    out = decoder_deep_forward(
        input_var, sos_onehot, init_hidden, init_feat, params,
        n_layer=N_LAYER, hidden_size=HIDDEN, d_size=D_SIZE,
        output_size=OUTPUT_SIZE)
    out = jax.block_until_ready(out)

    ref = reference_forward(input_var, sos_onehot, init_hidden, init_feat,
                            params, n_layer=N_LAYER, hidden_size=HIDDEN)
    np.testing.assert_allclose(np.asarray(out), np.asarray(ref),
                               rtol=1e-3, atol=1e-3)

    assert out.shape == (B, T, OUTPUT_SIZE)
    print("KERNEL_OK")
</pallas_src>

<mosaic_0001>
module attributes {stable_mosaic.version = 11 : i64} {
  func.func @kernel(%arg0: i32, %arg1: memref<8x8x544xf32, #tpu.memory_space<vmem>>, %arg2: memref<8x128xf32, #tpu.memory_space<vmem>>, %arg3: memref<8x128xf32, #tpu.memory_space<vmem>>, %arg4: memref<8x32xf32, #tpu.memory_space<vmem>>, %arg5: memref<128x544xf32, #tpu.memory_space<vmem>>, %arg6: memref<64x544xf32, #tpu.memory_space<vmem>>, %arg7: memref<32x64xf32, #tpu.memory_space<vmem>>, %arg8: memref<8x8x128xf32, #tpu.memory_space<vmem>>, %arg9: memref<8x128xf32, #tpu.memory_space<vmem>>, %arg10: memref<8x128xf32, #tpu.memory_space<vmem>>, %arg11: memref<8x32xf32, #tpu.memory_space<vmem>>) attributes {dimension_semantics = [#tpu.dimension_semantics<arbitrary>], iteration_bounds = array<i64: 1>, scalar_prefetch = 0 : i64, scratch_operands = 3 : i64, tpu.core_type = #tpu.core_type<tc>, window_params = [{transform_indices = @transform_0, window_bounds = array<i64: 8, 8, 544>}, {pipeline_mode = #tpu.pipeline_mode<synchronous>, transform_indices = @transform_1, window_bounds = array<i64: 8, 128>}, {pipeline_mode = #tpu.pipeline_mode<synchronous>, transform_indices = @transform_2, window_bounds = array<i64: 8, 128>}, {pipeline_mode = #tpu.pipeline_mode<synchronous>, transform_indices = @transform_3, window_bounds = array<i64: 8, 32>}, {pipeline_mode = #tpu.pipeline_mode<synchronous>, transform_indices = @transform_4, window_bounds = array<i64: 128, 544>}, {pipeline_mode = #tpu.pipeline_mode<synchronous>, transform_indices = @transform_5, window_bounds = array<i64: 64, 544>}, {pipeline_mode = #tpu.pipeline_mode<synchronous>, transform_indices = @transform_6, window_bounds = array<i64: 32, 64>}, {transform_indices = @transform_7, window_bounds = array<i64: 8, 8, 128>}]} {
    %c0_i32 = arith.constant 0 : i32
    %0 = arith.cmpi eq, %arg0, %c0_i32 : i32
    %1 = arith.extui %0 : i1 to i32
    %c0_i32_0 = arith.constant 0 : i32
    %2 = arith.cmpi ne, %1, %c0_i32_0 : i32
    scf.if %2 {
      %c0_324 = arith.constant 0 : index
      %c0_325 = arith.constant 0 : index
      %670 = vector.load %arg2[%c0_324, %c0_325] : memref<8x128xf32, #tpu.memory_space<vmem>>, vector<8x128xf32>
      %c0_326 = arith.constant 0 : index
      %c0_327 = arith.constant 0 : index
      %671 = vector.load %arg9[%c0_326, %c0_327] : memref<8x128xf32, #tpu.memory_space<vmem>>, vector<8x128xf32>
      tpu.vector_store %arg9[%c0_326, %c0_327], %670 {strides = array<i32>} : memref<8x128xf32, #tpu.memory_space<vmem>>, vector<8x128xf32>,
      %c0_328 = arith.constant 0 : index
      %c0_329 = arith.constant 0 : index
      %672 = vector.load %arg3[%c0_328, %c0_329] : memref<8x128xf32, #tpu.memory_space<vmem>>, vector<8x128xf32>
      %c0_330 = arith.constant 0 : index
      %c0_331 = arith.constant 0 : index
      %673 = vector.load %arg10[%c0_330, %c0_331] : memref<8x128xf32, #tpu.memory_space<vmem>>, vector<8x128xf32>
      tpu.vector_store %arg10[%c0_330, %c0_331], %672 {strides = array<i32>} : memref<8x128xf32, #tpu.memory_space<vmem>>, vector<8x128xf32>,
      %c0_332 = arith.constant 0 : index
      %c0_333 = arith.constant 0 : index
      %674 = vector.load %arg4[%c0_332, %c0_333] : memref<8x32xf32, #tpu.memory_space<vmem>>, vector<8x32xf32>
      %c0_334 = arith.constant 0 : index
      %c0_335 = arith.constant 0 : index
      %675 = vector.load %arg11[%c0_334, %c0_335] : memref<8x32xf32, #tpu.memory_space<vmem>>, vector<8x32xf32>
      tpu.vector_store %arg11[%c0_334, %c0_335], %674 {strides = array<i32>} : memref<8x32xf32, #tpu.memory_space<vmem>>, vector<8x32xf32>,
    } else {
    }
    %c0 = arith.constant 0 : index
    %c0_1 = arith.constant 0 : index
    %3 = vector.load %arg5[%c0, %c0_1] : memref<128x544xf32, #tpu.memory_space<vmem>>, vector<128x544xf32>
    %c0_2 = arith.constant 0 : index
    %c0_3 = arith.constant 0 : index
    %4 = vector.load %arg6[%c0_2, %c0_3] : memref<64x544xf32, #tpu.memory_space<vmem>>, vector<64x544xf32>
    %c0_4 = arith.constant 0 : index
    %c0_5 = arith.constant 0 : index
    %5 = vector.load %arg7[%c0_4, %c0_5] : memref<32x64xf32, #tpu.memory_space<vmem>>, vector<32x64xf32>
    %c0_i32_6 = arith.constant 0 : i32
    %c0_7 = arith.constant 0 : index
    %c0_8 = arith.constant 0 : index
    %6 = vector.load %arg9[%c0_7, %c0_8] : memref<8x128xf32, #tpu.memory_space<vmem>>, vector<8x128xf32>
    %7 = arith.index_cast %c0_i32_6 : i32 to index
    %c0_9 = arith.constant 0 : index
    %c0_10 = arith.constant 0 : index
    %8 = vector.load %arg1[%7, %c0_9, %c0_10] : memref<8x8x544xf32, #tpu.memory_space<vmem>>, vector<1x8x544xf32>
    %9 = vector.shape_cast %8 : vector<1x8x544xf32> to vector<8x544xf32>
    %cst = arith.constant dense<0.000000e+00> : vector<8x544xf32>
    %10 = tpu.matmul %6, %3, %cst {dimension_numbers = #tpu.dot_dimension_numbers<[1], [0], [0], [1], [0, 0, 1, 1], [], []>} : vector<8x128xf32>, vector<128x544xf32>, vector<8x544xf32> -> vector<8x544xf32>
    %11 = arith.addf %9, %10 : vector<8x544xf32>
    %12 = vector.extract_strided_slice %11 {offsets = [0, 0], sizes = [8, 256], strides = [1, 1]} : vector<8x544xf32> to vector<8x256xf32>
    %13 = arith.negf %12 : vector<8x256xf32>
    %14 = math.exp %13 : vector<8x256xf32>
    %cst_11 = arith.constant 1.000000e+00 : f32
    %15 = vector.broadcast %cst_11 : f32 to vector<8x256xf32>
    %16 = arith.addf %15, %14 : vector<8x256xf32>
    %17 = arith.divf %15, %16 : vector<8x256xf32>
    %18 = vector.extract_strided_slice %17 {offsets = [0, 0], sizes = [8, 64], strides = [1, 1]} : vector<8x256xf32> to vector<8x64xf32>
    %19 = vector.extract_strided_slice %17 {offsets = [0, 64], sizes = [8, 64], strides = [1, 1]} : vector<8x256xf32> to vector<8x64xf32>
    %20 = vector.extract_strided_slice %17 {offsets = [0, 128], sizes = [8, 64], strides = [1, 1]} : vector<8x256xf32> to vector<8x64xf32>
    %21 = vector.extract_strided_slice %17 {offsets = [0, 192], sizes = [8, 64], strides = [1, 1]} : vector<8x256xf32> to vector<8x64xf32>
    %cst_12 = arith.constant 2.000000e+00 : f32
    %22 = vector.broadcast %cst_12 : f32 to vector<8x64xf32>
    %23 = arith.mulf %22, %21 : vector<8x64xf32>
    %cst_13 = arith.constant 1.000000e+00 : f32
    %24 = vector.broadcast %cst_13 : f32 to vector<8x64xf32>
    %25 = arith.subf %23, %24 : vector<8x64xf32>
    %26 = vector.extract_strided_slice %11 {offsets = [0, 512], sizes = [8, 16], strides = [1, 1]} : vector<8x544xf32> to vector<8x16xf32>
    %27 = arith.negf %26 : vector<8x16xf32>
    %28 = math.exp %27 : vector<8x16xf32>
    %cst_14 = arith.constant 1.000000e+00 : f32
    %29 = vector.broadcast %cst_14 : f32 to vector<8x16xf32>
    %30 = arith.addf %29, %28 : vector<8x16xf32>
    %31 = arith.divf %29, %30 : vector<8x16xf32>
    %c0_15 = arith.constant 0 : index
    %c0_16 = arith.constant 0 : index
    %32 = vector.load %arg11[%c0_15, %c0_16] : memref<8x32xf32, #tpu.memory_space<vmem>>, vector<8x16xf32>
    %33 = arith.mulf %31, %32 : vector<8x16xf32>
    %34 = vector.extract_strided_slice %5 {offsets = [0, 0], sizes = [16, 64], strides = [1, 1]} : vector<32x64xf32> to vector<16x64xf32>
    %cst_17 = arith.constant dense<0.000000e+00> : vector<8x64xf32>
    %35 = tpu.matmul %33, %34, %cst_17 {dimension_numbers = #tpu.dot_dimension_numbers<[1], [0], [0], [1], [0, 0, 1, 1], [], []>} : vector<8x16xf32>, vector<16x64xf32>, vector<8x64xf32> -> vector<8x64xf32>
    %36 = math.tanh %35 : vector<8x64xf32>
    %c0_18 = arith.constant 0 : index
    %c0_19 = arith.constant 0 : index
    %37 = vector.load %arg10[%c0_18, %c0_19] : memref<8x128xf32, #tpu.memory_space<vmem>>, vector<8x64xf32>
    %38 = arith.mulf %19, %37 : vector<8x64xf32>
    %39 = arith.mulf %18, %25 : vector<8x64xf32>
    %40 = arith.addf %38, %39 : vector<8x64xf32>
    %41 = arith.addf %40, %36 : vector<8x64xf32>
    %42 = math.tanh %41 : vector<8x64xf32>
    %43 = arith.mulf %20, %42 : vector<8x64xf32>
    %c0_20 = arith.constant 0 : index
    %c0_21 = arith.constant 0 : index
    %44 = vector.load %arg9[%c0_20, %c0_21] : memref<8x128xf32, #tpu.memory_space<vmem>>, vector<8x64xf32>
    tpu.vector_store %arg9[%c0_20, %c0_21], %43 {strides = array<i32>} : memref<8x128xf32, #tpu.memory_space<vmem>>, vector<8x64xf32>,
    %c0_22 = arith.constant 0 : index
    %c0_23 = arith.constant 0 : index
    %45 = vector.load %arg10[%c0_22, %c0_23] : memref<8x128xf32, #tpu.memory_space<vmem>>, vector<8x64xf32>
    tpu.vector_store %arg10[%c0_22, %c0_23], %41 {strides = array<i32>} : memref<8x128xf32, #tpu.memory_space<vmem>>, vector<8x64xf32>,
    %c0_24 = arith.constant 0 : index
    %c0_25 = arith.constant 0 : index
    %46 = vector.load %arg11[%c0_24, %c0_25] : memref<8x32xf32, #tpu.memory_space<vmem>>, vector<8x16xf32>
    tpu.vector_store %arg11[%c0_24, %c0_25], %33 {strides = array<i32>} : memref<8x32xf32, #tpu.memory_space<vmem>>, vector<8x16xf32>,
    %cst_26 = arith.constant dense<0.000000e+00> : vector<8x544xf32>
    %47 = tpu.matmul %43, %4, %cst_26 {dimension_numbers = #tpu.dot_dimension_numbers<[1], [0], [0], [1], [0, 0, 1, 1], [], []>} : vector<8x64xf32>, vector<64x544xf32>, vector<8x544xf32> -> vector<8x544xf32>
    %48 = arith.addf %11, %47 : vector<8x544xf32>
    %49 = vector.extract_strided_slice %48 {offsets = [0, 256], sizes = [8, 256], strides = [1, 1]} : vector<8x544xf32> to vector<8x256xf32>
    %50 = arith.negf %49 : vector<8x256xf32>
    %51 = math.exp %50 : vector<8x256xf32>
    %cst_27 = arith.constant 1.000000e+00 : f32
    %52 = vector.broadcast %cst_27 : f32 to vector<8x256xf32>
    %53 = arith.addf %52, %51 : vector<8x256xf32>
    %54 = arith.divf %52, %53 : vector<8x256xf32>
    %55 = vector.extract_strided_slice %54 {offsets = [0, 0], sizes = [8, 64], strides = [1, 1]} : vector<8x256xf32> to vector<8x64xf32>
    %56 = vector.extract_strided_slice %54 {offsets = [0, 64], sizes = [8, 64], strides = [1, 1]} : vector<8x256xf32> to vector<8x64xf32>
    %57 = vector.extract_strided_slice %54 {offsets = [0, 128], sizes = [8, 64], strides = [1, 1]} : vector<8x256xf32> to vector<8x64xf32>
    %58 = vector.extract_strided_slice %54 {offsets = [0, 192], sizes = [8, 64], strides = [1, 1]} : vector<8x256xf32> to vector<8x64xf32>
    %cst_28 = arith.constant 2.000000e+00 : f32
    %59 = vector.broadcast %cst_28 : f32 to vector<8x64xf32>
    %60 = arith.mulf %59, %58 : vector<8x64xf32>
    %cst_29 = arith.constant 1.000000e+00 : f32
    %61 = vector.broadcast %cst_29 : f32 to vector<8x64xf32>
    %62 = arith.subf %60, %61 : vector<8x64xf32>
    %63 = vector.extract_strided_slice %48 {offsets = [0, 528], sizes = [8, 16], strides = [1, 1]} : vector<8x544xf32> to vector<8x16xf32>
    %64 = arith.negf %63 : vector<8x16xf32>
    %65 = math.exp %64 : vector<8x16xf32>
    %cst_30 = arith.constant 1.000000e+00 : f32
    %66 = vector.broadcast %cst_30 : f32 to vector<8x16xf32>
    %67 = arith.addf %66, %65 : vector<8x16xf32>
    %68 = arith.divf %66, %67 : vector<8x16xf32>
    %c0_31 = arith.constant 0 : index
    %c16 = arith.constant 16 : index
    %69 = vector.load %arg11[%c0_31, %c16] : memref<8x32xf32, #tpu.memory_space<vmem>>, vector<8x16xf32>
    %70 = arith.mulf %68, %69 : vector<8x16xf32>
    %71 = vector.extract_strided_slice %5 {offsets = [16, 0], sizes = [16, 64], strides = [1, 1]} : vector<32x64xf32> to vector<16x64xf32>
    %cst_32 = arith.constant dense<0.000000e+00> : vector<8x64xf32>
    %72 = tpu.matmul %70, %71, %cst_32 {dimension_numbers = #tpu.dot_dimension_numbers<[1], [0], [0], [1], [0, 0, 1, 1], [], []>} : vector<8x16xf32>, vector<16x64xf32>, vector<8x64xf32> -> vector<8x64xf32>
    %73 = math.tanh %72 : vector<8x64xf32>
    %c0_33 = arith.constant 0 : index
    %c64 = arith.constant 64 : index
    %74 = vector.load %arg10[%c0_33, %c64] : memref<8x128xf32, #tpu.memory_space<vmem>>, vector<8x64xf32>
    %75 = arith.mulf %56, %74 : vector<8x64xf32>
    %76 = arith.mulf %55, %62 : vector<8x64xf32>
    %77 = arith.addf %75, %76 : vector<8x64xf32>
    %78 = arith.addf %77, %73 : vector<8x64xf32>
    %79 = math.tanh %78 : vector<8x64xf32>
    %80 = arith.mulf %57, %79 : vector<8x64xf32>
    %c0_34 = arith.constant 0 : index
    %c64_35 = arith.constant 64 : index
    %81 = vector.load %arg9[%c0_34, %c64_35] : memref<8x128xf32, #tpu.memory_space<vmem>>, vector<8x64xf32>
    tpu.vector_store %arg9[%c0_34, %c64_35], %80 {strides = array<i32>} : memref<8x128xf32, #tpu.memory_space<vmem>>, vector<8x64xf32>,
    %c0_36 = arith.constant 0 : index
    %c64_37 = arith.constant 64 : index
    %82 = vector.load %arg10[%c0_36, %c64_37] : memref<8x128xf32, #tpu.memory_space<vmem>>, vector<8x64xf32>
    tpu.vector_store %arg10[%c0_36, %c64_37], %78 {strides = array<i32>} : memref<8x128xf32, #tpu.memory_space<vmem>>, vector<8x64xf32>,
    %c0_38 = arith.constant 0 : index
    %c16_39 = arith.constant 16 : index
    %83 = vector.load %arg11[%c0_38, %c16_39] : memref<8x32xf32, #tpu.memory_space<vmem>>, vector<8x16xf32>
    tpu.vector_store %arg11[%c0_38, %c16_39], %70 {strides = array<i32>} : memref<8x32xf32, #tpu.memory_space<vmem>>, vector<8x16xf32>,
    %c0_40 = arith.constant 0 : index
    %c0_41 = arith.constant 0 : index
    %84 = vector.load %arg9[%c0_40, %c0_41] : memref<8x128xf32, #tpu.memory_space<vmem>>, vector<8x128xf32>
    %85 = arith.index_cast %c0_i32_6 : i32 to index
    %c0_42 = arith.constant 0 : index
    %c0_43 = arith.constant 0 : index
    %86 = vector.load %arg8[%85, %c0_42, %c0_43] : memref<8x8x128xf32, #tpu.memory_space<vmem>>, vector<1x8x128xf32>
    %87 = vector.shape_cast %86 : vector<1x8x128xf32> to vector<8x128xf32>
    %88 = vector.shape_cast %84 : vector<8x128xf32> to vector<1x8x128xf32>
    tpu.vector_store %arg8[%85, %c0_42, %c0_43], %88 {strides = array<i32>} : memref<8x8x128xf32, #tpu.memory_space<vmem>>, vector<1x8x128xf32>,
    %c1_i32 = arith.constant 1 : i32
    %c0_44 = arith.constant 0 : index
    %c0_45 = arith.constant 0 : index
    %89 = vector.load %arg9[%c0_44, %c0_45] : memref<8x128xf32, #tpu.memory_space<vmem>>, vector<8x128xf32>
    %90 = arith.index_cast %c1_i32 : i32 to index
    %c0_46 = arith.constant 0 : index
    %c0_47 = arith.constant 0 : index
    %91 = vector.load %arg1[%90, %c0_46, %c0_47] : memref<8x8x544xf32, #tpu.memory_space<vmem>>, vector<1x8x544xf32>
    %92 = vector.shape_cast %91 : vector<1x8x544xf32> to vector<8x544xf32>
    %cst_48 = arith.constant dense<0.000000e+00> : vector<8x544xf32>
    %93 = tpu.matmul %89, %3, %cst_48 {dimension_numbers = #tpu.dot_dimension_numbers<[1], [0], [0], [1], [0, 0, 1, 1], [], []>} : vector<8x128xf32>, vector<128x544xf32>, vector<8x544xf32> -> vector<8x544xf32>
    %94 = arith.addf %92, %93 : vector<8x544xf32>
    %95 = vector.extract_strided_slice %94 {offsets = [0, 0], sizes = [8, 256], strides = [1, 1]} : vector<8x544xf32> to vector<8x256xf32>
    %96 = arith.negf %95 : vector<8x256xf32>
    %97 = math.exp %96 : vector<8x256xf32>
    %cst_49 = arith.constant 1.000000e+00 : f32
    %98 = vector.broadcast %cst_49 : f32 to vector<8x256xf32>
    %99 = arith.addf %98, %97 : vector<8x256xf32>
    %100 = arith.divf %98, %99 : vector<8x256xf32>
    %101 = vector.extract_strided_slice %100 {offsets = [0, 0], sizes = [8, 64], strides = [1, 1]} : vector<8x256xf32> to vector<8x64xf32>
    %102 = vector.extract_strided_slice %100 {offsets = [0, 64], sizes = [8, 64], strides = [1, 1]} : vector<8x256xf32> to vector<8x64xf32>
    %103 = vector.extract_strided_slice %100 {offsets = [0, 128], sizes = [8, 64], strides = [1, 1]} : vector<8x256xf32> to vector<8x64xf32>
    %104 = vector.extract_strided_slice %100 {offsets = [0, 192], sizes = [8, 64], strides = [1, 1]} : vector<8x256xf32> to vector<8x64xf32>
    %cst_50 = arith.constant 2.000000e+00 : f32
    %105 = vector.broadcast %cst_50 : f32 to vector<8x64xf32>
    %106 = arith.mulf %105, %104 : vector<8x64xf32>
    %cst_51 = arith.constant 1.000000e+00 : f32
    %107 = vector.broadcast %cst_51 : f32 to vector<8x64xf32>
    %108 = arith.subf %106, %107 : vector<8x64xf32>
    %109 = vector.extract_strided_slice %94 {offsets = [0, 512], sizes = [8, 16], strides = [1, 1]} : vector<8x544xf32> to vector<8x16xf32>
    %110 = arith.negf %109 : vector<8x16xf32>
    %111 = math.exp %110 : vector<8x16xf32>
    %cst_52 = arith.constant 1.000000e+00 : f32
    %112 = vector.broadcast %cst_52 : f32 to vector<8x16xf32>
    %113 = arith.addf %112, %111 : vector<8x16xf32>
    %114 = arith.divf %112, %113 : vector<8x16xf32>
    %c0_53 = arith.constant 0 : index
    %c0_54 = arith.constant 0 : index
    %115 = vector.load %arg11[%c0_53, %c0_54] : memref<8x32xf32, #tpu.memory_space<vmem>>, vector<8x16xf32>
    %116 = arith.mulf %114, %115 : vector<8x16xf32>
    %117 = vector.extract_strided_slice %5 {offsets = [0, 0], sizes = [16, 64], strides = [1, 1]} : vector<32x64xf32> to vector<16x64xf32>
    %cst_55 = arith.constant dense<0.000000e+00> : vector<8x64xf32>
    %118 = tpu.matmul %116, %117, %cst_55 {dimension_numbers = #tpu.dot_dimension_numbers<[1], [0], [0], [1], [0, 0, 1, 1], [], []>} : vector<8x16xf32>, vector<16x64xf32>, vector<8x64xf32> -> vector<8x64xf32>
    %119 = math.tanh %118 : vector<8x64xf32>
    %c0_56 = arith.constant 0 : index
    %c0_57 = arith.constant 0 : index
    %120 = vector.load %arg10[%c0_56, %c0_57] : memref<8x128xf32, #tpu.memory_space<vmem>>, vector<8x64xf32>
    %121 = arith.mulf %102, %120 : vector<8x64xf32>
    %122 = arith.mulf %101, %108 : vector<8x64xf32>
    %123 = arith.addf %121, %122 : vector<8x64xf32>
    %124 = arith.addf %123, %119 : vector<8x64xf32>
    %125 = math.tanh %124 : vector<8x64xf32>
    %126 = arith.mulf %103, %125 : vector<8x64xf32>
    %c0_58 = arith.constant 0 : index
    %c0_59 = arith.constant 0 : index
    %127 = vector.load %arg9[%c0_58, %c0_59] : memref<8x128xf32, #tpu.memory_space<vmem>>, vector<8x64xf32>
    tpu.vector_store %arg9[%c0_58, %c0_59], %126 {strides = array<i32>} : memref<8x128xf32, #tpu.memory_space<vmem>>, vector<8x64xf32>,
    %c0_60 = arith.constant 0 : index
    %c0_61 = arith.constant 0 : index
    %128 = vector.load %arg10[%c0_60, %c0_61] : memref<8x128xf32, #tpu.memory_space<vmem>>, vector<8x64xf32>
    tpu.vector_store %arg10[%c0_60, %c0_61], %124 {strides = array<i32>} : memref<8x128xf32, #tpu.memory_space<vmem>>, vector<8x64xf32>,
    %c0_62 = arith.constant 0 : index
    %c0_63 = arith.constant 0 : index
    %129 = vector.load %arg11[%c0_62, %c0_63] : memref<8x32xf32, #tpu.memory_space<vmem>>, vector<8x16xf32>
    tpu.vector_store %arg11[%c0_62, %c0_63], %116 {strides = array<i32>} : memref<8x32xf32, #tpu.memory_space<vmem>>, vector<8x16xf32>,
    %cst_64 = arith.constant dense<0.000000e+00> : vector<8x544xf32>
    %130 = tpu.matmul %126, %4, %cst_64 {dimension_numbers = #tpu.dot_dimension_numbers<[1], [0], [0], [1], [0, 0, 1, 1], [], []>} : vector<8x64xf32>, vector<64x544xf32>, vector<8x544xf32> -> vector<8x544xf32>
    %131 = arith.addf %94, %130 : vector<8x544xf32>
    %132 = vector.extract_strided_slice %131 {offsets = [0, 256], sizes = [8, 256], strides = [1, 1]} : vector<8x544xf32> to vector<8x256xf32>
    %133 = arith.negf %132 : vector<8x256xf32>
    %134 = math.exp %133 : vector<8x256xf32>
    %cst_65 = arith.constant 1.000000e+00 : f32
    %135 = vector.broadcast %cst_65 : f32 to vector<8x256xf32>
    %136 = arith.addf %135, %134 : vector<8x256xf32>
    %137 = arith.divf %135, %136 : vector<8x256xf32>
    %138 = vector.extract_strided_slice %137 {offsets = [0, 0], sizes = [8, 64], strides = [1, 1]} : vector<8x256xf32> to vector<8x64xf32>
    %139 = vector.extract_strided_slice %137 {offsets = [0, 64], sizes = [8, 64], strides = [1, 1]} : vector<8x256xf32> to vector<8x64xf32>
    %140 = vector.extract_strided_slice %137 {offsets = [0, 128], sizes = [8, 64], strides = [1, 1]} : vector<8x256xf32> to vector<8x64xf32>
    %141 = vector.extract_strided_slice %137 {offsets = [0, 192], sizes = [8, 64], strides = [1, 1]} : vector<8x256xf32> to vector<8x64xf32>
    %cst_66 = arith.constant 2.000000e+00 : f32
    %142 = vector.broadcast %cst_66 : f32 to vector<8x64xf32>
    %143 = arith.mulf %142, %141 : vector<8x64xf32>
    %cst_67 = arith.constant 1.000000e+00 : f32
    %144 = vector.broadcast %cst_67 : f32 to vector<8x64xf32>
    %145 = arith.subf %143, %144 : vector<8x64xf32>
    %146 = vector.extract_strided_slice %131 {offsets = [0, 528], sizes = [8, 16], strides = [1, 1]} : vector<8x544xf32> to vector<8x16xf32>
    %147 = arith.negf %146 : vector<8x16xf32>
    %148 = math.exp %147 : vector<8x16xf32>
    %cst_68 = arith.constant 1.000000e+00 : f32
    %149 = vector.broadcast %cst_68 : f32 to vector<8x16xf32>
    %150 = arith.addf %149, %148 : vector<8x16xf32>
    %151 = arith.divf %149, %150 : vector<8x16xf32>
    %c0_69 = arith.constant 0 : index
    %c16_70 = arith.constant 16 : index
    %152 = vector.load %arg11[%c0_69, %c16_70] : memref<8x32xf32, #tpu.memory_space<vmem>>, vector<8x16xf32>
    %153 = arith.mulf %151, %152 : vector<8x16xf32>
    %154 = vector.extract_strided_slice %5 {offsets = [16, 0], sizes = [16, 64], strides = [1, 1]} : vector<32x64xf32> to vector<16x64xf32>
    %cst_71 = arith.constant dense<0.000000e+00> : vector<8x64xf32>
    %155 = tpu.matmul %153, %154, %cst_71 {dimension_numbers = #tpu.dot_dimension_numbers<[1], [0], [0], [1], [0, 0, 1, 1], [], []>} : vector<8x16xf32>, vector<16x64xf32>, vector<8x64xf32> -> vector<8x64xf32>
    %156 = math.tanh %155 : vector<8x64xf32>
    %c0_72 = arith.constant 0 : index
    %c64_73 = arith.constant 64 : index
    %157 = vector.load %arg10[%c0_72, %c64_73] : memref<8x128xf32, #tpu.memory_space<vmem>>, vector<8x64xf32>
    %158 = arith.mulf %139, %157 : vector<8x64xf32>
    %159 = arith.mulf %138, %145 : vector<8x64xf32>
    %160 = arith.addf %158, %159 : vector<8x64xf32>
    %161 = arith.addf %160, %156 : vector<8x64xf32>
    %162 = math.tanh %161 : vector<8x64xf32>
    %163 = arith.mulf %140, %162 : vector<8x64xf32>
    %c0_74 = arith.constant 0 : index
    %c64_75 = arith.constant 64 : index
    %164 = vector.load %arg9[%c0_74, %c64_75] : memref<8x128xf32, #tpu.memory_space<vmem>>, vector<8x64xf32>
    tpu.vector_store %arg9[%c0_74, %c64_75], %163 {strides = array<i32>} : memref<8x128xf32, #tpu.memory_space<vmem>>, vector<8x64xf32>,
    %c0_76 = arith.constant 0 : index
    %c64_77 = arith.constant 64 : index
    %165 = vector.load %arg10[%c0_76, %c64_77] : memref<8x128xf32, #tpu.memory_space<vmem>>, vector<8x64xf32>
    tpu.vector_store %arg10[%c0_76, %c64_77], %161 {strides = array<i32>} : memref<8x128xf32, #tpu.memory_space<vmem>>, vector<8x64xf32>,
    %c0_78 = arith.constant 0 : index
    %c16_79 = arith.constant 16 : index
    %166 = vector.load %arg11[%c0_78, %c16_79] : memref<8x32xf32, #tpu.memory_space<vmem>>, vector<8x16xf32>
    tpu.vector_store %arg11[%c0_78, %c16_79], %153 {strides = array<i32>} : memref<8x32xf32, #tpu.memory_space<vmem>>, vector<8x16xf32>,
    %c0_80 = arith.constant 0 : index
    %c0_81 = arith.constant 0 : index
    %167 = vector.load %arg9[%c0_80, %c0_81] : memref<8x128xf32, #tpu.memory_space<vmem>>, vector<8x128xf32>
    %168 = arith.index_cast %c1_i32 : i32 to index
    %c0_82 = arith.constant 0 : index
    %c0_83 = arith.constant 0 : index
    %169 = vector.load %arg8[%168, %c0_82, %c0_83] : memref<8x8x128xf32, #tpu.memory_space<vmem>>, vector<1x8x128xf32>
    %170 = vector.shape_cast %169 : vector<1x8x128xf32> to vector<8x128xf32>
    %171 = vector.shape_cast %167 : vector<8x128xf32> to vector<1x8x128xf32>
    tpu.vector_store %arg8[%168, %c0_82, %c0_83], %171 {strides = array<i32>} : memref<8x8x128xf32, #tpu.memory_space<vmem>>, vector<1x8x128xf32>,
    %c2_i32 = arith.constant 2 : i32
    %c0_84 = arith.constant 0 : index
    %c0_85 = arith.constant 0 : index
    %172 = vector.load %arg9[%c0_84, %c0_85] : memref<8x128xf32, #tpu.memory_space<vmem>>, vector<8x128xf32>
    %173 = arith.index_cast %c2_i32 : i32 to index
    %c0_86 = arith.constant 0 : index
    %c0_87 = arith.constant 0 : index
    %174 = vector.load %arg1[%173, %c0_86, %c0_87] : memref<8x8x544xf32, #tpu.memory_space<vmem>>, vector<1x8x544xf32>
    %175 = vector.shape_cast %174 : vector<1x8x544xf32> to vector<8x544xf32>
    %cst_88 = arith.constant dense<0.000000e+00> : vector<8x544xf32>
    %176 = tpu.matmul %172, %3, %cst_88 {dimension_numbers = #tpu.dot_dimension_numbers<[1], [0], [0], [1], [0, 0, 1, 1], [], []>} : vector<8x128xf32>, vector<128x544xf32>, vector<8x544xf32> -> vector<8x544xf32>
    %177 = arith.addf %175, %176 : vector<8x544xf32>
    %178 = vector.extract_strided_slice %177 {offsets = [0, 0], sizes = [8, 256], strides = [1, 1]} : vector<8x544xf32> to vector<8x256xf32>
    %179 = arith.negf %178 : vector<8x256xf32>
    %180 = math.exp %179 : vector<8x256xf32>
    %cst_89 = arith.constant 1.000000e+00 : f32
    %181 = vector.broadcast %cst_89 : f32 to vector<8x256xf32>
    %182 = arith.addf %181, %180 : vector<8x256xf32>
    %183 = arith.divf %181, %182 : vector<8x256xf32>
    %184 = vector.extract_strided_slice %183 {offsets = [0, 0], sizes = [8, 64], strides = [1, 1]} : vector<8x256xf32> to vector<8x64xf32>
    %185 = vector.extract_strided_slice %183 {offsets = [0, 64], sizes = [8, 64], strides = [1, 1]} : vector<8x256xf32> to vector<8x64xf32>
    %186 = vector.extract_strided_slice %183 {offsets = [0, 128], sizes = [8, 64], strides = [1, 1]} : vector<8x256xf32> to vector<8x64xf32>
    %187 = vector.extract_strided_slice %183 {offsets = [0, 192], sizes = [8, 64], strides = [1, 1]} : vector<8x256xf32> to vector<8x64xf32>
    %cst_90 = arith.constant 2.000000e+00 : f32
    %188 = vector.broadcast %cst_90 : f32 to vector<8x64xf32>
    %189 = arith.mulf %188, %187 : vector<8x64xf32>
    %cst_91 = arith.constant 1.000000e+00 : f32
    %190 = vector.broadcast %cst_91 : f32 to vector<8x64xf32>
    %191 = arith.subf %189, %190 : vector<8x64xf32>
    %192 = vector.extract_strided_slice %177 {offsets = [0, 512], sizes = [8, 16], strides = [1, 1]} : vector<8x544xf32> to vector<8x16xf32>
    %193 = arith.negf %192 : vector<8x16xf32>
    %194 = math.exp %193 : vector<8x16xf32>
    %cst_92 = arith.constant 1.000000e+00 : f32
    %195 = vector.broadcast %cst_92 : f32 to vector<8x16xf32>
    %196 = arith.addf %195, %194 : vector<8x16xf32>
    %197 = arith.divf %195, %196 : vector<8x16xf32>
    %c0_93 = arith.constant 0 : index
    %c0_94 = arith.constant 0 : index
    %198 = vector.load %arg11[%c0_93, %c0_94] : memref<8x32xf32, #tpu.memory_space<vmem>>, vector<8x16xf32>
    %199 = arith.mulf %197, %198 : vector<8x16xf32>
    %200 = vector.extract_strided_slice %5 {offsets = [0, 0], sizes = [16, 64], strides = [1, 1]} : vector<32x64xf32> to vector<16x64xf32>
    %cst_95 = arith.constant dense<0.000000e+00> : vector<8x64xf32>
    %201 = tpu.matmul %199, %200, %cst_95 {dimension_numbers = #tpu.dot_dimension_numbers<[1], [0], [0], [1], [0, 0, 1, 1], [], []>} : vector<8x16xf32>, vector<16x64xf32>, vector<8x64xf32> -> vector<8x64xf32>
    %202 = math.tanh %201 : vector<8x64xf32>
    %c0_96 = arith.constant 0 : index
    %c0_97 = arith.constant 0 : index
    %203 = vector.load %arg10[%c0_96, %c0_97] : memref<8x128xf32, #tpu.memory_space<vmem>>, vector<8x64xf32>
    %204 = arith.mulf %185, %203 : vector<8x64xf32>
    %205 = arith.mulf %184, %191 : vector<8x64xf32>
    %206 = arith.addf %204, %205 : vector<8x64xf32>
    %207 = arith.addf %206, %202 : vector<8x64xf32>
    %208 = math.tanh %207 : vector<8x64xf32>
    %209 = arith.mulf %186, %208 : vector<8x64xf32>
    %c0_98 = arith.constant 0 : index
    %c0_99 = arith.constant 0 : index
    %210 = vector.load %arg9[%c0_98, %c0_99] : memref<8x128xf32, #tpu.memory_space<vmem>>, vector<8x64xf32>
    tpu.vector_store %arg9[%c0_98, %c0_99], %209 {strides = array<i32>} : memref<8x128xf32, #tpu.memory_space<vmem>>, vector<8x64xf32>,
    %c0_100 = arith.constant 0 : index
    %c0_101 = arith.constant 0 : index
    %211 = vector.load %arg10[%c0_100, %c0_101] : memref<8x128xf32, #tpu.memory_space<vmem>>, vector<8x64xf32>
    tpu.vector_store %arg10[%c0_100, %c0_101], %207 {strides = array<i32>} : memref<8x128xf32, #tpu.memory_space<vmem>>, vector<8x64xf32>,
    %c0_102 = arith.constant 0 : index
    %c0_103 = arith.constant 0 : index
    %212 = vector.load %arg11[%c0_102, %c0_103] : memref<8x32xf32, #tpu.memory_space<vmem>>, vector<8x16xf32>
    tpu.vector_store %arg11[%c0_102, %c0_103], %199 {strides = array<i32>} : memref<8x32xf32, #tpu.memory_space<vmem>>, vector<8x16xf32>,
    %cst_104 = arith.constant dense<0.000000e+00> : vector<8x544xf32>
    %213 = tpu.matmul %209, %4, %cst_104 {dimension_numbers = #tpu.dot_dimension_numbers<[1], [0], [0], [1], [0, 0, 1, 1], [], []>} : vector<8x64xf32>, vector<64x544xf32>, vector<8x544xf32> -> vector<8x544xf32>
    %214 = arith.addf %177, %213 : vector<8x544xf32>
    %215 = vector.extract_strided_slice %214 {offsets = [0, 256], sizes = [8, 256], strides = [1, 1]} : vector<8x544xf32> to vector<8x256xf32>
    %216 = arith.negf %215 : vector<8x256xf32>
    %217 = math.exp %216 : vector<8x256xf32>
    %cst_105 = arith.constant 1.000000e+00 : f32
    %218 = vector.broadcast %cst_105 : f32 to vector<8x256xf32>
    %219 = arith.addf %218, %217 : vector<8x256xf32>
    %220 = arith.divf %218, %219 : vector<8x256xf32>
    %221 = vector.extract_strided_slice %220 {offsets = [0, 0], sizes = [8, 64], strides = [1, 1]} : vector<8x256xf32> to vector<8x64xf32>
    %222 = vector.extract_strided_slice %220 {offsets = [0, 64], sizes = [8, 64], strides = [1, 1]} : vector<8x256xf32> to vector<8x64xf32>
    %223 = vector.extract_strided_slice %220 {offsets = [0, 128], sizes = [8, 64], strides = [1, 1]} : vector<8x256xf32> to vector<8x64xf32>
    %224 = vector.extract_strided_slice %220 {offsets = [0, 192], sizes = [8, 64], strides = [1, 1]} : vector<8x256xf32> to vector<8x64xf32>
    %cst_106 = arith.constant 2.000000e+00 : f32
    %225 = vector.broadcast %cst_106 : f32 to vector<8x64xf32>
    %226 = arith.mulf %225, %224 : vector<8x64xf32>
    %cst_107 = arith.constant 1.000000e+00 : f32
    %227 = vector.broadcast %cst_107 : f32 to vector<8x64xf32>
    %228 = arith.subf %226, %227 : vector<8x64xf32>
    %229 = vector.extract_strided_slice %214 {offsets = [0, 528], sizes = [8, 16], strides = [1, 1]} : vector<8x544xf32> to vector<8x16xf32>
    %230 = arith.negf %229 : vector<8x16xf32>
    %231 = math.exp %230 : vector<8x16xf32>
    %cst_108 = arith.constant 1.000000e+00 : f32
    %232 = vector.broadcast %cst_108 : f32 to vector<8x16xf32>
    %233 = arith.addf %232, %231 : vector<8x16xf32>
    %234 = arith.divf %232, %233 : vector<8x16xf32>
    %c0_109 = arith.constant 0 : index
    %c16_110 = arith.constant 16 : index
    %235 = vector.load %arg11[%c0_109, %c16_110] : memref<8x32xf32, #tpu.memory_space<vmem>>, vector<8x16xf32>
    %236 = arith.mulf %234, %235 : vector<8x16xf32>
    %237 = vector.extract_strided_slice %5 {offsets = [16, 0], sizes = [16, 64], strides = [1, 1]} : vector<32x64xf32> to vector<16x64xf32>
    %cst_111 = arith.constant dense<0.000000e+00> : vector<8x64xf32>
    %238 = tpu.matmul %236, %237, %cst_111 {dimension_numbers = #tpu.dot_dimension_numbers<[1], [0], [0], [1], [0, 0, 1, 1], [], []>} : vector<8x16xf32>, vector<16x64xf32>, vector<8x64xf32> -> vector<8x64xf32>
    %239 = math.tanh %238 : vector<8x64xf32>
    %c0_112 = arith.constant 0 : index
    %c64_113 = arith.constant 64 : index
    %240 = vector.load %arg10[%c0_112, %c64_113] : memref<8x128xf32, #tpu.memory_space<vmem>>, vector<8x64xf32>
    %241 = arith.mulf %222, %240 : vector<8x64xf32>
    %242 = arith.mulf %221, %228 : vector<8x64xf32>
    %243 = arith.addf %241, %242 : vector<8x64xf32>
    %244 = arith.addf %243, %239 : vector<8x64xf32>
    %245 = math.tanh %244 : vector<8x64xf32>
    %246 = arith.mulf %223, %245 : vector<8x64xf32>
    %c0_114 = arith.constant 0 : index
    %c64_115 = arith.constant 64 : index
    %247 = vector.load %arg9[%c0_114, %c64_115] : memref<8x128xf32, #tpu.memory_space<vmem>>, vector<8x64xf32>
    tpu.vector_store %arg9[%c0_114, %c64_115], %246 {strides = array<i32>} : memref<8x128xf32, #tpu.memory_space<vmem>>, vector<8x64xf32>,
    %c0_116 = arith.constant 0 : index
    %c64_117 = arith.constant 64 : index
    %248 = vector.load %arg10[%c0_116, %c64_117] : memref<8x128xf32, #tpu.memory_space<vmem>>, vector<8x64xf32>
    tpu.vector_store %arg10[%c0_116, %c64_117], %244 {strides = array<i32>} : memref<8x128xf32, #tpu.memory_space<vmem>>, vector<8x64xf32>,
    %c0_118 = arith.constant 0 : index
    %c16_119 = arith.constant 16 : index
    %249 = vector.load %arg11[%c0_118, %c16_119] : memref<8x32xf32, #tpu.memory_space<vmem>>, vector<8x16xf32>
    tpu.vector_store %arg11[%c0_118, %c16_119], %236 {strides = array<i32>} : memref<8x32xf32, #tpu.memory_space<vmem>>, vector<8x16xf32>,
    %c0_120 = arith.constant 0 : index
    %c0_121 = arith.constant 0 : index
    %250 = vector.load %arg9[%c0_120, %c0_121] : memref<8x128xf32, #tpu.memory_space<vmem>>, vector<8x128xf32>
    %251 = arith.index_cast %c2_i32 : i32 to index
    %c0_122 = arith.constant 0 : index
    %c0_123 = arith.constant 0 : index
    %252 = vector.load %arg8[%251, %c0_122, %c0_123] : memref<8x8x128xf32, #tpu.memory_space<vmem>>, vector<1x8x128xf32>
    %253 = vector.shape_cast %252 : vector<1x8x128xf32> to vector<8x128xf32>
    %254 = vector.shape_cast %250 : vector<8x128xf32> to vector<1x8x128xf32>
    tpu.vector_store %arg8[%251, %c0_122, %c0_123], %254 {strides = array<i32>} : memref<8x8x128xf32, #tpu.memory_space<vmem>>, vector<1x8x128xf32>,
    %c3_i32 = arith.constant 3 : i32
    %c0_124 = arith.constant 0 : index
    %c0_125 = arith.constant 0 : index
    %255 = vector.load %arg9[%c0_124, %c0_125] : memref<8x128xf32, #tpu.memory_space<vmem>>, vector<8x128xf32>
    %256 = arith.index_cast %c3_i32 : i32 to index
    %c0_126 = arith.constant 0 : index
    %c0_127 = arith.constant 0 : index
    %257 = vector.load %arg1[%256, %c0_126, %c0_127] : memref<8x8x544xf32, #tpu.memory_space<vmem>>, vector<1x8x544xf32>
    %258 = vector.shape_cast %257 : vector<1x8x544xf32> to vector<8x544xf32>
    %cst_128 = arith.constant dense<0.000000e+00> : vector<8x544xf32>
    %259 = tpu.matmul %255, %3, %cst_128 {dimension_numbers = #tpu.dot_dimension_numbers<[1], [0], [0], [1], [0, 0, 1, 1], [], []>} : vector<8x128xf32>, vector<128x544xf32>, vector<8x544xf32> -> vector<8x544xf32>
    %260 = arith.addf %258, %259 : vector<8x544xf32>
    %261 = vector.extract_strided_slice %260 {offsets = [0, 0], sizes = [8, 256], strides = [1, 1]} : vector<8x544xf32> to vector<8x256xf32>
    %262 = arith.negf %261 : vector<8x256xf32>
    %263 = math.exp %262 : vector<8x256xf32>
    %cst_129 = arith.constant 1.000000e+00 : f32
    %264 = vector.broadcast %cst_129 : f32 to vector<8x256xf32>
    %265 = arith.addf %264, %263 : vector<8x256xf32>
    %266 = arith.divf %264, %265 : vector<8x256xf32>
    %267 = vector.extract_strided_slice %266 {offsets = [0, 0], sizes = [8, 64], strides = [1, 1]} : vector<8x256xf32> to vector<8x64xf32>
    %268 = vector.extract_strided_slice %266 {offsets = [0, 64], sizes = [8, 64], strides = [1, 1]} : vector<8x256xf32> to vector<8x64xf32>
    %269 = vector.extract_strided_slice %266 {offsets = [0, 128], sizes = [8, 64], strides = [1, 1]} : vector<8x256xf32> to vector<8x64xf32>
    %270 = vector.extract_strided_slice %266 {offsets = [0, 192], sizes = [8, 64], strides = [1, 1]} : vector<8x256xf32> to vector<8x64xf32>
    %cst_130 = arith.constant 2.000000e+00 : f32
    %271 = vector.broadcast %cst_130 : f32 to vector<8x64xf32>
    %272 = arith.mulf %271, %270 : vector<8x64xf32>
    %cst_131 = arith.constant 1.000000e+00 : f32
    %273 = vector.broadcast %cst_131 : f32 to vector<8x64xf32>
    %274 = arith.subf %272, %273 : vector<8x64xf32>
    %275 = vector.extract_strided_slice %260 {offsets = [0, 512], sizes = [8, 16], strides = [1, 1]} : vector<8x544xf32> to vector<8x16xf32>
    %276 = arith.negf %275 : vector<8x16xf32>
    %277 = math.exp %276 : vector<8x16xf32>
    %cst_132 = arith.constant 1.000000e+00 : f32
    %278 = vector.broadcast %cst_132 : f32 to vector<8x16xf32>
    %279 = arith.addf %278, %277 : vector<8x16xf32>
    %280 = arith.divf %278, %279 : vector<8x16xf32>
    %c0_133 = arith.constant 0 : index
    %c0_134 = arith.constant 0 : index
    %281 = vector.load %arg11[%c0_133, %c0_134] : memref<8x32xf32, #tpu.memory_space<vmem>>, vector<8x16xf32>
    %282 = arith.mulf %280, %281 : vector<8x16xf32>
    %283 = vector.extract_strided_slice %5 {offsets = [0, 0], sizes = [16, 64], strides = [1, 1]} : vector<32x64xf32> to vector<16x64xf32>
    %cst_135 = arith.constant dense<0.000000e+00> : vector<8x64xf32>
    %284 = tpu.matmul %282, %283, %cst_135 {dimension_numbers = #tpu.dot_dimension_numbers<[1], [0], [0], [1], [0, 0, 1, 1], [], []>} : vector<8x16xf32>, vector<16x64xf32>, vector<8x64xf32> -> vector<8x64xf32>
    %285 = math.tanh %284 : vector<8x64xf32>
    %c0_136 = arith.constant 0 : index
    %c0_137 = arith.constant 0 : index
    %286 = vector.load %arg10[%c0_136, %c0_137] : memref<8x128xf32, #tpu.memory_space<vmem>>, vector<8x64xf32>
    %287 = arith.mulf %268, %286 : vector<8x64xf32>
    %288 = arith.mulf %267, %274 : vector<8x64xf32>
    %289 = arith.addf %287, %288 : vector<8x64xf32>
    %290 = arith.addf %289, %285 : vector<8x64xf32>
    %291 = math.tanh %290 : vector<8x64xf32>
    %292 = arith.mulf %269, %291 : vector<8x64xf32>
    %c0_138 = arith.constant 0 : index
    %c0_139 = arith.constant 0 : index
    %293 = vector.load %arg9[%c0_138, %c0_139] : memref<8x128xf32, #tpu.memory_space<vmem>>, vector<8x64xf32>
    tpu.vector_store %arg9[%c0_138, %c0_139], %292 {strides = array<i32>} : memref<8x128xf32, #tpu.memory_space<vmem>>, vector<8x64xf32>,
    %c0_140 = arith.constant 0 : index
    %c0_141 = arith.constant 0 : index
    %294 = vector.load %arg10[%c0_140, %c0_141] : memref<8x128xf32, #tpu.memory_space<vmem>>, vector<8x64xf32>
    tpu.vector_store %arg10[%c0_140, %c0_141], %290 {strides = array<i32>} : memref<8x128xf32, #tpu.memory_space<vmem>>, vector<8x64xf32>,
    %c0_142 = arith.constant 0 : index
    %c0_143 = arith.constant 0 : index
    %295 = vector.load %arg11[%c0_142, %c0_143] : memref<8x32xf32, #tpu.memory_space<vmem>>, vector<8x16xf32>
    tpu.vector_store %arg11[%c0_142, %c0_143], %282 {strides = array<i32>} : memref<8x32xf32, #tpu.memory_space<vmem>>, vector<8x16xf32>,
    %cst_144 = arith.constant dense<0.000000e+00> : vector<8x544xf32>
    %296 = tpu.matmul %292, %4, %cst_144 {dimension_numbers = #tpu.dot_dimension_numbers<[1], [0], [0], [1], [0, 0, 1, 1], [], []>} : vector<8x64xf32>, vector<64x544xf32>, vector<8x544xf32> -> vector<8x544xf32>
    %297 = arith.addf %260, %296 : vector<8x544xf32>
    %298 = vector.extract_strided_slice %297 {offsets = [0, 256], sizes = [8, 256], strides = [1, 1]} : vector<8x544xf32> to vector<8x256xf32>
    %299 = arith.negf %298 : vector<8x256xf32>
    %300 = math.exp %299 : vector<8x256xf32>
    %cst_145 = arith.constant 1.000000e+00 : f32
    %301 = vector.broadcast %cst_145 : f32 to vector<8x256xf32>
    %302 = arith.addf %301, %300 : vector<8x256xf32>
    %303 = arith.divf %301, %302 : vector<8x256xf32>
    %304 = vector.extract_strided_slice %303 {offsets = [0, 0], sizes = [8, 64], strides = [1, 1]} : vector<8x256xf32> to vector<8x64xf32>
    %305 = vector.extract_strided_slice %303 {offsets = [0, 64], sizes = [8, 64], strides = [1, 1]} : vector<8x256xf32> to vector<8x64xf32>
    %306 = vector.extract_strided_slice %303 {offsets = [0, 128], sizes = [8, 64], strides = [1, 1]} : vector<8x256xf32> to vector<8x64xf32>
    %307 = vector.extract_strided_slice %303 {offsets = [0, 192], sizes = [8, 64], strides = [1, 1]} : vector<8x256xf32> to vector<8x64xf32>
    %cst_146 = arith.constant 2.000000e+00 : f32
    %308 = vector.broadcast %cst_146 : f32 to vector<8x64xf32>
    %309 = arith.mulf %308, %307 : vector<8x64xf32>
    %cst_147 = arith.constant 1.000000e+00 : f32
    %310 = vector.broadcast %cst_147 : f32 to vector<8x64xf32>
    %311 = arith.subf %309, %310 : vector<8x64xf32>
    %312 = vector.extract_strided_slice %297 {offsets = [0, 528], sizes = [8, 16], strides = [1, 1]} : vector<8x544xf32> to vector<8x16xf32>
    %313 = arith.negf %312 : vector<8x16xf32>
    %314 = math.exp %313 : vector<8x16xf32>
    %cst_148 = arith.constant 1.000000e+00 : f32
    %315 = vector.broadcast %cst_148 : f32 to vector<8x16xf32>
    %316 = arith.addf %315, %314 : vector<8x16xf32>
    %317 = arith.divf %315, %316 : vector<8x16xf32>
    %c0_149 = arith.constant 0 : index
    %c16_150 = arith.constant 16 : index
    %318 = vector.load %arg11[%c0_149, %c16_150] : memref<8x32xf32, #tpu.memory_space<vmem>>, vector<8x16xf32>
    %319 = arith.mulf %317, %318 : vector<8x16xf32>
    %320 = vector.extract_strided_slice %5 {offsets = [16, 0], sizes = [16, 64], strides = [1, 1]} : vector<32x64xf32> to vector<16x64xf32>
    %cst_151 = arith.constant dense<0.000000e+00> : vector<8x64xf32>
    %321 = tpu.matmul %319, %320, %cst_151 {dimension_numbers = #tpu.dot_dimension_numbers<[1], [0], [0], [1], [0, 0, 1, 1], [], []>} : vector<8x16xf32>, vector<16x64xf32>, vector<8x64xf32> -> vector<8x64xf32>
    %322 = math.tanh %321 : vector<8x64xf32>
    %c0_152 = arith.constant 0 : index
    %c64_153 = arith.constant 64 : index
    %323 = vector.load %arg10[%c0_152, %c64_153] : memref<8x128xf32, #tpu.memory_space<vmem>>, vector<8x64xf32>
    %324 = arith.mulf %305, %323 : vector<8x64xf32>
    %325 = arith.mulf %304, %311 : vector<8x64xf32>
    %326 = arith.addf %324, %325 : vector<8x64xf32>
    %327 = arith.addf %326, %322 : vector<8x64xf32>
    %328 = math.tanh %327 : vector<8x64xf32>
    %329 = arith.mulf %306, %328 : vector<8x64xf32>
    %c0_154 = arith.constant 0 : index
    %c64_155 = arith.constant 64 : index
    %330 = vector.load %arg9[%c0_154, %c64_155] : memref<8x128xf32, #tpu.memory_space<vmem>>, vector<8x64xf32>
    tpu.vector_store %arg9[%c0_154, %c64_155], %329 {strides = array<i32>} : memref<8x128xf32, #tpu.memory_space<vmem>>, vector<8x64xf32>,
    %c0_156 = arith.constant 0 : index
    %c64_157 = arith.constant 64 : index
    %331 = vector.load %arg10[%c0_156, %c64_157] : memref<8x128xf32, #tpu.memory_space<vmem>>, vector<8x64xf32>
    tpu.vector_store %arg10[%c0_156, %c64_157], %327 {strides = array<i32>} : memref<8x128xf32, #tpu.memory_space<vmem>>, vector<8x64xf32>,
    %c0_158 = arith.constant 0 : index
    %c16_159 = arith.constant 16 : index
    %332 = vector.load %arg11[%c0_158, %c16_159] : memref<8x32xf32, #tpu.memory_space<vmem>>, vector<8x16xf32>
    tpu.vector_store %arg11[%c0_158, %c16_159], %319 {strides = array<i32>} : memref<8x32xf32, #tpu.memory_space<vmem>>, vector<8x16xf32>,
    %c0_160 = arith.constant 0 : index
    %c0_161 = arith.constant 0 : index
    %333 = vector.load %arg9[%c0_160, %c0_161] : memref<8x128xf32, #tpu.memory_space<vmem>>, vector<8x128xf32>
    %334 = arith.index_cast %c3_i32 : i32 to index
    %c0_162 = arith.constant 0 : index
    %c0_163 = arith.constant 0 : index
    %335 = vector.load %arg8[%334, %c0_162, %c0_163] : memref<8x8x128xf32, #tpu.memory_space<vmem>>, vector<1x8x128xf32>
    %336 = vector.shape_cast %335 : vector<1x8x128xf32> to vector<8x128xf32>
    %337 = vector.shape_cast %333 : vector<8x128xf32> to vector<1x8x128xf32>
    tpu.vector_store %arg8[%334, %c0_162, %c0_163], %337 {strides = array<i32>} : memref<8x8x128xf32, #tpu.memory_space<vmem>>, vector<1x8x128xf32>,
    %c4_i32 = arith.constant 4 : i32
    %c0_164 = arith.constant 0 : index
    %c0_165 = arith.constant 0 : index
    %338 = vector.load %arg9[%c0_164, %c0_165] : memref<8x128xf32, #tpu.memory_space<vmem>>, vector<8x128xf32>
    %339 = arith.index_cast %c4_i32 : i32 to index
    %c0_166 = arith.constant 0 : index
    %c0_167 = arith.constant 0 : index
    %340 = vector.load %arg1[%339, %c0_166, %c0_167] : memref<8x8x544xf32, #tpu.memory_space<vmem>>, vector<1x8x544xf32>
    %341 = vector.shape_cast %340 : vector<1x8x544xf32> to vector<8x544xf32>
    %cst_168 = arith.constant dense<0.000000e+00> : vector<8x544xf32>
    %342 = tpu.matmul %338, %3, %cst_168 {dimension_numbers = #tpu.dot_dimension_numbers<[1], [0], [0], [1], [0, 0, 1, 1], [], []>} : vector<8x128xf32>, vector<128x544xf32>, vector<8x544xf32> -> vector<8x544xf32>
    %343 = arith.addf %341, %342 : vector<8x544xf32>
    %344 = vector.extract_strided_slice %343 {offsets = [0, 0], sizes = [8, 256], strides = [1, 1]} : vector<8x544xf32> to vector<8x256xf32>
    %345 = arith.negf %344 : vector<8x256xf32>
    %346 = math.exp %345 : vector<8x256xf32>
    %cst_169 = arith.constant 1.000000e+00 : f32
    %347 = vector.broadcast %cst_169 : f32 to vector<8x256xf32>
    %348 = arith.addf %347, %346 : vector<8x256xf32>
    %349 = arith.divf %347, %348 : vector<8x256xf32>
    %350 = vector.extract_strided_slice %349 {offsets = [0, 0], sizes = [8, 64], strides = [1, 1]} : vector<8x256xf32> to vector<8x64xf32>
    %351 = vector.extract_strided_slice %349 {offsets = [0, 64], sizes = [8, 64], strides = [1, 1]} : vector<8x256xf32> to vector<8x64xf32>
    %352 = vector.extract_strided_slice %349 {offsets = [0, 128], sizes = [8, 64], strides = [1, 1]} : vector<8x256xf32> to vector<8x64xf32>
    %353 = vector.extract_strided_slice %349 {offsets = [0, 192], sizes = [8, 64], strides = [1, 1]} : vector<8x256xf32> to vector<8x64xf32>
    %cst_170 = arith.constant 2.000000e+00 : f32
    %354 = vector.broadcast %cst_170 : f32 to vector<8x64xf32>
    %355 = arith.mulf %354, %353 : vector<8x64xf32>
    %cst_171 = arith.constant 1.000000e+00 : f32
    %356 = vector.broadcast %cst_171 : f32 to vector<8x64xf32>
    %357 = arith.subf %355, %356 : vector<8x64xf32>
    %358 = vector.extract_strided_slice %343 {offsets = [0, 512], sizes = [8, 16], strides = [1, 1]} : vector<8x544xf32> to vector<8x16xf32>
    %359 = arith.negf %358 : vector<8x16xf32>
    %360 = math.exp %359 : vector<8x16xf32>
    %cst_172 = arith.constant 1.000000e+00 : f32
    %361 = vector.broadcast %cst_172 : f32 to vector<8x16xf32>
    %362 = arith.addf %361, %360 : vector<8x16xf32>
    %363 = arith.divf %361, %362 : vector<8x16xf32>
    %c0_173 = arith.constant 0 : index
    %c0_174 = arith.constant 0 : index
    %364 = vector.load %arg11[%c0_173, %c0_174] : memref<8x32xf32, #tpu.memory_space<vmem>>, vector<8x16xf32>
    %365 = arith.mulf %363, %364 : vector<8x16xf32>
    %366 = vector.extract_strided_slice %5 {offsets = [0, 0], sizes = [16, 64], strides = [1, 1]} : vector<32x64xf32> to vector<16x64xf32>
    %cst_175 = arith.constant dense<0.000000e+00> : vector<8x64xf32>
    %367 = tpu.matmul %365, %366, %cst_175 {dimension_numbers = #tpu.dot_dimension_numbers<[1], [0], [0], [1], [0, 0, 1, 1], [], []>} : vector<8x16xf32>, vector<16x64xf32>, vector<8x64xf32> -> vector<8x64xf32>
    %368 = math.tanh %367 : vector<8x64xf32>
    %c0_176 = arith.constant 0 : index
    %c0_177 = arith.constant 0 : index
    %369 = vector.load %arg10[%c0_176, %c0_177] : memref<8x128xf32, #tpu.memory_space<vmem>>, vector<8x64xf32>
    %370 = arith.mulf %351, %369 : vector<8x64xf32>
    %371 = arith.mulf %350, %357 : vector<8x64xf32>
    %372 = arith.addf %370, %371 : vector<8x64xf32>
    %373 = arith.addf %372, %368 : vector<8x64xf32>
    %374 = math.tanh %373 : vector<8x64xf32>
    %375 = arith.mulf %352, %374 : vector<8x64xf32>
    %c0_178 = arith.constant 0 : index
    %c0_179 = arith.constant 0 : index
    %376 = vector.load %arg9[%c0_178, %c0_179] : memref<8x128xf32, #tpu.memory_space<vmem>>, vector<8x64xf32>
    tpu.vector_store %arg9[%c0_178, %c0_179], %375 {strides = array<i32>} : memref<8x128xf32, #tpu.memory_space<vmem>>, vector<8x64xf32>,
    %c0_180 = arith.constant 0 : index
    %c0_181 = arith.constant 0 : index
    %377 = vector.load %arg10[%c0_180, %c0_181] : memref<8x128xf32, #tpu.memory_space<vmem>>, vector<8x64xf32>
    tpu.vector_store %arg10[%c0_180, %c0_181], %373 {strides = array<i32>} : memref<8x128xf32, #tpu.memory_space<vmem>>, vector<8x64xf32>,
    %c0_182 = arith.constant 0 : index
    %c0_183 = arith.constant 0 : index
    %378 = vector.load %arg11[%c0_182, %c0_183] : memref<8x32xf32, #tpu.memory_space<vmem>>, vector<8x16xf32>
    tpu.vector_store %arg11[%c0_182, %c0_183], %365 {strides = array<i32>} : memref<8x32xf32, #tpu.memory_space<vmem>>, vector<8x16xf32>,
    %cst_184 = arith.constant dense<0.000000e+00> : vector<8x544xf32>
    %379 = tpu.matmul %375, %4, %cst_184 {dimension_numbers = #tpu.dot_dimension_numbers<[1], [0], [0], [1], [0, 0, 1, 1], [], []>} : vector<8x64xf32>, vector<64x544xf32>, vector<8x544xf32> -> vector<8x544xf32>
    %380 = arith.addf %343, %379 : vector<8x544xf32>
    %381 = vector.extract_strided_slice %380 {offsets = [0, 256], sizes = [8, 256], strides = [1, 1]} : vector<8x544xf32> to vector<8x256xf32>
    %382 = arith.negf %381 : vector<8x256xf32>
    %383 = math.exp %382 : vector<8x256xf32>
    %cst_185 = arith.constant 1.000000e+00 : f32
    %384 = vector.broadcast %cst_185 : f32 to vector<8x256xf32>
    %385 = arith.addf %384, %383 : vector<8x256xf32>
    %386 = arith.divf %384, %385 : vector<8x256xf32>
    %387 = vector.extract_strided_slice %386 {offsets = [0, 0], sizes = [8, 64], strides = [1, 1]} : vector<8x256xf32> to vector<8x64xf32>
    %388 = vector.extract_strided_slice %386 {offsets = [0, 64], sizes = [8, 64], strides = [1, 1]} : vector<8x256xf32> to vector<8x64xf32>
    %389 = vector.extract_strided_slice %386 {offsets = [0, 128], sizes = [8, 64], strides = [1, 1]} : vector<8x256xf32> to vector<8x64xf32>
    %390 = vector.extract_strided_slice %386 {offsets = [0, 192], sizes = [8, 64], strides = [1, 1]} : vector<8x256xf32> to vector<8x64xf32>
    %cst_186 = arith.constant 2.000000e+00 : f32
    %391 = vector.broadcast %cst_186 : f32 to vector<8x64xf32>
    %392 = arith.mulf %391, %390 : vector<8x64xf32>
    %cst_187 = arith.constant 1.000000e+00 : f32
    %393 = vector.broadcast %cst_187 : f32 to vector<8x64xf32>
    %394 = arith.subf %392, %393 : vector<8x64xf32>
    %395 = vector.extract_strided_slice %380 {offsets = [0, 528], sizes = [8, 16], strides = [1, 1]} : vector<8x544xf32> to vector<8x16xf32>
    %396 = arith.negf %395 : vector<8x16xf32>
    %397 = math.exp %396 : vector<8x16xf32>
    %cst_188 = arith.constant 1.000000e+00 : f32
    %398 = vector.broadcast %cst_188 : f32 to vector<8x16xf32>
    %399 = arith.addf %398, %397 : vector<8x16xf32>
    %400 = arith.divf %398, %399 : vector<8x16xf32>
    %c0_189 = arith.constant 0 : index
    %c16_190 = arith.constant 16 : index
    %401 = vector.load %arg11[%c0_189, %c16_190] : memref<8x32xf32, #tpu.memory_space<vmem>>, vector<8x16xf32>
    %402 = arith.mulf %400, %401 : vector<8x16xf32>
    %403 = vector.extract_strided_slice %5 {offsets = [16, 0], sizes = [16, 64], strides = [1, 1]} : vector<32x64xf32> to vector<16x64xf32>
    %cst_191 = arith.constant dense<0.000000e+00> : vector<8x64xf32>
    %404 = tpu.matmul %402, %403, %cst_191 {dimension_numbers = #tpu.dot_dimension_numbers<[1], [0], [0], [1], [0, 0, 1, 1], [], []>} : vector<8x16xf32>, vector<16x64xf32>, vector<8x64xf32> -> vector<8x64xf32>
    %405 = math.tanh %404 : vector<8x64xf32>
    %c0_192 = arith.constant 0 : index
    %c64_193 = arith.constant 64 : index
    %406 = vector.load %arg10[%c0_192, %c64_193] : memref<8x128xf32, #tpu.memory_space<vmem>>, vector<8x64xf32>
    %407 = arith.mulf %388, %406 : vector<8x64xf32>
    %408 = arith.mulf %387, %394 : vector<8x64xf32>
    %409 = arith.addf %407, %408 : vector<8x64xf32>
    %410 = arith.addf %409, %405 : vector<8x64xf32>
    %411 = math.tanh %410 : vector<8x64xf32>
    %412 = arith.mulf %389, %411 : vector<8x64xf32>
    %c0_194 = arith.constant 0 : index
    %c64_195 = arith.constant 64 : index
    %413 = vector.load %arg9[%c0_194, %c64_195] : memref<8x128xf32, #tpu.memory_space<vmem>>, vector<8x64xf32>
    tpu.vector_store %arg9[%c0_194, %c64_195], %412 {strides = array<i32>} : memref<8x128xf32, #tpu.memory_space<vmem>>, vector<8x64xf32>,
    %c0_196 = arith.constant 0 : index
    %c64_197 = arith.constant 64 : index
    %414 = vector.load %arg10[%c0_196, %c64_197] : memref<8x128xf32, #tpu.memory_space<vmem>>, vector<8x64xf32>
    tpu.vector_store %arg10[%c0_196, %c64_197], %410 {strides = array<i32>} : memref<8x128xf32, #tpu.memory_space<vmem>>, vector<8x64xf32>,
    %c0_198 = arith.constant 0 : index
    %c16_199 = arith.constant 16 : index
    %415 = vector.load %arg11[%c0_198, %c16_199] : memref<8x32xf32, #tpu.memory_space<vmem>>, vector<8x16xf32>
    tpu.vector_store %arg11[%c0_198, %c16_199], %402 {strides = array<i32>} : memref<8x32xf32, #tpu.memory_space<vmem>>, vector<8x16xf32>,
    %c0_200 = arith.constant 0 : index
    %c0_201 = arith.constant 0 : index
    %416 = vector.load %arg9[%c0_200, %c0_201] : memref<8x128xf32, #tpu.memory_space<vmem>>, vector<8x128xf32>
    %417 = arith.index_cast %c4_i32 : i32 to index
    %c0_202 = arith.constant 0 : index
    %c0_203 = arith.constant 0 : index
    %418 = vector.load %arg8[%417, %c0_202, %c0_203] : memref<8x8x128xf32, #tpu.memory_space<vmem>>, vector<1x8x128xf32>
    %419 = vector.shape_cast %418 : vector<1x8x128xf32> to vector<8x128xf32>
    %420 = vector.shape_cast %416 : vector<8x128xf32> to vector<1x8x128xf32>
    tpu.vector_store %arg8[%417, %c0_202, %c0_203], %420 {strides = array<i32>} : memref<8x8x128xf32, #tpu.memory_space<vmem>>, vector<1x8x128xf32>,
    %c5_i32 = arith.constant 5 : i32
    %c0_204 = arith.constant 0 : index
    %c0_205 = arith.constant 0 : index
    %421 = vector.load %arg9[%c0_204, %c0_205] : memref<8x128xf32, #tpu.memory_space<vmem>>, vector<8x128xf32>
    %422 = arith.index_cast %c5_i32 : i32 to index
    %c0_206 = arith.constant 0 : index
    %c0_207 = arith.constant 0 : index
    %423 = vector.load %arg1[%422, %c0_206, %c0_207] : memref<8x8x544xf32, #tpu.memory_space<vmem>>, vector<1x8x544xf32>
    %424 = vector.shape_cast %423 : vector<1x8x544xf32> to vector<8x544xf32>
    %cst_208 = arith.constant dense<0.000000e+00> : vector<8x544xf32>
    %425 = tpu.matmul %421, %3, %cst_208 {dimension_numbers = #tpu.dot_dimension_numbers<[1], [0], [0], [1], [0, 0, 1, 1], [], []>} : vector<8x128xf32>, vector<128x544xf32>, vector<8x544xf32> -> vector<8x544xf32>
    %426 = arith.addf %424, %425 : vector<8x544xf32>
    %427 = vector.extract_strided_slice %426 {offsets = [0, 0], sizes = [8, 256], strides = [1, 1]} : vector<8x544xf32> to vector<8x256xf32>
    %428 = arith.negf %427 : vector<8x256xf32>
    %429 = math.exp %428 : vector<8x256xf32>
    %cst_209 = arith.constant 1.000000e+00 : f32
    %430 = vector.broadcast %cst_209 : f32 to vector<8x256xf32>
    %431 = arith.addf %430, %429 : vector<8x256xf32>
    %432 = arith.divf %430, %431 : vector<8x256xf32>
    %433 = vector.extract_strided_slice %432 {offsets = [0, 0], sizes = [8, 64], strides = [1, 1]} : vector<8x256xf32> to vector<8x64xf32>
    %434 = vector.extract_strided_slice %432 {offsets = [0, 64], sizes = [8, 64], strides = [1, 1]} : vector<8x256xf32> to vector<8x64xf32>
    %435 = vector.extract_strided_slice %432 {offsets = [0, 128], sizes = [8, 64], strides = [1, 1]} : vector<8x256xf32> to vector<8x64xf32>
    %436 = vector.extract_strided_slice %432 {offsets = [0, 192], sizes = [8, 64], strides = [1, 1]} : vector<8x256xf32> to vector<8x64xf32>
    %cst_210 = arith.constant 2.000000e+00 : f32
    %437 = vector.broadcast %cst_210 : f32 to vector<8x64xf32>
    %438 = arith.mulf %437, %436 : vector<8x64xf32>
    %cst_211 = arith.constant 1.000000e+00 : f32
    %439 = vector.broadcast %cst_211 : f32 to vector<8x64xf32>
    %440 = arith.subf %438, %439 : vector<8x64xf32>
    %441 = vector.extract_strided_slice %426 {offsets = [0, 512], sizes = [8, 16], strides = [1, 1]} : vector<8x544xf32> to vector<8x16xf32>
    %442 = arith.negf %441 : vector<8x16xf32>
    %443 = math.exp %442 : vector<8x16xf32>
    %cst_212 = arith.constant 1.000000e+00 : f32
    %444 = vector.broadcast %cst_212 : f32 to vector<8x16xf32>
    %445 = arith.addf %444, %443 : vector<8x16xf32>
    %446 = arith.divf %444, %445 : vector<8x16xf32>
    %c0_213 = arith.constant 0 : index
    %c0_214 = arith.constant 0 : index
    %447 = vector.load %arg11[%c0_213, %c0_214] : memref<8x32xf32, #tpu.memory_space<vmem>>, vector<8x16xf32>
    %448 = arith.mulf %446, %447 : vector<8x16xf32>
    %449 = vector.extract_strided_slice %5 {offsets = [0, 0], sizes = [16, 64], strides = [1, 1]} : vector<32x64xf32> to vector<16x64xf32>
    %cst_215 = arith.constant dense<0.000000e+00> : vector<8x64xf32>
    %450 = tpu.matmul %448, %449, %cst_215 {dimension_numbers = #tpu.dot_dimension_numbers<[1], [0], [0], [1], [0, 0, 1, 1], [], []>} : vector<8x16xf32>, vector<16x64xf32>, vector<8x64xf32> -> vector<8x64xf32>
    %451 = math.tanh %450 : vector<8x64xf32>
    %c0_216 = arith.constant 0 : index
    %c0_217 = arith.constant 0 : index
    %452 = vector.load %arg10[%c0_216, %c0_217] : memref<8x128xf32, #tpu.memory_space<vmem>>, vector<8x64xf32>
    %453 = arith.mulf %434, %452 : vector<8x64xf32>
    %454 = arith.mulf %433, %440 : vector<8x64xf32>
    %455 = arith.addf %453, %454 : vector<8x64xf32>
    %456 = arith.addf %455, %451 : vector<8x64xf32>
    %457 = math.tanh %456 : vector<8x64xf32>
    %458 = arith.mulf %435, %457 : vector<8x64xf32>
    %c0_218 = arith.constant 0 : index
    %c0_219 = arith.constant 0 : index
    %459 = vector.load %arg9[%c0_218, %c0_219] : memref<8x128xf32, #tpu.memory_space<vmem>>, vector<8x64xf32>
    tpu.vector_store %arg9[%c0_218, %c0_219], %458 {strides = array<i32>} : memref<8x128xf32, #tpu.memory_space<vmem>>, vector<8x64xf32>,
    %c0_220 = arith.constant 0 : index
    %c0_221 = arith.constant 0 : index
    %460 = vector.load %arg10[%c0_220, %c0_221] : memref<8x128xf32, #tpu.memory_space<vmem>>, vector<8x64xf32>
    tpu.vector_store %arg10[%c0_220, %c0_221], %456 {strides = array<i32>} : memref<8x128xf32, #tpu.memory_space<vmem>>, vector<8x64xf32>,
    %c0_222 = arith.constant 0 : index
    %c0_223 = arith.constant 0 : index
    %461 = vector.load %arg11[%c0_222, %c0_223] : memref<8x32xf32, #tpu.memory_space<vmem>>, vector<8x16xf32>
    tpu.vector_store %arg11[%c0_222, %c0_223], %448 {strides = array<i32>} : memref<8x32xf32, #tpu.memory_space<vmem>>, vector<8x16xf32>,
    %cst_224 = arith.constant dense<0.000000e+00> : vector<8x544xf32>
    %462 = tpu.matmul %458, %4, %cst_224 {dimension_numbers = #tpu.dot_dimension_numbers<[1], [0], [0], [1], [0, 0, 1, 1], [], []>} : vector<8x64xf32>, vector<64x544xf32>, vector<8x544xf32> -> vector<8x544xf32>
    %463 = arith.addf %426, %462 : vector<8x544xf32>
    %464 = vector.extract_strided_slice %463 {offsets = [0, 256], sizes = [8, 256], strides = [1, 1]} : vector<8x544xf32> to vector<8x256xf32>
    %465 = arith.negf %464 : vector<8x256xf32>
    %466 = math.exp %465 : vector<8x256xf32>
    %cst_225 = arith.constant 1.000000e+00 : f32
    %467 = vector.broadcast %cst_225 : f32 to vector<8x256xf32>
    %468 = arith.addf %467, %466 : vector<8x256xf32>
    %469 = arith.divf %467, %468 : vector<8x256xf32>
    %470 = vector.extract_strided_slice %469 {offsets = [0, 0], sizes = [8, 64], strides = [1, 1]} : vector<8x256xf32> to vector<8x64xf32>
    %471 = vector.extract_strided_slice %469 {offsets = [0, 64], sizes = [8, 64], strides = [1, 1]} : vector<8x256xf32> to vector<8x64xf32>
    %472 = vector.extract_strided_slice %469 {offsets = [0, 128], sizes = [8, 64], strides = [1, 1]} : vector<8x256xf32> to vector<8x64xf32>
    %473 = vector.extract_strided_slice %469 {offsets = [0, 192], sizes = [8, 64], strides = [1, 1]} : vector<8x256xf32> to vector<8x64xf32>
    %cst_226 = arith.constant 2.000000e+00 : f32
    %474 = vector.broadcast %cst_226 : f32 to vector<8x64xf32>
    %475 = arith.mulf %474, %473 : vector<8x64xf32>
    %cst_227 = arith.constant 1.000000e+00 : f32
    %476 = vector.broadcast %cst_227 : f32 to vector<8x64xf32>
    %477 = arith.subf %475, %476 : vector<8x64xf32>
    %478 = vector.extract_strided_slice %463 {offsets = [0, 528], sizes = [8, 16], strides = [1, 1]} : vector<8x544xf32> to vector<8x16xf32>
    %479 = arith.negf %478 : vector<8x16xf32>
    %480 = math.exp %479 : vector<8x16xf32>
    %cst_228 = arith.constant 1.000000e+00 : f32
    %481 = vector.broadcast %cst_228 : f32 to vector<8x16xf32>
    %482 = arith.addf %481, %480 : vector<8x16xf32>
    %483 = arith.divf %481, %482 : vector<8x16xf32>
    %c0_229 = arith.constant 0 : index
    %c16_230 = arith.constant 16 : index
    %484 = vector.load %arg11[%c0_229, %c16_230] : memref<8x32xf32, #tpu.memory_space<vmem>>, vector<8x16xf32>
    %485 = arith.mulf %483, %484 : vector<8x16xf32>
    %486 = vector.extract_strided_slice %5 {offsets = [16, 0], sizes = [16, 64], strides = [1, 1]} : vector<32x64xf32> to vector<16x64xf32>
    %cst_231 = arith.constant dense<0.000000e+00> : vector<8x64xf32>
    %487 = tpu.matmul %485, %486, %cst_231 {dimension_numbers = #tpu.dot_dimension_numbers<[1], [0], [0], [1], [0, 0, 1, 1], [], []>} : vector<8x16xf32>, vector<16x64xf32>, vector<8x64xf32> -> vector<8x64xf32>
    %488 = math.tanh %487 : vector<8x64xf32>
    %c0_232 = arith.constant 0 : index
    %c64_233 = arith.constant 64 : index
    %489 = vector.load %arg10[%c0_232, %c64_233] : memref<8x128xf32, #tpu.memory_space<vmem>>, vector<8x64xf32>
    %490 = arith.mulf %471, %489 : vector<8x64xf32>
    %491 = arith.mulf %470, %477 : vector<8x64xf32>
    %492 = arith.addf %490, %491 : vector<8x64xf32>
    %493 = arith.addf %492, %488 : vector<8x64xf32>
    %494 = math.tanh %493 : vector<8x64xf32>
    %495 = arith.mulf %472, %494 : vector<8x64xf32>
    %c0_234 = arith.constant 0 : index
    %c64_235 = arith.constant 64 : index
    %496 = vector.load %arg9[%c0_234, %c64_235] : memref<8x128xf32, #tpu.memory_space<vmem>>, vector<8x64xf32>
    tpu.vector_store %arg9[%c0_234, %c64_235], %495 {strides = array<i32>} : memref<8x128xf32, #tpu.memory_space<vmem>>, vector<8x64xf32>,
    %c0_236 = arith.constant 0 : index
    %c64_237 = arith.constant 64 : index
    %497 = vector.load %arg10[%c0_236, %c64_237] : memref<8x128xf32, #tpu.memory_space<vmem>>, vector<8x64xf32>
    tpu.vector_store %arg10[%c0_236, %c64_237], %493 {strides = array<i32>} : memref<8x128xf32, #tpu.memory_space<vmem>>, vector<8x64xf32>,
    %c0_238 = arith.constant 0 : index
    %c16_239 = arith.constant 16 : index
    %498 = vector.load %arg11[%c0_238, %c16_239] : memref<8x32xf32, #tpu.memory_space<vmem>>, vector<8x16xf32>
    tpu.vector_store %arg11[%c0_238, %c16_239], %485 {strides = array<i32>} : memref<8x32xf32, #tpu.memory_space<vmem>>, vector<8x16xf32>,
    %c0_240 = arith.constant 0 : index
    %c0_241 = arith.constant 0 : index
    %499 = vector.load %arg9[%c0_240, %c0_241] : memref<8x128xf32, #tpu.memory_space<vmem>>, vector<8x128xf32>
    %500 = arith.index_cast %c5_i32 : i32 to index
    %c0_242 = arith.constant 0 : index
    %c0_243 = arith.constant 0 : index
    %501 = vector.load %arg8[%500, %c0_242, %c0_243] : memref<8x8x128xf32, #tpu.memory_space<vmem>>, vector<1x8x128xf32>
    %502 = vector.shape_cast %501 : vector<1x8x128xf32> to vector<8x128xf32>
    %503 = vector.shape_cast %499 : vector<8x128xf32> to vector<1x8x128xf32>
    tpu.vector_store %arg8[%500, %c0_242, %c0_243], %503 {strides = array<i32>} : memref<8x8x128xf32, #tpu.memory_space<vmem>>, vector<1x8x128xf32>,
    %c6_i32 = arith.constant 6 : i32
    %c0_244 = arith.constant 0 : index
    %c0_245 = arith.constant 0 : index
    %504 = vector.load %arg9[%c0_244, %c0_245] : memref<8x128xf32, #tpu.memory_space<vmem>>, vector<8x128xf32>
    %505 = arith.index_cast %c6_i32 : i32 to index
    %c0_246 = arith.constant 0 : index
    %c0_247 = arith.constant 0 : index
    %506 = vector.load %arg1[%505, %c0_246, %c0_247] : memref<8x8x544xf32, #tpu.memory_space<vmem>>, vector<1x8x544xf32>
    %507 = vector.shape_cast %506 : vector<1x8x544xf32> to vector<8x544xf32>
    %cst_248 = arith.constant dense<0.000000e+00> : vector<8x544xf32>
    %508 = tpu.matmul %504, %3, %cst_248 {dimension_numbers = #tpu.dot_dimension_numbers<[1], [0], [0], [1], [0, 0, 1, 1], [], []>} : vector<8x128xf32>, vector<128x544xf32>, vector<8x544xf32> -> vector<8x544xf32>
    %509 = arith.addf %507, %508 : vector<8x544xf32>
    %510 = vector.extract_strided_slice %509 {offsets = [0, 0], sizes = [8, 256], strides = [1, 1]} : vector<8x544xf32> to vector<8x256xf32>
    %511 = arith.negf %510 : vector<8x256xf32>
    %512 = math.exp %511 : vector<8x256xf32>
    %cst_249 = arith.constant 1.000000e+00 : f32
    %513 = vector.broadcast %cst_249 : f32 to vector<8x256xf32>
    %514 = arith.addf %513, %512 : vector<8x256xf32>
    %515 = arith.divf %513, %514 : vector<8x256xf32>
    %516 = vector.extract_strided_slice %515 {offsets = [0, 0], sizes = [8, 64], strides = [1, 1]} : vector<8x256xf32> to vector<8x64xf32>
    %517 = vector.extract_strided_slice %515 {offsets = [0, 64], sizes = [8, 64], strides = [1, 1]} : vector<8x256xf32> to vector<8x64xf32>
    %518 = vector.extract_strided_slice %515 {offsets = [0, 128], sizes = [8, 64], strides = [1, 1]} : vector<8x256xf32> to vector<8x64xf32>
    %519 = vector.extract_strided_slice %515 {offsets = [0, 192], sizes = [8, 64], strides = [1, 1]} : vector<8x256xf32> to vector<8x64xf32>
    %cst_250 = arith.constant 2.000000e+00 : f32
    %520 = vector.broadcast %cst_250 : f32 to vector<8x64xf32>
    %521 = arith.mulf %520, %519 : vector<8x64xf32>
    %cst_251 = arith.constant 1.000000e+00 : f32
    %522 = vector.broadcast %cst_251 : f32 to vector<8x64xf32>
    %523 = arith.subf %521, %522 : vector<8x64xf32>
    %524 = vector.extract_strided_slice %509 {offsets = [0, 512], sizes = [8, 16], strides = [1, 1]} : vector<8x544xf32> to vector<8x16xf32>
    %525 = arith.negf %524 : vector<8x16xf32>
    %526 = math.exp %525 : vector<8x16xf32>
    %cst_252 = arith.constant 1.000000e+00 : f32
    %527 = vector.broadcast %cst_252 : f32 to vector<8x16xf32>
    %528 = arith.addf %527, %526 : vector<8x16xf32>
    %529 = arith.divf %527, %528 : vector<8x16xf32>
    %c0_253 = arith.constant 0 : index
    %c0_254 = arith.constant 0 : index
    %530 = vector.load %arg11[%c0_253, %c0_254] : memref<8x32xf32, #tpu.memory_space<vmem>>, vector<8x16xf32>
    %531 = arith.mulf %529, %530 : vector<8x16xf32>
    %532 = vector.extract_strided_slice %5 {offsets = [0, 0], sizes = [16, 64], strides = [1, 1]} : vector<32x64xf32> to vector<16x64xf32>
    %cst_255 = arith.constant dense<0.000000e+00> : vector<8x64xf32>
    %533 = tpu.matmul %531, %532, %cst_255 {dimension_numbers = #tpu.dot_dimension_numbers<[1], [0], [0], [1], [0, 0, 1, 1], [], []>} : vector<8x16xf32>, vector<16x64xf32>, vector<8x64xf32> -> vector<8x64xf32>
    %534 = math.tanh %533 : vector<8x64xf32>
    %c0_256 = arith.constant 0 : index
    %c0_257 = arith.constant 0 : index
    %535 = vector.load %arg10[%c0_256, %c0_257] : memref<8x128xf32, #tpu.memory_space<vmem>>, vector<8x64xf32>
    %536 = arith.mulf %517, %535 : vector<8x64xf32>
    %537 = arith.mulf %516, %523 : vector<8x64xf32>
    %538 = arith.addf %536, %537 : vector<8x64xf32>
    %539 = arith.addf %538, %534 : vector<8x64xf32>
    %540 = math.tanh %539 : vector<8x64xf32>
    %541 = arith.mulf %518, %540 : vector<8x64xf32>
    %c0_258 = arith.constant 0 : index
    %c0_259 = arith.constant 0 : index
    %542 = vector.load %arg9[%c0_258, %c0_259] : memref<8x128xf32, #tpu.memory_space<vmem>>, vector<8x64xf32>
    tpu.vector_store %arg9[%c0_258, %c0_259], %541 {strides = array<i32>} : memref<8x128xf32, #tpu.memory_space<vmem>>, vector<8x64xf32>,
    %c0_260 = arith.constant 0 : index
    %c0_261 = arith.constant 0 : index
    %543 = vector.load %arg10[%c0_260, %c0_261] : memref<8x128xf32, #tpu.memory_space<vmem>>, vector<8x64xf32>
    tpu.vector_store %arg10[%c0_260, %c0_261], %539 {strides = array<i32>} : memref<8x128xf32, #tpu.memory_space<vmem>>, vector<8x64xf32>,
    %c0_262 = arith.constant 0 : index
    %c0_263 = arith.constant 0 : index
    %544 = vector.load %arg11[%c0_262, %c0_263] : memref<8x32xf32, #tpu.memory_space<vmem>>, vector<8x16xf32>
    tpu.vector_store %arg11[%c0_262, %c0_263], %531 {strides = array<i32>} : memref<8x32xf32, #tpu.memory_space<vmem>>, vector<8x16xf32>,
    %cst_264 = arith.constant dense<0.000000e+00> : vector<8x544xf32>
    %545 = tpu.matmul %541, %4, %cst_264 {dimension_numbers = #tpu.dot_dimension_numbers<[1], [0], [0], [1], [0, 0, 1, 1], [], []>} : vector<8x64xf32>, vector<64x544xf32>, vector<8x544xf32> -> vector<8x544xf32>
    %546 = arith.addf %509, %545 : vector<8x544xf32>
    %547 = vector.extract_strided_slice %546 {offsets = [0, 256], sizes = [8, 256], strides = [1, 1]} : vector<8x544xf32> to vector<8x256xf32>
    %548 = arith.negf %547 : vector<8x256xf32>
    %549 = math.exp %548 : vector<8x256xf32>
    %cst_265 = arith.constant 1.000000e+00 : f32
    %550 = vector.broadcast %cst_265 : f32 to vector<8x256xf32>
    %551 = arith.addf %550, %549 : vector<8x256xf32>
    %552 = arith.divf %550, %551 : vector<8x256xf32>
    %553 = vector.extract_strided_slice %552 {offsets = [0, 0], sizes = [8, 64], strides = [1, 1]} : vector<8x256xf32> to vector<8x64xf32>
    %554 = vector.extract_strided_slice %552 {offsets = [0, 64], sizes = [8, 64], strides = [1, 1]} : vector<8x256xf32> to vector<8x64xf32>
    %555 = vector.extract_strided_slice %552 {offsets = [0, 128], sizes = [8, 64], strides = [1, 1]} : vector<8x256xf32> to vector<8x64xf32>
    %556 = vector.extract_strided_slice %552 {offsets = [0, 192], sizes = [8, 64], strides = [1, 1]} : vector<8x256xf32> to vector<8x64xf32>
    %cst_266 = arith.constant 2.000000e+00 : f32
    %557 = vector.broadcast %cst_266 : f32 to vector<8x64xf32>
    %558 = arith.mulf %557, %556 : vector<8x64xf32>
    %cst_267 = arith.constant 1.000000e+00 : f32
    %559 = vector.broadcast %cst_267 : f32 to vector<8x64xf32>
    %560 = arith.subf %558, %559 : vector<8x64xf32>
    %561 = vector.extract_strided_slice %546 {offsets = [0, 528], sizes = [8, 16], strides = [1, 1]} : vector<8x544xf32> to vector<8x16xf32>
    %562 = arith.negf %561 : vector<8x16xf32>
    %563 = math.exp %562 : vector<8x16xf32>
    %cst_268 = arith.constant 1.000000e+00 : f32
    %564 = vector.broadcast %cst_268 : f32 to vector<8x16xf32>
    %565 = arith.addf %564, %563 : vector<8x16xf32>
    %566 = arith.divf %564, %565 : vector<8x16xf32>
    %c0_269 = arith.constant 0 : index
    %c16_270 = arith.constant 16 : index
    %567 = vector.load %arg11[%c0_269, %c16_270] : memref<8x32xf32, #tpu.memory_space<vmem>>, vector<8x16xf32>
    %568 = arith.mulf %566, %567 : vector<8x16xf32>
    %569 = vector.extract_strided_slice %5 {offsets = [16, 0], sizes = [16, 64], strides = [1, 1]} : vector<32x64xf32> to vector<16x64xf32>
    %cst_271 = arith.constant dense<0.000000e+00> : vector<8x64xf32>
    %570 = tpu.matmul %568, %569, %cst_271 {dimension_numbers = #tpu.dot_dimension_numbers<[1], [0], [0], [1], [0, 0, 1, 1], [], []>} : vector<8x16xf32>, vector<16x64xf32>, vector<8x64xf32> -> vector<8x64xf32>
    %571 = math.tanh %570 : vector<8x64xf32>
    %c0_272 = arith.constant 0 : index
    %c64_273 = arith.constant 64 : index
    %572 = vector.load %arg10[%c0_272, %c64_273] : memref<8x128xf32, #tpu.memory_space<vmem>>, vector<8x64xf32>
    %573 = arith.mulf %554, %572 : vector<8x64xf32>
    %574 = arith.mulf %553, %560 : vector<8x64xf32>
    %575 = arith.addf %573, %574 : vector<8x64xf32>
    %576 = arith.addf %575, %571 : vector<8x64xf32>
    %577 = math.tanh %576 : vector<8x64xf32>
    %578 = arith.mulf %555, %577 : vector<8x64xf32>
    %c0_274 = arith.constant 0 : index
    %c64_275 = arith.constant 64 : index
    %579 = vector.load %arg9[%c0_274, %c64_275] : memref<8x128xf32, #tpu.memory_space<vmem>>, vector<8x64xf32>
    tpu.vector_store %arg9[%c0_274, %c64_275], %578 {strides = array<i32>} : memref<8x128xf32, #tpu.memory_space<vmem>>, vector<8x64xf32>,
    %c0_276 = arith.constant 0 : index
    %c64_277 = arith.constant 64 : index
    %580 = vector.load %arg10[%c0_276, %c64_277] : memref<8x128xf32, #tpu.memory_space<vmem>>, vector<8x64xf32>
    tpu.vector_store %arg10[%c0_276, %c64_277], %576 {strides = array<i32>} : memref<8x128xf32, #tpu.memory_space<vmem>>, vector<8x64xf32>,
    %c0_278 = arith.constant 0 : index
    %c16_279 = arith.constant 16 : index
    %581 = vector.load %arg11[%c0_278, %c16_279] : memref<8x32xf32, #tpu.memory_space<vmem>>, vector<8x16xf32>
    tpu.vector_store %arg11[%c0_278, %c16_279], %568 {strides = array<i32>} : memref<8x32xf32, #tpu.memory_space<vmem>>, vector<8x16xf32>,
    %c0_280 = arith.constant 0 : index
    %c0_281 = arith.constant 0 : index
    %582 = vector.load %arg9[%c0_280, %c0_281] : memref<8x128xf32, #tpu.memory_space<vmem>>, vector<8x128xf32>
    %583 = arith.index_cast %c6_i32 : i32 to index
    %c0_282 = arith.constant 0 : index
    %c0_283 = arith.constant 0 : index
    %584 = vector.load %arg8[%583, %c0_282, %c0_283] : memref<8x8x128xf32, #tpu.memory_space<vmem>>, vector<1x8x128xf32>
    %585 = vector.shape_cast %584 : vector<1x8x128xf32> to vector<8x128xf32>
    %586 = vector.shape_cast %582 : vector<8x128xf32> to vector<1x8x128xf32>
    tpu.vector_store %arg8[%583, %c0_282, %c0_283], %586 {strides = array<i32>} : memref<8x8x128xf32, #tpu.memory_space<vmem>>, vector<1x8x128xf32>,
    %c7_i32 = arith.constant 7 : i32
    %c0_284 = arith.constant 0 : index
    %c0_285 = arith.constant 0 : index
    %587 = vector.load %arg9[%c0_284, %c0_285] : memref<8x128xf32, #tpu.memory_space<vmem>>, vector<8x128xf32>
    %588 = arith.index_cast %c7_i32 : i32 to index
    %c0_286 = arith.constant 0 : index
    %c0_287 = arith.constant 0 : index
    %589 = vector.load %arg1[%588, %c0_286, %c0_287] : memref<8x8x544xf32, #tpu.memory_space<vmem>>, vector<1x8x544xf32>
    %590 = vector.shape_cast %589 : vector<1x8x544xf32> to vector<8x544xf32>
    %cst_288 = arith.constant dense<0.000000e+00> : vector<8x544xf32>
    %591 = tpu.matmul %587, %3, %cst_288 {dimension_numbers = #tpu.dot_dimension_numbers<[1], [0], [0], [1], [0, 0, 1, 1], [], []>} : vector<8x128xf32>, vector<128x544xf32>, vector<8x544xf32> -> vector<8x544xf32>
    %592 = arith.addf %590, %591 : vector<8x544xf32>
    %593 = vector.extract_strided_slice %592 {offsets = [0, 0], sizes = [8, 256], strides = [1, 1]} : vector<8x544xf32> to vector<8x256xf32>
    %594 = arith.negf %593 : vector<8x256xf32>
    %595 = math.exp %594 : vector<8x256xf32>
    %cst_289 = arith.constant 1.000000e+00 : f32
    %596 = vector.broadcast %cst_289 : f32 to vector<8x256xf32>
    %597 = arith.addf %596, %595 : vector<8x256xf32>
    %598 = arith.divf %596, %597 : vector<8x256xf32>
    %599 = vector.extract_strided_slice %598 {offsets = [0, 0], sizes = [8, 64], strides = [1, 1]} : vector<8x256xf32> to vector<8x64xf32>
    %600 = vector.extract_strided_slice %598 {offsets = [0, 64], sizes = [8, 64], strides = [1, 1]} : vector<8x256xf32> to vector<8x64xf32>
    %601 = vector.extract_strided_slice %598 {offsets = [0, 128], sizes = [8, 64], strides = [1, 1]} : vector<8x256xf32> to vector<8x64xf32>
    %602 = vector.extract_strided_slice %598 {offsets = [0, 192], sizes = [8, 64], strides = [1, 1]} : vector<8x256xf32> to vector<8x64xf32>
    %cst_290 = arith.constant 2.000000e+00 : f32
    %603 = vector.broadcast %cst_290 : f32 to vector<8x64xf32>
    %604 = arith.mulf %603, %602 : vector<8x64xf32>
    %cst_291 = arith.constant 1.000000e+00 : f32
    %605 = vector.broadcast %cst_291 : f32 to vector<8x64xf32>
    %606 = arith.subf %604, %605 : vector<8x64xf32>
    %607 = vector.extract_strided_slice %592 {offsets = [0, 512], sizes = [8, 16], strides = [1, 1]} : vector<8x544xf32> to vector<8x16xf32>
    %608 = arith.negf %607 : vector<8x16xf32>
    %609 = math.exp %608 : vector<8x16xf32>
    %cst_292 = arith.constant 1.000000e+00 : f32
    %610 = vector.broadcast %cst_292 : f32 to vector<8x16xf32>
    %611 = arith.addf %610, %609 : vector<8x16xf32>
    %612 = arith.divf %610, %611 : vector<8x16xf32>
    %c0_293 = arith.constant 0 : index
    %c0_294 = arith.constant 0 : index
    %613 = vector.load %arg11[%c0_293, %c0_294] : memref<8x32xf32, #tpu.memory_space<vmem>>, vector<8x16xf32>
    %614 = arith.mulf %612, %613 : vector<8x16xf32>
    %615 = vector.extract_strided_slice %5 {offsets = [0, 0], sizes = [16, 64], strides = [1, 1]} : vector<32x64xf32> to vector<16x64xf32>
    %cst_295 = arith.constant dense<0.000000e+00> : vector<8x64xf32>
    %616 = tpu.matmul %614, %615, %cst_295 {dimension_numbers = #tpu.dot_dimension_numbers<[1], [0], [0], [1], [0, 0, 1, 1], [], []>} : vector<8x16xf32>, vector<16x64xf32>, vector<8x64xf32> -> vector<8x64xf32>
    %617 = math.tanh %616 : vector<8x64xf32>
    %c0_296 = arith.constant 0 : index
    %c0_297 = arith.constant 0 : index
    %618 = vector.load %arg10[%c0_296, %c0_297] : memref<8x128xf32, #tpu.memory_space<vmem>>, vector<8x64xf32>
    %619 = arith.mulf %600, %618 : vector<8x64xf32>
    %620 = arith.mulf %599, %606 : vector<8x64xf32>
    %621 = arith.addf %619, %620 : vector<8x64xf32>
    %622 = arith.addf %621, %617 : vector<8x64xf32>
    %623 = math.tanh %622 : vector<8x64xf32>
    %624 = arith.mulf %601, %623 : vector<8x64xf32>
    %c0_298 = arith.constant 0 : index
    %c0_299 = arith.constant 0 : index
    %625 = vector.load %arg9[%c0_298, %c0_299] : memref<8x128xf32, #tpu.memory_space<vmem>>, vector<8x64xf32>
    tpu.vector_store %arg9[%c0_298, %c0_299], %624 {strides = array<i32>} : memref<8x128xf32, #tpu.memory_space<vmem>>, vector<8x64xf32>,
    %c0_300 = arith.constant 0 : index
    %c0_301 = arith.constant 0 : index
    %626 = vector.load %arg10[%c0_300, %c0_301] : memref<8x128xf32, #tpu.memory_space<vmem>>, vector<8x64xf32>
    tpu.vector_store %arg10[%c0_300, %c0_301], %622 {strides = array<i32>} : memref<8x128xf32, #tpu.memory_space<vmem>>, vector<8x64xf32>,
    %c0_302 = arith.constant 0 : index
    %c0_303 = arith.constant 0 : index
    %627 = vector.load %arg11[%c0_302, %c0_303] : memref<8x32xf32, #tpu.memory_space<vmem>>, vector<8x16xf32>
    tpu.vector_store %arg11[%c0_302, %c0_303], %614 {strides = array<i32>} : memref<8x32xf32, #tpu.memory_space<vmem>>, vector<8x16xf32>,
    %cst_304 = arith.constant dense<0.000000e+00> : vector<8x544xf32>
    %628 = tpu.matmul %624, %4, %cst_304 {dimension_numbers = #tpu.dot_dimension_numbers<[1], [0], [0], [1], [0, 0, 1, 1], [], []>} : vector<8x64xf32>, vector<64x544xf32>, vector<8x544xf32> -> vector<8x544xf32>
    %629 = arith.addf %592, %628 : vector<8x544xf32>
    %630 = vector.extract_strided_slice %629 {offsets = [0, 256], sizes = [8, 256], strides = [1, 1]} : vector<8x544xf32> to vector<8x256xf32>
    %631 = arith.negf %630 : vector<8x256xf32>
    %632 = math.exp %631 : vector<8x256xf32>
    %cst_305 = arith.constant 1.000000e+00 : f32
    %633 = vector.broadcast %cst_305 : f32 to vector<8x256xf32>
    %634 = arith.addf %633, %632 : vector<8x256xf32>
    %635 = arith.divf %633, %634 : vector<8x256xf32>
    %636 = vector.extract_strided_slice %635 {offsets = [0, 0], sizes = [8, 64], strides = [1, 1]} : vector<8x256xf32> to vector<8x64xf32>
    %637 = vector.extract_strided_slice %635 {offsets = [0, 64], sizes = [8, 64], strides = [1, 1]} : vector<8x256xf32> to vector<8x64xf32>
    %638 = vector.extract_strided_slice %635 {offsets = [0, 128], sizes = [8, 64], strides = [1, 1]} : vector<8x256xf32> to vector<8x64xf32>
    %639 = vector.extract_strided_slice %635 {offsets = [0, 192], sizes = [8, 64], strides = [1, 1]} : vector<8x256xf32> to vector<8x64xf32>
    %cst_306 = arith.constant 2.000000e+00 : f32
    %640 = vector.broadcast %cst_306 : f32 to vector<8x64xf32>
    %641 = arith.mulf %640, %639 : vector<8x64xf32>
    %cst_307 = arith.constant 1.000000e+00 : f32
    %642 = vector.broadcast %cst_307 : f32 to vector<8x64xf32>
    %643 = arith.subf %641, %642 : vector<8x64xf32>
    %644 = vector.extract_strided_slice %629 {offsets = [0, 528], sizes = [8, 16], strides = [1, 1]} : vector<8x544xf32> to vector<8x16xf32>
    %645 = arith.negf %644 : vector<8x16xf32>
    %646 = math.exp %645 : vector<8x16xf32>
    %cst_308 = arith.constant 1.000000e+00 : f32
    %647 = vector.broadcast %cst_308 : f32 to vector<8x16xf32>
    %648 = arith.addf %647, %646 : vector<8x16xf32>
    %649 = arith.divf %647, %648 : vector<8x16xf32>
    %c0_309 = arith.constant 0 : index
    %c16_310 = arith.constant 16 : index
    %650 = vector.load %arg11[%c0_309, %c16_310] : memref<8x32xf32, #tpu.memory_space<vmem>>, vector<8x16xf32>
    %651 = arith.mulf %649, %650 : vector<8x16xf32>
    %652 = vector.extract_strided_slice %5 {offsets = [16, 0], sizes = [16, 64], strides = [1, 1]} : vector<32x64xf32> to vector<16x64xf32>
    %cst_311 = arith.constant dense<0.000000e+00> : vector<8x64xf32>
    %653 = tpu.matmul %651, %652, %cst_311 {dimension_numbers = #tpu.dot_dimension_numbers<[1], [0], [0], [1], [0, 0, 1, 1], [], []>} : vector<8x16xf32>, vector<16x64xf32>, vector<8x64xf32> -> vector<8x64xf32>
    %654 = math.tanh %653 : vector<8x64xf32>
    %c0_312 = arith.constant 0 : index
    %c64_313 = arith.constant 64 : index
    %655 = vector.load %arg10[%c0_312, %c64_313] : memref<8x128xf32, #tpu.memory_space<vmem>>, vector<8x64xf32>
    %656 = arith.mulf %637, %655 : vector<8x64xf32>
    %657 = arith.mulf %636, %643 : vector<8x64xf32>
    %658 = arith.addf %656, %657 : vector<8x64xf32>
    %659 = arith.addf %658, %654 : vector<8x64xf32>
    %660 = math.tanh %659 : vector<8x64xf32>
    %661 = arith.mulf %638, %660 : vector<8x64xf32>
    %c0_314 = arith.constant 0 : index
    %c64_315 = arith.constant 64 : index
    %662 = vector.load %arg9[%c0_314, %c64_315] : memref<8x128xf32, #tpu.memory_space<vmem>>, vector<8x64xf32>
    tpu.vector_store %arg9[%c0_314, %c64_315], %661 {strides = array<i32>} : memref<8x128xf32, #tpu.memory_space<vmem>>, vector<8x64xf32>,
    %c0_316 = arith.constant 0 : index
    %c64_317 = arith.constant 64 : index
    %663 = vector.load %arg10[%c0_316, %c64_317] : memref<8x128xf32, #tpu.memory_space<vmem>>, vector<8x64xf32>
    tpu.vector_store %arg10[%c0_316, %c64_317], %659 {strides = array<i32>} : memref<8x128xf32, #tpu.memory_space<vmem>>, vector<8x64xf32>,
    %c0_318 = arith.constant 0 : index
    %c16_319 = arith.constant 16 : index
    %664 = vector.load %arg11[%c0_318, %c16_319] : memref<8x32xf32, #tpu.memory_space<vmem>>, vector<8x16xf32>
    tpu.vector_store %arg11[%c0_318, %c16_319], %651 {strides = array<i32>} : memref<8x32xf32, #tpu.memory_space<vmem>>, vector<8x16xf32>,
    %c0_320 = arith.constant 0 : index
    %c0_321 = arith.constant 0 : index
    %665 = vector.load %arg9[%c0_320, %c0_321] : memref<8x128xf32, #tpu.memory_space<vmem>>, vector<8x128xf32>
    %666 = arith.index_cast %c7_i32 : i32 to index
    %c0_322 = arith.constant 0 : index
    %c0_323 = arith.constant 0 : index
    %667 = vector.load %arg8[%666, %c0_322, %c0_323] : memref<8x8x128xf32, #tpu.memory_space<vmem>>, vector<1x8x128xf32>
    %668 = vector.shape_cast %667 : vector<1x8x128xf32> to vector<8x128xf32>
    %669 = vector.shape_cast %665 : vector<8x128xf32> to vector<1x8x128xf32>
    tpu.vector_store %arg8[%666, %c0_322, %c0_323], %669 {strides = array<i32>} : memref<8x8x128xf32, #tpu.memory_space<vmem>>, vector<1x8x128xf32>,
    %c8_i32 = arith.constant 8 : i32
    return
  }
  func.func @transform_0(%arg0: i32) -> (i32, i32, i32) {
    %c0_i32 = arith.constant 0 : i32
    %c0_i32_0 = arith.constant 0 : i32
    %c0_i32_1 = arith.constant 0 : i32
    return %arg0, %c0_i32, %c0_i32_0 : i32, i32, i32
  }
  func.func @transform_1(%arg0: i32) -> (i32, i32) {
    %c0_i32 = arith.constant 0 : i32
    %c0_i32_0 = arith.constant 0 : i32
    %c0_i32_1 = arith.constant 0 : i32
    return %c0_i32, %c0_i32_0 : i32, i32
  }
  func.func @transform_2(%arg0: i32) -> (i32, i32) {
    %c0_i32 = arith.constant 0 : i32
    %c0_i32_0 = arith.constant 0 : i32
    %c0_i32_1 = arith.constant 0 : i32
    return %c0_i32, %c0_i32_0 : i32, i32
  }
  func.func @transform_3(%arg0: i32) -> (i32, i32) {
    %c0_i32 = arith.constant 0 : i32
    %c0_i32_0 = arith.constant 0 : i32
    %c0_i32_1 = arith.constant 0 : i32
    return %c0_i32, %c0_i32_0 : i32, i32
  }
  func.func @transform_4(%arg0: i32) -> (i32, i32) {
    %c0_i32 = arith.constant 0 : i32
    %c0_i32_0 = arith.constant 0 : i32
    %c0_i32_1 = arith.constant 0 : i32
    return %c0_i32, %c0_i32_0 : i32, i32
  }
  func.func @transform_5(%arg0: i32) -> (i32, i32) {
    %c0_i32 = arith.constant 0 : i32
    %c0_i32_0 = arith.constant 0 : i32
    %c0_i32_1 = arith.constant 0 : i32
    return %c0_i32, %c0_i32_0 : i32, i32
  }
  func.func @transform_6(%arg0: i32) -> (i32, i32) {
    %c0_i32 = arith.constant 0 : i32
    %c0_i32_0 = arith.constant 0 : i32
    %c0_i32_1 = arith.constant 0 : i32
    return %c0_i32, %c0_i32_0 : i32, i32
  }
  func.func @transform_7(%arg0: i32) -> (i32, i32, i32) {
    %c0_i32 = arith.constant 0 : i32
    %c0_i32_0 = arith.constant 0 : i32
    %c0_i32_1 = arith.constant 0 : i32
    return %arg0, %c0_i32, %c0_i32_0 : i32, i32, i32
  }
}

</mosaic_0001>

<bundles_post_ra>
// kernel: tpu_custom_call.1
= control target key start
LH: loop header
LB: loop body
LE: loop exit
PB: predicated region body
PF: predicated region fallthrough
CT: control target
= control target key end

     0   :  { %s7605_s0 = inlined_call_operand.vmem [shape: f32[8,8,544], index: 0, kind: input, shape index: {}]   ;;  %s7606_s1 = inlined_call_operand.vmem [shape: f32[8,128], index: 1, kind: input, shape index: {}]   ;;  %s7607_s2 = inlined_call_operand.vmem [shape: f32[8,128], index: 2, kind: input, shape index: {}]   ;;  %s7608_s3 = inlined_call_operand.vmem [shape: f32[8,32], index: 3, kind: input, shape index: {}]   ;;  %s7609_s4 = inlined_call_operand.vmem [shape: f32[128,544], index: 4, kind: input, shape index: {}]   ;;  %s7610_s5 = inlined_call_operand.vmem [shape: f32[64,544], index: 5, kind: input, shape index: {}]   ;;  %s7611_s6 = inlined_call_operand.vmem [shape: f32[32,64], index: 6, kind: input, shape index: {}]   ;;  %s7612_s7 = inlined_call_operand.hbm [shape: f32[8,8,128], index: 7, kind: output, shape index: {}]  }
   0x1   :  { %v4300_v0 = vld [vmem:[%s7609_s4 + $0x258] sm:$0xff]  ;;  %v4305_v1 = vld [vmem:[%s7609_s4 + $0x260] sm:$0xff]  ;;  %v4310_v2 = vld [vmem:[%s7609_s4 + $0x230] sm:$0xff] }
   0x2   :  { %152 = vmatpush.msra.mxu0 %v4300_v0  ;;  %172 = vmatpush.msra.mxu1 %v4305_v1  ;;  %v4317_v3 = vld [vmem:[%s7609_s4 + $0x238] sm:$0xff]  ;;  %v4322_v4 = vld [vmem:[%s7609_s4 + $0x208] sm:$0xff]  ;;  %v4327_v5 = vld [vmem:[%s7609_s4 + $0x210] sm:$0xff] }
   0x3   :  { %v4334_v6 = vld [vmem:[%s7609_s4 + $0x1e0] sm:$0xff]  ;;  %v4339_v7 = vld [vmem:[%s7609_s4 + $0x1e8] sm:$0xff]  ;;  %v4346_v8 = vld [vmem:[%s7609_s4 + $0x1b8] sm:$0xff] }
   0x4   :  { %153 = vmatpush.msra.mxu0 %v4310_v2  ;;  %173 = vmatpush.msra.mxu1 %v4317_v3  ;;  %v4351_v9 = vld [vmem:[%s7609_s4 + $0x1c0] sm:$0xff]  ;;  %v4358_v10 = vld [vmem:[%s7609_s4 + $0x190] sm:$0xff]  ;;  %v4363_v11 = vld [vmem:[%s7609_s4 + $0x198] sm:$0xff] }
   0x5   :  { %v4370_v12 = vld [vmem:[%s7609_s4 + $0x168] sm:$0xff]  ;;  %v4375_v13 = vld [vmem:[%s7609_s4 + $0x170] sm:$0xff]  ;;  %v4380_v14 = vld [vmem:[%s7606_s1] sm:$0xff] }
   0x6   :  { %154 = vmatpush.msra.mxu0 %v4322_v4  ;;  %174 = vmatpush.msra.mxu1 %v4327_v5  ;;  %32 = vst [vmem:[#allocation2] sm:$0xff] %v4380_v14  ;;  %v4388_v15 = vld [vmem:[%s7609_s4 + $0x140] sm:$0xff]  ;;  %v4393_v16 = vld [vmem:[%s7609_s4 + $0x148] sm:$0xff] }
   0x8   :  { %155 = vmatpush.msra.mxu0 %v4334_v6  ;;  %175 = vmatpush.msra.mxu1 %v4339_v7 }
   0xa   :  { %156 = vmatpush.msra.mxu0 %v4346_v8  ;;  %176 = vmatpush.msra.mxu1 %v4351_v9 }
   0xc   :  { %157 = vmatpush.msra.mxu0 %v4358_v10  ;;  %177 = vmatpush.msra.mxu1 %v4363_v11 }
   0xe   :  { %158 = vmatpush.msra.mxu0 %v4370_v12  ;;  %178 = vmatpush.msra.mxu1 %v4375_v13 }
   0xf   :  { %12 = vsyncpa [#allocation6], 0  ;;  %v4400_v17 = vld [vmem:[%s7609_s4 + $0x118] sm:$0xff]  ;;  %v4405_v18 = vld [vmem:[%s7609_s4 + $0x120] sm:$0xff]  ;;  %vm36_vm0 = vcmask 261120   ;;  %s4252_s13 = smov 64  }
  0x10   :  { %159 = vmatpush.msra.mxu0 %v4388_v15  ;;  %179 = vmatpush.msra.mxu1 %v4393_v16  ;;  %v4412_v19 = vld [vmem:[%s7609_s4 + $0xf0] sm:$0xff]  ;;  %v4417_v20 = vld [vmem:[%s7609_s4 + $0xf8] sm:$0xff]  ;;  %v4424_v21 = vld [vmem:[%s7609_s4 + $0xc8] sm:$0xff]  ;;  %vm318_vm9 = vcmask 130048   ;;  %vm370_vm14 = vcmask 523264   ;;  %s4253_s11 = smov 112  }
  0x11   :  { %v4429_v22 = vld [vmem:[%s7609_s4 + $0xd0] sm:$0xff]  ;;  %v4436_v23 = vld [vmem:[%s7609_s4 + $0xa0] sm:$0xff]  ;;  %v4441_v24 = vld [vmem:[%s7609_s4 + $0xa8] sm:$0xff]  ;;  %s3490_s9 = sshll.u32 %s7612_s7, 4  ;;  %s4255_s10 = smov 128   ;;  %s3491_s9 = int_to_ptr.hbm [resolvable:$true] %s3490_s9 }
  0x12   :  { %160 = vmatpush.msra.mxu0 %v4400_v17  ;;  %180 = vmatpush.msra.mxu1 %v4405_v18  ;;  %v4448_v25 = vld [vmem:[%s7609_s4 + $0x78] sm:$0xff]  ;;  %v4453_v26 = vld [vmem:[%s7609_s4 + $0x80] sm:$0xff]  ;;  %v4460_v27 = vld [vmem:[%s7609_s4 + $0x50] sm:$0xff]  ;;  %s4256_s1 = smov 8  }
  0x13   :  { %v4465_v28 = vld [vmem:[%s7609_s4 + $0x58] sm:$0xff]  ;;  %v4472_v29 = vld [vmem:[%s7609_s4 + $0x28] sm:$0xff]  ;;  %v4477_v30 = vld [vmem:[%s7609_s4 + $0x30] sm:$0xff] }
  0x14   :  { %161 = vmatpush.msra.mxu0 %v4412_v19  ;;  %181 = vmatpush.msra.mxu1 %v4417_v20  ;;  %v4484_v31 = vld [vmem:[%s7609_s4] sm:$0xff]  ;;  %v4489_v32 = vld [vmem:[%s7609_s4 + $0x8] sm:$0xff]  ;;  %v4496_v33 = vld [vmem:[%s7609_s4 + $0x278] sm:$0xff] }
  0x15   :  { %v4503_v34 = vld [vmem:[%s7609_s4 + $0x250] sm:$0xff]  ;;  %v4510_v35 = vld [vmem:[%s7609_s4 + $0x228] sm:$0xff]  ;;  %v4517_v36 = vld [vmem:[%s7609_s4 + $0x200] sm:$0xff] }
  0x16   :  { %162 = vmatpush.msra.mxu0 %v4424_v21  ;;  %182 = vmatpush.msra.mxu1 %v4429_v22  ;;  %v4523_v37 = vld [vmem:[%s7609_s4 + $0x1d8] sm:$0xff]  ;;  %v4529_v38 = vld [vmem:[%s7609_s4 + $0x1b0] sm:$0xff]  ;;  %v4535_v39 = vld [vmem:[%s7609_s4 + $0x188] sm:$0xff] }
  0x17   :  { %v4541_v40 = vld [vmem:[%s7609_s4 + $0x160] sm:$0xff]  ;;  %v4547_v41 = vld [vmem:[%s7609_s4 + $0x138] sm:$0xff]  ;;  %v4553_v42 = vld [vmem:[%s7609_s4 + $0x110] sm:$0xff] }
  0x18   :  { %163 = vmatpush.msra.mxu0 %v4436_v23  ;;  %183 = vmatpush.msra.mxu1 %v4441_v24  ;;  %v4559_v43 = vld [vmem:[%s7609_s4 + $0xe8] sm:$0xff]  ;;  %v4565_v44 = vld [vmem:[%s7609_s4 + $0xc0] sm:$0xff]  ;;  %v4571_v45 = vld [vmem:[%s7609_s4 + $0x98] sm:$0xff] }
  0x19   :  { %7738 = vst [vmem:[#allocation8_spill] sm:$0xff] %v4571_v45  ;;  %v4577_v46 = vld [vmem:[%s7609_s4 + $0x70] sm:$0xff]  ;;  %v4583_v47 = vld [vmem:[%s7609_s4 + $0x48] sm:$0xff]  ;;  %v4589_v48 = vld [vmem:[%s7609_s4 + $0x20] sm:$0xff] }
  0x1a   :  { %164 = vmatpush.msra.mxu0 %v4448_v25  ;;  %184 = vmatpush.msra.mxu1 %v4453_v26  ;;  %7739 = vst [vmem:[#allocation9_spill] sm:$0xff] %v4577_v46  ;;  %v148_v49 = vld [vmem:[%s7605_s0 + $0x8] sm:$0xff]  ;;  %v33_v53 = vld [vmem:[%s7607_s2] sm:$0xff] }
  0x1b   :  { %7740 = vst [vmem:[#allocation10_spill] sm:$0xff] %v4583_v47  ;;  %v35_v58 = vld [vmem:[%s7608_s3] sm:$0xff]  ;;  %v4606_v60 = vld [vmem:[%s7611_s6 + $0x8] sm:$0xff] }
  0x1c   :  { %165 = vmatpush.msra.mxu0 %v4460_v27  ;;  %185 = vmatpush.msra.mxu1 %v4465_v28  ;;  %7741 = vst [vmem:[#allocation11_spill] sm:$0xff] %v4589_v48  ;;  %v4611_v61 = vld [vmem:[%s7611_s6] sm:$0xff] }
  0x1d   :  { %34 = vst [vmem:[#allocation3] sm:$0xff] %v33_v53 }
  0x1e   :  { %166 = vmatpush.msra.mxu0 %v4472_v29  ;;  %186 = vmatpush.msra.mxu1 %v4477_v30  ;;  %37 = vst.msk [vmem:[#allocation4] sm:$0xff] %vm36_vm0, %v35_v58 }
  0x20   :  { %167 = vmatpush.msra.mxu0 %v4484_v31  ;;  %187 = vmatpush.msra.mxu1 %v4489_v32 }
  0x21   :  { %188 = vmatmul.f32.vlgmr.msra.gmra.mxu1 %v4380_v14  ;;  %168 = vmatmul.f32.vlgmr.msra.gmra.mxu0 %v4380_v14 }
  0x22   :  { %232 = vmatpush.msrb.mxu0 %v4496_v33  ;;  %336 = vmatpush.msrb.mxu1 %v4606_v60 }
  0x24   :  { %233 = vmatpush.msrb.mxu0 %v4503_v34  ;;  %337 = vmatpush.msrb.mxu1 %v4611_v61 }
  0x26   :  { %234 = vmatpush.msrb.mxu0 %v4510_v35 }
  0x28   :  { %235 = vmatpush.msrb.mxu0 %v4517_v36 }
  0x2a   :  { %236 = vmatpush.msrb.mxu0 %v4523_v37 }
  0x2c   :  { %237 = vmatpush.msrb.mxu0 %v4529_v38 }
  0x2e   :  { %238 = vmatpush.msrb.mxu0 %v4535_v39 }
  0x30   :  { %239 = vmatpush.msrb.mxu0 %v4541_v40 }
  0x32   :  { %240 = vmatpush.msrb.mxu0 %v4547_v41 }
  0x34   :  { %241 = vmatpush.msrb.mxu0 %v4553_v42 }
  0x36   :  { %242 = vmatpush.msrb.mxu0 %v4559_v43 }
  0x38   :  { %243 = vmatpush.msrb.mxu0 %v4565_v44 }
  0x3a   :  { %244 = vmatpush.msrb.mxu0 %v4571_v45 }
  0x3c   :  { %245 = vmatpush.msrb.mxu0 %v4577_v46 }
  0x3e   :  { %246 = vmatpush.msrb.mxu0 %v4583_v47 }
  0x40   :  { %247 = vmatpush.msrb.mxu0 %v4589_v48 }
  0x41   :  { %248 = vmatmul.f32.vlgmr.msrb.gmra.mxu0 %v4380_v14 }
  0x9e   :  { %v189_v50 = vpop.f32.mrf.mxu1  ;;  %v169_v62 = vpop.f32.mrf.mxu0 }
  0x9f   :  { %v253_v51 = vadd.f32 %v189_v50, %v148_v49 }
  0xa1   :  { %v3503_v52 = vmul.f32 -1.442695, %v253_v51 }
  0xa3   :  { %3646 = vpow2.f32 %v3503_v52 }
  0xa9   :  { %v3647_v54 = vpop.eup %3646 }
  0xaa   :  { %v264_v55 = vadd.f32 1.0, %v3647_v54  ;;  %v151_v54 = vld [vmem:[%s7605_s0 + $0x20] sm:$0xff] }
  0xac   :  { %3648 = vrcp.f32 %v264_v55  ;;  %v291_v59 = vand.u32 2147483648, %v264_v55  ;;  %vm285_vm1 = vweird.f32 %v264_v55  ;;  %v289_v49 = vand.u32 2147483647, %v264_v55 }
  0xae   :  { %v292_v51 = vor.u32 1.1754944e-38, %v291_v59  ;;  %vm290_vm4 = vcmp.eq.f32.partialorder %v289_v49, 8.507059e+37 }
  0xb2   :  { %v3649_v56 = vpop.eup %3648 }
  0xb3   :  { %v281_v57 = vmul.f32 %v3649_v56, %v264_v55  ;;  %vm286_vm2 = vweird.f32 %v3649_v56 }
  0xb4   :  { %vm287_vm3 = vmor %vm285_vm1, %vm286_vm2 }
  0xb5   :  { %v282_v63 = vsub.f32 1.0, %v281_v57 }
  0xb7   :  { %v283_v50 = vmul.f32 %v3649_v56, %v282_v63 }
  0xb9   :  { %v284_v52 = vadd.f32 %v3649_v56, %v283_v50 }
  0xbb   :  { %v288_v48 = vsel %vm287_vm3, %v3649_v56, %v284_v52  ;;  %vm561_vm3 = vcmask 261248  }
  0xbc   :  { %v4618_v58 = vsel %vm290_vm4, %v292_v51, %v288_v48 }
  0xbd   :  { %v295_v47 = vmul.f32 2.0, %v4618_v58 }
  0xbe   :  { %v249_v57 = vpop.f32.mrf.mxu0 }
  0xbf   :  { %v4621_v55 = vadd.f32 %v249_v57, %v151_v54  ;;  %v3504_v46 = vadd.f32 -1.0, %v295_v47 }
  0xc1   :  { %7742 = vst [vmem:[#allocation12_spill] sm:$0xff] %v4621_v55  ;;  %v3505_v63 = vmul.f32 -1.442695, %v4621_v55  ;;  %350 = vrot.lane.b32.xlu0 %v3504_v46, %s4252_s13  ;;  %v316_v55 = vld [vmem:[#allocation4] sm:$0xff] }
  0xc3   :  { %3650 = vpow2.f32 %v3505_v63 }
  0xc9   :  { %v3651_v59 = vpop.eup %3650  ;;  %345 = vrot.lane.b32.xlu0 %v33_v53, %s4252_s13  ;;  %v147_v53 = vld [vmem:[%s7605_s0] sm:$0xff] }
  0xca   :  { %v300_v49 = vadd.f32 1.0, %v3651_v59  ;;  %v252_v59 = vadd.f32 %v169_v62, %v147_v53 }
  0xcc   :  { %3652 = vrcp.f32 %v300_v49  ;;  %v312_v51 = vand.u32 2147483648, %v300_v49  ;;  %v310_v54 = vand.u32 2147483647, %v300_v49  ;;  %vm306_vm6 = vweird.f32 %v300_v49 }
  0xce   :  { %v313_v47 = vor.u32 1.1754944e-38, %v312_v51  ;;  %vm311_vm8 = vcmp.eq.f32.partialorder %v310_v54, 8.507059e+37 }
  0xd2   :  { %v3653_v56 = vpop.eup %3652 }
  0xd3   :  { %v302_v48 = vmul.f32 %v3653_v56, %v300_v49  ;;  %vm307_vm5 = vweird.f32 %v3653_v56 }
  0xd4   :  { %vm308_vm7 = vmor %vm306_vm6, %vm307_vm5 }
  0xd5   :  { %v303_v50 = vsub.f32 1.0, %v302_v48  ;;  %v3502_v48 = vmul.f32 -1.442695, %v252_v59 }
  0xd7   :  { %v304_v52 = vmul.f32 %v3653_v56, %v303_v50  ;;  %3654 = vpow2.f32 %v3502_v48 }
  0xd9   :  { %v305_v57 = vadd.f32 %v3653_v56, %v304_v52 }
  0xdb   :  { %v309_v45 = vsel %vm308_vm7, %v3653_v56, %v305_v57 }
  0xdc   :  { %v314_v46 = vsel %vm311_vm8, %v313_v47, %v309_v45 }
  0xdd   :  { %v317_v63 = vmul.f32 %v316_v55, %v314_v46  ;;  %v3655_v49 = vpop.eup %3654 }
  0xde   :  { %v263_v50 = vadd.f32 1.0, %v3655_v49  ;;  %v4639_v49 = vld [vmem:[%s7609_s4 + $0x268] sm:$0xff] }
  0xdf   :  { %3506 = vmatmul.msk.f32.vlgmr.msrb.gmra.mxu1 %vm318_vm9, %v317_v63  ;;  %377 = vst.msk [vmem:[#allocation4] sm:$0xff] %vm318_vm9, %v317_v63  ;;  %192 = vmatpush.msra.mxu2 %v4639_v49 }
  0xe0   :  { %3656 = vrcp.f32 %v263_v50  ;;  %vm270_vm10 = vweird.f32 %v263_v50  ;;  %v276_v55 = vand.u32 2147483648, %v263_v50  ;;  %v274_v57 = vand.u32 2147483647, %v263_v50 }
  0xe2   :  { %v277_v47 = vor.u32 1.1754944e-38, %v276_v55  ;;  %vm275_vm13 = vcmp.eq.f32.partialorder %v274_v57, 8.507059e+37  ;;  %v4674_v55 = vld [vmem:[%s7609_s4 + $0x1f0] sm:$0xff]  ;;  %v4687_v57 = vld [vmem:[%s7609_s4 + $0x1c8] sm:$0xff] }
  0xe3   :  { %7746 = vst [vmem:[#allocation16_spill] sm:$0xff] %v4674_v55 }
  0xe4   :  { %7748 = vst [vmem:[#allocation18_spill] sm:$0xff] %v4687_v57 }
  0xe6   :  { %v3657_v51 = vpop.eup %3656 }
  0xe7   :  { %v266_v56 = vmul.f32 %v3657_v51, %v263_v50  ;;  %vm271_vm11 = vweird.f32 %v3657_v51  ;;  %v4644_v50 = vld [vmem:[%s7609_s4 + $0x270] sm:$0xff] }
  0xe8   :  { %vm272_vm12 = vmor %vm270_vm10, %vm271_vm11  ;;  %7743 = vst [vmem:[#allocation13_spill] sm:$0xff] %v4644_v50  ;;  %212 = vmatpush.msra.mxu3 %v4644_v50  ;;  %632 = vmatpush.msra.mxu0 %v4644_v50 }
  0xe9   :  { %v267_v52 = vsub.f32 1.0, %v266_v56  ;;  %v4656_v56 = vld [vmem:[%s7609_s4 + $0x248] sm:$0xff] }
  0xea   :  { %7744 = vst [vmem:[#allocation14_spill] sm:$0xff] %v4656_v56  ;;  %213 = vmatpush.msra.mxu3 %v4656_v56  ;;  %633 = vmatpush.msra.mxu0 %v4656_v56  ;;  %v4750_v56 = vld [vmem:[%s7610_s5 + $0xe8] sm:$0xff] }
  0xeb   :  { %v268_v45 = vmul.f32 %v3657_v51, %v267_v52  ;;  %v4661_v52 = vld [vmem:[%s7609_s4 + $0x218] sm:$0xff]  ;;  %7758 = vst [vmem:[#allocation28_spill] sm:$0xff] %v4750_v56 }
  0xed   :  { %v269_v54 = vadd.f32 %v3657_v51, %v268_v45  ;;  %v4666_v45 = vld [vmem:[%s7609_s4 + $0x220] sm:$0xff] }
  0xee   :  { %7745 = vst [vmem:[#allocation15_spill] sm:$0xff] %v4666_v45  ;;  %214 = vmatpush.msra.mxu3 %v4666_v45  ;;  %634 = vmatpush.msra.mxu0 %v4666_v45  ;;  %v4736_v45 = vld [vmem:[%s7609_s4 + $0x158] sm:$0xff] }
  0xef   :  { %v273_v46 = vsel %vm272_vm12, %v3657_v51, %v269_v54  ;;  %v4649_v51 = vld [vmem:[%s7609_s4 + $0x240] sm:$0xff]  ;;  %v4679_v54 = vld [vmem:[%s7609_s4 + $0x1f8] sm:$0xff]  ;;  %7756 = vst [vmem:[#allocation26_spill] sm:$0xff] %v4736_v45 }
  0xf0   :  { %v4631_v62 = vsel %vm275_vm13, %v277_v47, %v273_v46  ;;  %193 = vmatpush.msra.mxu2 %v4649_v51  ;;  %7747 = vst [vmem:[#allocation17_spill] sm:$0xff] %v4679_v54  ;;  %v4692_v47 = vld [vmem:[%s7609_s4 + $0x1d0] sm:$0xff]  ;;  %215 = vmatpush.msra.mxu3 %v4679_v54  ;;  %v4700_v46 = vld [vmem:[%s7609_s4 + $0x1a0] sm:$0xff]  ;;  %vm558_vm13 = vcmask 1048064  }
  0xf1   :  { %7749 = vst [vmem:[#allocation19_spill] sm:$0xff] %v4692_v47  ;;  %635 = vmatpush.msra.mxu0 %v4679_v54  ;;  %v4731_v54 = vld [vmem:[%s7609_s4 + $0x150] sm:$0xff] }
  0xf2   :  { %194 = vmatpush.msra.mxu2 %v4661_v52  ;;  %7750 = vst [vmem:[#allocation20_spill] sm:$0xff] %v4700_v46  ;;  %216 = vmatpush.msra.mxu3 %v4692_v47 }
  0xf3   :  { %636 = vmatpush.msra.mxu0 %v4692_v47  ;;  %7755 = vst [vmem:[#allocation25_spill] sm:$0xff] %v4731_v54  ;;  %v4742_v47 = vld [vmem:[%s7610_s5 + $0x110] sm:$0xff] }
  0xf4   :  { %195 = vmatpush.msra.mxu2 %v4674_v55  ;;  %7757 = vst [vmem:[#allocation27_spill] sm:$0xff] %v4742_v47  ;;  %v4813_v55 = vld [vmem:[%s7609_s4 + $0xb0] sm:$0xff] }
  0xf6   :  { %196 = vmatpush.msra.mxu2 %v4687_v57  ;;  %v4774_v57 = vld [vmem:[%s7609_s4 + $0x100] sm:$0xff] }
  0xf7   :  { %7762 = vst [vmem:[#allocation32_spill] sm:$0xff] %v4774_v57 }
  0xf8   :  { %197 = vmatpush.msra.mxu2 %v4700_v46  ;;  %v4760_v46 = vld [vmem:[%s7609_s4 + $0x130] sm:$0xff] }
  0xf9   :  { %7760 = vst [vmem:[#allocation30_spill] sm:$0xff] %v4760_v46 }
 0x133   :  { %v351_v63 = vpop.permute.xlu0 %350 }
 0x134   :  { %v353_v53 = vmul.f32 %v351_v63, %v4631_v62  ;;  %v4705_v63 = vld [vmem:[%s7609_s4 + $0x1a8] sm:$0xff] }
 0x135   :  { %7751 = vst [vmem:[#allocation21_spill] sm:$0xff] %v4705_v63  ;;  %217 = vmatpush.msra.mxu3 %v4705_v63  ;;  %637 = vmatpush.msra.mxu0 %v4705_v63  ;;  %v4769_v63 = vld [vmem:[%s7610_s5 + $0xc0] sm:$0xff] }
 0x136   :  { %355 = vrot.lane.b32.xlu1 %v353_v53, %s4252_s13  ;;  %v4713_v53 = vld [vmem:[%s7609_s4 + $0x178] sm:$0xff]  ;;  %7761 = vst [vmem:[#allocation31_spill] sm:$0xff] %v4769_v63 }
 0x137   :  { %7752 = vst [vmem:[#allocation22_spill] sm:$0xff] %v4713_v53  ;;  %198 = vmatpush.msra.mxu2 %v4713_v53 }
 0x139   :  { %199 = vmatpush.msra.mxu2 %v4731_v54  ;;  %v4793_v54 = vld [vmem:[%s7609_s4 + $0xd8] sm:$0xff] }
 0x13b   :  { %v346_v53 = vpop.permute.xlu0 %345 }
 0x15c   :  { %v339_v59 = vpop.f32.mrf.mxu1 }
 0x15d   :  { %3658 = vtanh.f32 %v339_v59  ;;  %v4718_v59 = vld [vmem:[%s7609_s4 + $0x180] sm:$0xff] }
 0x15e   :  { %7753 = vst [vmem:[#allocation23_spill] sm:$0xff] %v4718_v59  ;;  %218 = vmatpush.msra.mxu3 %v4718_v59  ;;  %638 = vmatpush.msra.mxu0 %v4718_v59  ;;  %v4788_v59 = vld [vmem:[%s7610_s5 + $0x98] sm:$0xff] }
 0x15f   :  { %7764 = vst [vmem:[#allocation34_spill] sm:$0xff] %v4788_v59 }
 0x160   :  { %219 = vmatpush.msra.mxu3 %v4736_v45  ;;  %639 = vmatpush.msra.mxu0 %v4736_v45  ;;  %v348_v45 = vmul.f32 %v346_v53, %v4631_v62  ;;  %v4827_v53 = vld [vmem:[%s7610_s5 + $0x48] sm:$0xff] }
 0x161   :  { %7768 = vst [vmem:[#allocation38_spill] sm:$0xff] %v4827_v53 }
 0x162   :  { %220 = vmatpush.msra.mxu3 %v4760_v46  ;;  %640 = vmatpush.msra.mxu0 %v4760_v46  ;;  %v4818_v46 = vld [vmem:[%s7609_s4 + $0xb8] sm:$0xff] }
 0x163   :  { %v3659_v48 = vpop.eup %3658  ;;  %7767 = vst [vmem:[#allocation37_spill] sm:$0xff] %v4818_v46 }
 0x164   :  { %360 = vrot.lane.b32.xlu1 %v3659_v48, %s4252_s13  ;;  %v4726_v48 = vld [vmem:[%s7610_s5 + $0x138] sm:$0xff] }
 0x165   :  { %7754 = vst [vmem:[#allocation24_spill] sm:$0xff] %v4726_v48  ;;  %429 = vmatpush.msra.mxu1 %v4726_v48  ;;  %v4755_v48 = vld [vmem:[%s7609_s4 + $0x128] sm:$0xff] }
 0x166   :  { %7759 = vst [vmem:[#allocation29_spill] sm:$0xff] %v4755_v48  ;;  %200 = vmatpush.msra.mxu2 %v4755_v48  ;;  %v4808_v48 = vld [vmem:[%s7610_s5 + $0x70] sm:$0xff] }
 0x167   :  { %430 = vmatpush.msra.mxu1 %v4742_v47  ;;  %v4779_v47 = vld [vmem:[%s7609_s4 + $0x108] sm:$0xff]  ;;  %7766 = vst [vmem:[#allocation36_spill] sm:$0xff] %v4808_v48 }
 0x168   :  { %7763 = vst [vmem:[#allocation33_spill] sm:$0xff] %v4779_v47  ;;  %201 = vmatpush.msra.mxu2 %v4774_v57  ;;  %221 = vmatpush.msra.mxu3 %v4779_v47  ;;  %v4832_v57 = vld [vmem:[%s7609_s4 + $0x88] sm:$0xff] }
 0x169   :  { %431 = vmatpush.msra.mxu1 %v4750_v56  ;;  %v4798_v56 = vld [vmem:[%s7609_s4 + $0xe0] sm:$0xff]  ;;  %641 = vmatpush.msra.mxu0 %v4779_v47 }
 0x16a   :  { %7765 = vst [vmem:[#allocation35_spill] sm:$0xff] %v4798_v56  ;;  %202 = vmatpush.msra.mxu2 %v4793_v54  ;;  %222 = vmatpush.msra.mxu3 %v4798_v56  ;;  %v4846_v47 = vld [vmem:[%s7609_s4 + $0x60] sm:$0xff] }
 0x16b   :  { %432 = vmatpush.msra.mxu1 %v4769_v63  ;;  %642 = vmatpush.msra.mxu0 %v4798_v56  ;;  %v4887_v56 = vld [vmem:[%s7610_s5 + $0x128] sm:$0xff] }
 0x16c   :  { %203 = vmatpush.msra.mxu2 %v4813_v55  ;;  %223 = vmatpush.msra.mxu3 %v4818_v46  ;;  %7774 = vst [vmem:[#allocation44_spill] sm:$0xff] %v4887_v56 }
 0x16d   :  { %433 = vmatpush.msra.mxu1 %v4788_v59  ;;  %643 = vmatpush.msra.mxu0 %v4818_v46  ;;  %v4874_v46 = vld [vmem:[%s7609_s4 + $0x10] sm:$0xff]  ;;  %v4906_v59 = vld [vmem:[%s7610_s5 + $0x108] sm:$0xff] }
 0x16e   :  { %204 = vmatpush.msra.mxu2 %v4832_v57  ;;  %7772 = vst [vmem:[#allocation42_spill] sm:$0xff] %v4874_v46 }
 0x16f   :  { %434 = vmatpush.msra.mxu1 %v4808_v48  ;;  %v4901_v48 = vld [vmem:[%s7610_s5 + $0x100] sm:$0xff]  ;;  %7777 = vst [vmem:[#allocation47_spill] sm:$0xff] %v4906_v59 }
 0x170   :  { %205 = vmatpush.msra.mxu2 %v4846_v47  ;;  %7776 = vst [vmem:[#allocation46_spill] sm:$0xff] %v4901_v48 }
 0x171   :  { %435 = vmatpush.msra.mxu1 %v4827_v53  ;;  %v4892_v53 = vld [vmem:[%s7610_s5 + $0x130] sm:$0xff] }
 0x172   :  { %7775 = vst [vmem:[#allocation45_spill] sm:$0xff] %v4892_v53 }
 0x1a8   :  { %v356_v50 = vpop.permute.xlu1 %355 }
 0x1a9   :  { %v358_v62 = vadd.f32 %v356_v50, %v348_v45  ;;  %v4841_v45 = vld [vmem:[%s7609_s4 + $0x90] sm:$0xff] }
 0x1aa   :  { %7769 = vst [vmem:[#allocation39_spill] sm:$0xff] %v4841_v45  ;;  %224 = vmatpush.msra.mxu3 %v4841_v45  ;;  %644 = vmatpush.msra.mxu0 %v4841_v45  ;;  %v4881_v45 = vld [vmem:[%s7609_s4 + $0x18] sm:$0xff] }
 0x1ab   :  { %7773 = vst [vmem:[#allocation43_spill] sm:$0xff] %v4881_v45 }
 0x1d6   :  { %v361_v63 = vpop.permute.xlu1 %360 }
 0x1d7   :  { %v363_v50 = vadd.f32 %v361_v63, %v358_v62  ;;  %v4855_v63 = vld [vmem:[%s7609_s4 + $0x68] sm:$0xff]  ;;  %v4861_v62 = vld [vmem:[%s7609_s4 + $0x38] sm:$0xff] }
 0x1d8   :  { %7770 = vst [vmem:[#allocation40_spill] sm:$0xff] %v4855_v63  ;;  %225 = vmatpush.msra.mxu3 %v4855_v63  ;;  %645 = vmatpush.msra.mxu0 %v4855_v63 }
 0x1d9   :  { %3660 = vtanh.f32 %v363_v50  ;;  %373 = vrot.lane.b32.xlu1 %v363_v50, %s4252_s13  ;;  %v4868_v50 = vld [vmem:[%s7609_s4 + $0x40] sm:$0xff]  ;;  %206 = vmatpush.msra.mxu2 %v4861_v62 }
 0x1da   :  { %7771 = vst [vmem:[#allocation41_spill] sm:$0xff] %v4868_v50  ;;  %226 = vmatpush.msra.mxu3 %v4868_v50  ;;  %646 = vmatpush.msra.mxu0 %v4868_v50  ;;  %v4918_v50 = vld [vmem:[%s7610_s5 + $0xe0] sm:$0xff] }
 0x1db   :  { %207 = vmatpush.msra.mxu2 %v4874_v46  ;;  %7779 = vst [vmem:[#allocation49_spill] sm:$0xff] %v4918_v50  ;;  %v4932_v46 = vld [vmem:[%s7610_s5 + $0xb8] sm:$0xff] }
 0x1dc   :  { %227 = vmatpush.msra.mxu3 %v4881_v45  ;;  %208 = vmatmul.f32.vlgmr.msra.gmra.mxu2 %v4380_v14  ;;  %7781 = vst [vmem:[#allocation51_spill] sm:$0xff] %v4932_v46 }
 0x1dd   :  { %389 = vmatpush.msrb.mxu2 %v4887_v56  ;;  %228 = vmatmul.f32.vlgmr.msra.gmra.mxu3 %v4380_v14  ;;  %v4927_v56 = vld [vmem:[%s7610_s5 + $0xb0] sm:$0xff]  ;;  %v4940_v14 = vld [vmem:[%s7610_s5 + $0x88] sm:$0xff] }
 0x1de   :  { %409 = vmatpush.msrb.mxu3 %v4892_v53  ;;  %7780 = vst [vmem:[#allocation50_spill] sm:$0xff] %v4927_v56  ;;  %647 = vmatpush.msra.mxu0 %v4881_v45  ;;  %v4953_v45 = vld [vmem:[%s7610_s5 + $0x60] sm:$0xff] }
 0x1df   :  { %v3661_v63 = vpop.eup %3660  ;;  %390 = vmatpush.msrb.mxu2 %v4901_v48  ;;  %v4945_v48 = vld [vmem:[%s7610_s5 + $0x90] sm:$0xff] }
 0x1e0   :  { %366 = vrot.lane.b32.xlu2 %v3661_v63, %s4252_s13  ;;  %v4913_v63 = vld [vmem:[%s7610_s5 + $0xd8] sm:$0xff]  ;;  %410 = vmatpush.msrb.mxu3 %v4906_v59 }
 0x1e1   :  { %7778 = vst [vmem:[#allocation48_spill] sm:$0xff] %v4913_v63  ;;  %391 = vmatpush.msrb.mxu2 %v4913_v63  ;;  %827 = vmatpush.msrb.mxu0 %v4892_v53  ;;  %v4958_v63 = vld [vmem:[%s7610_s5 + $0x68] sm:$0xff]  ;;  %v4966_v53 = vld [vmem:[%s7610_s5 + $0x38] sm:$0xff] }
 0x1e2   :  { %411 = vmatpush.msrb.mxu3 %v4918_v50 }
 0x1e3   :  { %392 = vmatpush.msrb.mxu2 %v4927_v56  ;;  %828 = vmatpush.msrb.mxu0 %v4906_v59  ;;  %v4971_v56 = vld [vmem:[%s7610_s5 + $0x40] sm:$0xff]  ;;  %v4990_v59 = vld [vmem:[%s7610_s5 + $0x18] sm:$0xff] }
 0x1e4   :  { %412 = vmatpush.msrb.mxu3 %v4932_v46 }
 0x1e5   :  { %393 = vmatpush.msrb.mxu2 %v4940_v14  ;;  %829 = vmatpush.msrb.mxu0 %v4918_v50  ;;  %v4985_v50 = vld [vmem:[%s7610_s5 + $0x10] sm:$0xff] }
 0x1e6   :  { %413 = vmatpush.msrb.mxu3 %v4945_v48 }
 0x1e7   :  { %394 = vmatpush.msrb.mxu2 %v4953_v45  ;;  %830 = vmatpush.msrb.mxu0 %v4932_v46  ;;  %v4995_v46 = vld [vmem:[%s7610_s5 + $0x20] sm:$0xff] }
 0x1e8   :  { %414 = vmatpush.msrb.mxu3 %v4958_v63  ;;  %436 = vmatpush.msra.mxu1 %v4995_v46 }
 0x1e9   :  { %395 = vmatpush.msrb.mxu2 %v4966_v53  ;;  %831 = vmatpush.msrb.mxu0 %v4945_v48 }
 0x1ea   :  { %415 = vmatpush.msrb.mxu3 %v4971_v56  ;;  %592 = vmatpush.msrb.mxu1 %v4305_v1 }
 0x1eb   :  { %832 = vmatpush.msrb.mxu0 %v4958_v63  ;;  %396 = vmatpush.msrb.mxu2 %v4985_v50 }
 0x1ec   :  { %416 = vmatpush.msrb.mxu3 %v4990_v59  ;;  %593 = vmatpush.msrb.mxu1 %v4317_v3  ;;  %v7782_v3 = vld [vmem:[#allocation8_spill] sm:$0xff] }
 0x1ed   :  { %833 = vmatpush.msrb.mxu0 %v4971_v56 }
 0x1ee   :  { %572 = vmatpush.msra.mxu3 %v4300_v0  ;;  %594 = vmatpush.msrb.mxu1 %v4327_v5  ;;  %v7784_v5 = vld [vmem:[#allocation10_spill] sm:$0xff] }
 0x1ef   :  { %834 = vmatpush.msrb.mxu0 %v4990_v59 }
 0x1f0   :  { %573 = vmatpush.msra.mxu3 %v4310_v2  ;;  %595 = vmatpush.msrb.mxu1 %v4339_v7 }
 0x1f2   :  { %574 = vmatpush.msra.mxu3 %v4322_v4  ;;  %596 = vmatpush.msrb.mxu1 %v4351_v9  ;;  %v7783_v4 = vld [vmem:[#allocation9_spill] sm:$0xff] }
 0x1f4   :  { %575 = vmatpush.msra.mxu3 %v4334_v6  ;;  %597 = vmatpush.msrb.mxu1 %v4363_v11  ;;  %v7785_v6 = vld [vmem:[#allocation11_spill] sm:$0xff] }
 0x1f6   :  { %576 = vmatpush.msra.mxu3 %v4346_v8  ;;  %598 = vmatpush.msrb.mxu1 %v4375_v13  ;;  %v150_v8 = vld [vmem:[%s7605_s0 + $0x18] sm:$0xff] }
 0x1f8   :  { %577 = vmatpush.msra.mxu3 %v4358_v10  ;;  %599 = vmatpush.msrb.mxu1 %v4393_v16  ;;  %v7786_v10 = vld [vmem:[#allocation12_spill] sm:$0xff] }
 0x1fa   :  { %578 = vmatpush.msra.mxu3 %v4370_v12  ;;  %600 = vmatpush.msrb.mxu1 %v4405_v18  ;;  %v5064_v18 = vld [vmem:[%s7611_s6 + $0x18] sm:$0xff] }
 0x1fb   :  { %524 = vmatpush.msra.mxu2 %v5064_v18 }
 0x1fc   :  { %579 = vmatpush.msra.mxu3 %v4388_v15  ;;  %601 = vmatpush.msrb.mxu1 %v4417_v20 }
 0x1fe   :  { %580 = vmatpush.msra.mxu3 %v4400_v17  ;;  %602 = vmatpush.msrb.mxu1 %v4429_v22 }
 0x200   :  { %581 = vmatpush.msra.mxu3 %v4412_v19  ;;  %603 = vmatpush.msrb.mxu1 %v4441_v24  ;;  %v5069_v19 = vld [vmem:[%s7611_s6 + $0x10] sm:$0xff]  ;;  %v7787_v24 = vld [vmem:[#allocation16_spill] sm:$0xff] }
 0x201   :  { %525 = vmatpush.msra.mxu2 %v5069_v19 }
 0x202   :  { %582 = vmatpush.msra.mxu3 %v4424_v21  ;;  %604 = vmatpush.msrb.mxu1 %v4453_v26 }
 0x204   :  { %583 = vmatpush.msra.mxu3 %v4436_v23  ;;  %605 = vmatpush.msrb.mxu1 %v4465_v28 }
 0x206   :  { %584 = vmatpush.msra.mxu3 %v4448_v25  ;;  %606 = vmatpush.msrb.mxu1 %v4477_v30 }
 0x208   :  { %585 = vmatpush.msra.mxu3 %v4460_v27  ;;  %607 = vmatpush.msrb.mxu1 %v4489_v32  ;;  %v7788_v27 = vld [vmem:[#allocation18_spill] sm:$0xff] }
 0x20a   :  { %586 = vmatpush.msra.mxu3 %v4472_v29  ;;  %v7789_v29 = vld [vmem:[#allocation20_spill] sm:$0xff] }
 0x20c   :  { %587 = vmatpush.msra.mxu3 %v4484_v31 }
 0x23a   :  { %v367_v0 = vpop.permute.xlu2 %366 }
 0x23b   :  { %v369_v1 = vmul.f32 %v367_v0, %v4618_v58  ;;  %v7793_v0 = vld [vmem:[#allocation32_spill] sm:$0xff] }
 0x23d   :  { %3507 = vmatmul.msk.f32.vlgmr.msrb.gmra.mxu2 %vm370_vm14, %v369_v1  ;;  %371 = vst.msk [vmem:[#allocation2] sm:$0xff] %vm370_vm14, %v369_v1  ;;  %3508 = vmatmul.msk.f32.vlgmr.msrb.gmra.mxu3 %vm370_vm14, %v369_v1 }
 0x23e   :  { %3509 = vmatmul.msk.f32.vlgmr.msra.gmra.mxu1 %vm370_vm14, %v369_v1  ;;  %652 = vmatpush.msrb.mxu3 %v4496_v33  ;;  %v7790_v33 = vld [vmem:[#allocation22_spill] sm:$0xff] }
 0x23f   :  { %755 = vmatpush.msra.mxu1 %v4606_v60  ;;  %612 = vmatpush.msrb.mxu2 %v4639_v49 }
 0x240   :  { %653 = vmatpush.msrb.mxu3 %v4503_v34 }
 0x241   :  { %756 = vmatpush.msra.mxu1 %v4611_v61  ;;  %613 = vmatpush.msrb.mxu2 %v4649_v51 }
 0x242   :  { %654 = vmatpush.msrb.mxu3 %v4510_v35 }
 0x243   :  { %614 = vmatpush.msrb.mxu2 %v4661_v52 }
 0x244   :  { %655 = vmatpush.msrb.mxu3 %v4517_v36 }
 0x245   :  { %615 = vmatpush.msrb.mxu2 %v7787_v24 }
 0x246   :  { %656 = vmatpush.msrb.mxu3 %v4523_v37  ;;  %v7791_v37 = vld [vmem:[#allocation25_spill] sm:$0xff] }
 0x247   :  { %616 = vmatpush.msrb.mxu2 %v7788_v27 }
 0x248   :  { %657 = vmatpush.msrb.mxu3 %v4529_v38 }
 0x249   :  { %617 = vmatpush.msrb.mxu2 %v7789_v29 }
 0x24a   :  { %658 = vmatpush.msrb.mxu3 %v4535_v39 }
 0x24b   :  { %v374_v2 = vpop.permute.xlu1 %373  ;;  %618 = vmatpush.msrb.mxu2 %v7790_v33 }
 0x24c   :  { %376 = vst.msk [vmem:[#allocation3] sm:$0xff] %vm370_vm14, %v374_v2  ;;  %659 = vmatpush.msrb.mxu3 %v4541_v40 }
 0x24d   :  { %619 = vmatpush.msrb.mxu2 %v7791_v37 }
 0x24e   :  { %660 = vmatpush.msrb.mxu3 %v4547_v41  ;;  %v7792_v41 = vld [vmem:[#allocation29_spill] sm:$0xff] }
 0x24f   :  { %620 = vmatpush.msrb.mxu2 %v7792_v41 }
 0x250   :  { %661 = vmatpush.msrb.mxu3 %v4553_v42 }
 0x251   :  { %621 = vmatpush.msrb.mxu2 %v7793_v0 }
 0x252   :  { %662 = vmatpush.msrb.mxu3 %v4559_v43  ;;  %v503_v43 = vld [vmem:[#allocation4] sm:$0xff] }
 0x253   :  { %622 = vmatpush.msrb.mxu2 %v4793_v54 }
 0x254   :  { %663 = vmatpush.msrb.mxu3 %v4565_v44 }
 0x255   :  { %623 = vmatpush.msrb.mxu2 %v4813_v55 }
 0x256   :  { %664 = vmatpush.msrb.mxu3 %v7782_v3 }
 0x257   :  { %624 = vmatpush.msrb.mxu2 %v4832_v57 }
 0x258   :  { %665 = vmatpush.msrb.mxu3 %v7783_v4 }
 0x259   :  { %625 = vmatpush.msrb.mxu2 %v4846_v47 }
 0x25a   :  { %666 = vmatpush.msrb.mxu3 %v7784_v5 }
 0x25b   :  { %626 = vmatpush.msrb.mxu2 %v4861_v62 }
 0x25c   :  { %667 = vmatpush.msrb.mxu3 %v7785_v6 }
 0x260   :  { %v229_v7 = vpop.f32.mrf.mxu3 }
 0x261   :  { %v255_v12 = vadd.f32 %v229_v7, %v150_v8  ;;  %v7794_v7 = vld [vmem:[#allocation42_spill] sm:$0xff]  ;;  %v209_v8 = vpop.f32.mrf.mxu2 }
 0x262   :  { %627 = vmatpush.msrb.mxu2 %v7794_v7 }
 0x2bb   :  { %v438_v9 = vpop.f32.mrf.mxu1 }
 0x2bc   :  { %v443_v11 = vadd.f32 %v438_v9, %v7786_v10  ;;  %v149_v9 = vld [vmem:[%s7605_s0 + $0x10] sm:$0xff] }
 0x2bd   :  { %v254_v10 = vadd.f32 %v209_v8, %v149_v9 }
 0x2be   :  { %v3513_v13 = vmul.f32 -1.442695, %v443_v11 }
 0x2c0   :  { %3662 = vpow2.f32 %v3513_v13  ;;  %v418_v15 = vpop.f32.mrf.mxu3  ;;  %v398_v11 = vpop.f32.mrf.mxu2 }
 0x2c1   :  { %v442_v16 = vadd.f32 %v418_v15, %v255_v12  ;;  %v441_v12 = vadd.f32 %v398_v11, %v254_v10  ;;  %v7799_v11 = vld [vmem:[#allocation24_spill] sm:$0xff] }
 0x2c3   :  { %v3511_v17 = vmul.f32 -1.442695, %v442_v16  ;;  %v3510_v13 = vmul.f32 -1.442695, %v441_v12  ;;  %v5120_v12 = vld [vmem:[%s7609_s4 + $0x258] sm:$0xff] }
 0x2c5   :  { %3664 = vpow2.f32 %v3511_v17 }
 0x2c6   :  { %v3663_v20 = vpop.eup %3662 }
 0x2c7   :  { %v487_v21 = vadd.f32 1.0, %v3663_v20  ;;  %v7795_v20 = vld [vmem:[#allocation44_spill] sm:$0xff] }
 0x2c9   :  { %3666 = vrcp.f32 %v487_v21  ;;  %v499_v30 = vand.u32 2147483648, %v487_v21  ;;  %v497_v32 = vand.u32 2147483647, %v487_v21  ;;  %vm493_vm0 = vweird.f32 %v487_v21 }
 0x2cb   :  { %v3665_v22 = vpop.eup %3664  ;;  %v500_v38 = vor.u32 1.1754944e-38, %v499_v30  ;;  %vm498_vm2 = vcmp.eq.f32.partialorder %v497_v32, 8.507059e+37 }
 0x2cc   :  { %v451_v23 = vadd.f32 1.0, %v3665_v22  ;;  %v7797_v22 = vld [vmem:[#allocation48_spill] sm:$0xff] }
 0x2ce   :  { %3668 = vrcp.f32 %v451_v23  ;;  %v478_v44 = vand.u32 2147483648, %v451_v23  ;;  %v476_v58 = vand.u32 2147483647, %v451_v23  ;;  %vm472_vm5 = vweird.f32 %v451_v23 }
 0x2cf   :  { %v3667_v25 = vpop.eup %3666  ;;  %3670 = vpow2.f32 %v3510_v13  ;;  %v7801_v13 = vld [vmem:[#allocation27_spill] sm:$0xff] }
 0x2d0   :  { %v489_v26 = vmul.f32 %v3667_v25, %v487_v21  ;;  %vm494_vm15 = vweird.f32 %v3667_v25  ;;  %v479_v2 = vor.u32 1.1754944e-38, %v478_v44  ;;  %vm477_vm7 = vcmp.eq.f32.partialorder %v476_v58, 8.507059e+37  ;;  %v7796_v21 = vld [vmem:[#allocation46_spill] sm:$0xff] }
 0x2d1   :  { %vm495_vm1 = vmor %vm493_vm0, %vm494_vm15  ;;  %v531_v44 = vld [vmem:[#allocation3] sm:$0xff] }
 0x2d2   :  { %v490_v28 = vsub.f32 1.0, %v489_v26 }
 0x2d4   :  { %v491_v31 = vmul.f32 %v3667_v25, %v490_v28  ;;  %v3669_v34 = vpop.eup %3668 }
 0x2d5   :  { %v468_v35 = vmul.f32 %v3669_v34, %v451_v23  ;;  %vm473_vm4 = vweird.f32 %v3669_v34  ;;  %v3671_v15 = vpop.eup %3670  ;;  %v7798_v23 = vld [vmem:[#allocation50_spill] sm:$0xff] }
 0x2d6   :  { %v492_v36 = vadd.f32 %v3667_v25, %v491_v31  ;;  %vm474_vm6 = vmor %vm472_vm5, %vm473_vm4  ;;  %v450_v16 = vadd.f32 1.0, %v3671_v15  ;;  %v5129_v15 = vld [vmem:[%s7609_s4 + $0x230] sm:$0xff] }
 0x2d7   :  { %v469_v40 = vsub.f32 1.0, %v468_v35 }
 0x2d8   :  { %v496_v39 = vsel %vm495_vm1, %v3667_v25, %v492_v36  ;;  %3672 = vrcp.f32 %v450_v16  ;;  %v463_v32 = vand.u32 2147483648, %v450_v16  ;;  %vm457_vm10 = vweird.f32 %v450_v16 }
 0x2d9   :  { %v501_v42 = vsel %vm498_vm2, %v500_v38, %v496_v39  ;;  %v470_v61 = vmul.f32 %v3669_v34, %v469_v40 }
 0x2da   :  { %v504_v60 = vmul.f32 %v503_v43, %v501_v42  ;;  %v464_v36 = vor.u32 1.1754944e-38, %v463_v32  ;;  %v7807_v32 = vld [vmem:[#allocation34_spill] sm:$0xff] }
 0x2db   :  { %v471_v1 = vadd.f32 %v3669_v34, %v470_v61 }
 0x2dc   :  { %506 = vrot.lane.b32.xlu2 %v504_v60, %s4253_s11  ;;  %562 = vst.msk [vmem:[#allocation4] sm:$0xff] %vm561_vm3, %v504_v60 }
 0x2dd   :  { %v475_v3 = vsel %vm474_vm6, %v3669_v34, %v471_v1  ;;  %v461_v34 = vand.u32 2147483647, %v450_v16 }
 0x2de   :  { %v5087_v4 = vsel %vm477_vm7, %v479_v2, %v475_v3  ;;  %v3673_v25 = vpop.eup %3672 }
 0x2df   :  { %v482_v5 = vmul.f32 2.0, %v5087_v4  ;;  %v453_v26 = vmul.f32 %v3673_v25, %v450_v16  ;;  %vm458_vm8 = vweird.f32 %v3673_v25  ;;  %vm462_vm12 = vcmp.eq.f32.partialorder %v461_v34, 8.507059e+37  ;;  %v7802_v16 = vld [vmem:[#allocation14_spill] sm:$0xff]  ;;  %v5153_v34 = vld [vmem:[%s7609_s4 + $0x1b8] sm:$0xff] }
 0x2e0   :  { %vm459_vm11 = vmor %vm457_vm10, %vm458_vm8 }
 0x2e1   :  { %v3512_v6 = vadd.f32 -1.0, %v482_v5  ;;  %v454_v28 = vsub.f32 1.0, %v453_v26  ;;  %v7804_v26 = vld [vmem:[#allocation15_spill] sm:$0xff] }
 0x2e3   :  { %534 = vrot.lane.b32.xlu0 %v3512_v6, %s4252_s13  ;;  %v455_v30 = vmul.f32 %v3673_v25, %v454_v28  ;;  %v7805_v28 = vld [vmem:[#allocation31_spill] sm:$0xff] }
 0x2e5   :  { %v456_v31 = vadd.f32 %v3673_v25, %v455_v30  ;;  %v5145_v30 = vld [vmem:[%s7609_s4 + $0x1e0] sm:$0xff] }
 0x2e7   :  { %v460_v35 = vsel %vm459_vm11, %v3673_v25, %v456_v31  ;;  %v5137_v25 = vld [vmem:[%s7609_s4 + $0x208] sm:$0xff]  ;;  %v7806_v31 = vld [vmem:[#allocation17_spill] sm:$0xff] }
 0x2e8   :  { %v465_v39 = vsel %vm462_vm12, %v464_v36, %v460_v35  ;;  %v7808_v35 = vld [vmem:[#allocation19_spill] sm:$0xff]  ;;  %v7809_v36 = vld [vmem:[#allocation36_spill] sm:$0xff] }
 0x2e9   :  { %v532_v61 = vmul.f32 %v531_v44, %v465_v39  ;;  %v5177_v44 = vld [vmem:[%s7609_s4 + $0x140] sm:$0xff] }
 0x336   :  { %v507_v17 = vpop.permute.xlu2 %506 }
 0x337   :  { %3514 = vmatmul.msk.f32.vlgmr.msra.gmra.mxu2 %vm318_vm9, %v507_v17  ;;  %v7803_v17 = vld [vmem:[#allocation28_spill] sm:$0xff] }
 0x338   :  { %807 = vmatpush.msra.mxu2 %v7795_v20 }
 0x33a   :  { %808 = vmatpush.msra.mxu2 %v7796_v21 }
 0x33c   :  { %809 = vmatpush.msra.mxu2 %v7797_v22 }
 0x33e   :  { %810 = vmatpush.msra.mxu2 %v7798_v23 }
 0x340   :  { %811 = vmatpush.msra.mxu2 %v4940_v14 }
 0x342   :  { %812 = vmatpush.msra.mxu2 %v4953_v45 }
 0x344   :  { %813 = vmatpush.msra.mxu2 %v4966_v53 }
 0x346   :  { %814 = vmatpush.msra.mxu2 %v4985_v50 }
 0x355   :  { %v535_v38 = vpop.permute.xlu0 %534 }
 0x356   :  { %v537_v40 = vmul.f32 %v535_v38, %v465_v39  ;;  %v5161_v38 = vld [vmem:[%s7609_s4 + $0x190] sm:$0xff]  ;;  %v7810_v39 = vld [vmem:[#allocation21_spill] sm:$0xff] }
 0x358   :  { %539 = vrot.lane.b32.xlu2 %v537_v40, %s4252_s13  ;;  %v7811_v40 = vld [vmem:[#allocation38_spill] sm:$0xff] }
 0x3b2   :  { %v540_v60 = vpop.permute.xlu2 %539 }
 0x3b3   :  { %v542_v58 = vadd.f32 %v540_v60, %v532_v61  ;;  %v7813_v60 = vld [vmem:[#allocation26_spill] sm:$0xff]  ;;  %v5184_v61 = vld [vmem:[%s7609_s4 + $0x118] sm:$0xff] }
 0x3ba   :  { %v527_v42 = vpop.f32.mrf.mxu2 }
 0x3bb   :  { %3674 = vtanh.f32 %v527_v42  ;;  %v5169_v42 = vld [vmem:[%s7609_s4 + $0x168] sm:$0xff] }
 0x3c1   :  { %v3675_v43 = vpop.eup %3674 }
 0x3c2   :  { %544 = vrot.lane.b32.xlu0 %v3675_v43, %s4252_s13  ;;  %v7812_v43 = vld [vmem:[#allocation23_spill] sm:$0xff] }
 0x434   :  { %v545_v1 = vpop.permute.xlu0 %544 }
 0x435   :  { %v547_v2 = vadd.f32 %v545_v1, %v542_v58  ;;  %v7814_v58 = vld [vmem:[#allocation30_spill] sm:$0xff]  ;;  %v7815_v1 = vld [vmem:[#allocation33_spill] sm:$0xff] }
 0x437   :  { %3676 = vtanh.f32 %v547_v2  ;;  %560 = vst.msk [vmem:[#allocation3] sm:$0xff] %vm558_vm13, %v547_v2  ;;  %v5198_v2 = vld [vmem:[%s7609_s4 + $0xc8] sm:$0xff] }
 0x43d   :  { %v3677_v3 = vpop.eup %3676 }
 0x43e   :  { %550 = vrot.lane.b32.xlu1 %v3677_v3, %s4252_s13  ;;  %v762_v5 = vld [vmem:[#allocation3] sm:$0xff]  ;;  %v7816_v3 = vld [vmem:[#allocation35_spill] sm:$0xff] }
 0x446   :  { %764 = vrot.lane.b32.xlu1 %v762_v5, %s4252_s13  ;;  %v5205_v5 = vld [vmem:[%s7609_s4 + $0xa0] sm:$0xff] }
 0x4b0   :  { %v551_v6 = vpop.permute.xlu1 %550 }
 0x4b1   :  { %v553_v8 = vmul.f32 %v551_v6, %v5087_v4  ;;  %v7800_v4 = vld [vmem:[#allocation13_spill] sm:$0xff] }
 0x4b2   :  { %v7817_v6 = vld [vmem:[#allocation37_spill] sm:$0xff] }
 0x4b3   :  { %555 = vrot.lane.b32.xlu2 %v553_v8, %s4252_s13  ;;  %v5212_v8 = vld [vmem:[%s7609_s4 + $0x78] sm:$0xff] }
 0x50d   :  { %v556_v9 = vpop.permute.xlu2 %555 }
 0x50e   :  { %559 = vst.msk [vmem:[#allocation2] sm:$0xff] %vm558_vm13, %v556_v9  ;;  %v7818_v9 = vld [vmem:[#allocation39_spill] sm:$0xff] }
 0x515   :  { %v565_v10 = vld [vmem:[#allocation2] sm:$0xff] }
 0x516   :  { %588 = vmatmul.f32.vlgmr.msra.gmra.mxu3 %v565_v10  ;;  %608 = vmatmul.f32.vlgmr.msrb.gmra.mxu1 %v565_v10  ;;  %564 = vst [vmem:[#allocation5] sm:$0xff] %v565_v10 }
 0x517   :  { %628 = vmatmul.f32.vlgmr.msrb.gmra.mxu2 %v565_v10  ;;  %648 = vmatmul.f32.vlgmr.msra.gmra.mxu0 %v565_v10 }
 0x518   :  { %847 = vmatpush.msrb.mxu1 %v7799_v11  ;;  %942 = vmatpush.msrb.mxu2 %v5064_v18  ;;  %v7819_v11 = vld [vmem:[#allocation40_spill] sm:$0xff] }
 0x519   :  { %989 = vmatpush.msra.mxu0 %v5120_v12  ;;  %1049 = vmatpush.msra.mxu3 %v7800_v4  ;;  %v5226_v4 = vld [vmem:[%s7609_s4 + $0x28] sm:$0xff] }
 0x51a   :  { %848 = vmatpush.msrb.mxu1 %v7801_v13  ;;  %943 = vmatpush.msrb.mxu2 %v5069_v19  ;;  %v7820_v13 = vld [vmem:[#allocation41_spill] sm:$0xff] }
 0x51b   :  { %990 = vmatpush.msra.mxu0 %v5129_v15  ;;  %1050 = vmatpush.msra.mxu3 %v7802_v16  ;;  %v5233_v16 = vld [vmem:[%s7609_s4] sm:$0xff] }
 0x51c   :  { %849 = vmatpush.msrb.mxu1 %v7803_v17  ;;  %v7821_v17 = vld [vmem:[#allocation43_spill] sm:$0xff] }
 0x51d   :  { %991 = vmatpush.msra.mxu0 %v5137_v25  ;;  %1051 = vmatpush.msra.mxu3 %v7804_v26  ;;  %v7822_v26 = vld [vmem:[#allocation45_spill] sm:$0xff] }
 0x51e   :  { %668 = vmatmul.f32.vlgmr.msrb.gmra.mxu3 %v565_v10  ;;  %850 = vmatpush.msrb.mxu1 %v7805_v28  ;;  %v5219_v10 = vld [vmem:[%s7609_s4 + $0x50] sm:$0xff] }
 0x51f   :  { %992 = vmatpush.msra.mxu0 %v5145_v30  ;;  %1052 = vmatpush.msra.mxu3 %v7806_v31  ;;  %v7823_v28 = vld [vmem:[#allocation47_spill] sm:$0xff]  ;;  %v7824_v31 = vld [vmem:[#allocation49_spill] sm:$0xff] }
 0x520   :  { %851 = vmatpush.msrb.mxu1 %v7807_v32  ;;  %v7825_v32 = vld [vmem:[#allocation51_spill] sm:$0xff] }
 0x521   :  { %993 = vmatpush.msra.mxu0 %v5153_v34  ;;  %1053 = vmatpush.msra.mxu3 %v7808_v35  ;;  %v3516_v35 = vld [vmem:[%s7605_s0 + $0x30] sm:$0xff] }
 0x522   :  { %852 = vmatpush.msrb.mxu1 %v7809_v36 }
 0x523   :  { %994 = vmatpush.msra.mxu0 %v5161_v38  ;;  %1054 = vmatpush.msra.mxu3 %v7810_v39 }
 0x524   :  { %853 = vmatpush.msrb.mxu1 %v7811_v40 }
 0x525   :  { %995 = vmatpush.msra.mxu0 %v5169_v42  ;;  %1055 = vmatpush.msra.mxu3 %v7812_v43 }
 0x526   :  { %854 = vmatpush.msrb.mxu1 %v4995_v46  ;;  %v5191_v46 = vld [vmem:[%s7609_s4 + $0xf0] sm:$0xff] }
 0x527   :  { %996 = vmatpush.msra.mxu0 %v5177_v44  ;;  %1056 = vmatpush.msra.mxu3 %v7813_v60 }
 0x529   :  { %997 = vmatpush.msra.mxu0 %v5184_v61  ;;  %1057 = vmatpush.msra.mxu3 %v7814_v58 }
 0x52b   :  { %998 = vmatpush.msra.mxu0 %v5191_v46  ;;  %1058 = vmatpush.msra.mxu3 %v7815_v1 }
 0x52d   :  { %999 = vmatpush.msra.mxu0 %v5198_v2  ;;  %1059 = vmatpush.msra.mxu3 %v7816_v3 }
 0x52f   :  { %1000 = vmatpush.msra.mxu0 %v5205_v5  ;;  %1060 = vmatpush.msra.mxu3 %v7817_v6 }
 0x531   :  { %1001 = vmatpush.msra.mxu0 %v5212_v8  ;;  %1061 = vmatpush.msra.mxu3 %v7818_v9 }
 0x533   :  { %1002 = vmatpush.msra.mxu0 %v5219_v10  ;;  %1062 = vmatpush.msra.mxu3 %v7819_v11 }
 0x535   :  { %1003 = vmatpush.msra.mxu0 %v5226_v4  ;;  %1063 = vmatpush.msra.mxu3 %v7820_v13 }
 0x537   :  { %1004 = vmatpush.msra.mxu0 %v5233_v16  ;;  %1064 = vmatpush.msra.mxu3 %v7821_v17 }
 0x539   :  { %1244 = vmatpush.msrb.mxu3 %v7822_v26 }
 0x53b   :  { %1245 = vmatpush.msrb.mxu3 %v7823_v28 }
 0x53d   :  { %1246 = vmatpush.msrb.mxu3 %v7824_v31 }
 0x53f   :  { %1247 = vmatpush.msrb.mxu3 %v7825_v32 }
 0x541   :  { %1248 = vmatpush.msrb.mxu3 %v4945_v48  ;;  %v3519_v48 = vld [vmem:[%s7605_s0 + $0x48] sm:$0xff] }
 0x543   :  { %1249 = vmatpush.msrb.mxu3 %v4958_v63 }
 0x545   :  { %1250 = vmatpush.msrb.mxu3 %v4971_v56 }
 0x547   :  { %1251 = vmatpush.msrb.mxu3 %v4990_v59 }
 0x593   :  { %v609_v36 = vpop.f32.mrf.mxu1 }
 0x594   :  { %v673_v39 = vadd.f32 %v3516_v35, %v609_v36 }
 0x596   :  { %v3521_v40 = vmul.f32 -1.442695, %v673_v39 }
 0x598   :  { %3678 = vpow2.f32 %v3521_v40 }
 0x599   :  { %v5248_v43 = vpop.f32.mrf.mxu3 }
 0x59e   :  { %v3679_v60 = vpop.eup %3678 }
 0x59f   :  { %v684_v58 = vadd.f32 1.0, %v3679_v60 }
 0x5a1   :  { %3680 = vrcp.f32 %v684_v58  ;;  %v669_v56 = vpop.f32.mrf.mxu3  ;;  %v711_v9 = vand.u32 2147483648, %v684_v58  ;;  %v709_v17 = vand.u32 2147483647, %v684_v58  ;;  %vm705_vm0 = vweird.f32 %v684_v58 }
 0x5a2   :  { %v5253_v63 = vadd.f32 %v3519_v48, %v669_v56 }
 0x5a3   :  { %v712_v31 = vor.u32 1.1754944e-38, %v711_v9  ;;  %vm710_vm2 = vcmp.eq.f32.partialorder %v709_v17, 8.507059e+37  ;;  %v5265_v17 = vld [vmem:[%s7609_s4 + $0x260] sm:$0xff] }
 0x5a4   :  { %v3523_v59 = vmul.f32 -1.442695, %v5253_v63 }
 0x5a6   :  { %3682 = vpow2.f32 %v3523_v59 }
 0x5a7   :  { %v3681_v1 = vpop.eup %3680 }
 0x5a8   :  { %v701_v3 = vmul.f32 %v3681_v1, %v684_v58  ;;  %vm706_vm15 = vweird.f32 %v3681_v1 }
 0x5a9   :  { %vm707_vm1 = vmor %vm705_vm0, %vm706_vm15 }
 0x5aa   :  { %v702_v6 = vsub.f32 1.0, %v701_v3 }
 0x5ac   :  { %v3683_v11 = vpop.eup %3682  ;;  %v703_v13 = vmul.f32 %v3681_v1, %v702_v6 }
 0x5ad   :  { %v720_v26 = vadd.f32 1.0, %v3683_v11  ;;  %v736_v11 = vld [vmem:[#allocation4] sm:$0xff] }
 0x5ae   :  { %v704_v28 = vadd.f32 %v3681_v1, %v703_v13 }
 0x5af   :  { %3684 = vrcp.f32 %v720_v26  ;;  %v732_v56 = vand.u32 2147483648, %v720_v26  ;;  %v730_v3 = vand.u32 2147483647, %v720_v26  ;;  %vm726_vm5 = vweird.f32 %v720_v26 }
 0x5b0   :  { %v708_v32 = vsel %vm707_vm1, %v3681_v1, %v704_v28  ;;  %v5277_v28 = vld [vmem:[%s7609_s4 + $0x210] sm:$0xff] }
 0x5b1   :  { %v5256_v35 = vsel %vm710_vm2, %v712_v31, %v708_v32  ;;  %v733_v6 = vor.u32 1.1754944e-38, %v732_v56  ;;  %vm731_vm7 = vcmp.eq.f32.partialorder %v730_v3, 8.507059e+37  ;;  %v5283_v31 = vld [vmem:[%s7609_s4 + $0x1e8] sm:$0xff]  ;;  %v5289_v32 = vld [vmem:[%s7609_s4 + $0x1c0] sm:$0xff]  ;;  %v5325_v56 = vld [vmem:[%s7609_s4 + $0xd0] sm:$0xff] }
 0x5b2   :  { %v715_v36 = vmul.f32 2.0, %v5256_v35  ;;  %7826 = vst [vmem:[#allocation8_spill] sm:$0xff] %v5283_v31  ;;  %v5337_v3 = vld [vmem:[%s7609_s4 + $0x80] sm:$0xff] }
 0x5b3   :  { %7827 = vst [vmem:[#allocation9_spill] sm:$0xff] %v5289_v32 }
 0x5b4   :  { %v3522_v39 = vadd.f32 -1.0, %v715_v36  ;;  %v5295_v36 = vld [vmem:[%s7609_s4 + $0x198] sm:$0xff]  ;;  %7833 = vst [vmem:[#allocation20_spill] sm:$0xff] %v5325_v56 }
 0x5b5   :  { %v3685_v40 = vpop.eup %3684  ;;  %7828 = vst [vmem:[#allocation10_spill] sm:$0xff] %v5295_v36 }
 0x5b6   :  { %v722_v60 = vmul.f32 %v3685_v40, %v720_v26  ;;  %769 = vrot.lane.b32.xlu0 %v3522_v39, %s4252_s13  ;;  %vm727_vm4 = vweird.f32 %v3685_v40  ;;  %v5271_v26 = vld [vmem:[%s7609_s4 + $0x238] sm:$0xff]  ;;  %v5301_v39 = vld [vmem:[%s7609_s4 + $0x170] sm:$0xff]  ;;  %7835 = vst [vmem:[#allocation25_spill] sm:$0xff] %v5337_v3 }
 0x5b7   :  { %vm728_vm6 = vmor %vm726_vm5, %vm727_vm4  ;;  %7829 = vst [vmem:[#allocation11_spill] sm:$0xff] %v5301_v39 }
 0x5b8   :  { %v723_v48 = vsub.f32 1.0, %v722_v60  ;;  %v5313_v60 = vld [vmem:[%s7609_s4 + $0x120] sm:$0xff] }
 0x5b9   :  { %7831 = vst [vmem:[#allocation16_spill] sm:$0xff] %v5313_v60 }
 0x5ba   :  { %v724_v59 = vmul.f32 %v3685_v40, %v723_v48  ;;  %v5319_v48 = vld [vmem:[%s7609_s4 + $0xf8] sm:$0xff] }
 0x5bb   :  { %7832 = vst [vmem:[#allocation18_spill] sm:$0xff] %v5319_v48 }
 0x5bc   :  { %v725_v58 = vadd.f32 %v3685_v40, %v724_v59  ;;  %v5331_v59 = vld [vmem:[%s7609_s4 + $0xa8] sm:$0xff] }
 0x5bd   :  { %7834 = vst [vmem:[#allocation22_spill] sm:$0xff] %v5331_v59 }
 0x5be   :  { %v729_v1 = vsel %vm728_vm6, %v3685_v40, %v725_v58  ;;  %v5307_v40 = vld [vmem:[%s7609_s4 + $0x148] sm:$0xff]  ;;  %v5343_v58 = vld [vmem:[%s7609_s4 + $0x58] sm:$0xff] }
 0x5bf   :  { %v734_v9 = vsel %vm731_vm7, %v733_v6, %v729_v1  ;;  %7830 = vst [vmem:[#allocation12_spill] sm:$0xff] %v5307_v40  ;;  %v5349_v6 = vld [vmem:[%s7609_s4 + $0x30] sm:$0xff]  ;;  %v5355_v1 = vld [vmem:[%s7609_s4 + $0x8] sm:$0xff] }
 0x5c0   :  { %v737_v13 = vmul.f32 %v736_v11, %v734_v9  ;;  %7836 = vst [vmem:[#allocation29_spill] sm:$0xff] %v5343_v58  ;;  %v3515_v9 = vld [vmem:[%s7605_s0 + $0x28] sm:$0xff] }
 0x5c1   :  { %7837 = vst [vmem:[#allocation32_spill] sm:$0xff] %v5349_v6  ;;  %v672_v11 = vadd.f32 %v3515_v9, %v5248_v43 }
 0x5c2   :  { %3524 = vmatmul.msk.f32.vlgmr.msra.gmra.mxu1 %vm318_vm9, %v737_v13  ;;  %795 = vst.msk [vmem:[#allocation4] sm:$0xff] %vm318_vm9, %v737_v13 }
 0x5c3   :  { %1009 = vmatpush.msra.mxu1 %v5265_v17  ;;  %7838 = vst [vmem:[#allocation42_spill] sm:$0xff] %v5355_v1  ;;  %v3520_v13 = vmul.f32 -1.442695, %v672_v11 }
 0x5c5   :  { %1010 = vmatpush.msra.mxu1 %v5271_v26  ;;  %3686 = vpow2.f32 %v3520_v13 }
 0x5c7   :  { %1011 = vmatpush.msra.mxu1 %v5277_v28 }
 0x5c9   :  { %1012 = vmatpush.msra.mxu1 %v5283_v31 }
 0x5cb   :  { %1013 = vmatpush.msra.mxu1 %v5289_v32 }
 0x5cd   :  { %1014 = vmatpush.msra.mxu1 %v5295_v36 }
 0x5cf   :  { %1015 = vmatpush.msra.mxu1 %v5301_v39 }
 0x5d1   :  { %1016 = vmatpush.msra.mxu1 %v5307_v40 }
 0x5d3   :  { %1017 = vmatpush.msra.mxu1 %v5313_v60 }
 0x5d5   :  { %1018 = vmatpush.msra.mxu1 %v5319_v48 }
 0x5d7   :  { %1019 = vmatpush.msra.mxu1 %v5325_v56 }
 0x5d9   :  { %1020 = vmatpush.msra.mxu1 %v5331_v59 }
 0x5db   :  { %1021 = vmatpush.msra.mxu1 %v5337_v3 }
 0x5dd   :  { %1022 = vmatpush.msra.mxu1 %v5343_v58  ;;  %v3687_v58 = vpop.eup %3686 }
 0x5de   :  { %v683_v3 = vadd.f32 1.0, %v3687_v58 }
 0x5df   :  { %1023 = vmatpush.msra.mxu1 %v5349_v6 }
 0x5e0   :  { %3688 = vrcp.f32 %v683_v3  ;;  %v696_v40 = vand.u32 2147483648, %v683_v3  ;;  %vm690_vm10 = vweird.f32 %v683_v3 }
 0x5e1   :  { %1024 = vmatpush.msra.mxu1 %v5355_v1  ;;  %v694_v1 = vand.u32 2147483647, %v683_v3 }
 0x5e2   :  { %v697_v36 = vor.u32 1.1754944e-38, %v696_v40 }
 0x5e3   :  { %vm695_vm12 = vcmp.eq.f32.partialorder %v694_v1, 8.507059e+37  ;;  %v649_v1 = vpop.f32.mrf.mxu0 }
 0x5e6   :  { %v3689_v59 = vpop.eup %3688 }
 0x5e7   :  { %v686_v6 = vmul.f32 %v3689_v59, %v683_v3  ;;  %vm691_vm8 = vweird.f32 %v3689_v59 }
 0x5e8   :  { %vm692_vm11 = vmor %vm690_vm10, %vm691_vm8 }
 0x5e9   :  { %v687_v56 = vsub.f32 1.0, %v686_v6 }
 0x5eb   :  { %v688_v48 = vmul.f32 %v3689_v59, %v687_v56  ;;  %v765_v56 = vpop.permute.xlu1 %764 }
 0x5ed   :  { %v689_v60 = vadd.f32 %v3689_v59, %v688_v48 }
 0x5ef   :  { %v693_v39 = vsel %vm692_vm11, %v3689_v59, %v689_v60  ;;  %v5409_v59 = vld [vmem:[%s7609_s4 + $0x200] sm:$0xff] }
 0x5f0   :  { %v698_v43 = vsel %vm695_vm12, %v697_v36, %v693_v39  ;;  %v5394_v39 = vld [vmem:[%s7611_s6] sm:$0xff] }
 0x5f1   :  { %v767_v6 = vmul.f32 %v765_v56, %v698_v43 }
 0x628   :  { %v770_v32 = vpop.permute.xlu0 %769 }
 0x629   :  { %v772_v9 = vmul.f32 %v770_v32, %v698_v43 }
 0x62b   :  { %774 = vrot.lane.b32.xlu2 %v772_v9, %s4252_s13 }
 0x63f   :  { %v758_v58 = vpop.f32.mrf.mxu1 }
 0x640   :  { %3690 = vtanh.f32 %v758_v58 }
 0x646   :  { %v3691_v11 = vpop.eup %3690 }
 0x647   :  { %779 = vrot.lane.b32.xlu0 %v3691_v11, %s4252_s13 }
 0x685   :  { %v775_v48 = vpop.permute.xlu2 %774 }
 0x686   :  { %v777_v13 = vadd.f32 %v775_v48, %v767_v6 }
 0x6b9   :  { %v780_v31 = vpop.permute.xlu0 %779 }
 0x6ba   :  { %v782_v3 = vadd.f32 %v780_v31, %v777_v13  ;;  %v5375_v31 = vld [vmem:[%s7609_s4 + $0x278] sm:$0xff] }
 0x6bc   :  { %3692 = vtanh.f32 %v782_v3 }
 0x6c2   :  { %v3693_v60 = vpop.eup %3692 }
 0x6c3   :  { %785 = vrot.lane.b32.xlu1 %v3693_v60, %s4252_s13 }
 0x6cb   :  { %791 = vrot.lane.b32.xlu1 %v782_v3, %s4252_s13 }
 0x735   :  { %v786_v32 = vpop.permute.xlu1 %785 }
 0x736   :  { %v788_v36 = vmul.f32 %v786_v32, %v5256_v35  ;;  %v5381_v35 = vld [vmem:[%s7611_s6 + $0x8] sm:$0xff] }
 0x738   :  { %3525 = vmatmul.msk.f32.vlgmr.msra.gmra.mxu2 %vm370_vm14, %v788_v36  ;;  %3526 = vmatmul.msk.f32.vlgmr.msrb.gmra.mxu0 %vm370_vm14, %v788_v36  ;;  %789 = vst.msk [vmem:[#allocation2] sm:$0xff] %vm370_vm14, %v788_v36 }
 0x739   :  { %3527 = vmatmul.msk.f32.vlgmr.msrb.gmra.mxu1 %vm370_vm14, %v788_v36  ;;  %1029 = vmatpush.msra.mxu2 %v4639_v49  ;;  %v5388_v49 = vld [vmem:[%s7609_s4 + $0x250] sm:$0xff] }
 0x73a   :  { %1069 = vmatpush.msrb.mxu0 %v5375_v31  ;;  %1172 = vmatpush.msrb.mxu1 %v5381_v35 }
 0x73b   :  { %1030 = vmatpush.msra.mxu2 %v4649_v51  ;;  %v5402_v51 = vld [vmem:[%s7609_s4 + $0x228] sm:$0xff] }
 0x73c   :  { %1070 = vmatpush.msrb.mxu0 %v5388_v49  ;;  %1173 = vmatpush.msrb.mxu1 %v5394_v39 }
 0x73d   :  { %v792_v40 = vpop.permute.xlu1 %791  ;;  %1031 = vmatpush.msra.mxu2 %v4661_v52  ;;  %v5416_v52 = vld [vmem:[%s7609_s4 + $0x1d8] sm:$0xff] }
 0x73e   :  { %794 = vst.msk [vmem:[#allocation3] sm:$0xff] %vm370_vm14, %v792_v40  ;;  %1071 = vmatpush.msrb.mxu0 %v5402_v51 }
 0x73f   :  { %1032 = vmatpush.msra.mxu2 %v7787_v24  ;;  %v5423_v24 = vld [vmem:[%s7609_s4 + $0x1b0] sm:$0xff] }
 0x740   :  { %1072 = vmatpush.msrb.mxu0 %v5409_v59 }
 0x741   :  { %1033 = vmatpush.msra.mxu2 %v7788_v27  ;;  %v5430_v27 = vld [vmem:[%s7609_s4 + $0x188] sm:$0xff] }
 0x742   :  { %1073 = vmatpush.msrb.mxu0 %v5416_v52 }
 0x743   :  { %1034 = vmatpush.msra.mxu2 %v7789_v29  ;;  %v5437_v29 = vld [vmem:[%s7609_s4 + $0x160] sm:$0xff] }
 0x744   :  { %1074 = vmatpush.msrb.mxu0 %v5423_v24 }
 0x745   :  { %1035 = vmatpush.msra.mxu2 %v7790_v33  ;;  %v5444_v33 = vld [vmem:[%s7609_s4 + $0x138] sm:$0xff] }
 0x746   :  { %1075 = vmatpush.msrb.mxu0 %v5430_v27 }
 0x747   :  { %1036 = vmatpush.msra.mxu2 %v7791_v37  ;;  %v5451_v37 = vld [vmem:[%s7609_s4 + $0x110] sm:$0xff] }
 0x748   :  { %1076 = vmatpush.msrb.mxu0 %v5437_v29 }
 0x749   :  { %1037 = vmatpush.msra.mxu2 %v7792_v41  ;;  %v5458_v41 = vld [vmem:[%s7609_s4 + $0xe8] sm:$0xff] }
 0x74a   :  { %1077 = vmatpush.msrb.mxu0 %v5444_v33 }
 0x74b   :  { %1038 = vmatpush.msra.mxu2 %v7793_v0  ;;  %v5465_v0 = vld [vmem:[%s7609_s4 + $0xc0] sm:$0xff] }
 0x74c   :  { %1078 = vmatpush.msrb.mxu0 %v5451_v37  ;;  %7839 = vst [vmem:[#allocation44_spill] sm:$0xff] %v5465_v0 }
 0x74d   :  { %1039 = vmatpush.msra.mxu2 %v4793_v54  ;;  %v5472_v54 = vld [vmem:[%s7609_s4 + $0x98] sm:$0xff] }
 0x74e   :  { %1079 = vmatpush.msrb.mxu0 %v5458_v41  ;;  %7840 = vst [vmem:[#allocation46_spill] sm:$0xff] %v5472_v54 }
 0x74f   :  { %1040 = vmatpush.msra.mxu2 %v4813_v55  ;;  %v5479_v55 = vld [vmem:[%s7609_s4 + $0x70] sm:$0xff] }
 0x750   :  { %1080 = vmatpush.msrb.mxu0 %v5465_v0  ;;  %7841 = vst [vmem:[#allocation48_spill] sm:$0xff] %v5479_v55 }
 0x751   :  { %1041 = vmatpush.msra.mxu2 %v4832_v57  ;;  %v5486_v57 = vld [vmem:[%s7609_s4 + $0x48] sm:$0xff] }
 0x752   :  { %1081 = vmatpush.msrb.mxu0 %v5472_v54  ;;  %7842 = vst [vmem:[#allocation50_spill] sm:$0xff] %v5486_v57 }
 0x753   :  { %1042 = vmatpush.msra.mxu2 %v4846_v47  ;;  %v5493_v47 = vld [vmem:[%s7609_s4 + $0x20] sm:$0xff] }
 0x754   :  { %1082 = vmatpush.msrb.mxu0 %v5479_v55  ;;  %7843 = vst [vmem:[#allocation24_spill] sm:$0xff] %v5493_v47  ;;  %v921_v55 = vld [vmem:[#allocation4] sm:$0xff] }
 0x755   :  { %1043 = vmatpush.msra.mxu2 %v4861_v62  ;;  %v3518_v62 = vld [vmem:[%s7605_s0 + $0x40] sm:$0xff] }
 0x756   :  { %1083 = vmatpush.msrb.mxu0 %v5486_v57  ;;  %v675_v43 = vadd.f32 %v3518_v62, %v649_v1 }
 0x757   :  { %1044 = vmatpush.msra.mxu2 %v7794_v7 }
 0x758   :  { %1084 = vmatpush.msrb.mxu0 %v5493_v47 }
 0x7b5   :  { %v836_v9 = vpop.f32.mrf.mxu0 }
 0x7b6   :  { %v860_v58 = vadd.f32 %v836_v9, %v675_v43  ;;  %v856_v11 = vpop.f32.mrf.mxu1 }
 0x7b7   :  { %v861_v56 = vadd.f32 %v856_v11, %v5253_v63 }
 0x7b8   :  { %v3529_v48 = vmul.f32 -1.442695, %v860_v58 }
 0x7b9   :  { %v3531_v7 = vmul.f32 -1.442695, %v861_v56 }
 0x7ba   :  { %3694 = vpow2.f32 %v3529_v48 }
 0x7bb   :  { %3696 = vpow2.f32 %v3531_v7 }
 0x7c0   :  { %v3695_v6 = vpop.eup %3694 }
 0x7c1   :  { %v3697_v13 = vpop.eup %3696  ;;  %v869_v3 = vadd.f32 1.0, %v3695_v6 }
 0x7c2   :  { %v905_v60 = vadd.f32 1.0, %v3697_v13 }
 0x7c3   :  { %3698 = vrcp.f32 %v869_v3  ;;  %v896_v43 = vand.u32 2147483648, %v869_v3  ;;  %v894_v63 = vand.u32 2147483647, %v869_v3  ;;  %vm890_vm1 = vweird.f32 %v869_v3 }
 0x7c4   :  { %3700 = vrcp.f32 %v905_v60  ;;  %v917_v9 = vand.u32 2147483648, %v905_v60  ;;  %v915_v11 = vand.u32 2147483647, %v905_v60  ;;  %vm911_vm2 = vweird.f32 %v905_v60 }
 0x7c5   :  { %v897_v7 = vor.u32 1.1754944e-38, %v896_v43  ;;  %vm895_vm6 = vcmp.eq.f32.partialorder %v894_v63, 8.507059e+37 }
 0x7c6   :  { %v918_v6 = vor.u32 1.1754944e-38, %v917_v9  ;;  %vm916_vm7 = vcmp.eq.f32.partialorder %v915_v11, 8.507059e+37 }
 0x7c9   :  { %v3699_v32 = vpop.eup %3698 }
 0x7ca   :  { %v3701_v36 = vpop.eup %3700  ;;  %v886_v40 = vmul.f32 %v3699_v32, %v869_v3  ;;  %vm891_vm15 = vweird.f32 %v3699_v32  ;;  %v3517_v3 = vld [vmem:[%s7605_s0 + $0x38] sm:$0xff] }
 0x7cb   :  { %v907_v47 = vmul.f32 %v3701_v36, %v905_v60  ;;  %vm912_vm0 = vweird.f32 %v3701_v36  ;;  %vm892_vm4 = vmor %vm890_vm1, %vm891_vm15 }
 0x7cc   :  { %v887_v1 = vsub.f32 1.0, %v886_v40  ;;  %vm913_vm5 = vmor %vm911_vm2, %vm912_vm0 }
 0x7cd   :  { %v908_v62 = vsub.f32 1.0, %v907_v47 }
 0x7ce   :  { %v888_v57 = vmul.f32 %v3699_v32, %v887_v1 }
 0x7cf   :  { %v909_v58 = vmul.f32 %v3701_v36, %v908_v62 }
 0x7d0   :  { %v889_v56 = vadd.f32 %v3699_v32, %v888_v57  ;;  %v629_v57 = vpop.f32.mrf.mxu2 }
 0x7d1   :  { %v910_v48 = vadd.f32 %v3701_v36, %v909_v58 }
 0x7d2   :  { %v893_v13 = vsel %vm892_vm4, %v3699_v32, %v889_v56  ;;  %v674_v32 = vadd.f32 %v3517_v3, %v629_v57 }
 0x7d3   :  { %v914_v40 = vsel %vm913_vm5, %v3701_v36, %v910_v48  ;;  %v5500_v47 = vsel %vm895_vm6, %v897_v7, %v893_v13 }
 0x7d4   :  { %v919_v1 = vsel %vm916_vm7, %v918_v6, %v914_v40  ;;  %v900_v62 = vmul.f32 2.0, %v5500_v47 }
 0x7d5   :  { %v922_v54 = vmul.f32 %v921_v55, %v919_v1 }
 0x7d6   :  { %v3530_v0 = vadd.f32 -1.0, %v900_v62 }
 0x7d7   :  { %924 = vrot.lane.b32.xlu2 %v922_v54, %s4253_s11  ;;  %978 = vst.msk [vmem:[#allocation4] sm:$0xff] %vm561_vm3, %v922_v54 }
 0x7d8   :  { %952 = vrot.lane.b32.xlu0 %v3530_v0, %s4252_s13  ;;  %v816_v60 = vpop.f32.mrf.mxu2 }
 0x7d9   :  { %v859_v36 = vadd.f32 %v816_v60, %v674_v32 }
 0x7db   :  { %v3528_v43 = vmul.f32 -1.442695, %v859_v36 }
 0x7dd   :  { %3702 = vpow2.f32 %v3528_v43 }
 0x7e3   :  { %v3703_v9 = vpop.eup %3702 }
 0x7e4   :  { %v868_v63 = vadd.f32 1.0, %v3703_v9  ;;  %v5529_v9 = vld [vmem:[%s7610_s5 + $0x138] sm:$0xff] }
 0x7e6   :  { %3704 = vrcp.f32 %v868_v63  ;;  %vm875_vm10 = vweird.f32 %v868_v63 }
 0x7ec   :  { %v3705_v54 = vpop.eup %3704 }
 0x7ed   :  { %v871_v0 = vmul.f32 %v3705_v54, %v868_v63  ;;  %vm876_vm8 = vweird.f32 %v3705_v54 }
 0x7ee   :  { %vm877_vm11 = vmor %vm875_vm10, %vm876_vm8 }
 0x7ef   :  { %v872_v58 = vsub.f32 1.0, %v871_v0  ;;  %v5609_v0 = vld [vmem:[%s7610_s5 + $0x48] sm:$0xff] }
 0x7f1   :  { %v873_v11 = vmul.f32 %v3705_v54, %v872_v58  ;;  %v5622_v58 = vld [vmem:[%s7610_s5 + $0x20] sm:$0xff] }
 0x7f3   :  { %v874_v56 = vadd.f32 %v3705_v54, %v873_v11  ;;  %v5636_v11 = vld [vmem:[%s7609_s4 + $0x130] sm:$0xff] }
 0x7f5   :  { %v878_v48 = vsel %vm877_vm11, %v3705_v54, %v874_v56  ;;  %v5596_v54 = vld [vmem:[%s7610_s5 + $0x70] sm:$0xff]  ;;  %v5697_v56 = vld [vmem:[%s7610_s5 + $0x108] sm:$0xff] }
 0x831   :  { %v925_v55 = vpop.permute.xlu2 %924 }
 0x832   :  { %3532 = vmatmul.msk.f32.vlgmr.msrb.gmra.mxu2 %vm318_vm9, %v925_v55  ;;  %v5583_v55 = vld [vmem:[%s7610_s5 + $0x98] sm:$0xff] }
 0x833   :  { %1224 = vmatpush.msrb.mxu2 %v7795_v20  ;;  %v881_v20 = vand.u32 2147483648, %v868_v63 }
 0x835   :  { %1225 = vmatpush.msrb.mxu2 %v7796_v21  ;;  %v879_v21 = vand.u32 2147483647, %v868_v63  ;;  %v5543_v63 = vld [vmem:[%s7610_s5 + $0x110] sm:$0xff] }
 0x837   :  { %1226 = vmatpush.msrb.mxu2 %v7797_v22  ;;  %v882_v22 = vor.u32 1.1754944e-38, %v881_v20  ;;  %vm880_vm12 = vcmp.eq.f32.partialorder %v879_v21, 8.507059e+37  ;;  %v5709_v20 = vld [vmem:[%s7610_s5 + $0xb8] sm:$0xff]  ;;  %v5715_v21 = vld [vmem:[%s7610_s5 + $0x90] sm:$0xff] }
 0x838   :  { %7844 = vst [vmem:[#allocation13_spill] sm:$0xff] %v5709_v20 }
 0x839   :  { %1227 = vmatpush.msrb.mxu2 %v7798_v23  ;;  %v883_v7 = vsel %vm880_vm12, %v882_v22, %v878_v48  ;;  %7845 = vst [vmem:[#allocation27_spill] sm:$0xff] %v5715_v21  ;;  %v5721_v48 = vld [vmem:[%s7610_s5 + $0x68] sm:$0xff]  ;;  %v5727_v22 = vld [vmem:[%s7610_s5 + $0x40] sm:$0xff] }
 0x83a   :  { %7846 = vst [vmem:[#allocation14_spill] sm:$0xff] %v5721_v48 }
 0x83b   :  { %1228 = vmatpush.msrb.mxu2 %v4940_v14  ;;  %7847 = vst [vmem:[#allocation28_spill] sm:$0xff] %v5727_v22 }
 0x83d   :  { %1229 = vmatpush.msrb.mxu2 %v4953_v45 }
 0x83f   :  { %1230 = vmatpush.msrb.mxu2 %v4966_v53 }
 0x841   :  { %1231 = vmatpush.msrb.mxu2 %v4985_v50  ;;  %v949_v50 = vld [vmem:[#allocation3] sm:$0xff] }
 0x842   :  { %v950_v13 = vmul.f32 %v949_v50, %v883_v7  ;;  %v3537_v50 = vld [vmem:[%s7605_s0 + $0x70] sm:$0xff] }
 0x84a   :  { %v953_v23 = vpop.permute.xlu0 %952 }
 0x84b   :  { %v955_v6 = vmul.f32 %v953_v23, %v883_v7  ;;  %v5733_v23 = vld [vmem:[%s7610_s5 + $0x18] sm:$0xff] }
 0x84c   :  { %7848 = vst [vmem:[#allocation15_spill] sm:$0xff] %v5733_v23  ;;  %v3534_v7 = vld [vmem:[%s7605_s0 + $0x58] sm:$0xff] }
 0x84d   :  { %957 = vrot.lane.b32.xlu2 %v955_v6, %s4252_s13 }
 0x8a7   :  { %v958_v53 = vpop.permute.xlu2 %957 }
 0x8a8   :  { %v960_v40 = vadd.f32 %v958_v53, %v950_v13 }
 0x8b5   :  { %v945_v45 = vpop.f32.mrf.mxu2 }
 0x8b6   :  { %3706 = vtanh.f32 %v945_v45 }
 0x8bc   :  { %v3707_v14 = vpop.eup %3706 }
 0x8bd   :  { %962 = vrot.lane.b32.xlu0 %v3707_v14, %s4252_s13 }
 0x92f   :  { %v963_v1 = vpop.permute.xlu0 %962 }
 0x930   :  { %v965_v62 = vadd.f32 %v963_v1, %v960_v40 }
 0x932   :  { %3708 = vtanh.f32 %v965_v62  ;;  %977 = vst.msk [vmem:[#allocation3] sm:$0xff] %vm558_vm13, %v965_v62 }
 0x938   :  { %v3709_v57 = vpop.eup %3708 }
 0x939   :  { %968 = vrot.lane.b32.xlu1 %v3709_v57, %s4252_s13  ;;  %v1179_v3 = vld [vmem:[#allocation3] sm:$0xff] }
 0x941   :  { %1181 = vrot.lane.b32.xlu1 %v1179_v3, %s4252_s13 }
 0x9ab   :  { %v969_v60 = vpop.permute.xlu1 %968 }
 0x9ac   :  { %v971_v32 = vmul.f32 %v969_v60, %v5500_v47  ;;  %v5537_v47 = vld [vmem:[%s7609_s4 + $0x270] sm:$0xff] }
 0x9ae   :  { %973 = vrot.lane.b32.xlu2 %v971_v32, %s4252_s13 }
 0xa08   :  { %v974_v36 = vpop.permute.xlu2 %973 }
 0xa09   :  { %976 = vst.msk [vmem:[#allocation2] sm:$0xff] %vm558_vm13, %v974_v36 }
 0xa10   :  { %v982_v43 = vld [vmem:[#allocation2] sm:$0xff] }
 0xa11   :  { %1005 = vmatmul.f32.vlgmr.msra.gmra.mxu0 %v982_v43  ;;  %1025 = vmatmul.f32.vlgmr.msra.gmra.mxu1 %v982_v43  ;;  %981 = vst [vmem:[#allocation5 + $0x8] sm:$0xff] %v982_v43 }
 0xa12   :  { %1045 = vmatmul.f32.vlgmr.msra.gmra.mxu2 %v982_v43  ;;  %1065 = vmatmul.f32.vlgmr.msra.gmra.mxu3 %v982_v43 }
 0xa13   :  { %1264 = vmatpush.msra.mxu1 %v5529_v9  ;;  %1359 = vmatpush.msra.mxu2 %v5064_v18  ;;  %v5551_v18 = vld [vmem:[%s7609_s4 + $0x248] sm:$0xff] }
 0xa14   :  { %1406 = vmatpush.msra.mxu3 %v5120_v12  ;;  %1466 = vmatpush.msra.mxu0 %v5537_v47  ;;  %v5557_v12 = vld [vmem:[%s7610_s5 + $0xe8] sm:$0xff] }
 0xa15   :  { %1265 = vmatpush.msra.mxu1 %v5543_v63  ;;  %1360 = vmatpush.msra.mxu2 %v5069_v19  ;;  %v5564_v19 = vld [vmem:[%s7609_s4 + $0x220] sm:$0xff] }
 0xa16   :  { %1407 = vmatpush.msra.mxu3 %v5129_v15  ;;  %1467 = vmatpush.msra.mxu0 %v5551_v18  ;;  %v5570_v15 = vld [vmem:[%s7610_s5 + $0xc0] sm:$0xff] }
 0xa17   :  { %1266 = vmatpush.msra.mxu1 %v5557_v12 }
 0xa18   :  { %1408 = vmatpush.msra.mxu3 %v5137_v25  ;;  %1468 = vmatpush.msra.mxu0 %v5564_v19  ;;  %v5577_v25 = vld [vmem:[%s7609_s4 + $0x1f8] sm:$0xff] }
 0xa19   :  { %1085 = vmatmul.f32.vlgmr.msrb.gmra.mxu0 %v982_v43  ;;  %1267 = vmatpush.msra.mxu1 %v5570_v15 }
 0xa1a   :  { %1409 = vmatpush.msra.mxu3 %v5145_v30  ;;  %1469 = vmatpush.msra.mxu0 %v5577_v25  ;;  %v5590_v30 = vld [vmem:[%s7609_s4 + $0x1d0] sm:$0xff] }
 0xa1b   :  { %1268 = vmatpush.msra.mxu1 %v5583_v55 }
 0xa1c   :  { %1410 = vmatpush.msra.mxu3 %v5153_v34  ;;  %1470 = vmatpush.msra.mxu0 %v5590_v30  ;;  %v5603_v34 = vld [vmem:[%s7609_s4 + $0x1a8] sm:$0xff] }
 0xa1d   :  { %1269 = vmatpush.msra.mxu1 %v5596_v54 }
 0xa1e   :  { %1411 = vmatpush.msra.mxu3 %v5161_v38  ;;  %1471 = vmatpush.msra.mxu0 %v5603_v34  ;;  %v5616_v38 = vld [vmem:[%s7609_s4 + $0x180] sm:$0xff] }
 0xa1f   :  { %1270 = vmatpush.msra.mxu1 %v5609_v0 }
 0xa20   :  { %1412 = vmatpush.msra.mxu3 %v5169_v42  ;;  %1472 = vmatpush.msra.mxu0 %v5616_v38  ;;  %v5629_v42 = vld [vmem:[%s7609_s4 + $0x158] sm:$0xff] }
 0xa21   :  { %1271 = vmatpush.msra.mxu1 %v5622_v58 }
 0xa22   :  { %1413 = vmatpush.msra.mxu3 %v5177_v44  ;;  %1473 = vmatpush.msra.mxu0 %v5629_v42  ;;  %v5643_v44 = vld [vmem:[%s7609_s4 + $0x108] sm:$0xff] }
 0xa24   :  { %1414 = vmatpush.msra.mxu3 %v5184_v61  ;;  %1474 = vmatpush.msra.mxu0 %v5636_v11  ;;  %v5650_v61 = vld [vmem:[%s7609_s4 + $0xe0] sm:$0xff] }
 0xa26   :  { %1415 = vmatpush.msra.mxu3 %v5191_v46  ;;  %1475 = vmatpush.msra.mxu0 %v5643_v44  ;;  %v5657_v46 = vld [vmem:[%s7609_s4 + $0xb8] sm:$0xff] }
 0xa28   :  { %1416 = vmatpush.msra.mxu3 %v5198_v2  ;;  %1476 = vmatpush.msra.mxu0 %v5650_v61  ;;  %v5664_v2 = vld [vmem:[%s7609_s4 + $0x90] sm:$0xff] }
 0xa2a   :  { %1417 = vmatpush.msra.mxu3 %v5205_v5  ;;  %1477 = vmatpush.msra.mxu0 %v5657_v46  ;;  %v5671_v5 = vld [vmem:[%s7609_s4 + $0x68] sm:$0xff] }
 0xa2c   :  { %1418 = vmatpush.msra.mxu3 %v5212_v8  ;;  %1478 = vmatpush.msra.mxu0 %v5664_v2  ;;  %v5678_v8 = vld [vmem:[%s7609_s4 + $0x40] sm:$0xff] }
 0xa2e   :  { %1419 = vmatpush.msra.mxu3 %v5219_v10  ;;  %1479 = vmatpush.msra.mxu0 %v5671_v5  ;;  %v5685_v10 = vld [vmem:[%s7609_s4 + $0x18] sm:$0xff] }
 0xa30   :  { %1420 = vmatpush.msra.mxu3 %v5226_v4  ;;  %1480 = vmatpush.msra.mxu0 %v5678_v8  ;;  %v5691_v4 = vld [vmem:[%s7610_s5 + $0x130] sm:$0xff] }
 0xa32   :  { %1421 = vmatpush.msra.mxu3 %v5233_v16  ;;  %1481 = vmatpush.msra.mxu0 %v5685_v10  ;;  %v5703_v16 = vld [vmem:[%s7610_s5 + $0xe0] sm:$0xff] }
 0xa34   :  { %1661 = vmatpush.msrb.mxu0 %v5691_v4 }
 0xa36   :  { %1662 = vmatpush.msrb.mxu0 %v5697_v56 }
 0xa38   :  { %1663 = vmatpush.msrb.mxu0 %v5703_v16 }
 0xa3a   :  { %1664 = vmatpush.msrb.mxu0 %v5709_v20 }
 0xa3c   :  { %1665 = vmatpush.msrb.mxu0 %v5715_v21 }
 0xa3e   :  { %1666 = vmatpush.msrb.mxu0 %v5721_v48 }
 0xa40   :  { %1667 = vmatpush.msrb.mxu0 %v5727_v22 }
 0xa42   :  { %1668 = vmatpush.msrb.mxu0 %v5733_v23 }
 0xa8e   :  { %v5739_v6 = vpop.f32.mrf.mxu0  ;;  %v1026_v45 = vpop.f32.mrf.mxu1 }
 0xa8f   :  { %v1090_v14 = vadd.f32 %v3534_v7, %v1026_v45 }
 0xa91   :  { %v3539_v53 = vmul.f32 -1.442695, %v1090_v14 }
 0xa93   :  { %3710 = vpow2.f32 %v3539_v53 }
 0xa96   :  { %v1086_v13 = vpop.f32.mrf.mxu0 }
 0xa97   :  { %v5744_v40 = vadd.f32 %v3537_v50, %v1086_v13 }
 0xa99   :  { %v3541_v1 = vmul.f32 -1.442695, %v5744_v40  ;;  %v3711_v62 = vpop.eup %3710 }
 0xa9a   :  { %v1101_v57 = vadd.f32 1.0, %v3711_v62 }
 0xa9b   :  { %3712 = vpow2.f32 %v3541_v1 }
 0xa9c   :  { %3714 = vrcp.f32 %v1101_v57  ;;  %v1128_v7 = vand.u32 2147483648, %v1101_v57  ;;  %v1126_v14 = vand.u32 2147483647, %v1101_v57  ;;  %vm1122_vm0 = vweird.f32 %v1101_v57 }
 0xa9e   :  { %v1129_v13 = vor.u32 1.1754944e-38, %v1128_v7  ;;  %vm1127_vm2 = vcmp.eq.f32.partialorder %v1126_v14, 8.507059e+37  ;;  %v7854_v14 = vld [vmem:[#allocation16_spill] sm:$0xff] }
 0xaa1   :  { %v3713_v3 = vpop.eup %3712 }
 0xaa2   :  { %v1137_v60 = vadd.f32 1.0, %v3713_v3  ;;  %v3715_v32 = vpop.eup %3714 }
 0xaa3   :  { %v1118_v36 = vmul.f32 %v3715_v32, %v1101_v57  ;;  %vm1123_vm15 = vweird.f32 %v3715_v32 }
 0xaa4   :  { %3716 = vrcp.f32 %v1137_v60  ;;  %vm1124_vm1 = vmor %vm1122_vm0, %vm1123_vm15  ;;  %v1149_v3 = vand.u32 2147483648, %v1137_v60  ;;  %vm1143_vm5 = vweird.f32 %v1137_v60 }
 0xaa5   :  { %v1119_v43 = vsub.f32 1.0, %v1118_v36  ;;  %v1147_v36 = vand.u32 2147483647, %v1137_v60 }
 0xaa6   :  { %v1150_v57 = vor.u32 1.1754944e-38, %v1149_v3  ;;  %v3533_v3 = vld [vmem:[%s7605_s0 + $0x50] sm:$0xff] }
 0xaa7   :  { %v1120_v45 = vmul.f32 %v3715_v32, %v1119_v43  ;;  %vm1148_vm7 = vcmp.eq.f32.partialorder %v1147_v36, 8.507059e+37  ;;  %v1089_v36 = vadd.f32 %v3533_v3, %v5739_v6 }
 0xaa9   :  { %v1121_v23 = vadd.f32 %v3715_v32, %v1120_v45 }
 0xaaa   :  { %v3717_v53 = vpop.eup %3716 }
 0xaab   :  { %v1139_v50 = vmul.f32 %v3717_v53, %v1137_v60  ;;  %v1125_v22 = vsel %vm1124_vm1, %v3715_v32, %v1121_v23  ;;  %vm1144_vm4 = vweird.f32 %v3717_v53  ;;  %v1153_v32 = vld [vmem:[#allocation4] sm:$0xff]  ;;  %v7853_v60 = vld [vmem:[#allocation12_spill] sm:$0xff] }
 0xaac   :  { %v5747_v62 = vsel %vm1127_vm2, %v1129_v13, %v1125_v22  ;;  %vm1145_vm6 = vmor %vm1143_vm5, %vm1144_vm4  ;;  %v7851_v22 = vld [vmem:[#allocation10_spill] sm:$0xff]  ;;  %v7860_v13 = vld [vmem:[#allocation32_spill] sm:$0xff] }
 0xaad   :  { %v1140_v1 = vsub.f32 1.0, %v1139_v50  ;;  %v1132_v48 = vmul.f32 2.0, %v5747_v62  ;;  %v7856_v50 = vld [vmem:[#allocation20_spill] sm:$0xff] }
 0xaaf   :  { %v1141_v21 = vmul.f32 %v3717_v53, %v1140_v1  ;;  %v3540_v43 = vadd.f32 -1.0, %v1132_v48  ;;  %v7850_v48 = vld [vmem:[#allocation9_spill] sm:$0xff]  ;;  %v7861_v1 = vld [vmem:[#allocation42_spill] sm:$0xff] }
 0xab1   :  { %v1142_v20 = vadd.f32 %v3717_v53, %v1141_v21  ;;  %1186 = vrot.lane.b32.xlu0 %v3540_v43, %s4252_s13  ;;  %v7849_v21 = vld [vmem:[#allocation8_spill] sm:$0xff]  ;;  %v3538_v43 = vmul.f32 -1.442695, %v1089_v36 }
 0xab3   :  { %v1146_v45 = vsel %vm1145_vm6, %v3717_v53, %v1142_v20  ;;  %v7852_v20 = vld [vmem:[#allocation11_spill] sm:$0xff]  ;;  %v7855_v53 = vld [vmem:[#allocation18_spill] sm:$0xff]  ;;  %3718 = vpow2.f32 %v3538_v43 }
 0xab4   :  { %v1151_v23 = vsel %vm1148_vm7, %v1150_v57, %v1146_v45 }
 0xab5   :  { %v1154_v7 = vmul.f32 %v1153_v32, %v1151_v23 }
 0xab7   :  { %3542 = vmatmul.msk.f32.vlgmr.msrb.gmra.mxu1 %vm318_vm9, %v1154_v7  ;;  %1212 = vst.msk [vmem:[#allocation4] sm:$0xff] %vm318_vm9, %v1154_v7 }
 0xab8   :  { %1426 = vmatpush.msrb.mxu1 %v5265_v17  ;;  %v7857_v17 = vld [vmem:[#allocation22_spill] sm:$0xff] }
 0xab9   :  { %v3719_v57 = vpop.eup %3718 }
 0xaba   :  { %1427 = vmatpush.msrb.mxu1 %v5271_v26  ;;  %v7858_v26 = vld [vmem:[#allocation25_spill] sm:$0xff]  ;;  %v1100_v45 = vadd.f32 1.0, %v3719_v57 }
 0xabc   :  { %1428 = vmatpush.msrb.mxu1 %v5277_v28  ;;  %v7859_v28 = vld [vmem:[#allocation29_spill] sm:$0xff]  ;;  %3720 = vrcp.f32 %v1100_v45  ;;  %vm1107_vm10 = vweird.f32 %v1100_v45 }
 0xabe   :  { %1429 = vmatpush.msrb.mxu1 %v7849_v21 }
 0xac0   :  { %1430 = vmatpush.msrb.mxu1 %v7850_v48 }
 0xac2   :  { %1431 = vmatpush.msrb.mxu1 %v7851_v22  ;;  %v3721_v23 = vpop.eup %3720  ;;  %v1113_v22 = vand.u32 2147483648, %v1100_v45 }
 0xac3   :  { %v1103_v32 = vmul.f32 %v3721_v23, %v1100_v45  ;;  %vm1108_vm8 = vweird.f32 %v3721_v23 }
 0xac4   :  { %1432 = vmatpush.msrb.mxu1 %v7852_v20  ;;  %v1111_v20 = vand.u32 2147483647, %v1100_v45  ;;  %vm1109_vm11 = vmor %vm1107_vm10, %vm1108_vm8 }
 0xac5   :  { %v1104_v7 = vsub.f32 1.0, %v1103_v32  ;;  %v5785_v32 = vld [vmem:[%s7609_s4 + $0x268] sm:$0xff] }
 0xac6   :  { %1433 = vmatpush.msrb.mxu1 %v7853_v60  ;;  %vm1112_vm12 = vcmp.eq.f32.partialorder %v1111_v20, 8.507059e+37  ;;  %v7865_v20 = vld [vmem:[#allocation50_spill] sm:$0xff] }
 0xac7   :  { %v1105_v21 = vmul.f32 %v3721_v23, %v1104_v7 }
 0xac8   :  { %1434 = vmatpush.msrb.mxu1 %v7854_v14  ;;  %v1114_v14 = vor.u32 1.1754944e-38, %v1113_v22  ;;  %v5886_v22 = vld [vmem:[%s7609_s4 + $0x38] sm:$0xff] }
 0xac9   :  { %v1106_v48 = vadd.f32 %v3721_v23, %v1105_v21  ;;  %v5801_v21 = vld [vmem:[%s7609_s4 + $0x218] sm:$0xff] }
 0xaca   :  { %1435 = vmatpush.msrb.mxu1 %v7855_v53 }
 0xacb   :  { %v1110_v60 = vsel %vm1109_vm11, %v3721_v23, %v1106_v48  ;;  %v7864_v48 = vld [vmem:[#allocation48_spill] sm:$0xff] }
 0xacc   :  { %1436 = vmatpush.msrb.mxu1 %v7856_v50  ;;  %v1115_v6 = vsel %vm1112_vm12, %v1114_v14, %v1110_v60  ;;  %v5893_v60 = vld [vmem:[%s7609_s4 + $0x10] sm:$0xff]  ;;  %v7866_v14 = vld [vmem:[#allocation24_spill] sm:$0xff] }
 0xace   :  { %1437 = vmatpush.msrb.mxu1 %v7857_v17 }
 0xad0   :  { %1438 = vmatpush.msrb.mxu1 %v7858_v26 }
 0xad2   :  { %1439 = vmatpush.msrb.mxu1 %v7859_v28  ;;  %v1182_v28 = vpop.permute.xlu1 %1181 }
 0xad4   :  { %1440 = vmatpush.msrb.mxu1 %v7860_v13 }
 0xad6   :  { %1441 = vmatpush.msrb.mxu1 %v7861_v1  ;;  %v1184_v1 = vmul.f32 %v1182_v28, %v1115_v6 }
 0xb23   :  { %v1187_v53 = vpop.permute.xlu0 %1186 }
 0xb24   :  { %v1189_v50 = vmul.f32 %v1187_v53, %v1115_v6  ;;  %v1066_v53 = vpop.f32.mrf.mxu3 }
 0xb26   :  { %1191 = vrot.lane.b32.xlu2 %v1189_v50, %s4252_s13  ;;  %v3536_v50 = vld [vmem:[%s7605_s0 + $0x68] sm:$0xff] }
 0xb27   :  { %v1092_v28 = vadd.f32 %v3536_v50, %v1066_v53 }
 0xb34   :  { %v1175_v17 = vpop.f32.mrf.mxu1 }
 0xb35   :  { %3722 = vtanh.f32 %v1175_v17 }
 0xb3b   :  { %v3723_v26 = vpop.eup %3722 }
 0xb3c   :  { %1196 = vrot.lane.b32.xlu0 %v3723_v26, %s4252_s13 }
 0xb80   :  { %v1192_v13 = vpop.permute.xlu2 %1191 }
 0xb81   :  { %v1194_v3 = vadd.f32 %v1192_v13, %v1184_v1 }
 0xbae   :  { %v1197_v36 = vpop.permute.xlu0 %1196 }
 0xbaf   :  { %v1199_v43 = vadd.f32 %v1197_v36, %v1194_v3 }
 0xbb1   :  { %3724 = vtanh.f32 %v1199_v43 }
 0xbb7   :  { %v3725_v57 = vpop.eup %3724 }
 0xbb8   :  { %1202 = vrot.lane.b32.xlu1 %v3725_v57, %s4252_s13 }
 0xbc0   :  { %1208 = vrot.lane.b32.xlu1 %v1199_v43, %s4252_s13 }
 0xc2a   :  { %v1203_v45 = vpop.permute.xlu1 %1202 }
 0xc2b   :  { %v1205_v23 = vmul.f32 %v1203_v45, %v5747_v62  ;;  %v5793_v62 = vld [vmem:[%s7609_s4 + $0x240] sm:$0xff] }
 0xc2d   :  { %3543 = vmatmul.msk.f32.vlgmr.msrb.gmra.mxu2 %vm370_vm14, %v1205_v23  ;;  %3544 = vmatmul.msk.f32.vlgmr.msrb.gmra.mxu3 %vm370_vm14, %v1205_v23  ;;  %1206 = vst.msk [vmem:[#allocation2] sm:$0xff] %vm370_vm14, %v1205_v23 }
 0xc2e   :  { %3545 = vmatmul.msk.f32.vlgmr.msra.gmra.mxu1 %vm370_vm14, %v1205_v23  ;;  %1446 = vmatpush.msrb.mxu2 %v5785_v32 }
 0xc2f   :  { %1486 = vmatpush.msrb.mxu3 %v5375_v31  ;;  %1589 = vmatpush.msra.mxu1 %v5381_v35  ;;  %v5809_v31 = vld [vmem:[%s7609_s4 + $0x1f0] sm:$0xff]  ;;  %v5816_v35 = vld [vmem:[%s7609_s4 + $0x1c8] sm:$0xff] }
 0xc30   :  { %1447 = vmatpush.msrb.mxu2 %v5793_v62 }
 0xc31   :  { %1487 = vmatpush.msrb.mxu3 %v5388_v49  ;;  %1590 = vmatpush.msra.mxu1 %v5394_v39  ;;  %v5823_v49 = vld [vmem:[%s7609_s4 + $0x1a0] sm:$0xff]  ;;  %v5830_v39 = vld [vmem:[%s7609_s4 + $0x178] sm:$0xff] }
 0xc32   :  { %v1209_v7 = vpop.permute.xlu1 %1208  ;;  %1448 = vmatpush.msrb.mxu2 %v5801_v21 }
 0xc33   :  { %1211 = vst.msk [vmem:[#allocation3] sm:$0xff] %vm370_vm14, %v1209_v7  ;;  %1488 = vmatpush.msrb.mxu3 %v5402_v51  ;;  %v5837_v51 = vld [vmem:[%s7609_s4 + $0x150] sm:$0xff] }
 0xc34   :  { %1449 = vmatpush.msrb.mxu2 %v5809_v31 }
 0xc35   :  { %1489 = vmatpush.msrb.mxu3 %v5409_v59  ;;  %v5844_v59 = vld [vmem:[%s7609_s4 + $0x128] sm:$0xff] }
 0xc36   :  { %1450 = vmatpush.msrb.mxu2 %v5816_v35 }
 0xc37   :  { %1490 = vmatpush.msrb.mxu3 %v5416_v52  ;;  %v5851_v52 = vld [vmem:[%s7609_s4 + $0x100] sm:$0xff] }
 0xc38   :  { %1451 = vmatpush.msrb.mxu2 %v5823_v49 }
 0xc39   :  { %1491 = vmatpush.msrb.mxu3 %v5423_v24  ;;  %v5858_v24 = vld [vmem:[%s7609_s4 + $0xd8] sm:$0xff] }
 0xc3a   :  { %1452 = vmatpush.msrb.mxu2 %v5830_v39 }
 0xc3b   :  { %1492 = vmatpush.msrb.mxu3 %v5430_v27  ;;  %v5865_v27 = vld [vmem:[%s7609_s4 + $0xb0] sm:$0xff] }
 0xc3c   :  { %1453 = vmatpush.msrb.mxu2 %v5837_v51 }
 0xc3d   :  { %1493 = vmatpush.msrb.mxu3 %v5437_v29  ;;  %v7862_v29 = vld [vmem:[#allocation44_spill] sm:$0xff] }
 0xc3e   :  { %1454 = vmatpush.msrb.mxu2 %v5844_v59 }
 0xc3f   :  { %1494 = vmatpush.msrb.mxu3 %v5444_v33  ;;  %v5872_v33 = vld [vmem:[%s7609_s4 + $0x88] sm:$0xff] }
 0xc40   :  { %1455 = vmatpush.msrb.mxu2 %v5851_v52 }
 0xc41   :  { %1495 = vmatpush.msrb.mxu3 %v5451_v37  ;;  %v7863_v37 = vld [vmem:[#allocation46_spill] sm:$0xff] }
 0xc42   :  { %1456 = vmatpush.msrb.mxu2 %v5858_v24 }
 0xc43   :  { %1496 = vmatpush.msrb.mxu3 %v5458_v41  ;;  %v5879_v41 = vld [vmem:[%s7609_s4 + $0x60] sm:$0xff] }
 0xc44   :  { %1457 = vmatpush.msrb.mxu2 %v5865_v27 }
 0xc45   :  { %1497 = vmatpush.msrb.mxu3 %v7862_v29 }
 0xc46   :  { %1458 = vmatpush.msrb.mxu2 %v5872_v33 }
 0xc47   :  { %1498 = vmatpush.msrb.mxu3 %v7863_v37 }
 0xc48   :  { %1459 = vmatpush.msrb.mxu2 %v5879_v41 }
 0xc49   :  { %1499 = vmatpush.msrb.mxu3 %v7864_v48 }
 0xc4a   :  { %1460 = vmatpush.msrb.mxu2 %v5886_v22 }
 0xc4b   :  { %1500 = vmatpush.msrb.mxu3 %v7865_v20 }
 0xc4c   :  { %1461 = vmatpush.msrb.mxu2 %v5893_v60 }
 0xc4d   :  { %1501 = vmatpush.msrb.mxu3 %v7866_v14 }
 0xcab   :  { %v1273_v6 = vpop.f32.mrf.mxu1 }
 0xcac   :  { %v1278_v17 = vadd.f32 %v1273_v6, %v5744_v40 }
 0xcae   :  { %v3549_v26 = vmul.f32 -1.442695, %v1278_v17 }
 0xcb0   :  { %3726 = vpow2.f32 %v3549_v26  ;;  %v1253_v13 = vpop.f32.mrf.mxu3 }
 0xcb1   :  { %v1277_v1 = vadd.f32 %v1253_v13, %v1092_v28  ;;  %v1338_v28 = vld [vmem:[#allocation4] sm:$0xff] }
 0xcb3   :  { %v3547_v3 = vmul.f32 -1.442695, %v1277_v1 }
 0xcb5   :  { %3728 = vpow2.f32 %v3547_v3 }
 0xcb6   :  { %v3727_v36 = vpop.eup %3726 }
 0xcb7   :  { %v1322_v43 = vadd.f32 1.0, %v3727_v36 }
 0xcb9   :  { %3730 = vrcp.f32 %v1322_v43  ;;  %v1334_v37 = vand.u32 2147483648, %v1322_v43  ;;  %v1332_v40 = vand.u32 2147483647, %v1322_v43  ;;  %vm1328_vm0 = vweird.f32 %v1322_v43 }
 0xcbb   :  { %v3729_v57 = vpop.eup %3728  ;;  %v1335_v6 = vor.u32 1.1754944e-38, %v1334_v37  ;;  %vm1333_vm2 = vcmp.eq.f32.partialorder %v1332_v40, 8.507059e+37  ;;  %v3535_v40 = vld [vmem:[%s7605_s0 + $0x60] sm:$0xff] }
 0xcbc   :  { %v1286_v45 = vadd.f32 1.0, %v3729_v57 }
 0xcbe   :  { %3732 = vrcp.f32 %v1286_v45  ;;  %v1313_v13 = vand.u32 2147483648, %v1286_v45  ;;  %v1311_v36 = vand.u32 2147483647, %v1286_v45  ;;  %vm1307_vm5 = vweird.f32 %v1286_v45 }
 0xcbf   :  { %v3731_v23 = vpop.eup %3730 }
 0xcc0   :  { %v1324_v7 = vmul.f32 %v3731_v23, %v1322_v43  ;;  %vm1329_vm15 = vweird.f32 %v3731_v23  ;;  %v1314_v43 = vor.u32 1.1754944e-38, %v1313_v13  ;;  %vm1312_vm7 = vcmp.eq.f32.partialorder %v1311_v36, 8.507059e+37  ;;  %v5926_v13 = vld [vmem:[%s7610_s5 + $0xd8] sm:$0xff]  ;;  %v5938_v36 = vld [vmem:[%s7610_s5 + $0x88] sm:$0xff] }
 0xcc1   :  { %vm1330_vm1 = vmor %vm1328_vm0, %vm1329_vm15  ;;  %7868 = vst [vmem:[#allocation17_spill] sm:$0xff] %v5938_v36 }
 0xcc2   :  { %v1325_v29 = vsub.f32 1.0, %v1324_v7 }
 0xcc4   :  { %v1326_v48 = vmul.f32 %v3731_v23, %v1325_v29  ;;  %v3733_v20 = vpop.eup %3732 }
 0xcc5   :  { %v1303_v14 = vmul.f32 %v3733_v20, %v1286_v45  ;;  %vm1308_vm4 = vweird.f32 %v3733_v20 }
 0xcc6   :  { %v1327_v53 = vadd.f32 %v3731_v23, %v1326_v48  ;;  %vm1309_vm6 = vmor %vm1307_vm5, %vm1308_vm4  ;;  %v1046_v48 = vpop.f32.mrf.mxu2 }
 0xcc7   :  { %v1304_v17 = vsub.f32 1.0, %v1303_v14 }
 0xcc8   :  { %v1331_v50 = vsel %vm1330_vm1, %v3731_v23, %v1327_v53  ;;  %v1091_v53 = vadd.f32 %v3535_v40, %v1046_v48 }
 0xcc9   :  { %v1336_v26 = vsel %vm1333_vm2, %v1335_v6, %v1331_v50  ;;  %v1305_v3 = vmul.f32 %v3733_v20, %v1304_v17 }
 0xcca   :  { %v1339_v1 = vmul.f32 %v1338_v28, %v1336_v26  ;;  %v5914_v26 = vld [vmem:[%s7610_s5 + $0x128] sm:$0xff]  ;;  %v5920_v28 = vld [vmem:[%s7610_s5 + $0x100] sm:$0xff] }
 0xccb   :  { %v1306_v57 = vadd.f32 %v3733_v20, %v1305_v3 }
 0xccc   :  { %1341 = vrot.lane.b32.xlu2 %v1339_v1, %s4253_s11  ;;  %1395 = vst.msk [vmem:[#allocation4] sm:$0xff] %vm561_vm3, %v1339_v1  ;;  %v5932_v1 = vld [vmem:[%s7610_s5 + $0xb0] sm:$0xff] }
 0xccd   :  { %v1310_v7 = vsel %vm1309_vm6, %v3733_v20, %v1306_v57  ;;  %7867 = vst [vmem:[#allocation31_spill] sm:$0xff] %v5932_v1  ;;  %v5944_v57 = vld [vmem:[%s7610_s5 + $0x60] sm:$0xff] }
 0xcce   :  { %v5903_v23 = vsel %vm1312_vm7, %v1314_v43, %v1310_v7  ;;  %v1233_v14 = vpop.f32.mrf.mxu2  ;;  %7869 = vst [vmem:[#allocation34_spill] sm:$0xff] %v5944_v57  ;;  %v5950_v7 = vld [vmem:[%s7610_s5 + $0x38] sm:$0xff] }
 0xccf   :  { %v1317_v29 = vmul.f32 2.0, %v5903_v23  ;;  %v1276_v6 = vadd.f32 %v1233_v14, %v1091_v53  ;;  %7870 = vst [vmem:[#allocation19_spill] sm:$0xff] %v5950_v7 }
 0xcd1   :  { %v3548_v37 = vadd.f32 -1.0, %v1317_v29  ;;  %v3546_v45 = vmul.f32 -1.442695, %v1276_v6  ;;  %v5956_v29 = vld [vmem:[%s7610_s5 + $0x10] sm:$0xff] }
 0xcd2   :  { %7871 = vst [vmem:[#allocation36_spill] sm:$0xff] %v5956_v29 }
 0xcd3   :  { %1369 = vrot.lane.b32.xlu0 %v3548_v37, %s4252_s13  ;;  %3734 = vpow2.f32 %v3546_v45 }
 0xcd9   :  { %v3735_v50 = vpop.eup %3734 }
 0xcda   :  { %v1285_v20 = vadd.f32 1.0, %v3735_v50 }
 0xcdc   :  { %3736 = vrcp.f32 %v1285_v20  ;;  %v1298_v14 = vand.u32 2147483648, %v1285_v20  ;;  %vm1292_vm10 = vweird.f32 %v1285_v20  ;;  %v1296_v53 = vand.u32 2147483647, %v1285_v20 }
 0xcde   :  { %v1299_v45 = vor.u32 1.1754944e-38, %v1298_v14  ;;  %vm1297_vm12 = vcmp.eq.f32.partialorder %v1296_v53, 8.507059e+37  ;;  %v3555_v53 = vld [vmem:[%s7605_s0 + $0x98] sm:$0xff] }
 0xce2   :  { %v3737_v3 = vpop.eup %3736 }
 0xce3   :  { %v1288_v43 = vmul.f32 %v3737_v3, %v1285_v20  ;;  %vm1293_vm8 = vweird.f32 %v3737_v3 }
 0xce4   :  { %vm1294_vm11 = vmor %vm1292_vm10, %vm1293_vm8 }
 0xce5   :  { %v1289_v37 = vsub.f32 1.0, %v1288_v43 }
 0xce7   :  { %v1290_v48 = vmul.f32 %v3737_v3, %v1289_v37  ;;  %v1366_v37 = vld [vmem:[#allocation3] sm:$0xff] }
 0xce9   :  { %v1291_v40 = vadd.f32 %v3737_v3, %v1290_v48 }
 0xceb   :  { %v1295_v6 = vsel %vm1294_vm11, %v3737_v3, %v1291_v40 }
 0xd26   :  { %v1342_v17 = vpop.permute.xlu2 %1341 }
 0xd27   :  { %3550 = vmatmul.msk.f32.vlgmr.msra.gmra.mxu2 %vm318_vm9, %v1342_v17  ;;  %v1300_v17 = vsel %vm1297_vm12, %v1299_v45, %v1295_v6 }
 0xd28   :  { %1641 = vmatpush.msra.mxu2 %v5914_v26  ;;  %v1367_v48 = vmul.f32 %v1366_v37, %v1300_v17 }
 0xd2a   :  { %1642 = vmatpush.msra.mxu2 %v5920_v28 }
 0xd2c   :  { %1643 = vmatpush.msra.mxu2 %v5926_v13 }
 0xd2e   :  { %1644 = vmatpush.msra.mxu2 %v5932_v1 }
 0xd30   :  { %1645 = vmatpush.msra.mxu2 %v5938_v36 }
 0xd32   :  { %1646 = vmatpush.msra.mxu2 %v5944_v57 }
 0xd34   :  { %1647 = vmatpush.msra.mxu2 %v5950_v7 }
 0xd36   :  { %1648 = vmatpush.msra.mxu2 %v5956_v29 }
 0xd45   :  { %v1370_v50 = vpop.permute.xlu0 %1369 }
 0xd46   :  { %v1372_v7 = vmul.f32 %v1370_v50, %v1300_v17 }
 0xd48   :  { %1374 = vrot.lane.b32.xlu2 %v1372_v7, %s4252_s13 }
 0xda2   :  { %v1375_v43 = vpop.permute.xlu2 %1374 }
 0xda3   :  { %v1377_v29 = vadd.f32 %v1375_v43, %v1367_v48 }
 0xdaa   :  { %v1362_v57 = vpop.f32.mrf.mxu2 }
 0xdab   :  { %3738 = vtanh.f32 %v1362_v57 }
 0xdb1   :  { %v3739_v36 = vpop.eup %3738 }
 0xdb2   :  { %1379 = vrot.lane.b32.xlu0 %v3739_v36, %s4252_s13 }
 0xe24   :  { %v1380_v1 = vpop.permute.xlu0 %1379 }
 0xe25   :  { %v1382_v20 = vadd.f32 %v1380_v1, %v1377_v29  ;;  %v5971_v1 = vld [vmem:[%s7611_s6 + $0x18] sm:$0xff]  ;;  %v5991_v29 = vld [vmem:[%s7609_s4 + $0x230] sm:$0xff] }
 0xe27   :  { %3740 = vtanh.f32 %v1382_v20  ;;  %1394 = vst.msk [vmem:[#allocation3] sm:$0xff] %vm558_vm13, %v1382_v20 }
 0xe2d   :  { %v3741_v3 = vpop.eup %3740 }
 0xe2e   :  { %1385 = vrot.lane.b32.xlu1 %v3741_v3, %s4252_s13  ;;  %v1596_v40 = vld [vmem:[#allocation3] sm:$0xff] }
 0xe36   :  { %1598 = vrot.lane.b32.xlu1 %v1596_v40, %s4252_s13 }
 0xea0   :  { %v1386_v7 = vpop.permute.xlu1 %1385 }
 0xea1   :  { %v1388_v57 = vmul.f32 %v1386_v7, %v5903_v23  ;;  %v5977_v23 = vld [vmem:[%s7609_s4 + $0x258] sm:$0xff] }
 0xea3   :  { %1390 = vrot.lane.b32.xlu2 %v1388_v57, %s4252_s13 }
 0xefd   :  { %v1391_v36 = vpop.permute.xlu2 %1390 }
 0xefe   :  { %1393 = vst.msk [vmem:[#allocation2] sm:$0xff] %vm558_vm13, %v1391_v36 }
 0xf05   :  { %v1399_v14 = vld [vmem:[#allocation2] sm:$0xff] }
 0xf06   :  { %1422 = vmatmul.f32.vlgmr.msra.gmra.mxu3 %v1399_v14  ;;  %1442 = vmatmul.f32.vlgmr.msrb.gmra.mxu1 %v1399_v14  ;;  %1398 = vst [vmem:[#allocation5 + $0x10] sm:$0xff] %v1399_v14 }
 0xf07   :  { %1462 = vmatmul.f32.vlgmr.msrb.gmra.mxu2 %v1399_v14  ;;  %1482 = vmatmul.f32.vlgmr.msra.gmra.mxu0 %v1399_v14 }
 0xf08   :  { %1681 = vmatpush.msrb.mxu1 %v5529_v9  ;;  %1776 = vmatpush.msrb.mxu2 %v5971_v1  ;;  %v5985_v9 = vld [vmem:[%s7611_s6 + $0x10] sm:$0xff] }
 0xf09   :  { %1823 = vmatpush.msra.mxu0 %v5977_v23  ;;  %1883 = vmatpush.msra.mxu3 %v5537_v47  ;;  %v5999_v47 = vld [vmem:[%s7609_s4 + $0x208] sm:$0xff] }
 0xf0a   :  { %1682 = vmatpush.msrb.mxu1 %v5543_v63  ;;  %1777 = vmatpush.msrb.mxu2 %v5985_v9  ;;  %v6007_v63 = vld [vmem:[%s7609_s4 + $0x1e0] sm:$0xff] }
 0xf0b   :  { %1824 = vmatpush.msra.mxu0 %v5991_v29  ;;  %1884 = vmatpush.msra.mxu3 %v5551_v18  ;;  %v6015_v18 = vld [vmem:[%s7609_s4 + $0x1b8] sm:$0xff] }
 0xf0c   :  { %1683 = vmatpush.msrb.mxu1 %v5557_v12  ;;  %v6023_v12 = vld [vmem:[%s7609_s4 + $0x190] sm:$0xff] }
 0xf0d   :  { %1825 = vmatpush.msra.mxu0 %v5999_v47  ;;  %1885 = vmatpush.msra.mxu3 %v5564_v19  ;;  %v6031_v19 = vld [vmem:[%s7609_s4 + $0x168] sm:$0xff] }
 0xf0e   :  { %1502 = vmatmul.f32.vlgmr.msrb.gmra.mxu3 %v1399_v14  ;;  %1684 = vmatpush.msrb.mxu1 %v5570_v15  ;;  %v6039_v15 = vld [vmem:[%s7609_s4 + $0x140] sm:$0xff] }
 0xf0f   :  { %1826 = vmatpush.msra.mxu0 %v6007_v63  ;;  %1886 = vmatpush.msra.mxu3 %v5577_v25  ;;  %v6046_v25 = vld [vmem:[%s7609_s4 + $0x118] sm:$0xff] }
 0xf10   :  { %1685 = vmatpush.msrb.mxu1 %v5583_v55  ;;  %v6053_v55 = vld [vmem:[%s7609_s4 + $0xf0] sm:$0xff] }
 0xf11   :  { %1827 = vmatpush.msra.mxu0 %v6015_v18  ;;  %1887 = vmatpush.msra.mxu3 %v5590_v30  ;;  %v6060_v30 = vld [vmem:[%s7609_s4 + $0xc8] sm:$0xff] }
 0xf12   :  { %1686 = vmatpush.msrb.mxu1 %v5596_v54  ;;  %v6067_v54 = vld [vmem:[%s7609_s4 + $0xa0] sm:$0xff] }
 0xf13   :  { %1828 = vmatpush.msra.mxu0 %v6023_v12  ;;  %1888 = vmatpush.msra.mxu3 %v5603_v34  ;;  %v6074_v34 = vld [vmem:[%s7609_s4 + $0x78] sm:$0xff] }
 0xf14   :  { %1687 = vmatpush.msrb.mxu1 %v5609_v0  ;;  %v6081_v0 = vld [vmem:[%s7609_s4 + $0x50] sm:$0xff] }
 0xf15   :  { %1829 = vmatpush.msra.mxu0 %v6031_v19  ;;  %1889 = vmatpush.msra.mxu3 %v5616_v38  ;;  %v6088_v38 = vld [vmem:[%s7609_s4 + $0x28] sm:$0xff] }
 0xf16   :  { %1688 = vmatpush.msrb.mxu1 %v5622_v58  ;;  %v6095_v58 = vld [vmem:[%s7609_s4] sm:$0xff] }
 0xf17   :  { %1830 = vmatpush.msra.mxu0 %v6039_v15  ;;  %1890 = vmatpush.msra.mxu3 %v5629_v42  ;;  %v7872_v42 = vld [vmem:[#allocation13_spill] sm:$0xff] }
 0xf19   :  { %1831 = vmatpush.msra.mxu0 %v6046_v25  ;;  %1891 = vmatpush.msra.mxu3 %v5636_v11  ;;  %v7873_v11 = vld [vmem:[#allocation27_spill] sm:$0xff] }
 0xf1b   :  { %1832 = vmatpush.msra.mxu0 %v6053_v55  ;;  %1892 = vmatpush.msra.mxu3 %v5643_v44  ;;  %v7874_v44 = vld [vmem:[#allocation14_spill] sm:$0xff] }
 0xf1d   :  { %1833 = vmatpush.msra.mxu0 %v6060_v30  ;;  %1893 = vmatpush.msra.mxu3 %v5650_v61  ;;  %v7875_v61 = vld [vmem:[#allocation28_spill] sm:$0xff] }
 0xf1f   :  { %1834 = vmatpush.msra.mxu0 %v6067_v54  ;;  %1894 = vmatpush.msra.mxu3 %v5657_v46  ;;  %v7876_v46 = vld [vmem:[#allocation15_spill] sm:$0xff] }
 0xf21   :  { %1835 = vmatpush.msra.mxu0 %v6074_v34  ;;  %1895 = vmatpush.msra.mxu3 %v5664_v2  ;;  %v3552_v2 = vld [vmem:[%s7605_s0 + $0x80] sm:$0xff] }
 0xf23   :  { %1836 = vmatpush.msra.mxu0 %v6081_v0  ;;  %1896 = vmatpush.msra.mxu3 %v5671_v5 }
 0xf25   :  { %1837 = vmatpush.msra.mxu0 %v6088_v38  ;;  %1897 = vmatpush.msra.mxu3 %v5678_v8 }
 0xf27   :  { %1838 = vmatpush.msra.mxu0 %v6095_v58  ;;  %1898 = vmatpush.msra.mxu3 %v5685_v10 }
 0xf29   :  { %2078 = vmatpush.msrb.mxu3 %v5691_v4 }
 0xf2b   :  { %2079 = vmatpush.msrb.mxu3 %v5697_v56 }
 0xf2d   :  { %2080 = vmatpush.msrb.mxu3 %v5703_v16 }
 0xf2f   :  { %2081 = vmatpush.msrb.mxu3 %v7872_v42 }
 0xf31   :  { %2082 = vmatpush.msrb.mxu3 %v7873_v11 }
 0xf33   :  { %2083 = vmatpush.msrb.mxu3 %v7874_v44 }
 0xf35   :  { %2084 = vmatpush.msrb.mxu3 %v7875_v61 }
 0xf37   :  { %2085 = vmatpush.msrb.mxu3 %v7876_v46 }
 0xf83   :  { %v1443_v5 = vpop.f32.mrf.mxu1 }
 0xf84   :  { %v1507_v8 = vadd.f32 %v3552_v2, %v1443_v5 }
 0xf86   :  { %v3557_v10 = vmul.f32 -1.442695, %v1507_v8 }
 0xf88   :  { %3742 = vpow2.f32 %v3557_v10 }
 0xf89   :  { %v6110_v4 = vpop.f32.mrf.mxu3 }
 0xf8e   :  { %v3743_v56 = vpop.eup %3742 }
 0xf8f   :  { %v1518_v16 = vadd.f32 1.0, %v3743_v56 }
 0xf91   :  { %3744 = vrcp.f32 %v1518_v16  ;;  %v1503_v6 = vpop.f32.mrf.mxu3  ;;  %v1545_v48 = vand.u32 2147483648, %v1518_v16  ;;  %v1543_v40 = vand.u32 2147483647, %v1518_v16  ;;  %vm1539_vm0 = vweird.f32 %v1518_v16 }
 0xf92   :  { %v6115_v45 = vadd.f32 %v3555_v53, %v1503_v6 }
 0xf93   :  { %v1546_v36 = vor.u32 1.1754944e-38, %v1545_v48  ;;  %vm1544_vm2 = vcmp.eq.f32.partialorder %v1543_v40, 8.507059e+37  ;;  %v6139_v48 = vld [vmem:[%s7609_s4 + $0x210] sm:$0xff]  ;;  %v6157_v40 = vld [vmem:[%s7609_s4 + $0x198] sm:$0xff] }
 0xf94   :  { %v3559_v50 = vmul.f32 -1.442695, %v6115_v45 }
 0xf96   :  { %3746 = vpow2.f32 %v3559_v50  ;;  %v1570_v50 = vld [vmem:[#allocation4] sm:$0xff] }
 0xf97   :  { %v3745_v17 = vpop.eup %3744 }
 0xf98   :  { %v1535_v43 = vmul.f32 %v3745_v17, %v1518_v16  ;;  %vm1540_vm15 = vweird.f32 %v3745_v17 }
 0xf99   :  { %vm1541_vm1 = vmor %vm1539_vm0, %vm1540_vm15 }
 0xf9a   :  { %v1536_v37 = vsub.f32 1.0, %v1535_v43  ;;  %v6127_v43 = vld [vmem:[%s7609_s4 + $0x260] sm:$0xff] }
 0xf9c   :  { %v3747_v20 = vpop.eup %3746  ;;  %v1537_v3 = vmul.f32 %v3745_v17, %v1536_v37  ;;  %v6133_v37 = vld [vmem:[%s7609_s4 + $0x238] sm:$0xff] }
 0xf9d   :  { %v1554_v7 = vadd.f32 1.0, %v3747_v20  ;;  %v6145_v20 = vld [vmem:[%s7609_s4 + $0x1e8] sm:$0xff] }
 0xf9e   :  { %v1538_v57 = vadd.f32 %v3745_v17, %v1537_v3  ;;  %v6151_v3 = vld [vmem:[%s7609_s4 + $0x1c0] sm:$0xff] }
 0xf9f   :  { %3748 = vrcp.f32 %v1554_v7  ;;  %v1566_v5 = vand.u32 2147483648, %v1554_v7  ;;  %v1564_v10 = vand.u32 2147483647, %v1554_v7  ;;  %vm1560_vm5 = vweird.f32 %v1554_v7 }
 0xfa0   :  { %v1542_v14 = vsel %vm1541_vm1, %v3745_v17, %v1538_v57  ;;  %v6169_v57 = vld [vmem:[%s7609_s4 + $0x148] sm:$0xff] }
 0xfa1   :  { %v6118_v42 = vsel %vm1544_vm2, %v1546_v36, %v1542_v14  ;;  %v1567_v16 = vor.u32 1.1754944e-38, %v1566_v5  ;;  %vm1565_vm7 = vcmp.eq.f32.partialorder %v1564_v10, 8.507059e+37  ;;  %v6175_v36 = vld [vmem:[%s7609_s4 + $0x120] sm:$0xff]  ;;  %v6181_v14 = vld [vmem:[%s7609_s4 + $0xf8] sm:$0xff]  ;;  %v6217_v5 = vld [vmem:[%s7609_s4 + $0x8] sm:$0xff] }
 0xfa2   :  { %v1549_v11 = vmul.f32 2.0, %v6118_v42  ;;  %7877 = vst [vmem:[#allocation21_spill] sm:$0xff] %v6175_v36 }
 0xfa3   :  { %7878 = vst [vmem:[#allocation38_spill] sm:$0xff] %v6181_v14 }
 0xfa4   :  { %v3558_v44 = vadd.f32 -1.0, %v1549_v11  ;;  %v6187_v11 = vld [vmem:[%s7609_s4 + $0xd0] sm:$0xff]  ;;  %7884 = vst [vmem:[#allocation37_spill] sm:$0xff] %v6217_v5 }
 0xfa5   :  { %v3749_v61 = vpop.eup %3748  ;;  %7879 = vst [vmem:[#allocation23_spill] sm:$0xff] %v6187_v11 }
 0xfa6   :  { %v1556_v46 = vmul.f32 %v3749_v61, %v1554_v7  ;;  %1603 = vrot.lane.b32.xlu0 %v3558_v44, %s4252_s13  ;;  %vm1561_vm4 = vweird.f32 %v3749_v61  ;;  %v6163_v7 = vld [vmem:[%s7609_s4 + $0x170] sm:$0xff]  ;;  %v6193_v44 = vld [vmem:[%s7609_s4 + $0xa8] sm:$0xff] }
 0xfa7   :  { %vm1562_vm6 = vmor %vm1560_vm5, %vm1561_vm4  ;;  %7880 = vst [vmem:[#allocation26_spill] sm:$0xff] %v6193_v44 }
 0xfa8   :  { %v1557_v2 = vsub.f32 1.0, %v1556_v46  ;;  %v6205_v46 = vld [vmem:[%s7609_s4 + $0x58] sm:$0xff] }
 0xfa9   :  { %7882 = vst [vmem:[#allocation33_spill] sm:$0xff] %v6205_v46 }
 0xfaa   :  { %v1558_v8 = vmul.f32 %v3749_v61, %v1557_v2  ;;  %v6211_v2 = vld [vmem:[%s7609_s4 + $0x30] sm:$0xff] }
 0xfab   :  { %7883 = vst [vmem:[#allocation35_spill] sm:$0xff] %v6211_v2 }
 0xfac   :  { %v1559_v56 = vadd.f32 %v3749_v61, %v1558_v8  ;;  %v3551_v8 = vld [vmem:[%s7605_s0 + $0x78] sm:$0xff] }
 0xfad   :  { %v1506_v10 = vadd.f32 %v3551_v8, %v6110_v4 }
 0xfae   :  { %v1563_v53 = vsel %vm1562_vm6, %v3749_v61, %v1559_v56  ;;  %v6199_v61 = vld [vmem:[%s7609_s4 + $0x80] sm:$0xff] }
 0xfaf   :  { %v1568_v6 = vsel %vm1565_vm7, %v1567_v16, %v1563_v53  ;;  %7881 = vst [vmem:[#allocation30_spill] sm:$0xff] %v6199_v61  ;;  %v3556_v56 = vmul.f32 -1.442695, %v1506_v10 }
 0xfb0   :  { %v1571_v17 = vmul.f32 %v1570_v50, %v1568_v6 }
 0xfb1   :  { %3750 = vpow2.f32 %v3556_v56 }
 0xfb2   :  { %3560 = vmatmul.msk.f32.vlgmr.msra.gmra.mxu1 %vm318_vm9, %v1571_v17  ;;  %1629 = vst.msk [vmem:[#allocation4] sm:$0xff] %vm318_vm9, %v1571_v17 }
 0xfb3   :  { %1843 = vmatpush.msra.mxu1 %v6127_v43 }
 0xfb5   :  { %1844 = vmatpush.msra.mxu1 %v6133_v37 }
 0xfb7   :  { %1845 = vmatpush.msra.mxu1 %v6139_v48  ;;  %v3751_v16 = vpop.eup %3750 }
 0xfb8   :  { %v1517_v53 = vadd.f32 1.0, %v3751_v16  ;;  %v1599_v16 = vpop.permute.xlu1 %1598 }
 0xfb9   :  { %1846 = vmatpush.msra.mxu1 %v6145_v20 }
 0xfba   :  { %3752 = vrcp.f32 %v1517_v53  ;;  %vm1524_vm10 = vweird.f32 %v1517_v53 }
 0xfbb   :  { %1847 = vmatpush.msra.mxu1 %v6151_v3 }
 0xfbd   :  { %1848 = vmatpush.msra.mxu1 %v6157_v40 }
 0xfbf   :  { %1849 = vmatpush.msra.mxu1 %v6163_v7 }
 0xfc0   :  { %v3753_v6 = vpop.eup %3752 }
 0xfc1   :  { %1850 = vmatpush.msra.mxu1 %v6169_v57  ;;  %v1520_v50 = vmul.f32 %v3753_v6, %v1517_v53  ;;  %vm1525_vm8 = vweird.f32 %v3753_v6 }
 0xfc2   :  { %vm1526_vm11 = vmor %vm1524_vm10, %vm1525_vm8 }
 0xfc3   :  { %1851 = vmatpush.msra.mxu1 %v6175_v36  ;;  %v1521_v17 = vsub.f32 1.0, %v1520_v50 }
 0xfc5   :  { %1852 = vmatpush.msra.mxu1 %v6181_v14 }
 0xfc7   :  { %1853 = vmatpush.msra.mxu1 %v6187_v11 }
 0xfc9   :  { %1854 = vmatpush.msra.mxu1 %v6193_v44 }
 0xfcb   :  { %1855 = vmatpush.msra.mxu1 %v6199_v61  ;;  %v1530_v61 = vand.u32 2147483648, %v1517_v53 }
 0xfcd   :  { %1856 = vmatpush.msra.mxu1 %v6205_v46  ;;  %v1531_v11 = vor.u32 1.1754944e-38, %v1530_v61 }
 0xfcf   :  { %1857 = vmatpush.msra.mxu1 %v6211_v2  ;;  %v1522_v2 = vmul.f32 %v3753_v6, %v1521_v17 }
 0xfd1   :  { %1858 = vmatpush.msra.mxu1 %v6217_v5  ;;  %v1523_v46 = vadd.f32 %v3753_v6, %v1522_v2  ;;  %v1528_v5 = vand.u32 2147483647, %v1517_v53 }
 0xfd3   :  { %v1527_v44 = vsel %vm1526_vm11, %v3753_v6, %v1523_v46  ;;  %vm1529_vm12 = vcmp.eq.f32.partialorder %v1528_v5, 8.507059e+37  ;;  %v6271_v5 = vld [vmem:[%s7609_s4 + $0x200] sm:$0xff]  ;;  %v1483_v6 = vpop.f32.mrf.mxu0 }
 0xfd4   :  { %v1532_v4 = vsel %vm1529_vm12, %v1531_v11, %v1527_v44  ;;  %v6256_v44 = vld [vmem:[%s7611_s6] sm:$0xff] }
 0xfd5   :  { %v1601_v50 = vmul.f32 %v1599_v16, %v1532_v4 }
0x1018   :  { %v1604_v14 = vpop.permute.xlu0 %1603 }
0x1019   :  { %v1606_v8 = vmul.f32 %v1604_v14, %v1532_v4 }
0x101b   :  { %1608 = vrot.lane.b32.xlu2 %v1606_v8, %s4252_s13 }
0x102f   :  { %v1592_v10 = vpop.f32.mrf.mxu1 }
0x1030   :  { %3754 = vtanh.f32 %v1592_v10 }
0x1036   :  { %v3755_v56 = vpop.eup %3754 }
0x1037   :  { %1613 = vrot.lane.b32.xlu0 %v3755_v56, %s4252_s13 }
0x1075   :  { %v1609_v2 = vpop.permute.xlu2 %1608 }
0x1076   :  { %v1611_v17 = vadd.f32 %v1609_v2, %v1601_v50 }
0x10a9   :  { %v1614_v36 = vpop.permute.xlu0 %1613 }
0x10aa   :  { %v1616_v53 = vadd.f32 %v1614_v36, %v1611_v17  ;;  %v6237_v36 = vld [vmem:[%s7609_s4 + $0x278] sm:$0xff] }
0x10ac   :  { %3756 = vtanh.f32 %v1616_v53 }
0x10b2   :  { %v3757_v46 = vpop.eup %3756 }
0x10b3   :  { %1619 = vrot.lane.b32.xlu1 %v3757_v46, %s4252_s13 }
0x10bb   :  { %1625 = vrot.lane.b32.xlu1 %v1616_v53, %s4252_s13 }
0x1125   :  { %v1620_v14 = vpop.permute.xlu1 %1619 }
0x1126   :  { %v1622_v11 = vmul.f32 %v1620_v14, %v6118_v42  ;;  %v6243_v42 = vld [vmem:[%s7611_s6 + $0x8] sm:$0xff] }
0x1128   :  { %3561 = vmatmul.msk.f32.vlgmr.msra.gmra.mxu2 %vm370_vm14, %v1622_v11  ;;  %3562 = vmatmul.msk.f32.vlgmr.msrb.gmra.mxu0 %vm370_vm14, %v1622_v11  ;;  %1623 = vst.msk [vmem:[#allocation2] sm:$0xff] %vm370_vm14, %v1622_v11 }
0x1129   :  { %3563 = vmatmul.msk.f32.vlgmr.msrb.gmra.mxu1 %vm370_vm14, %v1622_v11  ;;  %1863 = vmatpush.msra.mxu2 %v5785_v32  ;;  %v6250_v32 = vld [vmem:[%s7609_s4 + $0x250] sm:$0xff] }
0x112a   :  { %1903 = vmatpush.msrb.mxu0 %v6237_v36  ;;  %2006 = vmatpush.msrb.mxu1 %v6243_v42 }
0x112b   :  { %1864 = vmatpush.msra.mxu2 %v5793_v62  ;;  %v6264_v62 = vld [vmem:[%s7609_s4 + $0x228] sm:$0xff] }
0x112c   :  { %1904 = vmatpush.msrb.mxu0 %v6250_v32  ;;  %2007 = vmatpush.msrb.mxu1 %v6256_v44 }
0x112d   :  { %v1626_v61 = vpop.permute.xlu1 %1625  ;;  %1865 = vmatpush.msra.mxu2 %v5801_v21  ;;  %v6278_v21 = vld [vmem:[%s7609_s4 + $0x1d8] sm:$0xff] }
0x112e   :  { %1628 = vst.msk [vmem:[#allocation3] sm:$0xff] %vm370_vm14, %v1626_v61  ;;  %1905 = vmatpush.msrb.mxu0 %v6264_v62 }
0x112f   :  { %1866 = vmatpush.msra.mxu2 %v5809_v31  ;;  %v6285_v31 = vld [vmem:[%s7609_s4 + $0x1b0] sm:$0xff] }
0x1130   :  { %1906 = vmatpush.msrb.mxu0 %v6271_v5 }
0x1131   :  { %1867 = vmatpush.msra.mxu2 %v5816_v35  ;;  %v6292_v35 = vld [vmem:[%s7609_s4 + $0x188] sm:$0xff] }
0x1132   :  { %1907 = vmatpush.msrb.mxu0 %v6278_v21 }
0x1133   :  { %1868 = vmatpush.msra.mxu2 %v5823_v49  ;;  %v6299_v49 = vld [vmem:[%s7609_s4 + $0x160] sm:$0xff] }
0x1134   :  { %1908 = vmatpush.msrb.mxu0 %v6285_v31 }
0x1135   :  { %1869 = vmatpush.msra.mxu2 %v5830_v39  ;;  %v6306_v39 = vld [vmem:[%s7609_s4 + $0x138] sm:$0xff] }
0x1136   :  { %1909 = vmatpush.msrb.mxu0 %v6292_v35 }
0x1137   :  { %1870 = vmatpush.msra.mxu2 %v5837_v51  ;;  %v6313_v51 = vld [vmem:[%s7609_s4 + $0x110] sm:$0xff] }
0x1138   :  { %1910 = vmatpush.msrb.mxu0 %v6299_v49 }
0x1139   :  { %1871 = vmatpush.msra.mxu2 %v5844_v59  ;;  %v6320_v59 = vld [vmem:[%s7609_s4 + $0xe8] sm:$0xff] }
0x113a   :  { %1911 = vmatpush.msrb.mxu0 %v6306_v39 }
0x113b   :  { %1872 = vmatpush.msra.mxu2 %v5851_v52  ;;  %v6327_v52 = vld [vmem:[%s7609_s4 + $0xc0] sm:$0xff] }
0x113c   :  { %1912 = vmatpush.msrb.mxu0 %v6313_v51  ;;  %7885 = vst [vmem:[#allocation39_spill] sm:$0xff] %v6327_v52 }
0x113d   :  { %1873 = vmatpush.msra.mxu2 %v5858_v24  ;;  %v6334_v24 = vld [vmem:[%s7609_s4 + $0x98] sm:$0xff] }
0x113e   :  { %1913 = vmatpush.msrb.mxu0 %v6320_v59  ;;  %7886 = vst [vmem:[#allocation40_spill] sm:$0xff] %v6334_v24 }
0x113f   :  { %1874 = vmatpush.msra.mxu2 %v5865_v27  ;;  %v6341_v27 = vld [vmem:[%s7609_s4 + $0x70] sm:$0xff] }
0x1140   :  { %1914 = vmatpush.msrb.mxu0 %v6327_v52  ;;  %7887 = vst [vmem:[#allocation41_spill] sm:$0xff] %v6341_v27 }
0x1141   :  { %1875 = vmatpush.msra.mxu2 %v5872_v33  ;;  %v6348_v33 = vld [vmem:[%s7609_s4 + $0x48] sm:$0xff] }
0x1142   :  { %1915 = vmatpush.msrb.mxu0 %v6334_v24  ;;  %7888 = vst [vmem:[#allocation43_spill] sm:$0xff] %v6348_v33 }
0x1143   :  { %1876 = vmatpush.msra.mxu2 %v5879_v41  ;;  %v6355_v41 = vld [vmem:[%s7609_s4 + $0x20] sm:$0xff] }
0x1144   :  { %1916 = vmatpush.msrb.mxu0 %v6341_v27  ;;  %7889 = vst [vmem:[#allocation45_spill] sm:$0xff] %v6355_v41  ;;  %v1755_v27 = vld [vmem:[#allocation4] sm:$0xff] }
0x1145   :  { %1877 = vmatpush.msra.mxu2 %v5886_v22  ;;  %v3554_v22 = vld [vmem:[%s7605_s0 + $0x90] sm:$0xff] }
0x1146   :  { %1917 = vmatpush.msrb.mxu0 %v6348_v33  ;;  %v1509_v4 = vadd.f32 %v3554_v22, %v1483_v6 }
0x1147   :  { %1878 = vmatpush.msra.mxu2 %v5893_v60 }
0x1148   :  { %1918 = vmatpush.msrb.mxu0 %v6355_v41 }
0x11a5   :  { %v1670_v8 = vpop.f32.mrf.mxu0 }
0x11a6   :  { %v1694_v10 = vadd.f32 %v1670_v8, %v1509_v4  ;;  %v1690_v56 = vpop.f32.mrf.mxu1 }
0x11a7   :  { %v1695_v16 = vadd.f32 %v1690_v56, %v6115_v45 }
0x11a8   :  { %v3565_v2 = vmul.f32 -1.442695, %v1694_v10 }
0x11a9   :  { %v3567_v60 = vmul.f32 -1.442695, %v1695_v16 }
0x11aa   :  { %3758 = vpow2.f32 %v3565_v2 }
0x11ab   :  { %3760 = vpow2.f32 %v3567_v60 }
0x11b0   :  { %v3759_v50 = vpop.eup %3758 }
0x11b1   :  { %v3761_v17 = vpop.eup %3760  ;;  %v1703_v53 = vadd.f32 1.0, %v3759_v50 }
0x11b2   :  { %v1739_v46 = vadd.f32 1.0, %v3761_v17 }
0x11b3   :  { %3762 = vrcp.f32 %v1703_v53  ;;  %v1730_v4 = vand.u32 2147483648, %v1703_v53  ;;  %v1728_v45 = vand.u32 2147483647, %v1703_v53  ;;  %vm1724_vm1 = vweird.f32 %v1703_v53 }
0x11b4   :  { %3764 = vrcp.f32 %v1739_v46  ;;  %v1751_v8 = vand.u32 2147483648, %v1739_v46  ;;  %v1749_v56 = vand.u32 2147483647, %v1739_v46  ;;  %vm1745_vm2 = vweird.f32 %v1739_v46 }
0x11b5   :  { %v1731_v60 = vor.u32 1.1754944e-38, %v1730_v4  ;;  %vm1729_vm6 = vcmp.eq.f32.partialorder %v1728_v45, 8.507059e+37 }
0x11b6   :  { %v1752_v50 = vor.u32 1.1754944e-38, %v1751_v8  ;;  %vm1750_vm7 = vcmp.eq.f32.partialorder %v1749_v56, 8.507059e+37 }
0x11b9   :  { %v3763_v14 = vpop.eup %3762 }
0x11ba   :  { %v3765_v11 = vpop.eup %3764  ;;  %v1720_v61 = vmul.f32 %v3763_v14, %v1703_v53  ;;  %vm1725_vm15 = vweird.f32 %v3763_v14  ;;  %v3553_v53 = vld [vmem:[%s7605_s0 + $0x88] sm:$0xff] }
0x11bb   :  { %v1741_v41 = vmul.f32 %v3765_v11, %v1739_v46  ;;  %vm1746_vm0 = vweird.f32 %v3765_v11  ;;  %vm1726_vm4 = vmor %vm1724_vm1, %vm1725_vm15 }
0x11bc   :  { %v1721_v6 = vsub.f32 1.0, %v1720_v61  ;;  %vm1747_vm5 = vmor %vm1745_vm2, %vm1746_vm0 }
0x11bd   :  { %v1742_v22 = vsub.f32 1.0, %v1741_v41 }
0x11be   :  { %v1722_v33 = vmul.f32 %v3763_v14, %v1721_v6 }
0x11bf   :  { %v1743_v10 = vmul.f32 %v3765_v11, %v1742_v22 }
0x11c0   :  { %v1723_v16 = vadd.f32 %v3763_v14, %v1722_v33  ;;  %v1463_v33 = vpop.f32.mrf.mxu2 }
0x11c1   :  { %v1744_v2 = vadd.f32 %v3765_v11, %v1743_v10  ;;  %v7890_v10 = vld [vmem:[#allocation31_spill] sm:$0xff] }
0x11c2   :  { %v1727_v17 = vsel %vm1726_vm4, %v3763_v14, %v1723_v16  ;;  %v1508_v14 = vadd.f32 %v3553_v53, %v1463_v33  ;;  %v7891_v16 = vld [vmem:[#allocation17_spill] sm:$0xff] }
0x11c3   :  { %v1748_v61 = vsel %vm1747_vm5, %v3765_v11, %v1744_v2  ;;  %v6362_v41 = vsel %vm1729_vm6, %v1731_v60, %v1727_v17  ;;  %v7892_v2 = vld [vmem:[#allocation34_spill] sm:$0xff]  ;;  %v7894_v17 = vld [vmem:[#allocation36_spill] sm:$0xff] }
0x11c4   :  { %v1753_v6 = vsel %vm1750_vm7, %v1752_v50, %v1748_v61  ;;  %v1734_v22 = vmul.f32 2.0, %v6362_v41  ;;  %v7893_v50 = vld [vmem:[#allocation19_spill] sm:$0xff] }
0x11c5   :  { %v1756_v24 = vmul.f32 %v1755_v27, %v1753_v6 }
0x11c6   :  { %v3566_v52 = vadd.f32 -1.0, %v1734_v22 }
0x11c7   :  { %1758 = vrot.lane.b32.xlu2 %v1756_v24, %s4253_s11  ;;  %1812 = vst.msk [vmem:[#allocation4] sm:$0xff] %vm561_vm3, %v1756_v24 }
0x11c8   :  { %1786 = vrot.lane.b32.xlu0 %v3566_v52, %s4252_s13  ;;  %v1650_v46 = vpop.f32.mrf.mxu2 }
0x11c9   :  { %v1693_v11 = vadd.f32 %v1650_v46, %v1508_v14 }
0x11cb   :  { %v3564_v4 = vmul.f32 -1.442695, %v1693_v11 }
0x11cd   :  { %3766 = vpow2.f32 %v3564_v4  ;;  %v1783_v4 = vld [vmem:[#allocation3] sm:$0xff] }
0x11d3   :  { %v3767_v8 = vpop.eup %3766 }
0x11d4   :  { %v1702_v45 = vadd.f32 1.0, %v3767_v8 }
0x11d6   :  { %3768 = vrcp.f32 %v1702_v45  ;;  %vm1709_vm10 = vweird.f32 %v1702_v45 }
0x11dc   :  { %v3769_v24 = vpop.eup %3768 }
0x11dd   :  { %v1705_v52 = vmul.f32 %v3769_v24, %v1702_v45  ;;  %vm1710_vm8 = vweird.f32 %v3769_v24 }
0x11de   :  { %vm1711_vm11 = vmor %vm1709_vm10, %vm1710_vm8 }
0x11df   :  { %v1706_v56 = vsub.f32 1.0, %v1705_v52 }
0x11e1   :  { %v1707_v60 = vmul.f32 %v3769_v24, %v1706_v56 }
0x11e3   :  { %v1708_v61 = vadd.f32 %v3769_v24, %v1707_v60 }
0x11e5   :  { %v1712_v6 = vsel %vm1711_vm11, %v3769_v24, %v1708_v61  ;;  %v6445_v61 = vld [vmem:[%s7610_s5 + $0x98] sm:$0xff] }
0x1221   :  { %v1759_v27 = vpop.permute.xlu2 %1758 }
0x1222   :  { %3568 = vmatmul.msk.f32.vlgmr.msrb.gmra.mxu2 %vm318_vm9, %v1759_v27 }
0x1223   :  { %2058 = vmatpush.msrb.mxu2 %v5914_v26  ;;  %v1715_v26 = vand.u32 2147483648, %v1702_v45 }
0x1225   :  { %2059 = vmatpush.msrb.mxu2 %v5920_v28  ;;  %v1713_v28 = vand.u32 2147483647, %v1702_v45 }
0x1227   :  { %2060 = vmatpush.msrb.mxu2 %v5926_v13  ;;  %v1716_v13 = vor.u32 1.1754944e-38, %v1715_v26  ;;  %vm1714_vm12 = vcmp.eq.f32.partialorder %v1713_v28, 8.507059e+37  ;;  %v6458_v26 = vld [vmem:[%s7610_s5 + $0x70] sm:$0xff]  ;;  %v6471_v28 = vld [vmem:[%s7610_s5 + $0x48] sm:$0xff] }
0x1229   :  { %2061 = vmatpush.msrb.mxu2 %v7890_v10  ;;  %v1717_v33 = vsel %vm1714_vm12, %v1716_v13, %v1712_v6  ;;  %v6484_v6 = vld [vmem:[%s7610_s5 + $0x20] sm:$0xff]  ;;  %v6498_v13 = vld [vmem:[%s7609_s4 + $0x130] sm:$0xff] }
0x122a   :  { %v1784_v8 = vmul.f32 %v1783_v4, %v1717_v33  ;;  %v3570_v4 = vld [vmem:[%s7605_s0 + $0xa8] sm:$0xff] }
0x122b   :  { %2062 = vmatpush.msrb.mxu2 %v7891_v16 }
0x122d   :  { %2063 = vmatpush.msrb.mxu2 %v7892_v2 }
0x122f   :  { %2064 = vmatpush.msrb.mxu2 %v7893_v50  ;;  %v6391_v50 = vld [vmem:[%s7610_s5 + $0x138] sm:$0xff] }
0x1231   :  { %2065 = vmatpush.msrb.mxu2 %v7894_v17  ;;  %v6405_v17 = vld [vmem:[%s7610_s5 + $0x110] sm:$0xff] }
0x123a   :  { %v1787_v22 = vpop.permute.xlu0 %1786 }
0x123b   :  { %v1789_v53 = vmul.f32 %v1787_v22, %v1717_v33  ;;  %v6559_v22 = vld [vmem:[%s7610_s5 + $0x108] sm:$0xff]  ;;  %v6571_v33 = vld [vmem:[%s7610_s5 + $0xb8] sm:$0xff] }
0x123c   :  { %7898 = vst [vmem:[#allocation8_spill] sm:$0xff] %v6559_v22 }
0x123d   :  { %1791 = vrot.lane.b32.xlu2 %v1789_v53, %s4252_s13  ;;  %7900 = vst [vmem:[#allocation10_spill] sm:$0xff] %v6571_v33  ;;  %v6577_v53 = vld [vmem:[%s7610_s5 + $0x90] sm:$0xff] }
0x123e   :  { %7901 = vst [vmem:[#allocation11_spill] sm:$0xff] %v6577_v53 }
0x1297   :  { %v1792_v11 = vpop.permute.xlu2 %1791 }
0x1298   :  { %v1794_v27 = vadd.f32 %v1792_v11, %v1784_v8  ;;  %v6595_v11 = vld [vmem:[%s7610_s5 + $0x18] sm:$0xff] }
0x1299   :  { %7904 = vst [vmem:[#allocation18_spill] sm:$0xff] %v6595_v11 }
0x12a5   :  { %v1779_v46 = vpop.f32.mrf.mxu2 }
0x12a6   :  { %3770 = vtanh.f32 %v1779_v46  ;;  %v6583_v46 = vld [vmem:[%s7610_s5 + $0x68] sm:$0xff] }
0x12a7   :  { %7902 = vst [vmem:[#allocation12_spill] sm:$0xff] %v6583_v46 }
0x12ac   :  { %v3771_v14 = vpop.eup %3770 }
0x12ad   :  { %1796 = vrot.lane.b32.xlu0 %v3771_v14, %s4252_s13  ;;  %v6589_v14 = vld [vmem:[%s7610_s5 + $0x40] sm:$0xff] }
0x12ae   :  { %7903 = vst [vmem:[#allocation16_spill] sm:$0xff] %v6589_v14 }
0x131f   :  { %v1797_v52 = vpop.permute.xlu0 %1796 }
0x1320   :  { %v1799_v45 = vadd.f32 %v1797_v52, %v1794_v27 }
0x1322   :  { %3772 = vtanh.f32 %v1799_v45  ;;  %1811 = vst.msk [vmem:[#allocation3] sm:$0xff] %vm558_vm13, %v1799_v45 }
0x1328   :  { %v3773_v24 = vpop.eup %3772 }
0x1329   :  { %1802 = vrot.lane.b32.xlu1 %v3773_v24, %s4252_s13  ;;  %v2013_v10 = vld [vmem:[#allocation3] sm:$0xff]  ;;  %v3573_v24 = vld [vmem:[%s7605_s0 + $0xc0] sm:$0xff] }
0x1331   :  { %2015 = vrot.lane.b32.xlu1 %v2013_v10, %s4252_s13 }
0x139b   :  { %v1803_v56 = vpop.permute.xlu1 %1802 }
0x139c   :  { %v1805_v16 = vmul.f32 %v1803_v56, %v6362_v41  ;;  %v6399_v41 = vld [vmem:[%s7609_s4 + $0x270] sm:$0xff] }
0x139e   :  { %1807 = vrot.lane.b32.xlu2 %v1805_v16, %s4252_s13 }
0x13f8   :  { %v1808_v2 = vpop.permute.xlu2 %1807 }
0x13f9   :  { %1810 = vst.msk [vmem:[#allocation2] sm:$0xff] %vm558_vm13, %v1808_v2 }
0x1400   :  { %v1816_v60 = vld [vmem:[#allocation2] sm:$0xff] }
0x1401   :  { %1839 = vmatmul.f32.vlgmr.msra.gmra.mxu0 %v1816_v60  ;;  %1859 = vmatmul.f32.vlgmr.msra.gmra.mxu1 %v1816_v60  ;;  %1815 = vst [vmem:[#allocation5 + $0x18] sm:$0xff] %v1816_v60 }
0x1402   :  { %1879 = vmatmul.f32.vlgmr.msra.gmra.mxu2 %v1816_v60  ;;  %1899 = vmatmul.f32.vlgmr.msra.gmra.mxu3 %v1816_v60 }
0x1403   :  { %2098 = vmatpush.msra.mxu1 %v6391_v50  ;;  %2193 = vmatpush.msra.mxu2 %v5971_v1  ;;  %v6413_v1 = vld [vmem:[%s7609_s4 + $0x248] sm:$0xff] }
0x1404   :  { %2240 = vmatpush.msra.mxu3 %v5977_v23  ;;  %2300 = vmatpush.msra.mxu0 %v6399_v41  ;;  %v6419_v23 = vld [vmem:[%s7610_s5 + $0xe8] sm:$0xff] }
0x1405   :  { %2099 = vmatpush.msra.mxu1 %v6405_v17  ;;  %2194 = vmatpush.msra.mxu2 %v5985_v9  ;;  %v6426_v9 = vld [vmem:[%s7609_s4 + $0x220] sm:$0xff] }
0x1406   :  { %2241 = vmatpush.msra.mxu3 %v5991_v29  ;;  %2301 = vmatpush.msra.mxu0 %v6413_v1  ;;  %v6432_v29 = vld [vmem:[%s7610_s5 + $0xc0] sm:$0xff] }
0x1407   :  { %2100 = vmatpush.msra.mxu1 %v6419_v23 }
0x1408   :  { %2242 = vmatpush.msra.mxu3 %v5999_v47  ;;  %2302 = vmatpush.msra.mxu0 %v6426_v9  ;;  %v6439_v47 = vld [vmem:[%s7609_s4 + $0x1f8] sm:$0xff] }
0x1409   :  { %1919 = vmatmul.f32.vlgmr.msrb.gmra.mxu0 %v1816_v60  ;;  %2101 = vmatpush.msra.mxu1 %v6432_v29 }
0x140a   :  { %2243 = vmatpush.msra.mxu3 %v6007_v63  ;;  %2303 = vmatpush.msra.mxu0 %v6439_v47  ;;  %v6452_v63 = vld [vmem:[%s7609_s4 + $0x1d0] sm:$0xff] }
0x140b   :  { %2102 = vmatpush.msra.mxu1 %v6445_v61 }
0x140c   :  { %2244 = vmatpush.msra.mxu3 %v6015_v18  ;;  %2304 = vmatpush.msra.mxu0 %v6452_v63  ;;  %v6465_v18 = vld [vmem:[%s7609_s4 + $0x1a8] sm:$0xff] }
0x140d   :  { %2103 = vmatpush.msra.mxu1 %v6458_v26 }
0x140e   :  { %2245 = vmatpush.msra.mxu3 %v6023_v12  ;;  %2305 = vmatpush.msra.mxu0 %v6465_v18  ;;  %v6478_v12 = vld [vmem:[%s7609_s4 + $0x180] sm:$0xff] }
0x140f   :  { %2104 = vmatpush.msra.mxu1 %v6471_v28 }
0x1410   :  { %2246 = vmatpush.msra.mxu3 %v6031_v19  ;;  %2306 = vmatpush.msra.mxu0 %v6478_v12  ;;  %v6491_v19 = vld [vmem:[%s7609_s4 + $0x158] sm:$0xff] }
0x1411   :  { %2105 = vmatpush.msra.mxu1 %v6484_v6 }
0x1412   :  { %2247 = vmatpush.msra.mxu3 %v6039_v15  ;;  %2307 = vmatpush.msra.mxu0 %v6491_v19  ;;  %v6505_v15 = vld [vmem:[%s7609_s4 + $0x108] sm:$0xff] }
0x1414   :  { %2248 = vmatpush.msra.mxu3 %v6046_v25  ;;  %2308 = vmatpush.msra.mxu0 %v6498_v13  ;;  %v6512_v25 = vld [vmem:[%s7609_s4 + $0xe0] sm:$0xff] }
0x1416   :  { %2249 = vmatpush.msra.mxu3 %v6053_v55  ;;  %2309 = vmatpush.msra.mxu0 %v6505_v15  ;;  %v6519_v55 = vld [vmem:[%s7609_s4 + $0xb8] sm:$0xff] }
0x1418   :  { %2250 = vmatpush.msra.mxu3 %v6060_v30  ;;  %2310 = vmatpush.msra.mxu0 %v6512_v25  ;;  %v6526_v30 = vld [vmem:[%s7609_s4 + $0x90] sm:$0xff] }
0x141a   :  { %2251 = vmatpush.msra.mxu3 %v6067_v54  ;;  %2311 = vmatpush.msra.mxu0 %v6519_v55  ;;  %v6533_v54 = vld [vmem:[%s7609_s4 + $0x68] sm:$0xff] }
0x141c   :  { %2252 = vmatpush.msra.mxu3 %v6074_v34  ;;  %2312 = vmatpush.msra.mxu0 %v6526_v30  ;;  %v6540_v34 = vld [vmem:[%s7609_s4 + $0x40] sm:$0xff] }
0x141d   :  { %7895 = vst [vmem:[#allocation47_spill] sm:$0xff] %v6540_v34 }
0x141e   :  { %2253 = vmatpush.msra.mxu3 %v6081_v0  ;;  %2313 = vmatpush.msra.mxu0 %v6533_v54  ;;  %v6547_v0 = vld [vmem:[%s7609_s4 + $0x18] sm:$0xff] }
0x141f   :  { %7896 = vst [vmem:[#allocation49_spill] sm:$0xff] %v6547_v0 }
0x1420   :  { %2254 = vmatpush.msra.mxu3 %v6088_v38  ;;  %2314 = vmatpush.msra.mxu0 %v6540_v34  ;;  %v6553_v38 = vld [vmem:[%s7610_s5 + $0x130] sm:$0xff] }
0x1421   :  { %7897 = vst [vmem:[#allocation51_spill] sm:$0xff] %v6553_v38 }
0x1422   :  { %2255 = vmatpush.msra.mxu3 %v6095_v58  ;;  %2315 = vmatpush.msra.mxu0 %v6547_v0  ;;  %v6565_v58 = vld [vmem:[%s7610_s5 + $0xe0] sm:$0xff] }
0x1423   :  { %7899 = vst [vmem:[#allocation9_spill] sm:$0xff] %v6565_v58 }
0x1424   :  { %2495 = vmatpush.msrb.mxu0 %v6553_v38 }
0x1426   :  { %2496 = vmatpush.msrb.mxu0 %v6559_v22 }
0x1428   :  { %2497 = vmatpush.msrb.mxu0 %v6565_v58 }
0x142a   :  { %2498 = vmatpush.msrb.mxu0 %v6571_v33 }
0x142c   :  { %2499 = vmatpush.msrb.mxu0 %v6577_v53 }
0x142e   :  { %2500 = vmatpush.msrb.mxu0 %v6583_v46 }
0x1430   :  { %2501 = vmatpush.msrb.mxu0 %v6589_v14 }
0x1432   :  { %2502 = vmatpush.msrb.mxu0 %v6595_v11 }
0x147e   :  { %v6601_v8 = vpop.f32.mrf.mxu0  ;;  %v1860_v27 = vpop.f32.mrf.mxu1 }
0x147f   :  { %v1924_v52 = vadd.f32 %v3570_v4, %v1860_v27 }
0x1481   :  { %v3575_v45 = vmul.f32 -1.442695, %v1924_v52 }
0x1483   :  { %3774 = vpow2.f32 %v3575_v45 }
0x1486   :  { %v1920_v10 = vpop.f32.mrf.mxu0 }
0x1487   :  { %v6606_v56 = vadd.f32 %v3573_v24, %v1920_v10 }
0x1489   :  { %v3577_v16 = vmul.f32 -1.442695, %v6606_v56  ;;  %v3775_v2 = vpop.eup %3774 }
0x148a   :  { %v1935_v60 = vadd.f32 1.0, %v3775_v2 }
0x148b   :  { %3776 = vpow2.f32 %v3577_v16 }
0x148c   :  { %3778 = vrcp.f32 %v1935_v60  ;;  %v1962_v27 = vand.u32 2147483648, %v1935_v60  ;;  %v1960_v45 = vand.u32 2147483647, %v1935_v60  ;;  %vm1956_vm0 = vweird.f32 %v1935_v60 }
0x148e   :  { %v1963_v10 = vor.u32 1.1754944e-38, %v1962_v27  ;;  %vm1961_vm2 = vcmp.eq.f32.partialorder %v1960_v45, 8.507059e+37 }
0x1491   :  { %v3777_v11 = vpop.eup %3776 }
0x1492   :  { %v1971_v14 = vadd.f32 1.0, %v3777_v11  ;;  %v3779_v46 = vpop.eup %3778 }
0x1493   :  { %v1952_v53 = vmul.f32 %v3779_v46, %v1935_v60  ;;  %vm1957_vm15 = vweird.f32 %v3779_v46 }
0x1494   :  { %3780 = vrcp.f32 %v1971_v14  ;;  %vm1958_vm1 = vmor %vm1956_vm0, %vm1957_vm15  ;;  %v1983_v11 = vand.u32 2147483648, %v1971_v14  ;;  %vm1977_vm5 = vweird.f32 %v1971_v14 }
0x1495   :  { %v1953_v4 = vsub.f32 1.0, %v1952_v53  ;;  %v1981_v53 = vand.u32 2147483647, %v1971_v14 }
0x1496   :  { %v1984_v60 = vor.u32 1.1754944e-38, %v1983_v11 }
0x1497   :  { %v1954_v52 = vmul.f32 %v3779_v46, %v1953_v4  ;;  %vm1982_vm7 = vcmp.eq.f32.partialorder %v1981_v53, 8.507059e+37 }
0x1499   :  { %v1955_v58 = vadd.f32 %v3779_v46, %v1954_v52 }
0x149a   :  { %v3781_v33 = vpop.eup %3780 }
0x149b   :  { %v1973_v24 = vmul.f32 %v3781_v33, %v1971_v14  ;;  %v1959_v22 = vsel %vm1958_vm1, %v3779_v46, %v1955_v58  ;;  %vm1978_vm4 = vweird.f32 %v3781_v33  ;;  %v1987_v46 = vld [vmem:[#allocation4] sm:$0xff] }
0x149c   :  { %v6609_v2 = vsel %vm1961_vm2, %v1963_v10, %v1959_v22  ;;  %vm1979_vm6 = vmor %vm1977_vm5, %vm1978_vm4 }
0x149d   :  { %v1974_v16 = vsub.f32 1.0, %v1973_v24  ;;  %v1966_v38 = vmul.f32 2.0, %v6609_v2 }
0x149f   :  { %v1975_v0 = vmul.f32 %v3781_v33, %v1974_v16  ;;  %v3576_v4 = vadd.f32 -1.0, %v1966_v38  ;;  %v7907_v38 = vld [vmem:[#allocation23_spill] sm:$0xff] }
0x14a1   :  { %v1976_v34 = vadd.f32 %v3781_v33, %v1975_v0  ;;  %2020 = vrot.lane.b32.xlu0 %v3576_v4, %s4252_s13  ;;  %v7906_v0 = vld [vmem:[#allocation38_spill] sm:$0xff] }
0x14a3   :  { %v1980_v52 = vsel %vm1979_vm6, %v3781_v33, %v1976_v34  ;;  %v7905_v34 = vld [vmem:[#allocation21_spill] sm:$0xff] }
0x14a4   :  { %v1985_v58 = vsel %vm1982_vm7, %v1984_v60, %v1980_v52 }
0x14a5   :  { %v1988_v27 = vmul.f32 %v1987_v46, %v1985_v58 }
0x14a7   :  { %3578 = vmatmul.msk.f32.vlgmr.msrb.gmra.mxu1 %vm318_vm9, %v1988_v27  ;;  %2046 = vst.msk [vmem:[#allocation4] sm:$0xff] %vm318_vm9, %v1988_v27 }
0x14a8   :  { %2260 = vmatpush.msrb.mxu1 %v6127_v43  ;;  %v7908_v43 = vld [vmem:[#allocation26_spill] sm:$0xff] }
0x14aa   :  { %2261 = vmatpush.msrb.mxu1 %v6133_v37  ;;  %v7909_v37 = vld [vmem:[#allocation30_spill] sm:$0xff] }
0x14ac   :  { %2262 = vmatpush.msrb.mxu1 %v6139_v48  ;;  %v7910_v48 = vld [vmem:[#allocation33_spill] sm:$0xff] }
0x14ae   :  { %2263 = vmatpush.msrb.mxu1 %v6145_v20  ;;  %v7911_v20 = vld [vmem:[#allocation35_spill] sm:$0xff] }
0x14b0   :  { %2264 = vmatpush.msrb.mxu1 %v6151_v3  ;;  %v7912_v3 = vld [vmem:[#allocation37_spill] sm:$0xff] }
0x14b2   :  { %2265 = vmatpush.msrb.mxu1 %v6157_v40  ;;  %v3569_v40 = vld [vmem:[%s7605_s0 + $0xa0] sm:$0xff] }
0x14b4   :  { %2266 = vmatpush.msrb.mxu1 %v6163_v7  ;;  %v1923_v7 = vadd.f32 %v3569_v40, %v6601_v8 }
0x14b6   :  { %2267 = vmatpush.msrb.mxu1 %v6169_v57  ;;  %v3574_v57 = vmul.f32 -1.442695, %v1923_v7  ;;  %v6647_v7 = vld [vmem:[%s7609_s4 + $0x268] sm:$0xff] }
0x14b8   :  { %2268 = vmatpush.msrb.mxu1 %v7905_v34  ;;  %3782 = vpow2.f32 %v3574_v57  ;;  %v2016_v34 = vpop.permute.xlu1 %2015 }
0x14ba   :  { %2269 = vmatpush.msrb.mxu1 %v7906_v0 }
0x14bc   :  { %2270 = vmatpush.msrb.mxu1 %v7907_v38 }
0x14be   :  { %2271 = vmatpush.msrb.mxu1 %v7908_v43  ;;  %v3783_v22 = vpop.eup %3782 }
0x14bf   :  { %v1934_v33 = vadd.f32 1.0, %v3783_v22  ;;  %v6663_v22 = vld [vmem:[%s7609_s4 + $0x218] sm:$0xff] }
0x14c0   :  { %2272 = vmatpush.msrb.mxu1 %v7909_v37 }
0x14c1   :  { %3784 = vrcp.f32 %v1934_v33  ;;  %v1947_v11 = vand.u32 2147483648, %v1934_v33  ;;  %vm1941_vm10 = vweird.f32 %v1934_v33  ;;  %v1945_v53 = vand.u32 2147483647, %v1934_v33 }
0x14c2   :  { %2273 = vmatpush.msrb.mxu1 %v7910_v48 }
0x14c3   :  { %v1948_v60 = vor.u32 1.1754944e-38, %v1947_v11  ;;  %vm1946_vm12 = vcmp.eq.f32.partialorder %v1945_v53, 8.507059e+37  ;;  %v3572_v53 = vld [vmem:[%s7605_s0 + $0xb8] sm:$0xff] }
0x14c4   :  { %2274 = vmatpush.msrb.mxu1 %v7911_v20 }
0x14c6   :  { %2275 = vmatpush.msrb.mxu1 %v7912_v3 }
0x14c7   :  { %v3785_v14 = vpop.eup %3784 }
0x14c8   :  { %v1937_v45 = vmul.f32 %v3785_v14, %v1934_v33  ;;  %vm1942_vm8 = vweird.f32 %v3785_v14  ;;  %v7915_v33 = vld [vmem:[#allocation41_spill] sm:$0xff] }
0x14c9   :  { %vm1943_vm11 = vmor %vm1941_vm10, %vm1942_vm8 }
0x14ca   :  { %v1938_v24 = vsub.f32 1.0, %v1937_v45  ;;  %v7916_v45 = vld [vmem:[#allocation43_spill] sm:$0xff] }
0x14cc   :  { %v1939_v10 = vmul.f32 %v3785_v14, %v1938_v24  ;;  %v6755_v24 = vld [vmem:[%s7609_s4 + $0x10] sm:$0xff] }
0x14ce   :  { %v1940_v16 = vadd.f32 %v3785_v14, %v1939_v10  ;;  %v7917_v10 = vld [vmem:[#allocation45_spill] sm:$0xff] }
0x14d0   :  { %v1944_v4 = vsel %vm1943_vm11, %v3785_v14, %v1940_v16  ;;  %v6748_v14 = vld [vmem:[%s7609_s4 + $0x38] sm:$0xff]  ;;  %v1900_v16 = vpop.f32.mrf.mxu3 }
0x14d1   :  { %v1949_v8 = vsel %vm1946_vm12, %v1948_v60, %v1944_v4 }
0x14d2   :  { %v2018_v38 = vmul.f32 %v2016_v34, %v1949_v8 }
0x1513   :  { %v2021_v52 = vpop.permute.xlu0 %2020 }
0x1514   :  { %v2023_v58 = vmul.f32 %v2021_v52, %v1949_v8  ;;  %v1926_v52 = vadd.f32 %v3572_v53, %v1900_v16  ;;  %v2172_v16 = vld [vmem:[#allocation4] sm:$0xff] }
0x1516   :  { %2025 = vrot.lane.b32.xlu2 %v2023_v58, %s4252_s13 }
0x1524   :  { %v2009_v46 = vpop.f32.mrf.mxu1 }
0x1525   :  { %3786 = vtanh.f32 %v2009_v46 }
0x152b   :  { %v3787_v27 = vpop.eup %3786 }
0x152c   :  { %2030 = vrot.lane.b32.xlu0 %v3787_v27, %s4252_s13 }
0x1570   :  { %v2026_v0 = vpop.permute.xlu2 %2025 }
0x1571   :  { %v2028_v43 = vadd.f32 %v2026_v0, %v2018_v38 }
0x159e   :  { %v2031_v37 = vpop.permute.xlu0 %2030 }
0x159f   :  { %v2033_v48 = vadd.f32 %v2031_v37, %v2028_v43 }
0x15a1   :  { %3788 = vtanh.f32 %v2033_v48 }
0x15a7   :  { %v3789_v20 = vpop.eup %3788 }
0x15a8   :  { %2036 = vrot.lane.b32.xlu1 %v3789_v20, %s4252_s13 }
0x15b0   :  { %2042 = vrot.lane.b32.xlu1 %v2033_v48, %s4252_s13 }
0x161a   :  { %v2037_v3 = vpop.permute.xlu1 %2036 }
0x161b   :  { %v2039_v40 = vmul.f32 %v2037_v3, %v6609_v2  ;;  %v6655_v2 = vld [vmem:[%s7609_s4 + $0x240] sm:$0xff] }
0x161d   :  { %3579 = vmatmul.msk.f32.vlgmr.msrb.gmra.mxu2 %vm370_vm14, %v2039_v40  ;;  %3580 = vmatmul.msk.f32.vlgmr.msrb.gmra.mxu3 %vm370_vm14, %v2039_v40  ;;  %2040 = vst.msk [vmem:[#allocation2] sm:$0xff] %vm370_vm14, %v2039_v40 }
0x161e   :  { %3581 = vmatmul.msk.f32.vlgmr.msra.gmra.mxu1 %vm370_vm14, %v2039_v40  ;;  %2280 = vmatpush.msrb.mxu2 %v6647_v7 }
0x161f   :  { %2320 = vmatpush.msrb.mxu3 %v6237_v36  ;;  %2423 = vmatpush.msra.mxu1 %v6243_v42  ;;  %v6671_v36 = vld [vmem:[%s7609_s4 + $0x1f0] sm:$0xff]  ;;  %v6678_v42 = vld [vmem:[%s7609_s4 + $0x1c8] sm:$0xff] }
0x1620   :  { %2281 = vmatpush.msrb.mxu2 %v6655_v2 }
0x1621   :  { %2321 = vmatpush.msrb.mxu3 %v6250_v32  ;;  %2424 = vmatpush.msra.mxu1 %v6256_v44  ;;  %v6685_v32 = vld [vmem:[%s7609_s4 + $0x1a0] sm:$0xff]  ;;  %v6692_v44 = vld [vmem:[%s7609_s4 + $0x178] sm:$0xff] }
0x1622   :  { %v2043_v57 = vpop.permute.xlu1 %2042  ;;  %2282 = vmatpush.msrb.mxu2 %v6663_v22 }
0x1623   :  { %2045 = vst.msk [vmem:[#allocation3] sm:$0xff] %vm370_vm14, %v2043_v57  ;;  %2322 = vmatpush.msrb.mxu3 %v6264_v62  ;;  %v6699_v62 = vld [vmem:[%s7609_s4 + $0x150] sm:$0xff] }
0x1624   :  { %2283 = vmatpush.msrb.mxu2 %v6671_v36 }
0x1625   :  { %2323 = vmatpush.msrb.mxu3 %v6271_v5  ;;  %v6706_v5 = vld [vmem:[%s7609_s4 + $0x128] sm:$0xff] }
0x1626   :  { %2284 = vmatpush.msrb.mxu2 %v6678_v42 }
0x1627   :  { %2324 = vmatpush.msrb.mxu3 %v6278_v21  ;;  %v6713_v21 = vld [vmem:[%s7609_s4 + $0x100] sm:$0xff] }
0x1628   :  { %2285 = vmatpush.msrb.mxu2 %v6685_v32 }
0x1629   :  { %2325 = vmatpush.msrb.mxu3 %v6285_v31  ;;  %v6720_v31 = vld [vmem:[%s7609_s4 + $0xd8] sm:$0xff] }
0x162a   :  { %2286 = vmatpush.msrb.mxu2 %v6692_v44 }
0x162b   :  { %2326 = vmatpush.msrb.mxu3 %v6292_v35  ;;  %v6727_v35 = vld [vmem:[%s7609_s4 + $0xb0] sm:$0xff] }
0x162c   :  { %2287 = vmatpush.msrb.mxu2 %v6699_v62 }
0x162d   :  { %2327 = vmatpush.msrb.mxu3 %v6299_v49  ;;  %v7913_v49 = vld [vmem:[#allocation39_spill] sm:$0xff] }
0x162e   :  { %2288 = vmatpush.msrb.mxu2 %v6706_v5 }
0x162f   :  { %2328 = vmatpush.msrb.mxu3 %v6306_v39  ;;  %v6734_v39 = vld [vmem:[%s7609_s4 + $0x88] sm:$0xff] }
0x1630   :  { %2289 = vmatpush.msrb.mxu2 %v6713_v21 }
0x1631   :  { %2329 = vmatpush.msrb.mxu3 %v6313_v51  ;;  %v7914_v51 = vld [vmem:[#allocation40_spill] sm:$0xff] }
0x1632   :  { %2290 = vmatpush.msrb.mxu2 %v6720_v31 }
0x1633   :  { %2330 = vmatpush.msrb.mxu3 %v6320_v59  ;;  %v6741_v59 = vld [vmem:[%s7609_s4 + $0x60] sm:$0xff] }
0x1634   :  { %2291 = vmatpush.msrb.mxu2 %v6727_v35 }
0x1635   :  { %2331 = vmatpush.msrb.mxu3 %v7913_v49 }
0x1636   :  { %2292 = vmatpush.msrb.mxu2 %v6734_v39 }
0x1637   :  { %2332 = vmatpush.msrb.mxu3 %v7914_v51 }
0x1638   :  { %2293 = vmatpush.msrb.mxu2 %v6741_v59 }
0x1639   :  { %2333 = vmatpush.msrb.mxu3 %v7915_v33 }
0x163a   :  { %2294 = vmatpush.msrb.mxu2 %v6748_v14 }
0x163b   :  { %2334 = vmatpush.msrb.mxu3 %v7916_v45 }
0x163c   :  { %2295 = vmatpush.msrb.mxu2 %v6755_v24 }
0x163d   :  { %2335 = vmatpush.msrb.mxu3 %v7917_v10 }
0x169b   :  { %v2107_v11 = vpop.f32.mrf.mxu1 }
0x169c   :  { %v2112_v4 = vadd.f32 %v2107_v11, %v6606_v56 }
0x169e   :  { %v3585_v60 = vmul.f32 -1.442695, %v2112_v4 }
0x16a0   :  { %3790 = vpow2.f32 %v3585_v60  ;;  %v2087_v8 = vpop.f32.mrf.mxu3 }
0x16a1   :  { %v2111_v58 = vadd.f32 %v2087_v8, %v1926_v52 }
0x16a3   :  { %v3583_v46 = vmul.f32 -1.442695, %v2111_v58 }
0x16a5   :  { %3792 = vpow2.f32 %v3583_v46 }
0x16a6   :  { %v3791_v27 = vpop.eup %3790 }
0x16a7   :  { %v2156_v34 = vadd.f32 1.0, %v3791_v27 }
0x16a9   :  { %3794 = vrcp.f32 %v2156_v34  ;;  %v2168_v20 = vand.u32 2147483648, %v2156_v34  ;;  %v2166_v56 = vand.u32 2147483647, %v2156_v34  ;;  %vm2162_vm0 = vweird.f32 %v2156_v34 }
0x16ab   :  { %v3793_v0 = vpop.eup %3792  ;;  %v2169_v51 = vor.u32 1.1754944e-38, %v2168_v20  ;;  %vm2167_vm2 = vcmp.eq.f32.partialorder %v2166_v56, 8.507059e+37 }
0x16ac   :  { %v2120_v38 = vadd.f32 1.0, %v3793_v0  ;;  %v1880_v0 = vpop.f32.mrf.mxu2 }
0x16ae   :  { %3796 = vrcp.f32 %v2120_v38  ;;  %v2147_v11 = vand.u32 2147483648, %v2120_v38  ;;  %v2145_v60 = vand.u32 2147483647, %v2120_v38  ;;  %vm2141_vm5 = vweird.f32 %v2120_v38 }
0x16af   :  { %v3795_v43 = vpop.eup %3794 }
0x16b0   :  { %v2158_v37 = vmul.f32 %v3795_v43, %v2156_v34  ;;  %vm2163_vm15 = vweird.f32 %v3795_v43  ;;  %v2148_v8 = vor.u32 1.1754944e-38, %v2147_v11  ;;  %vm2146_vm7 = vcmp.eq.f32.partialorder %v2145_v60, 8.507059e+37 }
0x16b1   :  { %vm2164_vm1 = vmor %vm2162_vm0, %vm2163_vm15 }
0x16b2   :  { %v2159_v48 = vsub.f32 1.0, %v2158_v37 }
0x16b4   :  { %v2160_v3 = vmul.f32 %v3795_v43, %v2159_v48  ;;  %v3797_v40 = vpop.eup %3796  ;;  %v2067_v37 = vpop.f32.mrf.mxu2 }
0x16b5   :  { %v2137_v57 = vmul.f32 %v3797_v40, %v2120_v38  ;;  %vm2142_vm4 = vweird.f32 %v3797_v40 }
0x16b6   :  { %v2161_v49 = vadd.f32 %v3795_v43, %v2160_v3  ;;  %vm2143_vm6 = vmor %vm2141_vm5, %vm2142_vm4 }
0x16b7   :  { %v2138_v45 = vsub.f32 1.0, %v2137_v57  ;;  %v6776_v57 = vld [vmem:[%s7610_s5 + $0x128] sm:$0xff] }
0x16b8   :  { %v2165_v33 = vsel %vm2164_vm1, %v3795_v43, %v2161_v49  ;;  %v3571_v43 = vld [vmem:[%s7605_s0 + $0xb0] sm:$0xff]  ;;  %v6782_v49 = vld [vmem:[%s7610_s5 + $0x100] sm:$0xff] }
0x16b9   :  { %v2170_v10 = vsel %vm2167_vm2, %v2169_v51, %v2165_v33  ;;  %v2139_v4 = vmul.f32 %v3797_v40, %v2138_v45  ;;  %v1925_v48 = vadd.f32 %v3571_v43, %v1880_v0  ;;  %v6788_v51 = vld [vmem:[%s7610_s5 + $0xd8] sm:$0xff]  ;;  %v6794_v33 = vld [vmem:[%s7610_s5 + $0xb0] sm:$0xff] }
0x16ba   :  { %v2173_v53 = vmul.f32 %v2172_v16, %v2170_v10  ;;  %v6800_v10 = vld [vmem:[%s7610_s5 + $0x88] sm:$0xff]  ;;  %v6806_v16 = vld [vmem:[%s7610_s5 + $0x60] sm:$0xff] }
0x16bb   :  { %v2140_v52 = vadd.f32 %v3797_v40, %v2139_v4  ;;  %v2110_v20 = vadd.f32 %v2067_v37, %v1925_v48  ;;  %v6818_v4 = vld [vmem:[%s7610_s5 + $0x10] sm:$0xff] }
0x16bc   :  { %2175 = vrot.lane.b32.xlu2 %v2173_v53, %s4253_s11  ;;  %2229 = vst.msk [vmem:[#allocation4] sm:$0xff] %vm561_vm3, %v2173_v53  ;;  %v6812_v53 = vld [vmem:[%s7610_s5 + $0x38] sm:$0xff] }
0x16bd   :  { %v2144_v58 = vsel %vm2143_vm6, %v3797_v40, %v2140_v52  ;;  %v3582_v38 = vmul.f32 -1.442695, %v2110_v20 }
0x16be   :  { %v6765_v46 = vsel %vm2146_vm7, %v2148_v8, %v2144_v58 }
0x16bf   :  { %v2151_v27 = vmul.f32 2.0, %v6765_v46  ;;  %3798 = vpow2.f32 %v3582_v38 }
0x16c1   :  { %v3584_v34 = vadd.f32 -1.0, %v2151_v27 }
0x16c3   :  { %2203 = vrot.lane.b32.xlu0 %v3584_v34, %s4252_s13 }
0x16c5   :  { %v3799_v3 = vpop.eup %3798 }
0x16c6   :  { %v2119_v56 = vadd.f32 1.0, %v3799_v3 }
0x16c8   :  { %3800 = vrcp.f32 %v2119_v56  ;;  %v2132_v58 = vand.u32 2147483648, %v2119_v56  ;;  %vm2126_vm10 = vweird.f32 %v2119_v56  ;;  %v2130_v27 = vand.u32 2147483647, %v2119_v56 }
0x16ca   :  { %v2133_v0 = vor.u32 1.1754944e-38, %v2132_v58  ;;  %vm2131_vm12 = vcmp.eq.f32.partialorder %v2130_v27, 8.507059e+37 }
0x16ce   :  { %v3801_v45 = vpop.eup %3800 }
0x16cf   :  { %v2122_v11 = vmul.f32 %v3801_v45, %v2119_v56  ;;  %vm2127_vm8 = vweird.f32 %v3801_v45 }
0x16d0   :  { %vm2128_vm11 = vmor %vm2126_vm10, %vm2127_vm8 }
0x16d1   :  { %v2123_v60 = vsub.f32 1.0, %v2122_v11 }
0x16d3   :  { %v2124_v52 = vmul.f32 %v3801_v45, %v2123_v60 }
0x16d5   :  { %v2125_v8 = vadd.f32 %v3801_v45, %v2124_v52 }
0x16d7   :  { %v2129_v34 = vsel %vm2128_vm11, %v3801_v45, %v2125_v8 }
0x16d8   :  { %v2134_v37 = vsel %vm2131_vm12, %v2133_v0, %v2129_v34 }
0x1716   :  { %v2176_v40 = vpop.permute.xlu2 %2175 }
0x1717   :  { %3586 = vmatmul.msk.f32.vlgmr.msra.gmra.mxu2 %vm318_vm9, %v2176_v40  ;;  %v2200_v40 = vld [vmem:[#allocation3] sm:$0xff] }
0x1718   :  { %2475 = vmatpush.msra.mxu2 %v6776_v57  ;;  %v2201_v11 = vmul.f32 %v2200_v40, %v2134_v37 }
0x171a   :  { %2476 = vmatpush.msra.mxu2 %v6782_v49 }
0x171c   :  { %2477 = vmatpush.msra.mxu2 %v6788_v51 }
0x171e   :  { %2478 = vmatpush.msra.mxu2 %v6794_v33 }
0x1720   :  { %2479 = vmatpush.msra.mxu2 %v6800_v10 }
0x1722   :  { %2480 = vmatpush.msra.mxu2 %v6806_v16 }
0x1724   :  { %2481 = vmatpush.msra.mxu2 %v6812_v53 }
0x1726   :  { %2482 = vmatpush.msra.mxu2 %v6818_v4 }
0x1735   :  { %v2204_v43 = vpop.permute.xlu0 %2203 }
0x1736   :  { %v2206_v48 = vmul.f32 %v2204_v43, %v2134_v37  ;;  %v6833_v43 = vld [vmem:[%s7611_s6 + $0x18] sm:$0xff]  ;;  %v6853_v37 = vld [vmem:[%s7609_s4 + $0x230] sm:$0xff] }
0x1738   :  { %2208 = vrot.lane.b32.xlu2 %v2206_v48, %s4252_s13  ;;  %v7925_v48 = vld [vmem:[#allocation12_spill] sm:$0xff] }
0x1792   :  { %v2209_v3 = vpop.permute.xlu2 %2208 }
0x1793   :  { %v2211_v60 = vadd.f32 %v2209_v3, %v2201_v11  ;;  %v3588_v3 = vld [vmem:[%s7605_s0 + $0xd0] sm:$0xff] }
0x179a   :  { %v2196_v20 = vpop.f32.mrf.mxu2 }
0x179b   :  { %3802 = vtanh.f32 %v2196_v20  ;;  %v7926_v20 = vld [vmem:[#allocation16_spill] sm:$0xff] }
0x17a1   :  { %v3803_v38 = vpop.eup %3802 }
0x17a2   :  { %2213 = vrot.lane.b32.xlu0 %v3803_v38, %s4252_s13  ;;  %v7927_v38 = vld [vmem:[#allocation18_spill] sm:$0xff] }
0x1814   :  { %v2214_v52 = vpop.permute.xlu0 %2213 }
0x1815   :  { %v2216_v56 = vadd.f32 %v2214_v52, %v2211_v60 }
0x1817   :  { %3804 = vtanh.f32 %v2216_v56  ;;  %2228 = vst.msk [vmem:[#allocation3] sm:$0xff] %vm558_vm13, %v2216_v56 }
0x181d   :  { %v3805_v45 = vpop.eup %3804 }
0x181e   :  { %2219 = vrot.lane.b32.xlu1 %v3805_v45, %s4252_s13  ;;  %v2430_v8 = vld [vmem:[#allocation3] sm:$0xff] }
0x1826   :  { %2432 = vrot.lane.b32.xlu1 %v2430_v8, %s4252_s13  ;;  %v3591_v8 = vld [vmem:[%s7605_s0 + $0xe8] sm:$0xff] }
0x1890   :  { %v2220_v58 = vpop.permute.xlu1 %2219 }
0x1891   :  { %v2222_v27 = vmul.f32 %v2220_v58, %v6765_v46  ;;  %v6839_v46 = vld [vmem:[%s7609_s4 + $0x258] sm:$0xff] }
0x1893   :  { %2224 = vrot.lane.b32.xlu2 %v2222_v27, %s4252_s13 }
0x18ed   :  { %v2225_v34 = vpop.permute.xlu2 %2224 }
0x18ee   :  { %2227 = vst.msk [vmem:[#allocation2] sm:$0xff] %vm558_vm13, %v2225_v34 }
0x18f5   :  { %v2233_v0 = vld [vmem:[#allocation2] sm:$0xff] }
0x18f6   :  { %2256 = vmatmul.f32.vlgmr.msra.gmra.mxu3 %v2233_v0  ;;  %2276 = vmatmul.f32.vlgmr.msrb.gmra.mxu1 %v2233_v0  ;;  %2232 = vst [vmem:[#allocation5 + $0x20] sm:$0xff] %v2233_v0 }
0x18f7   :  { %2296 = vmatmul.f32.vlgmr.msrb.gmra.mxu2 %v2233_v0  ;;  %2316 = vmatmul.f32.vlgmr.msra.gmra.mxu0 %v2233_v0 }
0x18f8   :  { %2515 = vmatpush.msrb.mxu1 %v6391_v50  ;;  %2610 = vmatpush.msrb.mxu2 %v6833_v43  ;;  %v6847_v50 = vld [vmem:[%s7611_s6 + $0x10] sm:$0xff] }
0x18f9   :  { %2657 = vmatpush.msra.mxu0 %v6839_v46  ;;  %2717 = vmatpush.msra.mxu3 %v6399_v41  ;;  %v6861_v41 = vld [vmem:[%s7609_s4 + $0x208] sm:$0xff] }
0x18fa   :  { %2516 = vmatpush.msrb.mxu1 %v6405_v17  ;;  %2611 = vmatpush.msrb.mxu2 %v6847_v50  ;;  %v6869_v17 = vld [vmem:[%s7609_s4 + $0x1e0] sm:$0xff] }
0x18fb   :  { %2658 = vmatpush.msra.mxu0 %v6853_v37  ;;  %2718 = vmatpush.msra.mxu3 %v6413_v1  ;;  %v6877_v1 = vld [vmem:[%s7609_s4 + $0x1b8] sm:$0xff] }
0x18fc   :  { %2517 = vmatpush.msrb.mxu1 %v6419_v23  ;;  %v6885_v23 = vld [vmem:[%s7609_s4 + $0x190] sm:$0xff] }
0x18fd   :  { %2659 = vmatpush.msra.mxu0 %v6861_v41  ;;  %2719 = vmatpush.msra.mxu3 %v6426_v9  ;;  %v6893_v9 = vld [vmem:[%s7609_s4 + $0x168] sm:$0xff] }
0x18fe   :  { %2336 = vmatmul.f32.vlgmr.msrb.gmra.mxu3 %v2233_v0  ;;  %2518 = vmatpush.msrb.mxu1 %v6432_v29  ;;  %v6901_v29 = vld [vmem:[%s7609_s4 + $0x140] sm:$0xff] }
0x18ff   :  { %2660 = vmatpush.msra.mxu0 %v6869_v17  ;;  %2720 = vmatpush.msra.mxu3 %v6439_v47  ;;  %v6908_v47 = vld [vmem:[%s7609_s4 + $0x118] sm:$0xff] }
0x1900   :  { %2519 = vmatpush.msrb.mxu1 %v6445_v61  ;;  %v6915_v61 = vld [vmem:[%s7609_s4 + $0xf0] sm:$0xff] }
0x1901   :  { %2661 = vmatpush.msra.mxu0 %v6877_v1  ;;  %2721 = vmatpush.msra.mxu3 %v6452_v63  ;;  %v6922_v63 = vld [vmem:[%s7609_s4 + $0xc8] sm:$0xff] }
0x1902   :  { %2520 = vmatpush.msrb.mxu1 %v6458_v26  ;;  %v6929_v26 = vld [vmem:[%s7609_s4 + $0xa0] sm:$0xff] }
0x1903   :  { %2662 = vmatpush.msra.mxu0 %v6885_v23  ;;  %2722 = vmatpush.msra.mxu3 %v6465_v18  ;;  %v6936_v18 = vld [vmem:[%s7609_s4 + $0x78] sm:$0xff] }
0x1904   :  { %2521 = vmatpush.msrb.mxu1 %v6471_v28  ;;  %v6943_v28 = vld [vmem:[%s7609_s4 + $0x50] sm:$0xff] }
0x1905   :  { %2663 = vmatpush.msra.mxu0 %v6893_v9  ;;  %2723 = vmatpush.msra.mxu3 %v6478_v12  ;;  %v6950_v12 = vld [vmem:[%s7609_s4 + $0x28] sm:$0xff] }
0x1906   :  { %2522 = vmatpush.msrb.mxu1 %v6484_v6  ;;  %v7918_v6 = vld [vmem:[#allocation47_spill] sm:$0xff] }
0x1907   :  { %2664 = vmatpush.msra.mxu0 %v6901_v29  ;;  %2724 = vmatpush.msra.mxu3 %v6491_v19  ;;  %v6957_v19 = vld [vmem:[%s7609_s4] sm:$0xff] }
0x1909   :  { %2665 = vmatpush.msra.mxu0 %v6908_v47  ;;  %2725 = vmatpush.msra.mxu3 %v6498_v13  ;;  %v7919_v13 = vld [vmem:[#allocation49_spill] sm:$0xff] }
0x190b   :  { %2666 = vmatpush.msra.mxu0 %v6915_v61  ;;  %2726 = vmatpush.msra.mxu3 %v6505_v15  ;;  %v7920_v15 = vld [vmem:[#allocation51_spill] sm:$0xff] }
0x190d   :  { %2667 = vmatpush.msra.mxu0 %v6922_v63  ;;  %2727 = vmatpush.msra.mxu3 %v6512_v25  ;;  %v7921_v25 = vld [vmem:[#allocation8_spill] sm:$0xff] }
0x190f   :  { %2668 = vmatpush.msra.mxu0 %v6929_v26  ;;  %2728 = vmatpush.msra.mxu3 %v6519_v55  ;;  %v7922_v55 = vld [vmem:[#allocation9_spill] sm:$0xff] }
0x1911   :  { %2669 = vmatpush.msra.mxu0 %v6936_v18  ;;  %2729 = vmatpush.msra.mxu3 %v6526_v30  ;;  %v7923_v30 = vld [vmem:[#allocation10_spill] sm:$0xff] }
0x1913   :  { %2670 = vmatpush.msra.mxu0 %v6943_v28  ;;  %2730 = vmatpush.msra.mxu3 %v6533_v54  ;;  %v7924_v54 = vld [vmem:[#allocation11_spill] sm:$0xff] }
0x1915   :  { %2671 = vmatpush.msra.mxu0 %v6950_v12  ;;  %2731 = vmatpush.msra.mxu3 %v7918_v6 }
0x1917   :  { %2672 = vmatpush.msra.mxu0 %v6957_v19  ;;  %2732 = vmatpush.msra.mxu3 %v7919_v13 }
0x1919   :  { %2912 = vmatpush.msrb.mxu3 %v7920_v15 }
0x191b   :  { %2913 = vmatpush.msrb.mxu3 %v7921_v25 }
0x191d   :  { %2914 = vmatpush.msrb.mxu3 %v7922_v55 }
0x191f   :  { %2915 = vmatpush.msrb.mxu3 %v7923_v30 }
0x1921   :  { %2916 = vmatpush.msrb.mxu3 %v7924_v54 }
0x1923   :  { %2917 = vmatpush.msrb.mxu3 %v7925_v48 }
0x1925   :  { %2918 = vmatpush.msrb.mxu3 %v7926_v20 }
0x1927   :  { %2919 = vmatpush.msrb.mxu3 %v7927_v38 }
0x1973   :  { %v2277_v40 = vpop.f32.mrf.mxu1 }
0x1974   :  { %v2341_v11 = vadd.f32 %v3588_v3, %v2277_v40 }
0x1976   :  { %v3593_v60 = vmul.f32 -1.442695, %v2341_v11 }
0x1978   :  { %3806 = vpow2.f32 %v3593_v60 }
0x1979   :  { %v6972_v52 = vpop.f32.mrf.mxu3 }
0x197e   :  { %v3807_v56 = vpop.eup %3806 }
0x197f   :  { %v2352_v45 = vadd.f32 1.0, %v3807_v56 }
0x1981   :  { %3808 = vrcp.f32 %v2352_v45  ;;  %v2337_v58 = vpop.f32.mrf.mxu3  ;;  %v2379_v15 = vand.u32 2147483648, %v2352_v45  ;;  %v2377_v30 = vand.u32 2147483647, %v2352_v45  ;;  %vm2373_vm0 = vweird.f32 %v2352_v45 }
0x1982   :  { %v6977_v27 = vadd.f32 %v3591_v8, %v2337_v58 }
0x1983   :  { %v2380_v20 = vor.u32 1.1754944e-38, %v2379_v15  ;;  %vm2378_vm2 = vcmp.eq.f32.partialorder %v2377_v30, 8.507059e+37  ;;  %v6989_v30 = vld [vmem:[%s7609_s4 + $0x260] sm:$0xff] }
0x1984   :  { %v3595_v34 = vmul.f32 -1.442695, %v6977_v27 }
0x1986   :  { %3810 = vpow2.f32 %v3595_v34 }
0x1987   :  { %v3809_v0 = vpop.eup %3808 }
0x1988   :  { %v2369_v6 = vmul.f32 %v3809_v0, %v2352_v45  ;;  %vm2374_vm15 = vweird.f32 %v3809_v0 }
0x1989   :  { %vm2375_vm1 = vmor %vm2373_vm0, %vm2374_vm15 }
0x198a   :  { %v2370_v13 = vsub.f32 1.0, %v2369_v6 }
0x198c   :  { %v3811_v25 = vpop.eup %3810  ;;  %v2371_v55 = vmul.f32 %v3809_v0, %v2370_v13 }
0x198d   :  { %v2388_v54 = vadd.f32 1.0, %v3811_v25  ;;  %v2404_v25 = vld [vmem:[#allocation4] sm:$0xff] }
0x198e   :  { %v2372_v48 = vadd.f32 %v3809_v0, %v2371_v55 }
0x198f   :  { %3812 = vrcp.f32 %v2388_v54  ;;  %v2400_v58 = vand.u32 2147483648, %v2388_v54  ;;  %v2398_v6 = vand.u32 2147483647, %v2388_v54  ;;  %vm2394_vm5 = vweird.f32 %v2388_v54 }
0x1990   :  { %v2376_v38 = vsel %vm2375_vm1, %v3809_v0, %v2372_v48  ;;  %v7001_v48 = vld [vmem:[%s7609_s4 + $0x210] sm:$0xff] }
0x1991   :  { %v6980_v3 = vsel %vm2378_vm2, %v2380_v20, %v2376_v38  ;;  %v2401_v13 = vor.u32 1.1754944e-38, %v2400_v58  ;;  %vm2399_vm7 = vcmp.eq.f32.partialorder %v2398_v6, 8.507059e+37  ;;  %v7007_v20 = vld [vmem:[%s7609_s4 + $0x1e8] sm:$0xff]  ;;  %v7013_v38 = vld [vmem:[%s7609_s4 + $0x1c0] sm:$0xff]  ;;  %v7049_v58 = vld [vmem:[%s7609_s4 + $0xd0] sm:$0xff] }
0x1992   :  { %v2383_v40 = vmul.f32 2.0, %v6980_v3  ;;  %7928 = vst [vmem:[#allocation20_spill] sm:$0xff] %v7007_v20  ;;  %v7061_v6 = vld [vmem:[%s7609_s4 + $0x80] sm:$0xff] }
0x1993   :  { %7929 = vst [vmem:[#allocation22_spill] sm:$0xff] %v7013_v38 }
0x1994   :  { %v3594_v11 = vadd.f32 -1.0, %v2383_v40  ;;  %v7019_v40 = vld [vmem:[%s7609_s4 + $0x198] sm:$0xff]  ;;  %7935 = vst [vmem:[#allocation46_spill] sm:$0xff] %v7049_v58 }
0x1995   :  { %v3813_v60 = vpop.eup %3812  ;;  %7930 = vst [vmem:[#allocation25_spill] sm:$0xff] %v7019_v40 }
0x1996   :  { %v2390_v56 = vmul.f32 %v3813_v60, %v2388_v54  ;;  %2437 = vrot.lane.b32.xlu0 %v3594_v11, %s4252_s13  ;;  %vm2395_vm4 = vweird.f32 %v3813_v60  ;;  %v6995_v54 = vld [vmem:[%s7609_s4 + $0x238] sm:$0xff]  ;;  %v7025_v11 = vld [vmem:[%s7609_s4 + $0x170] sm:$0xff]  ;;  %7937 = vst [vmem:[#allocation50_spill] sm:$0xff] %v7061_v6 }
0x1997   :  { %vm2396_vm6 = vmor %vm2394_vm5, %vm2395_vm4  ;;  %7931 = vst [vmem:[#allocation29_spill] sm:$0xff] %v7025_v11 }
0x1998   :  { %v2391_v8 = vsub.f32 1.0, %v2390_v56  ;;  %v7037_v56 = vld [vmem:[%s7609_s4 + $0x120] sm:$0xff] }
0x1999   :  { %7933 = vst [vmem:[#allocation42_spill] sm:$0xff] %v7037_v56 }
0x199a   :  { %v2392_v34 = vmul.f32 %v3813_v60, %v2391_v8  ;;  %v7043_v8 = vld [vmem:[%s7609_s4 + $0xf8] sm:$0xff] }
0x199b   :  { %7934 = vst [vmem:[#allocation44_spill] sm:$0xff] %v7043_v8 }
0x199c   :  { %v2393_v45 = vadd.f32 %v3813_v60, %v2392_v34  ;;  %v7055_v34 = vld [vmem:[%s7609_s4 + $0xa8] sm:$0xff] }
0x199d   :  { %7936 = vst [vmem:[#allocation48_spill] sm:$0xff] %v7055_v34 }
0x199e   :  { %v2397_v0 = vsel %vm2396_vm6, %v3813_v60, %v2393_v45  ;;  %v7031_v60 = vld [vmem:[%s7609_s4 + $0x148] sm:$0xff]  ;;  %v7067_v45 = vld [vmem:[%s7609_s4 + $0x58] sm:$0xff] }
0x199f   :  { %v2402_v15 = vsel %vm2399_vm7, %v2401_v13, %v2397_v0  ;;  %7932 = vst [vmem:[#allocation32_spill] sm:$0xff] %v7031_v60  ;;  %v7073_v13 = vld [vmem:[%s7609_s4 + $0x30] sm:$0xff]  ;;  %v7079_v0 = vld [vmem:[%s7609_s4 + $0x8] sm:$0xff] }
0x19a0   :  { %v2405_v55 = vmul.f32 %v2404_v25, %v2402_v15  ;;  %7938 = vst [vmem:[#allocation24_spill] sm:$0xff] %v7067_v45  ;;  %v3587_v15 = vld [vmem:[%s7605_s0 + $0xc8] sm:$0xff] }
0x19a1   :  { %7939 = vst [vmem:[#allocation13_spill] sm:$0xff] %v7073_v13  ;;  %v2340_v25 = vadd.f32 %v3587_v15, %v6972_v52 }
0x19a2   :  { %3596 = vmatmul.msk.f32.vlgmr.msra.gmra.mxu1 %vm318_vm9, %v2405_v55  ;;  %2463 = vst.msk [vmem:[#allocation4] sm:$0xff] %vm318_vm9, %v2405_v55 }
0x19a3   :  { %2677 = vmatpush.msra.mxu1 %v6989_v30  ;;  %7940 = vst [vmem:[#allocation27_spill] sm:$0xff] %v7079_v0  ;;  %v3592_v55 = vmul.f32 -1.442695, %v2340_v25 }
0x19a5   :  { %2678 = vmatpush.msra.mxu1 %v6995_v54  ;;  %3814 = vpow2.f32 %v3592_v55 }
0x19a7   :  { %2679 = vmatpush.msra.mxu1 %v7001_v48 }
0x19a9   :  { %2680 = vmatpush.msra.mxu1 %v7007_v20 }
0x19ab   :  { %2681 = vmatpush.msra.mxu1 %v7013_v38 }
0x19ad   :  { %2682 = vmatpush.msra.mxu1 %v7019_v40 }
0x19af   :  { %2683 = vmatpush.msra.mxu1 %v7025_v11 }
0x19b1   :  { %2684 = vmatpush.msra.mxu1 %v7031_v60 }
0x19b3   :  { %2685 = vmatpush.msra.mxu1 %v7037_v56 }
0x19b5   :  { %2686 = vmatpush.msra.mxu1 %v7043_v8 }
0x19b7   :  { %2687 = vmatpush.msra.mxu1 %v7049_v58 }
0x19b9   :  { %2688 = vmatpush.msra.mxu1 %v7055_v34 }
0x19bb   :  { %2689 = vmatpush.msra.mxu1 %v7061_v6 }
0x19bd   :  { %2690 = vmatpush.msra.mxu1 %v7067_v45  ;;  %v3815_v45 = vpop.eup %3814 }
0x19be   :  { %v2351_v6 = vadd.f32 1.0, %v3815_v45 }
0x19bf   :  { %2691 = vmatpush.msra.mxu1 %v7073_v13 }
0x19c0   :  { %3816 = vrcp.f32 %v2351_v6  ;;  %v2364_v60 = vand.u32 2147483648, %v2351_v6  ;;  %vm2358_vm10 = vweird.f32 %v2351_v6 }
0x19c1   :  { %2692 = vmatpush.msra.mxu1 %v7079_v0  ;;  %v2362_v0 = vand.u32 2147483647, %v2351_v6 }
0x19c2   :  { %v2365_v40 = vor.u32 1.1754944e-38, %v2364_v60 }
0x19c3   :  { %vm2363_vm12 = vcmp.eq.f32.partialorder %v2362_v0, 8.507059e+37  ;;  %v2317_v0 = vpop.f32.mrf.mxu0 }
0x19c6   :  { %v3817_v34 = vpop.eup %3816 }
0x19c7   :  { %v2354_v13 = vmul.f32 %v3817_v34, %v2351_v6  ;;  %vm2359_vm8 = vweird.f32 %v3817_v34 }
0x19c8   :  { %vm2360_vm11 = vmor %vm2358_vm10, %vm2359_vm8 }
0x19c9   :  { %v2355_v58 = vsub.f32 1.0, %v2354_v13 }
0x19cb   :  { %v2356_v8 = vmul.f32 %v3817_v34, %v2355_v58  ;;  %v2433_v58 = vpop.permute.xlu1 %2432 }
0x19cd   :  { %v2357_v56 = vadd.f32 %v3817_v34, %v2356_v8 }
0x19cf   :  { %v2361_v11 = vsel %vm2360_vm11, %v3817_v34, %v2357_v56  ;;  %v7133_v34 = vld [vmem:[%s7609_s4 + $0x200] sm:$0xff] }
0x19d0   :  { %v2366_v52 = vsel %vm2363_vm12, %v2365_v40, %v2361_v11  ;;  %v7118_v11 = vld [vmem:[%s7611_s6] sm:$0xff] }
0x19d1   :  { %v2435_v13 = vmul.f32 %v2433_v58, %v2366_v52 }
0x1a08   :  { %v2438_v38 = vpop.permute.xlu0 %2437 }
0x1a09   :  { %v2440_v15 = vmul.f32 %v2438_v38, %v2366_v52 }
0x1a0b   :  { %2442 = vrot.lane.b32.xlu2 %v2440_v15, %s4252_s13 }
0x1a1f   :  { %v2426_v45 = vpop.f32.mrf.mxu1 }
0x1a20   :  { %3818 = vtanh.f32 %v2426_v45 }
0x1a26   :  { %v3819_v25 = vpop.eup %3818 }
0x1a27   :  { %2447 = vrot.lane.b32.xlu0 %v3819_v25, %s4252_s13 }
0x1a65   :  { %v2443_v8 = vpop.permute.xlu2 %2442 }
0x1a66   :  { %v2445_v55 = vadd.f32 %v2443_v8, %v2435_v13 }
0x1a99   :  { %v2448_v20 = vpop.permute.xlu0 %2447 }
0x1a9a   :  { %v2450_v6 = vadd.f32 %v2448_v20, %v2445_v55  ;;  %v7099_v20 = vld [vmem:[%s7609_s4 + $0x278] sm:$0xff] }
0x1a9c   :  { %3820 = vtanh.f32 %v2450_v6 }
0x1aa2   :  { %v3821_v56 = vpop.eup %3820 }
0x1aa3   :  { %2453 = vrot.lane.b32.xlu1 %v3821_v56, %s4252_s13 }
0x1aab   :  { %2459 = vrot.lane.b32.xlu1 %v2450_v6, %s4252_s13 }
0x1b15   :  { %v2454_v38 = vpop.permute.xlu1 %2453 }
0x1b16   :  { %v2456_v40 = vmul.f32 %v2454_v38, %v6980_v3  ;;  %v7105_v3 = vld [vmem:[%s7611_s6 + $0x8] sm:$0xff] }
0x1b18   :  { %3597 = vmatmul.msk.f32.vlgmr.msra.gmra.mxu2 %vm370_vm14, %v2456_v40  ;;  %3598 = vmatmul.msk.f32.vlgmr.msrb.gmra.mxu0 %vm370_vm14, %v2456_v40  ;;  %2457 = vst.msk [vmem:[#allocation2] sm:$0xff] %vm370_vm14, %v2456_v40 }
0x1b19   :  { %3599 = vmatmul.msk.f32.vlgmr.msrb.gmra.mxu1 %vm370_vm14, %v2456_v40  ;;  %2697 = vmatpush.msra.mxu2 %v6647_v7  ;;  %v7112_v7 = vld [vmem:[%s7609_s4 + $0x250] sm:$0xff] }
0x1b1a   :  { %2737 = vmatpush.msrb.mxu0 %v7099_v20  ;;  %2840 = vmatpush.msrb.mxu1 %v7105_v3 }
0x1b1b   :  { %2698 = vmatpush.msra.mxu2 %v6655_v2  ;;  %v7126_v2 = vld [vmem:[%s7609_s4 + $0x228] sm:$0xff] }
0x1b1c   :  { %2738 = vmatpush.msrb.mxu0 %v7112_v7  ;;  %2841 = vmatpush.msrb.mxu1 %v7118_v11 }
0x1b1d   :  { %v2460_v60 = vpop.permute.xlu1 %2459  ;;  %2699 = vmatpush.msra.mxu2 %v6663_v22  ;;  %v7140_v22 = vld [vmem:[%s7609_s4 + $0x1d8] sm:$0xff] }
0x1b1e   :  { %2462 = vst.msk [vmem:[#allocation3] sm:$0xff] %vm370_vm14, %v2460_v60  ;;  %2739 = vmatpush.msrb.mxu0 %v7126_v2 }
0x1b1f   :  { %2700 = vmatpush.msra.mxu2 %v6671_v36  ;;  %v7147_v36 = vld [vmem:[%s7609_s4 + $0x1b0] sm:$0xff] }
0x1b20   :  { %2740 = vmatpush.msrb.mxu0 %v7133_v34 }
0x1b21   :  { %2701 = vmatpush.msra.mxu2 %v6678_v42  ;;  %v7154_v42 = vld [vmem:[%s7609_s4 + $0x188] sm:$0xff] }
0x1b22   :  { %2741 = vmatpush.msrb.mxu0 %v7140_v22 }
0x1b23   :  { %2702 = vmatpush.msra.mxu2 %v6685_v32  ;;  %v7161_v32 = vld [vmem:[%s7609_s4 + $0x160] sm:$0xff] }
0x1b24   :  { %2742 = vmatpush.msrb.mxu0 %v7147_v36 }
0x1b25   :  { %2703 = vmatpush.msra.mxu2 %v6692_v44  ;;  %v7168_v44 = vld [vmem:[%s7609_s4 + $0x138] sm:$0xff] }
0x1b26   :  { %2743 = vmatpush.msrb.mxu0 %v7154_v42 }
0x1b27   :  { %2704 = vmatpush.msra.mxu2 %v6699_v62  ;;  %v7175_v62 = vld [vmem:[%s7609_s4 + $0x110] sm:$0xff] }
0x1b28   :  { %2744 = vmatpush.msrb.mxu0 %v7161_v32 }
0x1b29   :  { %2705 = vmatpush.msra.mxu2 %v6706_v5  ;;  %v7182_v5 = vld [vmem:[%s7609_s4 + $0xe8] sm:$0xff] }
0x1b2a   :  { %2745 = vmatpush.msrb.mxu0 %v7168_v44 }
0x1b2b   :  { %2706 = vmatpush.msra.mxu2 %v6713_v21  ;;  %v7189_v21 = vld [vmem:[%s7609_s4 + $0xc0] sm:$0xff] }
0x1b2c   :  { %2746 = vmatpush.msrb.mxu0 %v7175_v62  ;;  %7941 = vst [vmem:[#allocation14_spill] sm:$0xff] %v7189_v21 }
0x1b2d   :  { %2707 = vmatpush.msra.mxu2 %v6720_v31  ;;  %v7196_v31 = vld [vmem:[%s7609_s4 + $0x98] sm:$0xff] }
0x1b2e   :  { %2747 = vmatpush.msrb.mxu0 %v7182_v5  ;;  %7942 = vst [vmem:[#allocation28_spill] sm:$0xff] %v7196_v31 }
0x1b2f   :  { %2708 = vmatpush.msra.mxu2 %v6727_v35  ;;  %v7203_v35 = vld [vmem:[%s7609_s4 + $0x70] sm:$0xff] }
0x1b30   :  { %2748 = vmatpush.msrb.mxu0 %v7189_v21  ;;  %7943 = vst [vmem:[#allocation15_spill] sm:$0xff] %v7203_v35 }
0x1b31   :  { %2709 = vmatpush.msra.mxu2 %v6734_v39  ;;  %v7210_v39 = vld [vmem:[%s7609_s4 + $0x48] sm:$0xff] }
0x1b32   :  { %2749 = vmatpush.msrb.mxu0 %v7196_v31  ;;  %7944 = vst [vmem:[#allocation31_spill] sm:$0xff] %v7210_v39 }
0x1b33   :  { %2710 = vmatpush.msra.mxu2 %v6741_v59  ;;  %v7217_v59 = vld [vmem:[%s7609_s4 + $0x20] sm:$0xff] }
0x1b34   :  { %2750 = vmatpush.msrb.mxu0 %v7203_v35  ;;  %7945 = vst [vmem:[#allocation17_spill] sm:$0xff] %v7217_v59  ;;  %v2589_v35 = vld [vmem:[#allocation4] sm:$0xff] }
0x1b35   :  { %2711 = vmatpush.msra.mxu2 %v6748_v14  ;;  %v3590_v14 = vld [vmem:[%s7605_s0 + $0xe0] sm:$0xff] }
0x1b36   :  { %2751 = vmatpush.msrb.mxu0 %v7210_v39  ;;  %v2343_v52 = vadd.f32 %v3590_v14, %v2317_v0 }
0x1b37   :  { %2712 = vmatpush.msra.mxu2 %v6755_v24 }
0x1b38   :  { %2752 = vmatpush.msrb.mxu0 %v7217_v59 }
0x1b95   :  { %v2504_v15 = vpop.f32.mrf.mxu0 }
0x1b96   :  { %v2528_v45 = vadd.f32 %v2504_v15, %v2343_v52  ;;  %v2524_v25 = vpop.f32.mrf.mxu1 }
0x1b97   :  { %v2529_v58 = vadd.f32 %v2524_v25, %v6977_v27 }
0x1b98   :  { %v3601_v8 = vmul.f32 -1.442695, %v2528_v45 }
0x1b99   :  { %v3603_v24 = vmul.f32 -1.442695, %v2529_v58 }
0x1b9a   :  { %3822 = vpow2.f32 %v3601_v8 }
0x1b9b   :  { %3824 = vpow2.f32 %v3603_v24 }
0x1ba0   :  { %v3823_v13 = vpop.eup %3822 }
0x1ba1   :  { %v3825_v55 = vpop.eup %3824  ;;  %v2537_v6 = vadd.f32 1.0, %v3823_v13 }
0x1ba2   :  { %v2573_v56 = vadd.f32 1.0, %v3825_v55 }
0x1ba3   :  { %3826 = vrcp.f32 %v2537_v6  ;;  %v2564_v52 = vand.u32 2147483648, %v2537_v6  ;;  %v2562_v27 = vand.u32 2147483647, %v2537_v6  ;;  %vm2558_vm1 = vweird.f32 %v2537_v6 }
0x1ba4   :  { %3828 = vrcp.f32 %v2573_v56  ;;  %v2585_v15 = vand.u32 2147483648, %v2573_v56  ;;  %v2583_v25 = vand.u32 2147483647, %v2573_v56  ;;  %vm2579_vm2 = vweird.f32 %v2573_v56 }
0x1ba5   :  { %v2565_v24 = vor.u32 1.1754944e-38, %v2564_v52  ;;  %vm2563_vm6 = vcmp.eq.f32.partialorder %v2562_v27, 8.507059e+37 }
0x1ba6   :  { %v2586_v13 = vor.u32 1.1754944e-38, %v2585_v15  ;;  %vm2584_vm7 = vcmp.eq.f32.partialorder %v2583_v25, 8.507059e+37 }
0x1ba9   :  { %v3827_v38 = vpop.eup %3826 }
0x1baa   :  { %v3829_v40 = vpop.eup %3828  ;;  %v2554_v60 = vmul.f32 %v3827_v38, %v2537_v6  ;;  %vm2559_vm15 = vweird.f32 %v3827_v38  ;;  %v3589_v6 = vld [vmem:[%s7605_s0 + $0xd8] sm:$0xff] }
0x1bab   :  { %v2575_v59 = vmul.f32 %v3829_v40, %v2573_v56  ;;  %vm2580_vm0 = vweird.f32 %v3829_v40  ;;  %vm2560_vm4 = vmor %vm2558_vm1, %vm2559_vm15 }
0x1bac   :  { %v2555_v0 = vsub.f32 1.0, %v2554_v60  ;;  %vm2581_vm5 = vmor %vm2579_vm2, %vm2580_vm0 }
0x1bad   :  { %v2576_v14 = vsub.f32 1.0, %v2575_v59 }
0x1bae   :  { %v2556_v39 = vmul.f32 %v3827_v38, %v2555_v0 }
0x1baf   :  { %v2577_v45 = vmul.f32 %v3829_v40, %v2576_v14 }
0x1bb0   :  { %v2557_v58 = vadd.f32 %v3827_v38, %v2556_v39  ;;  %v2297_v39 = vpop.f32.mrf.mxu2 }
0x1bb1   :  { %v2578_v8 = vadd.f32 %v3829_v40, %v2577_v45 }
0x1bb2   :  { %v2561_v55 = vsel %vm2560_vm4, %v3827_v38, %v2557_v58  ;;  %v2342_v38 = vadd.f32 %v3589_v6, %v2297_v39 }
0x1bb3   :  { %v2582_v60 = vsel %vm2581_vm5, %v3829_v40, %v2578_v8  ;;  %v7224_v59 = vsel %vm2563_vm6, %v2565_v24, %v2561_v55 }
0x1bb4   :  { %v2587_v0 = vsel %vm2584_vm7, %v2586_v13, %v2582_v60  ;;  %v2568_v14 = vmul.f32 2.0, %v7224_v59 }
0x1bb5   :  { %v2590_v31 = vmul.f32 %v2589_v35, %v2587_v0 }
0x1bb6   :  { %v3602_v21 = vadd.f32 -1.0, %v2568_v14 }
0x1bb7   :  { %2592 = vrot.lane.b32.xlu2 %v2590_v31, %s4253_s11  ;;  %2646 = vst.msk [vmem:[#allocation4] sm:$0xff] %vm561_vm3, %v2590_v31 }
0x1bb8   :  { %2620 = vrot.lane.b32.xlu0 %v3602_v21, %s4252_s13  ;;  %v2484_v56 = vpop.f32.mrf.mxu2 }
0x1bb9   :  { %v2527_v40 = vadd.f32 %v2484_v56, %v2342_v38 }
0x1bbb   :  { %v3600_v52 = vmul.f32 -1.442695, %v2527_v40 }
0x1bbd   :  { %3830 = vpow2.f32 %v3600_v52 }
0x1bc3   :  { %v3831_v15 = vpop.eup %3830 }
0x1bc4   :  { %v2536_v27 = vadd.f32 1.0, %v3831_v15  ;;  %v7253_v15 = vld [vmem:[%s7610_s5 + $0x138] sm:$0xff] }
0x1bc6   :  { %3832 = vrcp.f32 %v2536_v27  ;;  %vm2543_vm10 = vweird.f32 %v2536_v27 }
0x1bcc   :  { %v3833_v31 = vpop.eup %3832 }
0x1bcd   :  { %v2539_v21 = vmul.f32 %v3833_v31, %v2536_v27  ;;  %vm2544_vm8 = vweird.f32 %v3833_v31 }
0x1bce   :  { %vm2545_vm11 = vmor %vm2543_vm10, %vm2544_vm8 }
0x1bcf   :  { %v2540_v45 = vsub.f32 1.0, %v2539_v21  ;;  %v4179_v21 = vld [vmem:[%s7609_s4 + $0x1a8] sm:$0xff] }
0x1bd1   :  { %v2541_v25 = vmul.f32 %v3833_v31, %v2540_v45  ;;  %v4181_v45 = vld [vmem:[%s7609_s4 + $0x180] sm:$0xff] }
0x1bd3   :  { %v2542_v58 = vadd.f32 %v3833_v31, %v2541_v25  ;;  %v4183_v25 = vld [vmem:[%s7609_s4 + $0x158] sm:$0xff] }
0x1bd5   :  { %v2546_v8 = vsel %vm2545_vm11, %v3833_v31, %v2542_v58  ;;  %v4177_v31 = vld [vmem:[%s7609_s4 + $0x1d0] sm:$0xff]  ;;  %v4185_v58 = vld [vmem:[%s7609_s4 + $0x108] sm:$0xff] }
0x1c11   :  { %v2593_v35 = vpop.permute.xlu2 %2592 }
0x1c12   :  { %3604 = vmatmul.msk.f32.vlgmr.msrb.gmra.mxu2 %vm318_vm9, %v2593_v35  ;;  %v4175_v35 = vld [vmem:[%s7609_s4 + $0x1f8] sm:$0xff] }
0x1c13   :  { %2892 = vmatpush.msrb.mxu2 %v6776_v57  ;;  %v2549_v57 = vand.u32 2147483648, %v2536_v27 }
0x1c15   :  { %2893 = vmatpush.msrb.mxu2 %v6782_v49  ;;  %v2547_v49 = vand.u32 2147483647, %v2536_v27  ;;  %v7264_v27 = vld [vmem:[%s7610_s5 + $0x110] sm:$0xff] }
0x1c17   :  { %2894 = vmatpush.msrb.mxu2 %v6788_v51  ;;  %v2550_v51 = vor.u32 1.1754944e-38, %v2549_v57  ;;  %vm2548_vm12 = vcmp.eq.f32.partialorder %v2547_v49, 8.507059e+37  ;;  %v4194_v57 = vld [vmem:[%s7610_s5 + $0xe0] sm:$0xff]  ;;  %v4196_v49 = vld [vmem:[%s7610_s5 + $0x90] sm:$0xff] }
0x1c19   :  { %2895 = vmatpush.msrb.mxu2 %v6794_v33  ;;  %v2551_v24 = vsel %vm2548_vm12, %v2550_v51, %v2546_v8  ;;  %v4197_v8 = vld [vmem:[%s7610_s5 + $0x68] sm:$0xff]  ;;  %v4198_v51 = vld [vmem:[%s7610_s5 + $0x40] sm:$0xff] }
0x1c1b   :  { %2896 = vmatpush.msrb.mxu2 %v6800_v10 }
0x1c1d   :  { %2897 = vmatpush.msrb.mxu2 %v6806_v16 }
0x1c1f   :  { %2898 = vmatpush.msrb.mxu2 %v6812_v53 }
0x1c21   :  { %2899 = vmatpush.msrb.mxu2 %v6818_v4  ;;  %v2617_v4 = vld [vmem:[#allocation3] sm:$0xff] }
0x1c22   :  { %v2618_v55 = vmul.f32 %v2617_v4, %v2551_v24  ;;  %v3609_v4 = vld [vmem:[%s7605_s0 + $0x110] sm:$0xff] }
0x1c2a   :  { %v2621_v33 = vpop.permute.xlu0 %2620 }
0x1c2b   :  { %v2623_v13 = vmul.f32 %v2621_v33, %v2551_v24  ;;  %v4199_v33 = vld [vmem:[%s7610_s5 + $0x18] sm:$0xff] }
0x1c2c   :  { %v3606_v24 = vld [vmem:[%s7605_s0 + $0xf8] sm:$0xff] }
0x1c2d   :  { %2625 = vrot.lane.b32.xlu2 %v2623_v13, %s4252_s13 }
0x1c87   :  { %v2626_v53 = vpop.permute.xlu2 %2625 }
0x1c88   :  { %v2628_v60 = vadd.f32 %v2626_v53, %v2618_v55 }
0x1c95   :  { %v2613_v10 = vpop.f32.mrf.mxu2 }
0x1c96   :  { %3834 = vtanh.f32 %v2613_v10 }
0x1c9c   :  { %v3835_v16 = vpop.eup %3834 }
0x1c9d   :  { %2630 = vrot.lane.b32.xlu0 %v3835_v16, %s4252_s13 }
0x1d0f   :  { %v2631_v0 = vpop.permute.xlu0 %2630 }
0x1d10   :  { %v2633_v14 = vadd.f32 %v2631_v0, %v2628_v60 }
0x1d12   :  { %3836 = vtanh.f32 %v2633_v14  ;;  %2645 = vst.msk [vmem:[#allocation3] sm:$0xff] %vm558_vm13, %v2633_v14 }
0x1d18   :  { %v3837_v39 = vpop.eup %3836 }
0x1d19   :  { %2636 = vrot.lane.b32.xlu1 %v3837_v39, %s4252_s13  ;;  %v2847_v6 = vld [vmem:[#allocation3] sm:$0xff] }
0x1d21   :  { %2849 = vrot.lane.b32.xlu1 %v2847_v6, %s4252_s13 }
0x1d8b   :  { %v2637_v56 = vpop.permute.xlu1 %2636 }
0x1d8c   :  { %v2639_v38 = vmul.f32 %v2637_v56, %v7224_v59  ;;  %v4169_v59 = vld [vmem:[%s7609_s4 + $0x270] sm:$0xff] }
0x1d8e   :  { %2641 = vrot.lane.b32.xlu2 %v2639_v38, %s4252_s13 }
0x1de8   :  { %v2642_v40 = vpop.permute.xlu2 %2641 }
0x1de9   :  { %2644 = vst.msk [vmem:[#allocation2] sm:$0xff] %vm558_vm13, %v2642_v40 }
0x1df0   :  { %v2650_v52 = vld [vmem:[#allocation2] sm:$0xff] }
0x1df1   :  { %2673 = vmatmul.f32.vlgmr.msra.gmra.mxu0 %v2650_v52  ;;  %2693 = vmatmul.f32.vlgmr.msra.gmra.mxu1 %v2650_v52  ;;  %2649 = vst [vmem:[#allocation5 + $0x28] sm:$0xff] %v2650_v52 }
0x1df2   :  { %2713 = vmatmul.f32.vlgmr.msra.gmra.mxu2 %v2650_v52  ;;  %2733 = vmatmul.f32.vlgmr.msra.gmra.mxu3 %v2650_v52 }
0x1df3   :  { %2932 = vmatpush.msra.mxu1 %v7253_v15  ;;  %3027 = vmatpush.msra.mxu2 %v6833_v43  ;;  %v4171_v43 = vld [vmem:[%s7609_s4 + $0x248] sm:$0xff] }
0x1df4   :  { %3074 = vmatpush.msra.mxu3 %v6839_v46  ;;  %3134 = vmatpush.msra.mxu0 %v4169_v59  ;;  %v7275_v46 = vld [vmem:[%s7610_s5 + $0xe8] sm:$0xff] }
0x1df5   :  { %2933 = vmatpush.msra.mxu1 %v7264_v27  ;;  %3028 = vmatpush.msra.mxu2 %v6847_v50  ;;  %v4173_v50 = vld [vmem:[%s7609_s4 + $0x220] sm:$0xff] }
0x1df6   :  { %3075 = vmatpush.msra.mxu3 %v6853_v37  ;;  %3135 = vmatpush.msra.mxu0 %v4171_v43  ;;  %v7285_v37 = vld [vmem:[%s7610_s5 + $0xc0] sm:$0xff] }
0x1df7   :  { %2934 = vmatpush.msra.mxu1 %v7275_v46 }
0x1df8   :  { %3076 = vmatpush.msra.mxu3 %v6861_v41  ;;  %3136 = vmatpush.msra.mxu0 %v4173_v50  ;;  %v7295_v41 = vld [vmem:[%s7610_s5 + $0x98] sm:$0xff] }
0x1df9   :  { %2753 = vmatmul.f32.vlgmr.msrb.gmra.mxu0 %v2650_v52  ;;  %2935 = vmatpush.msra.mxu1 %v7285_v37 }
0x1dfa   :  { %3077 = vmatpush.msra.mxu3 %v6869_v17  ;;  %3137 = vmatpush.msra.mxu0 %v4175_v35  ;;  %v7305_v17 = vld [vmem:[%s7610_s5 + $0x70] sm:$0xff] }
0x1dfb   :  { %2936 = vmatpush.msra.mxu1 %v7295_v41 }
0x1dfc   :  { %3078 = vmatpush.msra.mxu3 %v6877_v1  ;;  %3138 = vmatpush.msra.mxu0 %v4177_v31  ;;  %v7315_v1 = vld [vmem:[%s7610_s5 + $0x48] sm:$0xff] }
0x1dfd   :  { %2937 = vmatpush.msra.mxu1 %v7305_v17 }
0x1dfe   :  { %3079 = vmatpush.msra.mxu3 %v6885_v23  ;;  %3139 = vmatpush.msra.mxu0 %v4179_v21  ;;  %v7325_v23 = vld [vmem:[%s7610_s5 + $0x20] sm:$0xff] }
0x1dff   :  { %2938 = vmatpush.msra.mxu1 %v7315_v1 }
0x1e00   :  { %3080 = vmatpush.msra.mxu3 %v6893_v9  ;;  %3140 = vmatpush.msra.mxu0 %v4181_v45  ;;  %v4184_v9 = vld [vmem:[%s7609_s4 + $0x130] sm:$0xff] }
0x1e01   :  { %2939 = vmatpush.msra.mxu1 %v7325_v23 }
0x1e02   :  { %3081 = vmatpush.msra.mxu3 %v6901_v29  ;;  %3141 = vmatpush.msra.mxu0 %v4183_v25  ;;  %v4186_v29 = vld [vmem:[%s7609_s4 + $0xe0] sm:$0xff] }
0x1e04   :  { %3082 = vmatpush.msra.mxu3 %v6908_v47  ;;  %3142 = vmatpush.msra.mxu0 %v4184_v9  ;;  %v4187_v47 = vld [vmem:[%s7609_s4 + $0xb8] sm:$0xff] }
0x1e06   :  { %3083 = vmatpush.msra.mxu3 %v6915_v61  ;;  %3143 = vmatpush.msra.mxu0 %v4185_v58  ;;  %v4188_v61 = vld [vmem:[%s7609_s4 + $0x90] sm:$0xff] }
0x1e08   :  { %3084 = vmatpush.msra.mxu3 %v6922_v63  ;;  %3144 = vmatpush.msra.mxu0 %v4186_v29  ;;  %v4189_v63 = vld [vmem:[%s7609_s4 + $0x68] sm:$0xff] }
0x1e0a   :  { %3085 = vmatpush.msra.mxu3 %v6929_v26  ;;  %3145 = vmatpush.msra.mxu0 %v4187_v47  ;;  %v4190_v26 = vld [vmem:[%s7609_s4 + $0x40] sm:$0xff] }
0x1e0c   :  { %3086 = vmatpush.msra.mxu3 %v6936_v18  ;;  %3146 = vmatpush.msra.mxu0 %v4188_v61  ;;  %v4191_v18 = vld [vmem:[%s7609_s4 + $0x18] sm:$0xff] }
0x1e0e   :  { %3087 = vmatpush.msra.mxu3 %v6943_v28  ;;  %3147 = vmatpush.msra.mxu0 %v4189_v63  ;;  %v4192_v28 = vld [vmem:[%s7610_s5 + $0x130] sm:$0xff] }
0x1e10   :  { %3088 = vmatpush.msra.mxu3 %v6950_v12  ;;  %3148 = vmatpush.msra.mxu0 %v4190_v26  ;;  %v4193_v12 = vld [vmem:[%s7610_s5 + $0x108] sm:$0xff] }
0x1e12   :  { %3089 = vmatpush.msra.mxu3 %v6957_v19  ;;  %3149 = vmatpush.msra.mxu0 %v4191_v18  ;;  %v4195_v19 = vld [vmem:[%s7610_s5 + $0xb8] sm:$0xff] }
0x1e14   :  { %3329 = vmatpush.msrb.mxu0 %v4192_v28 }
0x1e16   :  { %3330 = vmatpush.msrb.mxu0 %v4193_v12 }
0x1e18   :  { %3331 = vmatpush.msrb.mxu0 %v4194_v57 }
0x1e1a   :  { %3332 = vmatpush.msrb.mxu0 %v4195_v19  ;;  %v2821_v19 = vld [vmem:[#allocation4] sm:$0xff] }
0x1e1c   :  { %3333 = vmatpush.msrb.mxu0 %v4196_v49 }
0x1e1e   :  { %3334 = vmatpush.msrb.mxu0 %v4197_v8  ;;  %v7946_v8 = vld [vmem:[#allocation20_spill] sm:$0xff] }
0x1e20   :  { %3335 = vmatpush.msrb.mxu0 %v4198_v51  ;;  %v7947_v51 = vld [vmem:[#allocation22_spill] sm:$0xff] }
0x1e22   :  { %3336 = vmatpush.msrb.mxu0 %v4199_v33  ;;  %v7948_v33 = vld [vmem:[#allocation25_spill] sm:$0xff] }
0x1e6e   :  { %v7391_v13 = vpop.f32.mrf.mxu0  ;;  %v2694_v10 = vpop.f32.mrf.mxu1 }
0x1e6f   :  { %v2758_v16 = vadd.f32 %v3606_v24, %v2694_v10  ;;  %v7949_v24 = vld [vmem:[#allocation29_spill] sm:$0xff]  ;;  %v7950_v10 = vld [vmem:[#allocation32_spill] sm:$0xff] }
0x1e71   :  { %v3611_v53 = vmul.f32 -1.442695, %v2758_v16  ;;  %v7951_v16 = vld [vmem:[#allocation42_spill] sm:$0xff] }
0x1e73   :  { %3838 = vpow2.f32 %v3611_v53  ;;  %v7952_v53 = vld [vmem:[#allocation44_spill] sm:$0xff] }
0x1e76   :  { %v2754_v55 = vpop.f32.mrf.mxu0 }
0x1e77   :  { %v7396_v60 = vadd.f32 %v3609_v4, %v2754_v55  ;;  %v7953_v4 = vld [vmem:[#allocation46_spill] sm:$0xff]  ;;  %v7957_v55 = vld [vmem:[#allocation13_spill] sm:$0xff] }
0x1e79   :  { %v3613_v0 = vmul.f32 -1.442695, %v7396_v60  ;;  %v3839_v14 = vpop.eup %3838 }
0x1e7a   :  { %v2769_v39 = vadd.f32 1.0, %v3839_v14  ;;  %v3605_v14 = vld [vmem:[%s7605_s0 + $0xf0] sm:$0xff] }
0x1e7b   :  { %3840 = vpow2.f32 %v3613_v0  ;;  %v7958_v0 = vld [vmem:[#allocation27_spill] sm:$0xff] }
0x1e7c   :  { %3842 = vrcp.f32 %v2769_v39  ;;  %v2796_v59 = vand.u32 2147483648, %v2769_v39  ;;  %v2794_v50 = vand.u32 2147483647, %v2769_v39  ;;  %vm2790_vm0 = vweird.f32 %v2769_v39 }
0x1e7e   :  { %v2797_v45 = vor.u32 1.1754944e-38, %v2796_v59  ;;  %vm2795_vm2 = vcmp.eq.f32.partialorder %v2794_v50, 8.507059e+37 }
0x1e81   :  { %v3841_v6 = vpop.eup %3840 }
0x1e82   :  { %v2805_v56 = vadd.f32 1.0, %v3841_v6  ;;  %v3843_v38 = vpop.eup %3842 }
0x1e83   :  { %v2786_v40 = vmul.f32 %v3843_v38, %v2769_v39  ;;  %vm2791_vm15 = vweird.f32 %v3843_v38  ;;  %v2757_v39 = vadd.f32 %v3605_v14, %v7391_v13 }
0x1e84   :  { %3844 = vrcp.f32 %v2805_v56  ;;  %vm2792_vm1 = vmor %vm2790_vm0, %vm2791_vm15  ;;  %v2817_v29 = vand.u32 2147483648, %v2805_v56  ;;  %v2815_v63 = vand.u32 2147483647, %v2805_v56  ;;  %vm2811_vm5 = vweird.f32 %v2805_v56 }
0x1e85   :  { %v2787_v52 = vsub.f32 1.0, %v2786_v40  ;;  %v3610_v6 = vmul.f32 -1.442695, %v2757_v39 }
0x1e86   :  { %v2818_v28 = vor.u32 1.1754944e-38, %v2817_v29  ;;  %vm2816_vm7 = vcmp.eq.f32.partialorder %v2815_v63, 8.507059e+37 }
0x1e87   :  { %v2788_v43 = vmul.f32 %v3843_v38, %v2787_v52  ;;  %3846 = vpow2.f32 %v3610_v6 }
0x1e89   :  { %v2789_v31 = vadd.f32 %v3843_v38, %v2788_v43 }
0x1e8a   :  { %v3845_v35 = vpop.eup %3844 }
0x1e8b   :  { %v2807_v21 = vmul.f32 %v3845_v35, %v2805_v56  ;;  %v2793_v25 = vsel %vm2792_vm1, %v3843_v38, %v2789_v31  ;;  %vm2812_vm4 = vweird.f32 %v3845_v35 }
0x1e8c   :  { %v7399_v58 = vsel %vm2795_vm2, %v2797_v45, %v2793_v25  ;;  %vm2813_vm6 = vmor %vm2811_vm5, %vm2812_vm4 }
0x1e8d   :  { %v2808_v9 = vsub.f32 1.0, %v2807_v21  ;;  %v2800_v47 = vmul.f32 2.0, %v7399_v58  ;;  %v3847_v56 = vpop.eup %3846 }
0x1e8e   :  { %v2768_v38 = vadd.f32 1.0, %v3847_v56 }
0x1e8f   :  { %v2809_v61 = vmul.f32 %v3845_v35, %v2808_v9  ;;  %v3612_v26 = vadd.f32 -1.0, %v2800_v47 }
0x1e90   :  { %3848 = vrcp.f32 %v2768_v38  ;;  %vm2775_vm10 = vweird.f32 %v2768_v38  ;;  %v2779_v31 = vand.u32 2147483647, %v2768_v38 }
0x1e91   :  { %v2810_v18 = vadd.f32 %v3845_v35, %v2809_v61  ;;  %2854 = vrot.lane.b32.xlu0 %v3612_v26, %s4252_s13  ;;  %v2850_v61 = vpop.permute.xlu1 %2849 }
0x1e92   :  { %vm2780_vm12 = vcmp.eq.f32.partialorder %v2779_v31, 8.507059e+37 }
0x1e93   :  { %v2814_v12 = vsel %vm2813_vm6, %v3845_v35, %v2810_v18  ;;  %v2781_v35 = vand.u32 2147483648, %v2768_v38 }
0x1e94   :  { %v2819_v57 = vsel %vm2816_vm7, %v2818_v28, %v2814_v12 }
0x1e95   :  { %v2822_v49 = vmul.f32 %v2821_v19, %v2819_v57  ;;  %v2782_v45 = vor.u32 1.1754944e-38, %v2781_v35 }
0x1e96   :  { %v3849_v40 = vpop.eup %3848 }
0x1e97   :  { %3614 = vmatmul.msk.f32.vlgmr.msrb.gmra.mxu1 %vm318_vm9, %v2822_v49  ;;  %2880 = vst.msk [vmem:[#allocation4] sm:$0xff] %vm318_vm9, %v2822_v49  ;;  %v2771_v52 = vmul.f32 %v3849_v40, %v2768_v38  ;;  %vm2776_vm8 = vweird.f32 %v3849_v40 }
0x1e98   :  { %3094 = vmatpush.msrb.mxu1 %v6989_v30  ;;  %v7954_v30 = vld [vmem:[#allocation48_spill] sm:$0xff]  ;;  %vm2777_vm11 = vmor %vm2775_vm10, %vm2776_vm8 }
0x1e99   :  { %v2772_v59 = vsub.f32 1.0, %v2771_v52 }
0x1e9a   :  { %3095 = vmatpush.msrb.mxu1 %v6995_v54  ;;  %v7955_v54 = vld [vmem:[#allocation50_spill] sm:$0xff] }
0x1e9b   :  { %v2773_v43 = vmul.f32 %v3849_v40, %v2772_v59 }
0x1e9c   :  { %3096 = vmatpush.msrb.mxu1 %v7001_v48  ;;  %v7956_v48 = vld [vmem:[#allocation24_spill] sm:$0xff] }
0x1e9d   :  { %v2774_v50 = vadd.f32 %v3849_v40, %v2773_v43 }
0x1e9e   :  { %3097 = vmatpush.msrb.mxu1 %v7946_v8  ;;  %v4200_v8 = vld [vmem:[%s7609_s4 + $0x268] sm:$0xff] }
0x1e9f   :  { %v2778_v21 = vsel %vm2777_vm11, %v3849_v40, %v2774_v50 }
0x1ea0   :  { %3098 = vmatpush.msrb.mxu1 %v7947_v51  ;;  %v2783_v13 = vsel %vm2780_vm12, %v2782_v45, %v2778_v21 }
0x1ea1   :  { %v2852_v26 = vmul.f32 %v2850_v61, %v2783_v13 }
0x1ea2   :  { %3099 = vmatpush.msrb.mxu1 %v7948_v33  ;;  %v4202_v33 = vld [vmem:[%s7609_s4 + $0x218] sm:$0xff] }
0x1ea4   :  { %3100 = vmatpush.msrb.mxu1 %v7949_v24  ;;  %v4213_v24 = vld [vmem:[%s7609_s4 + $0x60] sm:$0xff] }
0x1ea6   :  { %3101 = vmatpush.msrb.mxu1 %v7950_v10  ;;  %v4214_v10 = vld [vmem:[%s7609_s4 + $0x38] sm:$0xff] }
0x1ea8   :  { %3102 = vmatpush.msrb.mxu1 %v7951_v16  ;;  %v7962_v16 = vld [vmem:[#allocation31_spill] sm:$0xff] }
0x1eaa   :  { %3103 = vmatpush.msrb.mxu1 %v7952_v53  ;;  %v4215_v53 = vld [vmem:[%s7609_s4 + $0x10] sm:$0xff] }
0x1eac   :  { %3104 = vmatpush.msrb.mxu1 %v7953_v4  ;;  %v7963_v4 = vld [vmem:[#allocation17_spill] sm:$0xff] }
0x1eae   :  { %3105 = vmatpush.msrb.mxu1 %v7954_v30  ;;  %v2734_v30 = vpop.f32.mrf.mxu3 }
0x1eb0   :  { %3106 = vmatpush.msrb.mxu1 %v7955_v54 }
0x1eb2   :  { %3107 = vmatpush.msrb.mxu1 %v7956_v48  ;;  %v3608_v48 = vld [vmem:[%s7605_s0 + $0x108] sm:$0xff] }
0x1eb3   :  { %v2760_v14 = vadd.f32 %v3608_v48, %v2734_v30 }
0x1eb4   :  { %3108 = vmatpush.msrb.mxu1 %v7957_v55 }
0x1eb6   :  { %3109 = vmatpush.msrb.mxu1 %v7958_v0 }
0x1f03   :  { %v2855_v25 = vpop.permute.xlu0 %2854 }
0x1f04   :  { %v2857_v9 = vmul.f32 %v2855_v25, %v2783_v13 }
0x1f06   :  { %2859 = vrot.lane.b32.xlu2 %v2857_v9, %s4252_s13 }
0x1f14   :  { %v2843_v29 = vpop.f32.mrf.mxu1 }
0x1f15   :  { %3850 = vtanh.f32 %v2843_v29 }
0x1f1b   :  { %v3851_v47 = vpop.eup %3850 }
0x1f1c   :  { %2864 = vrot.lane.b32.xlu0 %v3851_v47, %s4252_s13 }
0x1f60   :  { %v2860_v63 = vpop.permute.xlu2 %2859 }
0x1f61   :  { %v2862_v18 = vadd.f32 %v2860_v63, %v2852_v26  ;;  %v3006_v63 = vld [vmem:[#allocation4] sm:$0xff] }
0x1f8e   :  { %v2865_v28 = vpop.permute.xlu0 %2864 }
0x1f8f   :  { %v2867_v12 = vadd.f32 %v2865_v28, %v2862_v18 }
0x1f91   :  { %3852 = vtanh.f32 %v2867_v12 }
0x1f97   :  { %v3853_v57 = vpop.eup %3852 }
0x1f98   :  { %2870 = vrot.lane.b32.xlu1 %v3853_v57, %s4252_s13 }
0x1fa0   :  { %2876 = vrot.lane.b32.xlu1 %v2867_v12, %s4252_s13 }
0x200a   :  { %v2871_v19 = vpop.permute.xlu1 %2870 }
0x200b   :  { %v2873_v49 = vmul.f32 %v2871_v19, %v7399_v58  ;;  %v4201_v58 = vld [vmem:[%s7609_s4 + $0x240] sm:$0xff] }
0x200d   :  { %3615 = vmatmul.msk.f32.vlgmr.msrb.gmra.mxu2 %vm370_vm14, %v2873_v49  ;;  %3616 = vmatmul.msk.f32.vlgmr.msrb.gmra.mxu3 %vm370_vm14, %v2873_v49  ;;  %2874 = vst.msk [vmem:[#allocation2] sm:$0xff] %vm370_vm14, %v2873_v49 }
0x200e   :  { %3617 = vmatmul.msk.f32.vlgmr.msra.gmra.mxu1 %vm370_vm14, %v2873_v49  ;;  %3114 = vmatpush.msrb.mxu2 %v4200_v8 }
0x200f   :  { %3154 = vmatpush.msrb.mxu3 %v7099_v20  ;;  %3257 = vmatpush.msra.mxu1 %v7105_v3  ;;  %v4203_v20 = vld [vmem:[%s7609_s4 + $0x1f0] sm:$0xff]  ;;  %v4204_v3 = vld [vmem:[%s7609_s4 + $0x1c8] sm:$0xff] }
0x2010   :  { %3115 = vmatpush.msrb.mxu2 %v4201_v58 }
0x2011   :  { %3155 = vmatpush.msrb.mxu3 %v7112_v7  ;;  %3258 = vmatpush.msra.mxu1 %v7118_v11  ;;  %v4205_v7 = vld [vmem:[%s7609_s4 + $0x1a0] sm:$0xff]  ;;  %v4206_v11 = vld [vmem:[%s7609_s4 + $0x178] sm:$0xff] }
0x2012   :  { %v2877_v51 = vpop.permute.xlu1 %2876  ;;  %3116 = vmatpush.msrb.mxu2 %v4202_v33  ;;  %v2714_v33 = vpop.f32.mrf.mxu2 }
0x2013   :  { %2879 = vst.msk [vmem:[#allocation3] sm:$0xff] %vm370_vm14, %v2877_v51  ;;  %3156 = vmatpush.msrb.mxu3 %v7126_v2  ;;  %v4207_v2 = vld [vmem:[%s7609_s4 + $0x150] sm:$0xff] }
0x2014   :  { %3117 = vmatpush.msrb.mxu2 %v4203_v20  ;;  %v3607_v20 = vld [vmem:[%s7605_s0 + $0x100] sm:$0xff] }
0x2015   :  { %3157 = vmatpush.msrb.mxu3 %v7133_v34  ;;  %v4208_v34 = vld [vmem:[%s7609_s4 + $0x128] sm:$0xff] }
0x2016   :  { %3118 = vmatpush.msrb.mxu2 %v4204_v3 }
0x2017   :  { %3158 = vmatpush.msrb.mxu3 %v7140_v22  ;;  %v4209_v22 = vld [vmem:[%s7609_s4 + $0x100] sm:$0xff] }
0x2018   :  { %3119 = vmatpush.msrb.mxu2 %v4205_v7  ;;  %v2759_v7 = vadd.f32 %v3607_v20, %v2714_v33 }
0x2019   :  { %3159 = vmatpush.msrb.mxu3 %v7147_v36  ;;  %v4210_v36 = vld [vmem:[%s7609_s4 + $0xd8] sm:$0xff] }
0x201a   :  { %3120 = vmatpush.msrb.mxu2 %v4206_v11 }
0x201b   :  { %3160 = vmatpush.msrb.mxu3 %v7154_v42  ;;  %v4211_v42 = vld [vmem:[%s7609_s4 + $0xb0] sm:$0xff] }
0x201c   :  { %3121 = vmatpush.msrb.mxu2 %v4207_v2 }
0x201d   :  { %3161 = vmatpush.msrb.mxu3 %v7161_v32  ;;  %v7959_v32 = vld [vmem:[#allocation14_spill] sm:$0xff] }
0x201e   :  { %3122 = vmatpush.msrb.mxu2 %v4208_v34 }
0x201f   :  { %3162 = vmatpush.msrb.mxu3 %v7168_v44  ;;  %v4212_v44 = vld [vmem:[%s7609_s4 + $0x88] sm:$0xff] }
0x2020   :  { %3123 = vmatpush.msrb.mxu2 %v4209_v22 }
0x2021   :  { %3163 = vmatpush.msrb.mxu3 %v7175_v62  ;;  %v7960_v62 = vld [vmem:[#allocation28_spill] sm:$0xff] }
0x2022   :  { %3124 = vmatpush.msrb.mxu2 %v4210_v36 }
0x2023   :  { %3164 = vmatpush.msrb.mxu3 %v7182_v5  ;;  %v7961_v5 = vld [vmem:[#allocation15_spill] sm:$0xff] }
0x2024   :  { %3125 = vmatpush.msrb.mxu2 %v4211_v42  ;;  %v4216_v42 = vld [vmem:[%s7610_s5 + $0x128] sm:$0xff] }
0x2025   :  { %3165 = vmatpush.msrb.mxu3 %v7959_v32  ;;  %v4217_v32 = vld [vmem:[%s7610_s5 + $0x100] sm:$0xff] }
0x2026   :  { %3126 = vmatpush.msrb.mxu2 %v4212_v44  ;;  %v4218_v44 = vld [vmem:[%s7610_s5 + $0xd8] sm:$0xff] }
0x2027   :  { %3166 = vmatpush.msrb.mxu3 %v7960_v62  ;;  %v4219_v62 = vld [vmem:[%s7610_s5 + $0xb0] sm:$0xff] }
0x2028   :  { %3127 = vmatpush.msrb.mxu2 %v4213_v24 }
0x2029   :  { %3167 = vmatpush.msrb.mxu3 %v7961_v5  ;;  %v4220_v5 = vld [vmem:[%s7610_s5 + $0x88] sm:$0xff] }
0x202a   :  { %3128 = vmatpush.msrb.mxu2 %v4214_v10  ;;  %v4221_v10 = vld [vmem:[%s7610_s5 + $0x60] sm:$0xff] }
0x202b   :  { %3168 = vmatpush.msrb.mxu3 %v7962_v16 }
0x202c   :  { %3129 = vmatpush.msrb.mxu2 %v4215_v53  ;;  %v4222_v53 = vld [vmem:[%s7610_s5 + $0x38] sm:$0xff] }
0x202d   :  { %3169 = vmatpush.msrb.mxu3 %v7963_v4  ;;  %v4223_v4 = vld [vmem:[%s7610_s5 + $0x10] sm:$0xff] }
0x208b   :  { %v2941_v54 = vpop.f32.mrf.mxu1 }
0x208c   :  { %v2946_v55 = vadd.f32 %v2941_v54, %v7396_v60 }
0x208e   :  { %v3621_v0 = vmul.f32 -1.442695, %v2946_v55 }
0x2090   :  { %3854 = vpow2.f32 %v3621_v0  ;;  %v2921_v39 = vpop.f32.mrf.mxu3  ;;  %v2901_v3 = vpop.f32.mrf.mxu2 }
0x2091   :  { %v2945_v6 = vadd.f32 %v2921_v39, %v2760_v14  ;;  %v2944_v11 = vadd.f32 %v2901_v3, %v2759_v7 }
0x2093   :  { %v3619_v56 = vmul.f32 -1.442695, %v2945_v6  ;;  %v3618_v2 = vmul.f32 -1.442695, %v2944_v11 }
0x2095   :  { %3856 = vpow2.f32 %v3619_v56 }
0x2096   :  { %v3855_v38 = vpop.eup %3854 }
0x2097   :  { %v2990_v40 = vadd.f32 1.0, %v3855_v38 }
0x2099   :  { %3858 = vrcp.f32 %v2990_v40  ;;  %v3002_v31 = vand.u32 2147483648, %v2990_v40  ;;  %v3000_v60 = vand.u32 2147483647, %v2990_v40  ;;  %vm2996_vm0 = vweird.f32 %v2990_v40 }
0x209b   :  { %v3857_v52 = vpop.eup %3856  ;;  %v3003_v9 = vor.u32 1.1754944e-38, %v3002_v31  ;;  %vm3001_vm2 = vcmp.eq.f32.partialorder %v3000_v60, 8.507059e+37 }
0x209c   :  { %v2954_v59 = vadd.f32 1.0, %v3857_v52 }
0x209e   :  { %3860 = vrcp.f32 %v2954_v59  ;;  %v2981_v26 = vand.u32 2147483648, %v2954_v59  ;;  %v2979_v12 = vand.u32 2147483647, %v2954_v59  ;;  %vm2975_vm5 = vweird.f32 %v2954_v59 }
0x209f   :  { %v3859_v43 = vpop.eup %3858  ;;  %3862 = vpow2.f32 %v3618_v2 }
0x20a0   :  { %v2992_v50 = vmul.f32 %v3859_v43, %v2990_v40  ;;  %vm2997_vm15 = vweird.f32 %v3859_v43  ;;  %v2982_v19 = vor.u32 1.1754944e-38, %v2981_v26  ;;  %vm2980_vm7 = vcmp.eq.f32.partialorder %v2979_v12, 8.507059e+37 }
0x20a1   :  { %vm2998_vm1 = vmor %vm2996_vm0, %vm2997_vm15 }
0x20a2   :  { %v2993_v35 = vsub.f32 1.0, %v2992_v50 }
0x20a4   :  { %v2994_v21 = vmul.f32 %v3859_v43, %v2993_v35  ;;  %v3861_v45 = vpop.eup %3860 }
0x20a5   :  { %v2971_v25 = vmul.f32 %v3861_v45, %v2954_v59  ;;  %vm2976_vm4 = vweird.f32 %v3861_v45  ;;  %v3863_v34 = vpop.eup %3862 }
0x20a6   :  { %v2995_v13 = vadd.f32 %v3859_v43, %v2994_v21  ;;  %vm2977_vm6 = vmor %vm2975_vm5, %vm2976_vm4  ;;  %v2953_v22 = vadd.f32 1.0, %v3863_v34 }
0x20a7   :  { %v2972_v47 = vsub.f32 1.0, %v2971_v25 }
0x20a8   :  { %v2999_v29 = vsel %vm2998_vm1, %v3859_v43, %v2995_v13  ;;  %3864 = vrcp.f32 %v2953_v22  ;;  %v2966_v55 = vand.u32 2147483648, %v2953_v22  ;;  %vm2960_vm10 = vweird.f32 %v2953_v22  ;;  %v3034_v43 = vld [vmem:[#allocation3] sm:$0xff] }
0x20a9   :  { %v3004_v61 = vsel %vm3001_vm2, %v3003_v9, %v2999_v29  ;;  %v2973_v28 = vmul.f32 %v3861_v45, %v2972_v47  ;;  %v2964_v0 = vand.u32 2147483647, %v2953_v22  ;;  %v4224_v47 = vld [vmem:[%s7611_s6 + $0x18] sm:$0xff] }
0x20aa   :  { %v3007_v18 = vmul.f32 %v3006_v63, %v3004_v61  ;;  %v2967_v39 = vor.u32 1.1754944e-38, %v2966_v55  ;;  %v4225_v61 = vld [vmem:[%s7611_s6 + $0x10] sm:$0xff] }
0x20ab   :  { %v2974_v57 = vadd.f32 %v3861_v45, %v2973_v28  ;;  %vm2965_vm12 = vcmp.eq.f32.partialorder %v2964_v0, 8.507059e+37 }
0x20ac   :  { %3009 = vrot.lane.b32.xlu2 %v3007_v18, %s4253_s11  ;;  %3063 = vst.msk [vmem:[#allocation4] sm:$0xff] %vm561_vm3, %v3007_v18 }
0x20ad   :  { %v2978_v49 = vsel %vm2977_vm6, %v3861_v45, %v2974_v57 }
0x20ae   :  { %v7507_v8 = vsel %vm2980_vm7, %v2982_v19, %v2978_v49  ;;  %v3865_v24 = vpop.eup %3864 }
0x20af   :  { %v2985_v58 = vmul.f32 2.0, %v7507_v8  ;;  %v2956_v16 = vmul.f32 %v3865_v24, %v2953_v22  ;;  %vm2961_vm8 = vweird.f32 %v3865_v24 }
0x20b0   :  { %vm2962_vm11 = vmor %vm2960_vm10, %vm2961_vm8 }
0x20b1   :  { %v3620_v51 = vadd.f32 -1.0, %v2985_v58  ;;  %v2957_v30 = vsub.f32 1.0, %v2956_v16 }
0x20b3   :  { %3037 = vrot.lane.b32.xlu0 %v3620_v51, %s4252_s13  ;;  %v2958_v54 = vmul.f32 %v3865_v24, %v2957_v30  ;;  %v3238_v16 = vld [vmem:[#allocation4] sm:$0xff] }
0x20b5   :  { %v2959_v48 = vadd.f32 %v3865_v24, %v2958_v54 }
0x20b7   :  { %v2963_v14 = vsel %vm2962_vm11, %v3865_v24, %v2959_v48 }
0x20b8   :  { %v2968_v56 = vsel %vm2965_vm12, %v2967_v39, %v2963_v14 }
0x20b9   :  { %v3035_v50 = vmul.f32 %v3034_v43, %v2968_v56 }
0x2106   :  { %v3010_v36 = vpop.permute.xlu2 %3009 }
0x2107   :  { %3622 = vmatmul.msk.f32.vlgmr.msra.gmra.mxu2 %vm318_vm9, %v3010_v36 }
0x2108   :  { %3309 = vmatpush.msra.mxu2 %v4216_v42 }
0x210a   :  { %3310 = vmatpush.msra.mxu2 %v4217_v32 }
0x210c   :  { %3311 = vmatpush.msra.mxu2 %v4218_v44 }
0x210e   :  { %3312 = vmatpush.msra.mxu2 %v4219_v62 }
0x2110   :  { %3313 = vmatpush.msra.mxu2 %v4220_v5 }
0x2112   :  { %3314 = vmatpush.msra.mxu2 %v4221_v10 }
0x2114   :  { %3315 = vmatpush.msra.mxu2 %v4222_v53 }
0x2116   :  { %3316 = vmatpush.msra.mxu2 %v4223_v4  ;;  %v3623_v4 = vld [vmem:[%s7605_s0 + $0x118] sm:$0xff] }
0x2125   :  { %v3038_v6 = vpop.permute.xlu0 %3037 }
0x2126   :  { %v3040_v38 = vmul.f32 %v3038_v6, %v2968_v56 }
0x2128   :  { %3042 = vrot.lane.b32.xlu2 %v3040_v38, %s4252_s13 }
0x2182   :  { %v3043_v59 = vpop.permute.xlu2 %3042 }
0x2183   :  { %v3045_v35 = vadd.f32 %v3043_v59, %v3035_v50 }
0x218a   :  { %v3030_v40 = vpop.f32.mrf.mxu2 }
0x218b   :  { %3866 = vtanh.f32 %v3030_v40 }
0x2191   :  { %v3867_v52 = vpop.eup %3866 }
0x2192   :  { %3047 = vrot.lane.b32.xlu0 %v3867_v52, %s4252_s13 }
0x2204   :  { %v3048_v31 = vpop.permute.xlu0 %3047 }
0x2205   :  { %v3050_v21 = vadd.f32 %v3048_v31, %v3045_v35 }
0x2207   :  { %3868 = vtanh.f32 %v3050_v21  ;;  %3062 = vst.msk [vmem:[#allocation3] sm:$0xff] %vm558_vm13, %v3050_v21 }
0x220d   :  { %v3869_v60 = vpop.eup %3868 }
0x220e   :  { %3053 = vrot.lane.b32.xlu1 %v3869_v60, %s4252_s13  ;;  %v3264_v45 = vld [vmem:[#allocation3] sm:$0xff] }
0x2216   :  { %3266 = vrot.lane.b32.xlu1 %v3264_v45, %s4252_s13 }
0x2280   :  { %v3054_v25 = vpop.permute.xlu1 %3053 }
0x2281   :  { %v3056_v13 = vmul.f32 %v3054_v25, %v7507_v8 }
0x2283   :  { %3058 = vrot.lane.b32.xlu2 %v3056_v13, %s4252_s13 }
0x2288   :  { %v3267_v60 = vpop.permute.xlu1 %3266 }
0x22dd   :  { %v3059_v9 = vpop.permute.xlu2 %3058 }
0x22de   :  { %3061 = vst.msk [vmem:[#allocation2] sm:$0xff] %vm558_vm13, %v3059_v9 }
0x22e5   :  { %v3067_v29 = vld [vmem:[#allocation2] sm:$0xff] }
0x22e6   :  { %3090 = vmatmul.f32.vlgmr.msra.gmra.mxu3 %v3067_v29  ;;  %3110 = vmatmul.f32.vlgmr.msrb.gmra.mxu1 %v3067_v29  ;;  %3066 = vst [vmem:[#allocation5 + $0x30] sm:$0xff] %v3067_v29 }
0x22e7   :  { %3130 = vmatmul.f32.vlgmr.msrb.gmra.mxu2 %v3067_v29  ;;  %3150 = vmatmul.f32.vlgmr.msra.gmra.mxu0 %v3067_v29 }
0x22e8   :  { %3349 = vmatpush.msrb.mxu1 %v7253_v15  ;;  %3444 = vmatpush.msrb.mxu2 %v4224_v47  ;;  %v3624_v15 = vld [vmem:[%s7605_s0 + $0x120] sm:$0xff] }
0x22ea   :  { %3350 = vmatpush.msrb.mxu1 %v7264_v27  ;;  %3445 = vmatpush.msrb.mxu2 %v4225_v61 }
0x22ec   :  { %3351 = vmatpush.msrb.mxu1 %v7275_v46 }
0x22ee   :  { %3170 = vmatmul.f32.vlgmr.msrb.gmra.mxu3 %v3067_v29  ;;  %3352 = vmatpush.msrb.mxu1 %v7285_v37  ;;  %v3627_v37 = vld [vmem:[%s7605_s0 + $0x138] sm:$0xff] }
0x22f0   :  { %3353 = vmatpush.msrb.mxu1 %v7295_v41 }
0x22f2   :  { %3354 = vmatpush.msrb.mxu1 %v7305_v17 }
0x22f4   :  { %3355 = vmatpush.msrb.mxu1 %v7315_v1 }
0x22f6   :  { %3356 = vmatpush.msrb.mxu1 %v7325_v23 }
0x2363   :  { %v3111_v27 = vpop.f32.mrf.mxu1 }
0x2364   :  { %v3175_v63 = vadd.f32 %v3624_v15, %v3111_v27 }
0x2366   :  { %v3629_v26 = vmul.f32 -1.442695, %v3175_v63  ;;  %v3151_v63 = vpop.f32.mrf.mxu0 }
0x2368   :  { %3870 = vpow2.f32 %v3629_v26  ;;  %v3626_v26 = vld [vmem:[%s7605_s0 + $0x130] sm:$0xff] }
0x2369   :  { %v3091_v46 = vpop.f32.mrf.mxu3 }
0x236a   :  { %v3174_v30 = vadd.f32 %v3623_v4, %v3091_v46  ;;  %v3177_v46 = vadd.f32 %v3626_v26, %v3151_v63 }
0x236c   :  { %v3628_v54 = vmul.f32 -1.442695, %v3174_v30 }
0x236e   :  { %v3871_v18 = vpop.eup %3870 }
0x236f   :  { %v3186_v28 = vadd.f32 1.0, %v3871_v18 }
0x2371   :  { %3872 = vrcp.f32 %v3186_v28  ;;  %v3171_v41 = vpop.f32.mrf.mxu3  ;;  %v3213_v19 = vand.u32 2147483648, %v3186_v28  ;;  %v3211_v58 = vand.u32 2147483647, %v3186_v28  ;;  %vm3207_vm0 = vweird.f32 %v3186_v28 }
0x2372   :  { %v7567_v17 = vadd.f32 %v3627_v37, %v3171_v41 }
0x2373   :  { %v3214_v20 = vor.u32 1.1754944e-38, %v3213_v19  ;;  %vm3212_vm2 = vcmp.eq.f32.partialorder %v3211_v58, 8.507059e+37 }
0x2374   :  { %v3631_v1 = vmul.f32 -1.442695, %v7567_v17 }
0x2376   :  { %3874 = vpow2.f32 %v3631_v1 }
0x2377   :  { %v3873_v23 = vpop.eup %3872 }
0x2378   :  { %v3203_v12 = vmul.f32 %v3873_v23, %v3186_v28  ;;  %vm3208_vm15 = vweird.f32 %v3873_v23 }
0x2379   :  { %vm3209_vm1 = vmor %vm3207_vm0, %vm3208_vm15 }
0x237a   :  { %v3204_v57 = vsub.f32 1.0, %v3203_v12 }
0x237c   :  { %v3875_v49 = vpop.eup %3874  ;;  %v3205_v8 = vmul.f32 %v3873_v23, %v3204_v57 }
0x237d   :  { %v3222_v51 = vadd.f32 1.0, %v3875_v49 }
0x237e   :  { %v3206_v33 = vadd.f32 %v3873_v23, %v3205_v8 }
0x237f   :  { %3876 = vrcp.f32 %v3222_v51  ;;  %v3234_v42 = vand.u32 2147483648, %v3222_v51  ;;  %v3232_v44 = vand.u32 2147483647, %v3222_v51  ;;  %vm3228_vm5 = vweird.f32 %v3222_v51 }
0x2380   :  { %v3210_v3 = vsel %vm3209_vm1, %v3873_v23, %v3206_v33  ;;  %3878 = vpow2.f32 %v3628_v54  ;;  %v3131_v54 = vpop.f32.mrf.mxu2 }
0x2381   :  { %v3215_v7 = vsel %vm3212_vm2, %v3214_v20, %v3210_v3  ;;  %v3235_v24 = vor.u32 1.1754944e-38, %v3234_v42  ;;  %vm3233_vm7 = vcmp.eq.f32.partialorder %v3232_v44, 8.507059e+37 }
0x2382   :  { %v3217_v11 = vmul.f32 2.0, %v3215_v7 }
0x2384   :  { %v3630_v2 = vadd.f32 -1.0, %v3217_v11 }
0x2385   :  { %v3877_v34 = vpop.eup %3876 }
0x2386   :  { %v3224_v22 = vmul.f32 %v3877_v34, %v3222_v51  ;;  %3271 = vrot.lane.b32.xlu0 %v3630_v2, %s4252_s13  ;;  %vm3229_vm4 = vweird.f32 %v3877_v34  ;;  %v3879_v48 = vpop.eup %3878 }
0x2387   :  { %vm3230_vm6 = vmor %vm3228_vm5, %vm3229_vm4  ;;  %v3185_v55 = vadd.f32 1.0, %v3879_v48  ;;  %v3625_v48 = vld [vmem:[%s7605_s0 + $0x128] sm:$0xff]  ;;  %s4254_s0 = smov [#allocation5]  }
0x2388   :  { %v3225_v36 = vsub.f32 1.0, %v3224_v22 }
0x2389   :  { %3880 = vrcp.f32 %v3185_v55  ;;  %v3198_v38 = vand.u32 2147483648, %v3185_v55  ;;  %vm3192_vm10 = vweird.f32 %v3185_v55  ;;  %v3196_v40 = vand.u32 2147483647, %v3185_v55 }
0x238a   :  { %v3226_v32 = vmul.f32 %v3877_v34, %v3225_v36 }
0x238b   :  { %v3199_v59 = vor.u32 1.1754944e-38, %v3198_v38  ;;  %vm3197_vm12 = vcmp.eq.f32.partialorder %v3196_v40, 8.507059e+37 }
0x238c   :  { %v3227_v62 = vadd.f32 %v3877_v34, %v3226_v32 }
0x238e   :  { %v3231_v5 = vsel %vm3230_vm6, %v3877_v34, %v3227_v62 }
0x238f   :  { %v3236_v10 = vsel %vm3233_vm7, %v3235_v24, %v3231_v5  ;;  %v3881_v0 = vpop.eup %3880 }
0x2390   :  { %v3239_v53 = vmul.f32 %v3238_v16, %v3236_v10  ;;  %v3188_v14 = vmul.f32 %v3881_v0, %v3185_v55  ;;  %vm3193_vm8 = vweird.f32 %v3881_v0 }
0x2391   :  { %vm3194_vm11 = vmor %vm3192_vm10, %vm3193_vm8 }
0x2392   :  { %3632 = vmatmul.msk.f32.vlgmr.msra.gmra.mxu1 %vm318_vm9, %v3239_v53  ;;  %3297 = vst.msk [vmem:[#allocation4] sm:$0xff] %vm318_vm9, %v3239_v53  ;;  %v3189_v39 = vsub.f32 1.0, %v3188_v14 }
0x2394   :  { %v3190_v6 = vmul.f32 %v3881_v0, %v3189_v39 }
0x2396   :  { %v3191_v56 = vadd.f32 %v3881_v0, %v3190_v6 }
0x2398   :  { %v3195_v52 = vsel %vm3194_vm11, %v3881_v0, %v3191_v56  ;;  %v3176_v0 = vadd.f32 %v3625_v48, %v3131_v54 }
0x2399   :  { %v3200_v50 = vsel %vm3197_vm12, %v3199_v59, %v3195_v52  ;;  %v3423_v16 = vld [vmem:[#allocation4] sm:$0xff] }
0x239a   :  { %v3269_v25 = vmul.f32 %v3267_v60, %v3200_v50 }
0x23f8   :  { %v3272_v43 = vpop.permute.xlu0 %3271 }
0x23f9   :  { %v3274_v35 = vmul.f32 %v3272_v43, %v3200_v50 }
0x23fb   :  { %3276 = vrot.lane.b32.xlu2 %v3274_v35, %s4252_s13 }
0x240f   :  { %v3260_v31 = vpop.f32.mrf.mxu1 }
0x2410   :  { %3882 = vtanh.f32 %v3260_v31 }
0x2416   :  { %v3883_v21 = vpop.eup %3882 }
0x2417   :  { %3281 = vrot.lane.b32.xlu0 %v3883_v21, %s4252_s13 }
0x2455   :  { %v3277_v45 = vpop.permute.xlu2 %3276 }
0x2456   :  { %v3279_v13 = vadd.f32 %v3277_v45, %v3269_v25 }
0x2489   :  { %v3282_v9 = vpop.permute.xlu0 %3281 }
0x248a   :  { %v3284_v29 = vadd.f32 %v3282_v9, %v3279_v13 }
0x248c   :  { %3884 = vtanh.f32 %v3284_v29 }
0x2492   :  { %v3885_v47 = vpop.eup %3884 }
0x2493   :  { %3287 = vrot.lane.b32.xlu1 %v3885_v47, %s4252_s13 }
0x249b   :  { %3293 = vrot.lane.b32.xlu1 %v3284_v29, %s4252_s13 }
0x2505   :  { %v3288_v61 = vpop.permute.xlu1 %3287 }
0x2506   :  { %v3290_v15 = vmul.f32 %v3288_v61, %v3215_v7 }
0x2508   :  { %3633 = vmatmul.msk.f32.vlgmr.msra.gmra.mxu2 %vm370_vm14, %v3290_v15  ;;  %3634 = vmatmul.msk.f32.vlgmr.msrb.gmra.mxu0 %vm370_vm14, %v3290_v15  ;;  %3291 = vst.msk [vmem:[#allocation2] sm:$0xff] %vm370_vm14, %v3290_v15 }
0x2509   :  { %3635 = vmatmul.msk.f32.vlgmr.msrb.gmra.mxu1 %vm370_vm14, %v3290_v15 }
0x250d   :  { %v3294_v27 = vpop.permute.xlu1 %3293 }
0x250e   :  { %3296 = vst.msk [vmem:[#allocation3] sm:$0xff] %vm370_vm14, %v3294_v27 }
0x2515   :  { %v3451_v61 = vld [vmem:[#allocation3] sm:$0xff] }
0x2585   :  { %v3338_v18 = vpop.f32.mrf.mxu0 }
0x2586   :  { %v3362_v28 = vadd.f32 %v3338_v18, %v3177_v46  ;;  %v3358_v37 = vpop.f32.mrf.mxu1 }
0x2587   :  { %v3363_v41 = vadd.f32 %v3358_v37, %v7567_v17 }
0x2588   :  { %v3637_v1 = vmul.f32 -1.442695, %v3362_v28 }
0x2589   :  { %v3639_v23 = vmul.f32 -1.442695, %v3363_v41 }
0x258a   :  { %3886 = vpow2.f32 %v3637_v1 }
0x258b   :  { %3888 = vpow2.f32 %v3639_v23  ;;  %v3318_v55 = vpop.f32.mrf.mxu2 }
0x258c   :  { %v3361_v14 = vadd.f32 %v3318_v55, %v3176_v0 }
0x258e   :  { %v3636_v39 = vmul.f32 -1.442695, %v3361_v14 }
0x2590   :  { %v3887_v12 = vpop.eup %3886 }
0x2591   :  { %v3889_v57 = vpop.eup %3888  ;;  %v3371_v19 = vadd.f32 1.0, %v3887_v12 }
0x2592   :  { %v3407_v49 = vadd.f32 1.0, %v3889_v57 }
0x2593   :  { %3890 = vrcp.f32 %v3371_v19  ;;  %v3398_v7 = vand.u32 2147483648, %v3371_v19  ;;  %v3396_v17 = vand.u32 2147483647, %v3371_v19  ;;  %vm3392_vm0 = vweird.f32 %v3371_v19 }
0x2594   :  { %3892 = vrcp.f32 %v3407_v49  ;;  %v3419_v11 = vand.u32 2147483648, %v3407_v49  ;;  %v3417_v22 = vand.u32 2147483647, %v3407_v49  ;;  %vm3413_vm1 = vweird.f32 %v3407_v49 }
0x2595   :  { %v3399_v32 = vor.u32 1.1754944e-38, %v3398_v7  ;;  %vm3397_vm5 = vcmp.eq.f32.partialorder %v3396_v17, 8.507059e+37  ;;  %3894 = vpow2.f32 %v3636_v39 }
0x2596   :  { %v3420_v44 = vor.u32 1.1754944e-38, %v3419_v11  ;;  %vm3418_vm6 = vcmp.eq.f32.partialorder %v3417_v22, 8.507059e+37 }
0x2599   :  { %v3891_v8 = vpop.eup %3890 }
0x259a   :  { %v3893_v58 = vpop.eup %3892  ;;  %v3388_v51 = vmul.f32 %v3891_v8, %v3371_v19  ;;  %vm3393_vm14 = vweird.f32 %v3891_v8 }
0x259b   :  { %v3409_v33 = vmul.f32 %v3893_v58, %v3407_v49  ;;  %vm3414_vm15 = vweird.f32 %v3893_v58  ;;  %vm3394_vm2 = vmor %vm3392_vm0, %vm3393_vm14  ;;  %v3895_v6 = vpop.eup %3894 }
0x259c   :  { %v3389_v20 = vsub.f32 1.0, %v3388_v51  ;;  %vm3415_vm4 = vmor %vm3413_vm1, %vm3414_vm15  ;;  %v3370_v56 = vadd.f32 1.0, %v3895_v6 }
0x259d   :  { %v3410_v3 = vsub.f32 1.0, %v3409_v33 }
0x259e   :  { %v3390_v2 = vmul.f32 %v3891_v8, %v3389_v20  ;;  %3896 = vrcp.f32 %v3370_v56  ;;  %v3383_v35 = vand.u32 2147483648, %v3370_v56  ;;  %vm3377_vm7 = vweird.f32 %v3370_v56 }
0x259f   :  { %v3411_v34 = vmul.f32 %v3893_v58, %v3410_v3  ;;  %v3381_v31 = vand.u32 2147483647, %v3370_v56 }
0x25a0   :  { %v3391_v36 = vadd.f32 %v3891_v8, %v3390_v2  ;;  %v3384_v60 = vor.u32 1.1754944e-38, %v3383_v35 }
0x25a1   :  { %v3412_v42 = vadd.f32 %v3893_v58, %v3411_v34  ;;  %vm3382_vm10 = vcmp.eq.f32.partialorder %v3381_v31, 8.507059e+37 }
0x25a2   :  { %v3395_v62 = vsel %vm3394_vm2, %v3891_v8, %v3391_v36 }
0x25a3   :  { %v3416_v24 = vsel %vm3415_vm4, %v3893_v58, %v3412_v42  ;;  %v3400_v5 = vsel %vm3397_vm5, %v3399_v32, %v3395_v62 }
0x25a4   :  { %v3421_v10 = vsel %vm3418_vm6, %v3420_v44, %v3416_v24  ;;  %v3402_v53 = vmul.f32 2.0, %v3400_v5  ;;  %v3897_v40 = vpop.eup %3896 }
0x25a5   :  { %v3424_v4 = vmul.f32 %v3423_v16, %v3421_v10  ;;  %v3373_v52 = vmul.f32 %v3897_v40, %v3370_v56 }
0x25a6   :  { %v3638_v30 = vadd.f32 -1.0, %v3402_v53 }
0x25a7   :  { %3426 = vrot.lane.b32.xlu2 %v3424_v4, %s4253_s11  ;;  %3480 = vst.msk [vmem:[#allocation4] sm:$0xff] %vm561_vm3, %v3424_v4  ;;  %v3374_v59 = vsub.f32 1.0, %v3373_v52  ;;  %vm3378_vm3 = vweird.f32 %v3897_v40  ;;  %s3488_s11 = sshll.u32 %s4254_s0, 4  ;;  %s3489_s11 = int_to_ptr.vmem [resolvable:$true] %s3488_s11 }
0x25a8   :  { %3454 = vrot.lane.b32.xlu0 %v3638_v30, %s4252_s13  ;;  %vm3379_vm8 = vmor %vm3377_vm7, %vm3378_vm3 }
0x25a9   :  { %v3375_v43 = vmul.f32 %v3897_v40, %v3374_v59 }
0x25ab   :  { %v3376_v50 = vadd.f32 %v3897_v40, %v3375_v43 }
0x25ad   :  { %v3380_v21 = vsel %vm3379_vm8, %v3897_v40, %v3376_v50 }
0x25ae   :  { %v3385_v25 = vsel %vm3382_vm10, %v3384_v60, %v3380_v21 }
0x25af   :  { %v3452_v15 = vmul.f32 %v3451_v61, %v3385_v25 }
0x2601   :  { %v3427_v38 = vpop.permute.xlu2 %3426 }
0x2602   :  { %3640 = vmatmul.msk.f32.vlgmr.msrb.gmra.mxu2 %vm318_vm9, %v3427_v38 }
0x261a   :  { %v3455_v45 = vpop.permute.xlu0 %3454 }
0x261b   :  { %v3457_v13 = vmul.f32 %v3455_v45, %v3385_v25 }
0x261d   :  { %3459 = vrot.lane.b32.xlu2 %v3457_v13, %s4252_s13 }
0x2677   :  { %v3460_v47 = vpop.permute.xlu2 %3459 }
0x2678   :  { %v3462_v27 = vadd.f32 %v3460_v47, %v3452_v15 }
0x2685   :  { %v3447_v9 = vpop.f32.mrf.mxu2 }
0x2686   :  { %3898 = vtanh.f32 %v3447_v9 }
0x268c   :  { %v3899_v29 = vpop.eup %3898 }
0x268d   :  { %3464 = vrot.lane.b32.xlu0 %v3899_v29, %s4252_s13 }
0x26ff   :  { %v3465_v63 = vpop.permute.xlu0 %3464 }
0x2700   :  { %v3467_v26 = vadd.f32 %v3465_v63, %v3462_v27 }
0x2702   :  { %3900 = vtanh.f32 %v3467_v26  ;;  %3479 = vst.msk [vmem:[#allocation3] sm:$0xff] %vm558_vm13, %v3467_v26 }
0x2708   :  { %v3901_v46 = vpop.eup %3900 }
0x2709   :  { %3470 = vrot.lane.b32.xlu1 %v3901_v46, %s4252_s13 }
0x277b   :  { %v3471_v18 = vpop.permute.xlu1 %3470 }
0x277c   :  { %v3473_v28 = vmul.f32 %v3471_v18, %v3400_v5 }
0x277e   :  { %3475 = vrot.lane.b32.xlu2 %v3473_v28, %s4252_s13 }
0x27d8   :  { %v3476_v37 = vpop.permute.xlu2 %3475 }
0x27d9   :  { %3478 = vst.msk [vmem:[#allocation2] sm:$0xff] %vm558_vm13, %v3476_v37 }
0x27e0   :  { %v3481_v41 = vld [vmem:[#allocation2] sm:$0xff] }
0x27e1   :  { %3483 = vst [vmem:[#allocation5 + $0x38] sm:$0xff] %v3481_v41 }
0x27e2   :  { %3496 = dma.vmem_to_hbm [thread:$0]  %s3489_s11, 1024, %s3491_s9, [#allocation6], %s4255_s10, %s4255_s10, %s4256_s1  }
0x27e3   :  { %4250 = dma.done.wait [#allocation6], 1024  }
0x27e4   :  { %4251 = vsyncadd [#allocation6], 4294966272 }
0x27e5   :  { %3501 = vsyncpa [#allocation6], 1 }

</bundles_post_ra>
